<compile_context>
chip_gen: v7x
topology: tpu7x:2x2x1
jax: 0.10.0
libtpu: 0.0.40
codegen_flags: <defaults>
</compile_context>

<pallas_src>
import jax
import jax.numpy as jnp
from jax.experimental import pallas as pl
from jax.experimental.pallas import tpu as pltpu

STACK_SIZE = 4
N_ACTIONS = 7      # Assault action space
CPAD = 128         # lane-dense channel padding for conv outputs / activations
QPAD = 128         # lane-dense padding for the final Q-value vector
TM = 256           # M-tile (rows of the im2col GEMM) per grid step


# ----------------------------------------------------------------------------
# Pallas kernel 1: fused  out = relu(x @ w + b), M-tiled parallel grid
# ----------------------------------------------------------------------------
def _gemm_bias_relu_kernel(x_ref, w_ref, b_ref, o_ref):
    acc = jnp.dot(x_ref[...], w_ref[...], preferred_element_type=jnp.float32)
    acc = jnp.maximum(acc + b_ref[...], 0.0)     # bias/ReLU epilogue in f32
    o_ref[...] = acc.astype(o_ref.dtype)


def gemm_bias_relu(x, w, b2d, *, out_dtype):
    """x: (M, K) bf16, w: (K, N) bf16 with N % 128 == 0, b2d: (1, N) f32."""
    M, K = x.shape
    K2, N = w.shape
    assert K == K2 and N % 128 == 0
    tm = min(TM, M)
    grid = (pl.cdiv(M, tm),)
    return pl.pallas_call(
        _gemm_bias_relu_kernel,
        out_shape=jax.ShapeDtypeStruct((M, N), out_dtype),
        grid=grid,
        in_specs=[
            pl.BlockSpec((tm, K), lambda i: (i, 0)),
            pl.BlockSpec((K, N), lambda i: (0, 0)),
            pl.BlockSpec((1, N), lambda i: (0, 0)),
        ],
        out_specs=pl.BlockSpec((tm, N), lambda i: (i, 0)),
        compiler_params=pltpu.CompilerParams(
            dimension_semantics=("parallel",)),
    )(x, w, b2d)


# ----------------------------------------------------------------------------
# Pallas kernel 2: fused FC tail  q = relu(h @ w4 + b4) @ w5 + b5
#   (the (B, 512) intermediate stays in VMEM; never written to HBM)
# ----------------------------------------------------------------------------
def _fc_tail_kernel(h_ref, w4_ref, b4_ref, w5_ref, b5_ref, o_ref):
    h1 = jnp.dot(h_ref[...], w4_ref[...], preferred_element_type=jnp.float32)
    h1 = jnp.maximum(h1 + b4_ref[...], 0.0)
    q = jnp.dot(h1.astype(w5_ref.dtype), w5_ref[...],
                preferred_element_type=jnp.float32)
    o_ref[...] = (q + b5_ref[...]).astype(o_ref.dtype)


def fc_tail(h, w4, b4, w5, b5):
    B, K = h.shape
    K4, H = w4.shape
    H2, N = w5.shape
    assert K == K4 and H == H2 and N % 128 == 0
    return pl.pallas_call(
        _fc_tail_kernel,
        out_shape=jax.ShapeDtypeStruct((B, N), jnp.float32),
        in_specs=[
            pl.BlockSpec((B, K), lambda: (0, 0)),
            pl.BlockSpec((K, H), lambda: (0, 0)),
            pl.BlockSpec((1, H), lambda: (0, 0)),
            pl.BlockSpec((H, N), lambda: (0, 0)),
            pl.BlockSpec((1, N), lambda: (0, 0)),
        ],
        out_specs=pl.BlockSpec((B, N), lambda: (0, 0)),
    )(h, w4, b4, w5, b5)


# ----------------------------------------------------------------------------
# Glue: NHWC im2col (K ordered (kh, kw, c) -> channel slices are lane-contiguous)
# ----------------------------------------------------------------------------
def im2col_nhwc(x, k, s):
    B, H, W, C = x.shape
    Ho = (H - k) // s + 1
    Wo = (W - k) // s + 1
    cols = []
    for i in range(k):
        for j in range(k):
            cols.append(x[:, i:i + s * Ho:s, j:j + s * Wo:s, :])   # (B, Ho, Wo, C)
    col = jnp.concatenate(cols, axis=-1)                            # (B, Ho, Wo, k*k*C)
    return col.reshape(B * Ho * Wo, k * k * C), Ho, Wo


def conv2d_relu_nhwc(x, w_k, b_k, *, k, stride):
    """x: (B, H, W, Cin) bf16; w_k: (k*k*Cin, CoutPad) bf16; b_k: (1, CoutPad) f32."""
    # TODO(synk): conv1's patch extraction could move in-kernel (strided DMA of the
    # (k, s*Wo) window) to avoid materializing the im2col matrix in HBM.
    B = x.shape[0]
    col, Ho, Wo = im2col_nhwc(x, k, stride)
    out = gemm_bias_relu(col, w_k, b_k, out_dtype=jnp.bfloat16)
    return out.reshape(B, Ho, Wo, w_k.shape[1])


# ----------------------------------------------------------------------------
# DQN parameters: synthetic PyTorch-layout init + one-time kernel repack
# ----------------------------------------------------------------------------
def init_params(key, n_actions):
    ks = jax.random.split(key, 10)

    def u(k, shape, fan_in):
        bound = 1.0 / jnp.sqrt(fan_in)
        return jax.random.uniform(k, shape, jnp.float32, -bound, bound)

    p = {}
    p["w1"] = u(ks[0], (32, STACK_SIZE, 8, 8), STACK_SIZE * 8 * 8)
    p["b1"] = u(ks[1], (32,), STACK_SIZE * 8 * 8)
    p["w2"] = u(ks[2], (64, 32, 4, 4), 32 * 4 * 4)
    p["b2"] = u(ks[3], (64,), 32 * 4 * 4)
    p["w3"] = u(ks[4], (64, 64, 3, 3), 64 * 3 * 3)
    p["b3"] = u(ks[5], (64,), 64 * 3 * 3)
    p["w4"] = u(ks[6], (7 * 7 * 64, 512), 7 * 7 * 64)   # (in, out)
    p["b4"] = u(ks[7], (512,), 7 * 7 * 64)
    p["w5"] = u(ks[8], (512, n_actions), 512)
    p["b5"] = u(ks[9], (n_actions,), 512)
    return p


def prepare_params(params):
    """One-time (outside jit) repack: NHWC GEMM layout, Cin/Cout zero-padded to
    128, weights in bf16, biases in f32. Zero padding keeps results exact."""
    def conv_w(w, cin_pad, cout_pad):
        cout, cin, kh, kw = w.shape
        w = jnp.pad(w, ((0, cout_pad - cout), (0, cin_pad - cin), (0, 0), (0, 0)))
        w = jnp.transpose(w, (2, 3, 1, 0))                 # (kh, kw, cin_pad, cout_pad)
        return w.reshape(kh * kw * cin_pad, cout_pad).astype(jnp.bfloat16)

    def pad_bias(b, n_pad):
        return jnp.pad(b, (0, n_pad - b.shape[0])).astype(jnp.float32).reshape(1, n_pad)

    kp = {}
    kp["w1"] = conv_w(params["w1"], STACK_SIZE, CPAD)      # Cin=4 (unpadded), Cout 32->128
    kp["b1"] = pad_bias(params["b1"], CPAD)
    kp["w2"] = conv_w(params["w2"], CPAD, CPAD)            # Cin 32->128, Cout 64->128
    kp["b2"] = pad_bias(params["b2"], CPAD)
    kp["w3"] = conv_w(params["w3"], CPAD, CPAD)            # Cin 64->128, Cout 64->128
    kp["b3"] = pad_bias(params["b3"], CPAD)
    # FC1: reorder rows from PyTorch flatten order (c, h, w) to NHWC-padded (h, w, c).
    w4 = params["w4"].reshape(64, 7, 7, 512)               # (c, h, w, out)
    w4 = jnp.transpose(w4, (1, 2, 0, 3))                   # (h, w, c, out)
    w4 = jnp.pad(w4, ((0, 0), (0, 0), (0, CPAD - 64), (0, 0)))
    kp["w4"] = w4.reshape(7 * 7 * CPAD, 512).astype(jnp.bfloat16)
    kp["b4"] = params["b4"].astype(jnp.float32).reshape(1, 512)
    kp["w5"] = jnp.pad(params["w5"],
                       ((0, 0), (0, QPAD - N_ACTIONS))).astype(jnp.bfloat16)
    kp["b5"] = pad_bias(params["b5"], QPAD)
    return kp


# ----------------------------------------------------------------------------
# Forward
# ----------------------------------------------------------------------------
@jax.jit
def dqn_forward(kparams, x):
    # x: (B, 4, 84, 84) float32, NCHW (PyTorch layout); converted once to NHWC bf16.
    x = jnp.transpose(x, (0, 2, 3, 1)).astype(jnp.bfloat16)                   # (B,84,84,4)
    h = conv2d_relu_nhwc(x, kparams["w1"], kparams["b1"], k=8, stride=4)      # (B,20,20,128)
    h = conv2d_relu_nhwc(h, kparams["w2"], kparams["b2"], k=4, stride=2)      # (B, 9, 9,128)
    h = conv2d_relu_nhwc(h, kparams["w3"], kparams["b3"], k=3, stride=1)      # (B, 7, 7,128)
    B = h.shape[0]
    h = h.reshape(B, 7 * 7 * CPAD)
    q = fc_tail(h, kparams["w4"], kparams["b4"], kparams["w5"], kparams["b5"])  # (B,128) f32
    return q[:, :N_ACTIONS]


if __name__ == "__main__":
    key = jax.random.PRNGKey(0)
    pkey, xkey = jax.random.split(key)
    params = init_params(pkey, N_ACTIONS)
    kparams = prepare_params(params)   # one-time weight repack, outside jit

    # Batch of 2 stacked-frame observations; 84x84 is forced by the 7*7*64 Linear.
    x = jax.random.uniform(xkey, (2, STACK_SIZE, 84, 84), jnp.float32)

    q = dqn_forward(kparams, x)
    q = jax.block_until_ready(q)

    assert q.shape == (2, N_ACTIONS), q.shape
    assert bool(jnp.all(jnp.isfinite(q)))
    print("KERNEL_OK")
</pallas_src>

<mosaic_0001>
module attributes {stable_mosaic.version = 11 : i64} {
  func.func @_gemm_bias_relu_kernel(%arg0: i32, %arg1: memref<256x256xbf16, #tpu.memory_space<vmem>>, %arg2: memref<256x128xbf16, #tpu.memory_space<vmem>>, %arg3: memref<1x128xf32, #tpu.memory_space<vmem>>, %arg4: memref<256x128xbf16, #tpu.memory_space<vmem>>) attributes {dimension_semantics = [#tpu.dimension_semantics<parallel>], iteration_bounds = array<i64: 4>, scalar_prefetch = 0 : i64, scratch_operands = 0 : i64, tpu.core_type = #tpu.core_type<tc>, window_params = [{transform_indices = @transform_0, window_bounds = array<i64: 256, 256>}, {pipeline_mode = #tpu.pipeline_mode<synchronous>, transform_indices = @transform_1, window_bounds = array<i64: 256, 128>}, {pipeline_mode = #tpu.pipeline_mode<synchronous>, transform_indices = @transform_2, window_bounds = array<i64: 1, 128>}, {transform_indices = @transform_3, window_bounds = array<i64: 256, 128>}]} {
    %c0 = arith.constant 0 : index
    %c0_0 = arith.constant 0 : index
    %0 = vector.load %arg1[%c0, %c0_0] : memref<256x256xbf16, #tpu.memory_space<vmem>>, vector<256x256xbf16>
    %c0_1 = arith.constant 0 : index
    %c0_2 = arith.constant 0 : index
    %1 = vector.load %arg2[%c0_1, %c0_2] : memref<256x128xbf16, #tpu.memory_space<vmem>>, vector<256x128xbf16>
    %cst = arith.constant dense<0.000000e+00> : vector<256x128xf32>
    %2 = tpu.matmul %0, %1, %cst {dimension_numbers = #tpu.dot_dimension_numbers<[1], [0], [0], [1], [0, 0, 1, 1], [], []>} : vector<256x256xbf16>, vector<256x128xbf16>, vector<256x128xf32> -> vector<256x128xf32>
    %c0_3 = arith.constant 0 : index
    %c0_4 = arith.constant 0 : index
    %3 = vector.load %arg3[%c0_3, %c0_4] : memref<1x128xf32, #tpu.memory_space<vmem>>, vector<1x128xf32>
    %4 = vector.broadcast %3 : vector<1x128xf32> to vector<256x128xf32>
    %5 = arith.addf %2, %4 : vector<256x128xf32>
    %cst_5 = arith.constant 0.000000e+00 : f32
    %6 = vector.broadcast %cst_5 : f32 to vector<256x128xf32>
    %7 = arith.maximumf %5, %6 : vector<256x128xf32>
    %8 = arith.truncf %7 : vector<256x128xf32> to vector<256x128xbf16>
    %c0_6 = arith.constant 0 : index
    %c0_7 = arith.constant 0 : index
    %9 = vector.load %arg4[%c0_6, %c0_7] : memref<256x128xbf16, #tpu.memory_space<vmem>>, vector<256x128xbf16>
    tpu.vector_store %arg4[%c0_6, %c0_7], %8 {strides = array<i32>} : memref<256x128xbf16, #tpu.memory_space<vmem>>, vector<256x128xbf16>,
    return
  }
  func.func @transform_0(%arg0: i32) -> (i32, i32) {
    %c0_i32 = arith.constant 0 : i32
    %c0_i32_0 = arith.constant 0 : i32
    return %arg0, %c0_i32 : i32, i32
  }
  func.func @transform_1(%arg0: i32) -> (i32, i32) {
    %c0_i32 = arith.constant 0 : i32
    %c0_i32_0 = arith.constant 0 : i32
    %c0_i32_1 = arith.constant 0 : i32
    return %c0_i32, %c0_i32_0 : i32, i32
  }
  func.func @transform_2(%arg0: i32) -> (i32, i32) {
    %c0_i32 = arith.constant 0 : i32
    %c0_i32_0 = arith.constant 0 : i32
    %c0_i32_1 = arith.constant 0 : i32
    return %c0_i32, %c0_i32_0 : i32, i32
  }
  func.func @transform_3(%arg0: i32) -> (i32, i32) {
    %c0_i32 = arith.constant 0 : i32
    %c0_i32_0 = arith.constant 0 : i32
    return %arg0, %c0_i32 : i32, i32
  }
}

module attributes {stable_mosaic.version = 11 : i64} {
  func.func @_gemm_bias_relu_kernel(%arg0: i32, %arg1: memref<162x2048xbf16, #tpu.memory_space<vmem>>, %arg2: memref<2048x128xbf16, #tpu.memory_space<vmem>>, %arg3: memref<1x128xf32, #tpu.memory_space<vmem>>, %arg4: memref<162x128xbf16, #tpu.memory_space<vmem>>) attributes {dimension_semantics = [#tpu.dimension_semantics<parallel>], iteration_bounds = array<i64: 1>, scalar_prefetch = 0 : i64, scratch_operands = 0 : i64, tpu.core_type = #tpu.core_type<tc>, window_params = [{transform_indices = @transform_0, window_bounds = array<i64: 162, 2048>}, {pipeline_mode = #tpu.pipeline_mode<synchronous>, transform_indices = @transform_1, window_bounds = array<i64: 2048, 128>}, {pipeline_mode = #tpu.pipeline_mode<synchronous>, transform_indices = @transform_2, window_bounds = array<i64: 1, 128>}, {transform_indices = @transform_3, window_bounds = array<i64: 162, 128>}]} {
    %c0 = arith.constant 0 : index
    %c0_0 = arith.constant 0 : index
    %0 = vector.load %arg1[%c0, %c0_0] : memref<162x2048xbf16, #tpu.memory_space<vmem>>, vector<162x2048xbf16>
    %c0_1 = arith.constant 0 : index
    %c0_2 = arith.constant 0 : index
    %1 = vector.load %arg2[%c0_1, %c0_2] : memref<2048x128xbf16, #tpu.memory_space<vmem>>, vector<2048x128xbf16>
    %cst = arith.constant dense<0.000000e+00> : vector<162x128xf32>
    %2 = tpu.matmul %0, %1, %cst {dimension_numbers = #tpu.dot_dimension_numbers<[1], [0], [0], [1], [0, 0, 1, 1], [], []>} : vector<162x2048xbf16>, vector<2048x128xbf16>, vector<162x128xf32> -> vector<162x128xf32>
    %c0_3 = arith.constant 0 : index
    %c0_4 = arith.constant 0 : index
    %3 = vector.load %arg3[%c0_3, %c0_4] : memref<1x128xf32, #tpu.memory_space<vmem>>, vector<1x128xf32>
    %4 = vector.broadcast %3 : vector<1x128xf32> to vector<162x128xf32>
    %5 = arith.addf %2, %4 : vector<162x128xf32>
    %cst_5 = arith.constant 0.000000e+00 : f32
    %6 = vector.broadcast %cst_5 : f32 to vector<162x128xf32>
    %7 = arith.maximumf %5, %6 : vector<162x128xf32>
    %8 = arith.truncf %7 : vector<162x128xf32> to vector<162x128xbf16>
    %c0_6 = arith.constant 0 : index
    %c0_7 = arith.constant 0 : index
    %9 = vector.load %arg4[%c0_6, %c0_7] : memref<162x128xbf16, #tpu.memory_space<vmem>>, vector<162x128xbf16>
    tpu.vector_store %arg4[%c0_6, %c0_7], %8 {strides = array<i32>} : memref<162x128xbf16, #tpu.memory_space<vmem>>, vector<162x128xbf16>,
    return
  }
  func.func @transform_0(%arg0: i32) -> (i32, i32) {
    %c0_i32 = arith.constant 0 : i32
    %c0_i32_0 = arith.constant 0 : i32
    return %arg0, %c0_i32 : i32, i32
  }
  func.func @transform_1(%arg0: i32) -> (i32, i32) {
    %c0_i32 = arith.constant 0 : i32
    %c0_i32_0 = arith.constant 0 : i32
    %c0_i32_1 = arith.constant 0 : i32
    return %c0_i32, %c0_i32_0 : i32, i32
  }
  func.func @transform_2(%arg0: i32) -> (i32, i32) {
    %c0_i32 = arith.constant 0 : i32
    %c0_i32_0 = arith.constant 0 : i32
    %c0_i32_1 = arith.constant 0 : i32
    return %c0_i32, %c0_i32_0 : i32, i32
  }
  func.func @transform_3(%arg0: i32) -> (i32, i32) {
    %c0_i32 = arith.constant 0 : i32
    %c0_i32_0 = arith.constant 0 : i32
    return %arg0, %c0_i32 : i32, i32
  }
}

module attributes {stable_mosaic.version = 11 : i64} {
  func.func @_gemm_bias_relu_kernel(%arg0: i32, %arg1: memref<98x1152xbf16, #tpu.memory_space<vmem>>, %arg2: memref<1152x128xbf16, #tpu.memory_space<vmem>>, %arg3: memref<1x128xf32, #tpu.memory_space<vmem>>, %arg4: memref<98x128xbf16, #tpu.memory_space<vmem>>) attributes {dimension_semantics = [#tpu.dimension_semantics<parallel>], iteration_bounds = array<i64: 1>, scalar_prefetch = 0 : i64, scratch_operands = 0 : i64, tpu.core_type = #tpu.core_type<tc>, window_params = [{transform_indices = @transform_0, window_bounds = array<i64: 98, 1152>}, {pipeline_mode = #tpu.pipeline_mode<synchronous>, transform_indices = @transform_1, window_bounds = array<i64: 1152, 128>}, {pipeline_mode = #tpu.pipeline_mode<synchronous>, transform_indices = @transform_2, window_bounds = array<i64: 1, 128>}, {transform_indices = @transform_3, window_bounds = array<i64: 98, 128>}]} {
    %c0 = arith.constant 0 : index
    %c0_0 = arith.constant 0 : index
    %0 = vector.load %arg1[%c0, %c0_0] : memref<98x1152xbf16, #tpu.memory_space<vmem>>, vector<98x1152xbf16>
    %c0_1 = arith.constant 0 : index
    %c0_2 = arith.constant 0 : index
    %1 = vector.load %arg2[%c0_1, %c0_2] : memref<1152x128xbf16, #tpu.memory_space<vmem>>, vector<1152x128xbf16>
    %cst = arith.constant dense<0.000000e+00> : vector<98x128xf32>
    %2 = tpu.matmul %0, %1, %cst {dimension_numbers = #tpu.dot_dimension_numbers<[1], [0], [0], [1], [0, 0, 1, 1], [], []>} : vector<98x1152xbf16>, vector<1152x128xbf16>, vector<98x128xf32> -> vector<98x128xf32>
    %c0_3 = arith.constant 0 : index
    %c0_4 = arith.constant 0 : index
    %3 = vector.load %arg3[%c0_3, %c0_4] : memref<1x128xf32, #tpu.memory_space<vmem>>, vector<1x128xf32>
    %4 = vector.broadcast %3 : vector<1x128xf32> to vector<98x128xf32>
    %5 = arith.addf %2, %4 : vector<98x128xf32>
    %cst_5 = arith.constant 0.000000e+00 : f32
    %6 = vector.broadcast %cst_5 : f32 to vector<98x128xf32>
    %7 = arith.maximumf %5, %6 : vector<98x128xf32>
    %8 = arith.truncf %7 : vector<98x128xf32> to vector<98x128xbf16>
    %c0_6 = arith.constant 0 : index
    %c0_7 = arith.constant 0 : index
    %9 = vector.load %arg4[%c0_6, %c0_7] : memref<98x128xbf16, #tpu.memory_space<vmem>>, vector<98x128xbf16>
    tpu.vector_store %arg4[%c0_6, %c0_7], %8 {strides = array<i32>} : memref<98x128xbf16, #tpu.memory_space<vmem>>, vector<98x128xbf16>,
    return
  }
  func.func @transform_0(%arg0: i32) -> (i32, i32) {
    %c0_i32 = arith.constant 0 : i32
    %c0_i32_0 = arith.constant 0 : i32
    return %arg0, %c0_i32 : i32, i32
  }
  func.func @transform_1(%arg0: i32) -> (i32, i32) {
    %c0_i32 = arith.constant 0 : i32
    %c0_i32_0 = arith.constant 0 : i32
    %c0_i32_1 = arith.constant 0 : i32
    return %c0_i32, %c0_i32_0 : i32, i32
  }
  func.func @transform_2(%arg0: i32) -> (i32, i32) {
    %c0_i32 = arith.constant 0 : i32
    %c0_i32_0 = arith.constant 0 : i32
    %c0_i32_1 = arith.constant 0 : i32
    return %c0_i32, %c0_i32_0 : i32, i32
  }
  func.func @transform_3(%arg0: i32) -> (i32, i32) {
    %c0_i32 = arith.constant 0 : i32
    %c0_i32_0 = arith.constant 0 : i32
    return %arg0, %c0_i32 : i32, i32
  }
}

module attributes {stable_mosaic.version = 11 : i64} {
  func.func @_fc_tail_kernel(%arg0: memref<2x6272xbf16, #tpu.memory_space<vmem>>, %arg1: memref<6272x512xbf16, #tpu.memory_space<vmem>>, %arg2: memref<1x512xf32, #tpu.memory_space<vmem>>, %arg3: memref<512x128xbf16, #tpu.memory_space<vmem>>, %arg4: memref<1x128xf32, #tpu.memory_space<vmem>>, %arg5: memref<2x128xf32, #tpu.memory_space<vmem>>) attributes {dimension_semantics = [], scalar_prefetch = 0 : i64, scratch_operands = 0 : i64, tpu.core_type = #tpu.core_type<tc>} {
    %c0 = arith.constant 0 : index
    %c0_0 = arith.constant 0 : index
    %0 = vector.load %arg0[%c0, %c0_0] : memref<2x6272xbf16, #tpu.memory_space<vmem>>, vector<2x6272xbf16>
    %c0_1 = arith.constant 0 : index
    %c0_2 = arith.constant 0 : index
    %1 = vector.load %arg1[%c0_1, %c0_2] : memref<6272x512xbf16, #tpu.memory_space<vmem>>, vector<6272x512xbf16>
    %cst = arith.constant dense<0.000000e+00> : vector<2x512xf32>
    %2 = tpu.matmul %0, %1, %cst {dimension_numbers = #tpu.dot_dimension_numbers<[1], [0], [0], [1], [0, 0, 1, 1], [], []>} : vector<2x6272xbf16>, vector<6272x512xbf16>, vector<2x512xf32> -> vector<2x512xf32>
    %c0_3 = arith.constant 0 : index
    %c0_4 = arith.constant 0 : index
    %3 = vector.load %arg2[%c0_3, %c0_4] : memref<1x512xf32, #tpu.memory_space<vmem>>, vector<1x512xf32>
    %4 = vector.broadcast %3 : vector<1x512xf32> to vector<2x512xf32>
    %5 = arith.addf %2, %4 : vector<2x512xf32>
    %cst_5 = arith.constant 0.000000e+00 : f32
    %6 = vector.broadcast %cst_5 : f32 to vector<2x512xf32>
    %7 = arith.maximumf %5, %6 : vector<2x512xf32>
    %8 = arith.truncf %7 : vector<2x512xf32> to vector<2x512xbf16>
    %c0_6 = arith.constant 0 : index
    %c0_7 = arith.constant 0 : index
    %9 = vector.load %arg3[%c0_6, %c0_7] : memref<512x128xbf16, #tpu.memory_space<vmem>>, vector<512x128xbf16>
    %cst_8 = arith.constant dense<0.000000e+00> : vector<2x128xf32>
    %10 = tpu.matmul %8, %9, %cst_8 {dimension_numbers = #tpu.dot_dimension_numbers<[1], [0], [0], [1], [0, 0, 1, 1], [], []>} : vector<2x512xbf16>, vector<512x128xbf16>, vector<2x128xf32> -> vector<2x128xf32>
    %c0_9 = arith.constant 0 : index
    %c0_10 = arith.constant 0 : index
    %11 = vector.load %arg4[%c0_9, %c0_10] : memref<1x128xf32, #tpu.memory_space<vmem>>, vector<1x128xf32>
    %12 = vector.broadcast %11 : vector<1x128xf32> to vector<2x128xf32>
    %13 = arith.addf %10, %12 : vector<2x128xf32>
    %c0_11 = arith.constant 0 : index
    %c0_12 = arith.constant 0 : index
    %14 = vector.load %arg5[%c0_11, %c0_12] : memref<2x128xf32, #tpu.memory_space<vmem>>, vector<2x128xf32>
    tpu.vector_store %arg5[%c0_11, %c0_12], %13 {strides = array<i32>} : memref<2x128xf32, #tpu.memory_space<vmem>>, vector<2x128xf32>,
    return
  }
}

</mosaic_0001>

<bundles_post_ra>
// kernel: dqn_forward.4
= control target key start
LH: loop header
LB: loop body
LE: loop exit
PB: predicated region body
PF: predicated region fallthrough
CT: control target
= control target key end

     0   :  { %s1844_s12 = smov 0   ;;  %s1846_s13 = smov 0   ;;  %s2154_s0 = inlined_call_operand.vmem [shape: bf16[800,256], index: 0, kind: input, shape index: {}]   ;;  %s2155_s1 = inlined_call_operand.vmem [shape: bf16[256,128], index: 1, kind: input, shape index: {}]   ;;  %s2156_s2 = inlined_call_operand.vmem [shape: f32[1,128], index: 2, kind: input, shape index: {}]   ;;  %s2157_s3 = inlined_call_operand.vmem [shape: bf16[800,128], index: 3, kind: output, shape index: {}]  }
   0x1   :  { %s1848_s14 = smov 0  }
   0x2 LB: > { %s1857_s15 = sadd.s32 4294967295, %s1790_s14   ;;  %s1859_s16 = sadd.s32 1, %s1790_s14   ;;  %s1790_s14 = sphi %s1848_s14, %s2164_s14   ;;  %s1786_s13 = sphi %s1846_s13, %s2163_s13   ;;  %s1782_s12 = sphi %s1844_s12, %s2162_s12  }
   0x3   : > { %s85_s17 = ssub.s32 %s1790_s14, %s1859_s16  ;;  %s88_s18 = sadd.s32 1, %s1786_s13 }
   0x4   : > { %p86_p0 = scmp.eq.s32.totalorder %s85_s17, 0  ;;  %p98_p1 = scmp.ne.s32.totalorder %s1786_s13, %s1782_s12 }
   0x5   : > { %p99_p2 = scmp.eq.s32.totalorder %s1857_s15, 3  ;;  %p1222_p3 = scmp.ge.s32.totalorder %s1790_s14, 1 }
   0x6   : > { %s1867_s19 = scalar_select %p86_p0, %s1786_s13, %s88_s18  }
   0x7   : > { %p1869_p4 = por %p99_p2, %p98_p1  ;;  %p149_p5 = scmp.lt.s32.totalorder %s1790_s14, 5 }
   0x9   : > { %p150_p6 = pnand %p1222_p3, %p149_p5 }
   0xa   : > { %v1672_v0 = vld [vmem:[%s2155_s1 + $0x40] sm:$0xff] (!%p150_p6)   ;;  %s1877_s23 = sshll.u32 (!%p150_p6), %s1857_s15, 5  ;;  %v1674_v2 = vld [vmem:[%s2155_s1 + $0x48] sm:$0xff] (!%p150_p6)   ;;  %v1676_v4 = vld [vmem:[%s2155_s1 + $0x50] sm:$0xff] (!%p150_p6)   ;;  %s175_s18 = sand.u32 (!%p150_p6), 1, %s1782_s12  }
   0xb   : > { %153 = sbr.rel (%p150_p6) target bundleno = 394 (0x18a), region = 32  ;;  %v1673_v1 = vld [vmem:[%s2155_s1] sm:$0xff] (!%p150_p6)   ;;  %1456 = vmatprep.subr.bf16.mxu0 (!%p150_p6), %v1672_v0  ;;  %1568 = vmatprep.subr.bf16.mxu1 (!%p150_p6), %v1672_v0  ;;  %v1675_v3 = vld [vmem:[%s2155_s1 + $0x8] sm:$0xff] (!%p150_p6)   ;;  %p184_p7 = scmp.lt.s32.totalorder (!%p150_p6), %s1877_s23, 99  ;;  %v1677_v5 = vld [vmem:[%s2155_s1 + $0x10] sm:$0xff] (!%p150_p6)  }
   0xc   : > { %1457 = vmatpush3.bf16.msra.mxu0 (!%p150_p6), %v1673_v1  ;;  %1576 = vmatpush3.bf16.msra.mxu1 (!%p150_p6), %v1673_v1  ;;  %v1678_v6 = vld [vmem:[%s2155_s1 + $0x58] sm:$0xff] (!%p150_p6)   ;;  %v1680_v8 = vld [vmem:[%s2155_s1 + $0x60] sm:$0xff] (!%p150_p6)   ;;  %v1682_v10 = vld [vmem:[%s2155_s1 + $0x68] sm:$0xff] (!%p150_p6)   ;;  %s1223_s21 = sshll.u32 (!%p150_p6), %s175_s18, 7 }
   0xd   : > { %1458 = vmatprep.subr.bf16.mxu0 (!%p150_p6), %v1674_v2  ;;  %1569 = vmatprep.subr.bf16.mxu1 (!%p150_p6), %v1674_v2  ;;  %v1679_v7 = vld [vmem:[%s2155_s1 + $0x18] sm:$0xff] (!%p150_p6)   ;;  %v1681_v9 = vld [vmem:[%s2155_s1 + $0x20] sm:$0xff] (!%p150_p6)   ;;  %v1683_v13 = vld [vmem:[%s2155_s1 + $0x28] sm:$0xff] (!%p150_p6)   ;;  %s1973_s12 = scalar_lea.vmem (!%p150_p6), [#allocation2], %s1223_s21  }
   0xe   : > { %v1684_v14 = vld [vmem:[%s2155_s1 + $0x70] sm:$0xff] (!%p150_p6)   ;;  %v1686_v16 = vld [vmem:[%s2155_s1 + $0x78] sm:$0xff] (!%p150_p6)   ;;  %v1966_v50 = vld [vmem:[%s2156_s2] ss:$0 sm:$0xff] (!%p150_p6) }
   0xf   : > { %v1685_v15 = vld [vmem:[%s2155_s1 + $0x30] sm:$0xff] (!%p150_p6)   ;;  %v1687_v17 = vld [vmem:[%s2155_s1 + $0x38] sm:$0xff] (!%p150_p6)  }
  0x10   : > { %1459 = vmatpush3.bf16.msra.mxu0 (!%p150_p6), %v1675_v3  ;;  %1577 = vmatpush3.bf16.msra.mxu1 (!%p150_p6), %v1675_v3 }
  0x11   : > { %1460 = vmatprep.subr.bf16.mxu0 (!%p150_p6), %v1676_v4  ;;  %1570 = vmatprep.subr.bf16.mxu1 (!%p150_p6), %v1676_v4 }
  0x12   : > { %s185_s7 = scalar_select %p184_p7, %s1877_s23, 99 }
  0x13   : > { %s889_s22 = ssub.s32 (%p1869_p4), 100, %s1877_s23 }
  0x14   : > { %1461 = vmatpush3.bf16.msra.mxu0 %v1677_v5  ;;  %1578 = vmatpush3.bf16.msra.mxu1 %v1677_v5  ;;  %s1325_s14 = sshll.u32 %s185_s7, 3  ;;  %p890_p8 = scmp.lt.s32.totalorder (%p1869_p4), %s889_s22, 32 }
  0x15   : > { %1462 = vmatprep.subr.bf16.mxu0 %v1678_v6  ;;  %1571 = vmatprep.subr.bf16.mxu1 %v1678_v6  ;;  %s1908_s24 = scalar_lea.vmem %s2154_s0, %s1325_s14 }
  0x16   : > { %v1690_v11 = vld [vmem:[%s1908_s24 + $0x4] ss:$8 sps:$4 sm:$0xff]   ;;  %v1688_v18 = vld [vmem:[%s1908_s24] ss:$8 sps:$4 sm:$0xff]   ;;  %v1694_v20 = vld [vmem:[%s1908_s24 + $0x14] ss:$8 sps:$4 sm:$0xff]  }
  0x17   : > { %v1693_v12 = vld [vmem:[%s1908_s24 + $0x84] ss:$8 sps:$4 sm:$0xff]   ;;  %560 = vmatprep.mubr.bf16.mxu0 %v1690_v11  ;;  %v1691_v19 = vld [vmem:[%s1908_s24 + $0x80] ss:$8 sps:$4 sm:$0xff]   ;;  %v1696_v21 = vld [vmem:[%s1908_s24 + $0x94] ss:$8 sps:$4 sm:$0xff]  }
  0x18   : > { %1463 = vmatpush3.bf16.msra.mxu0 %v1679_v7  ;;  %1579 = vmatpush3.bf16.msra.mxu1 %v1679_v7  ;;  %v1698_v22 = vld [vmem:[%s1908_s24 + $0x10] ss:$8 sps:$4 sm:$0xff]   ;;  %v1700_v24 = vld [vmem:[%s1908_s24 + $0x24] ss:$8 sps:$4 sm:$0xff]   ;;  %v1704_v26 = vld [vmem:[%s1908_s24 + $0x20] ss:$8 sps:$4 sm:$0xff]  }
  0x19   : > { %1464 = vmatprep.subr.bf16.mxu0 %v1680_v8  ;;  %1572 = vmatprep.subr.bf16.mxu1 %v1680_v8  ;;  %v1699_v23 = vld [vmem:[%s1908_s24 + $0x90] ss:$8 sps:$4 sm:$0xff]   ;;  %v1702_v25 = vld [vmem:[%s1908_s24 + $0xa4] ss:$8 sps:$4 sm:$0xff]   ;;  %v1705_v27 = vld [vmem:[%s1908_s24 + $0xa0] ss:$8 sps:$4 sm:$0xff]  }
  0x1a   : > { %624 = vmatprep.mubr.bf16.mxu1 %v1693_v12  ;;  %v1706_v28 = vld [vmem:[%s1908_s24 + $0x34] ss:$8 sps:$4 sm:$0xff]   ;;  %v1710_v30 = vld [vmem:[%s1908_s24 + $0x30] ss:$8 sps:$4 sm:$0xff]   ;;  %v1712_v32 = vld [vmem:[%s1908_s24 + $0x44] ss:$8 sps:$4 sm:$0xff]  }
  0x1b   : > { %v1708_v29 = vld [vmem:[%s1908_s24 + $0xb4] ss:$8 sps:$4 sm:$0xff]   ;;  %v1711_v31 = vld [vmem:[%s1908_s24 + $0xb0] ss:$8 sps:$4 sm:$0xff]   ;;  %v1714_v33 = vld [vmem:[%s1908_s24 + $0xc4] ss:$8 sps:$4 sm:$0xff]  }
  0x1c   : > { %1465 = vmatpush3.bf16.msra.mxu0 %v1681_v9  ;;  %1580 = vmatpush3.bf16.msra.mxu1 %v1681_v9  ;;  %v1716_v34 = vld [vmem:[%s1908_s24 + $0x40] ss:$8 sps:$4 sm:$0xff]   ;;  %v1718_v36 = vld [vmem:[%s1908_s24 + $0x54] ss:$8 sps:$4 sm:$0xff]   ;;  %v1722_v38 = vld [vmem:[%s1908_s24 + $0x50] ss:$8 sps:$4 sm:$0xff]  }
  0x1d   : > { %1466 = vmatprep.subr.bf16.mxu0 %v1682_v10  ;;  %1573 = vmatprep.subr.bf16.mxu1 %v1682_v10  ;;  %v1717_v35 = vld [vmem:[%s1908_s24 + $0xc0] ss:$8 sps:$4 sm:$0xff]   ;;  %v1720_v37 = vld [vmem:[%s1908_s24 + $0xd4] ss:$8 sps:$4 sm:$0xff]   ;;  %v1723_v39 = vld [vmem:[%s1908_s24 + $0xd0] ss:$8 sps:$4 sm:$0xff]  }
  0x1e   : > { %v1724_v40 = vld [vmem:[%s1908_s24 + $0x64] ss:$8 sps:$4 sm:$0xff]   ;;  %v1728_v42 = vld [vmem:[%s1908_s24 + $0x60] ss:$8 sps:$4 sm:$0xff]   ;;  %v1730_v44 = vld [vmem:[%s1908_s24 + $0x74] ss:$8 sps:$4 sm:$0xff]  }
  0x1f   : > { %v1726_v41 = vld [vmem:[%s1908_s24 + $0xe4] ss:$8 sps:$4 sm:$0xff]   ;;  %v1729_v43 = vld [vmem:[%s1908_s24 + $0xe0] ss:$8 sps:$4 sm:$0xff]   ;;  %v1732_v45 = vld [vmem:[%s1908_s24 + $0xf4] ss:$8 sps:$4 sm:$0xff]  }
  0x20   : > { %1467 = vmatpush3.bf16.msra.mxu0 %v1683_v13  ;;  %1581 = vmatpush3.bf16.msra.mxu1 %v1683_v13  ;;  %v1734_v46 = vld [vmem:[%s1908_s24 + $0x70] ss:$8 sps:$4 sm:$0xff]  }
  0x21   : > { %1468 = vmatprep.subr.bf16.mxu0 %v1684_v14  ;;  %1574 = vmatprep.subr.bf16.mxu1 %v1684_v14  ;;  %v1735_v47 = vld [vmem:[%s1908_s24 + $0xf0] ss:$8 sps:$4 sm:$0xff]   ;;  %s1358_s24 = sshll.u32 (%p1869_p4), %s1857_s15, 7 }
  0x22   : > { %s2026_s27 = scalar_lea.vmem (%p1869_p4), %s2157_s3, %s1358_s24  }
  0x24   : > { %1469 = vmatpush3.bf16.msra.mxu0 %v1685_v15  ;;  %1582 = vmatpush3.bf16.msra.mxu1 %v1685_v15 }
  0x25   : > { %1470 = vmatprep.subr.bf16.mxu0 %v1686_v16  ;;  %1575 = vmatprep.subr.bf16.mxu1 %v1686_v16 }
  0x28   : > { %1471 = vmatpush3.bf16.msra.mxu0 %v1687_v17  ;;  %1583 = vmatpush3.bf16.msra.mxu1 %v1687_v17 }
  0x2b   : > { %561 = vmatmul.mubr.bf16.vlgmr.msra.gmra.mrb[0].mxu0 %v1688_v18  ;;  %625 = vmatmul.mubr.bf16.vlgmr.msra.gmra.mrb[0].mxu1 %v1691_v19 }
  0x2c   : > { %568 = vmatprep.mubr.bf16.mxu0 %v1694_v20  ;;  %632 = vmatprep.mubr.bf16.mxu1 %v1696_v21 }
  0x33   : > { %569 = vmatmul.mubr.bf16.gmra.mrb[4].mxu0 %v1698_v22  ;;  %633 = vmatmul.mubr.bf16.gmra.mrb[4].mxu1 %v1699_v23 }
  0x34   : > { %576 = vmatprep.mubr.bf16.mxu0 %v1700_v24  ;;  %640 = vmatprep.mubr.bf16.mxu1 %v1702_v25 }
  0x3b   : > { %577 = vmatmul.mubr.bf16.gmra.mrb[8].mxu0 %v1704_v26  ;;  %641 = vmatmul.mubr.bf16.gmra.mrb[8].mxu1 %v1705_v27 }
  0x3c   : > { %584 = vmatprep.mubr.bf16.mxu0 %v1706_v28  ;;  %648 = vmatprep.mubr.bf16.mxu1 %v1708_v29 }
  0x43   : > { %585 = vmatmul.mubr.bf16.gmra.mrb[12].mxu0 %v1710_v30  ;;  %649 = vmatmul.mubr.bf16.gmra.mrb[12].mxu1 %v1711_v31 }
  0x44   : > { %592 = vmatprep.mubr.bf16.mxu0 %v1712_v32  ;;  %656 = vmatprep.mubr.bf16.mxu1 %v1714_v33 }
  0x4b   : > { %593 = vmatmul.mubr.bf16.gmra.mrb[16].mxu0 %v1716_v34  ;;  %657 = vmatmul.mubr.bf16.gmra.mrb[16].mxu1 %v1717_v35 }
  0x4c   : > { %600 = vmatprep.mubr.bf16.mxu0 %v1718_v36  ;;  %664 = vmatprep.mubr.bf16.mxu1 %v1720_v37 }
  0x53   : > { %601 = vmatmul.mubr.bf16.gmra.mrb[20].mxu0 %v1722_v38  ;;  %665 = vmatmul.mubr.bf16.gmra.mrb[20].mxu1 %v1723_v39 }
  0x54   : > { %608 = vmatprep.mubr.bf16.mxu0 %v1724_v40  ;;  %672 = vmatprep.mubr.bf16.mxu1 %v1726_v41 }
  0x5b   : > { %609 = vmatmul.mubr.bf16.gmra.mrb[24].mxu0 %v1728_v42  ;;  %673 = vmatmul.mubr.bf16.gmra.mrb[24].mxu1 %v1729_v43 }
  0x5c   : > { %616 = vmatprep.mubr.bf16.mxu0 %v1730_v44  ;;  %680 = vmatprep.mubr.bf16.mxu1 %v1732_v45 }
  0x63   : > { %617 = vmatmul.mubr.bf16.gmra.mrb[28].mxu0 %v1734_v46  ;;  %681 = vmatmul.mubr.bf16.gmra.mrb[28].mxu1 %v1735_v47 }
  0xfe   : > { %v1472_v48 = vpop.f32.mrb[0].mxu0  ;;  %v1520_v49 = vpop.f32.mrb[0].mxu1 }
  0xff   : > { %v1473_v51 = vpop.f32.mrb[1].mxu0  ;;  %v1521_v52 = vpop.f32.mrb[1].mxu1 }
 0x100   : > { %v1474_v53 = vadd.f32 %v1473_v51, %v1472_v48  ;;  %v1522_v54 = vadd.f32 %v1521_v52, %v1520_v49  ;;  %v1475_v55 = vpop.f32.mrb[2].mxu0  ;;  %v1523_v56 = vpop.f32.mrb[2].mxu1 }
 0x101   : > { %v1476_v57 = vpop.f32.mrb[3].mxu0  ;;  %v1524_v58 = vpop.f32.mrb[3].mxu1 }
 0x102   : > { %v563_v59 = vadd.f32 %v1474_v53, %v1966_v50  ;;  %v627_v60 = vadd.f32 %v1522_v54, %v1966_v50  ;;  %v1477_v61 = vadd.f32 %v1476_v57, %v1475_v55  ;;  %v1525_v62 = vadd.f32 %v1524_v58, %v1523_v56 }
 0x104   : > { %v566_v63 = vadd.f32 %v1477_v61, %v1966_v50  ;;  %v630_v0 = vadd.f32 %v1525_v62, %v1966_v50  ;;  %v689_v1 = vmax.f32 %v563_v59, 0.0  ;;  %v705_v2 = vmax.f32 %v627_v60, 0.0 }
 0x106   : > { %v690_v3 = vmax.f32 %v566_v63, 0.0  ;;  %v706_v4 = vmax.f32 %v630_v0, 0.0  ;;  %v1478_v5 = vpop.f32.mrb[4].mxu0  ;;  %v1526_v6 = vpop.f32.mrb[4].mxu1 }
 0x107   : > { %v1479_v7 = vpop.f32.mrb[5].mxu0  ;;  %v1527_v8 = vpop.f32.mrb[5].mxu1 }
 0x108   : > { %v1364_v9 = vpack.c.bf16 %v690_v3, %v689_v1  ;;  %v1404_v10 = vpack.c.bf16 %v706_v4, %v705_v2  ;;  %v1480_v11 = vadd.f32 %v1479_v7, %v1478_v5  ;;  %v1528_v12 = vadd.f32 %v1527_v8, %v1526_v6  ;;  %v1481_v13 = vpop.f32.mrb[6].mxu0  ;;  %v1529_v14 = vpop.f32.mrb[6].mxu1 }
 0x109   : > { %v1482_v15 = vpop.f32.mrb[7].mxu0  ;;  %v1530_v16 = vpop.f32.mrb[7].mxu1 }
 0x10a   : > { %1365 = vst [vmem:[%s1973_s12] sm:$0xff] %v1364_v9   ;;  %1448 = vst [vmem:[%s1973_s12 + $0x40] sm:$0xff] %v1404_v10   ;;  %v571_v17 = vadd.f32 %v1480_v11, %v1966_v50  ;;  %v635_v18 = vadd.f32 %v1528_v12, %v1966_v50  ;;  %v1483_v19 = vadd.f32 %v1482_v15, %v1481_v13 }
 0x10b   : > { %v1531_v20 = vadd.f32 %v1530_v16, %v1529_v14 }
 0x10c   : > { %v574_v21 = vadd.f32 %v1483_v19, %v1966_v50  ;;  %v691_v23 = vmax.f32 %v571_v17, 0.0  ;;  %v707_v24 = vmax.f32 %v635_v18, 0.0 }
 0x10d   : > { %v638_v22 = vadd.f32 %v1531_v20, %v1966_v50 }
 0x10e   : > { %v692_v25 = vmax.f32 %v574_v21, 0.0  ;;  %v1484_v27 = vpop.f32.mrb[8].mxu0  ;;  %v1532_v28 = vpop.f32.mrb[8].mxu1 }
 0x10f   : > { %v708_v26 = vmax.f32 %v638_v22, 0.0  ;;  %v1485_v29 = vpop.f32.mrb[9].mxu0  ;;  %v1533_v30 = vpop.f32.mrb[9].mxu1 }
 0x110   : > { %v1369_v31 = vpack.c.bf16 %v692_v25, %v691_v23  ;;  %v1486_v33 = vadd.f32 %v1485_v29, %v1484_v27  ;;  %v1534_v34 = vadd.f32 %v1533_v30, %v1532_v28  ;;  %v1487_v35 = vpop.f32.mrb[10].mxu0  ;;  %v1535_v36 = vpop.f32.mrb[10].mxu1 }
 0x111   : > { %v1409_v32 = vpack.c.bf16 %v708_v26, %v707_v24  ;;  %v1488_v37 = vpop.f32.mrb[11].mxu0  ;;  %v1536_v38 = vpop.f32.mrb[11].mxu1 }
 0x112   : > { %1441 = vst [vmem:[%s1973_s12 + $0x8] sm:$0xff] %v1369_v31   ;;  %v579_v39 = vadd.f32 %v1486_v33, %v1966_v50  ;;  %v643_v40 = vadd.f32 %v1534_v34, %v1966_v50  ;;  %v1489_v41 = vadd.f32 %v1488_v37, %v1487_v35  ;;  %v1537_v42 = vadd.f32 %v1536_v38, %v1535_v36 }
 0x113   : > { %1449 = vst [vmem:[%s1973_s12 + $0x48] sm:$0xff] %v1409_v32  }
 0x114   : > { %v582_v43 = vadd.f32 %v1489_v41, %v1966_v50  ;;  %v646_v44 = vadd.f32 %v1537_v42, %v1966_v50  ;;  %v693_v45 = vmax.f32 %v579_v39, 0.0  ;;  %v709_v46 = vmax.f32 %v643_v40, 0.0 }
 0x116   : > { %v694_v47 = vmax.f32 %v582_v43, 0.0  ;;  %v710_v48 = vmax.f32 %v646_v44, 0.0  ;;  %v1490_v49 = vpop.f32.mrb[12].mxu0  ;;  %v1538_v51 = vpop.f32.mrb[12].mxu1 }
 0x117   : > { %v1491_v52 = vpop.f32.mrb[13].mxu0  ;;  %v1539_v53 = vpop.f32.mrb[13].mxu1 }
 0x118   : > { %v1374_v54 = vpack.c.bf16 %v694_v47, %v693_v45  ;;  %v1414_v55 = vpack.c.bf16 %v710_v48, %v709_v46  ;;  %v1492_v56 = vadd.f32 %v1491_v52, %v1490_v49  ;;  %v1540_v57 = vadd.f32 %v1539_v53, %v1538_v51  ;;  %v1493_v58 = vpop.f32.mrb[14].mxu0  ;;  %v1541_v59 = vpop.f32.mrb[14].mxu1 }
 0x119   : > { %v1494_v60 = vpop.f32.mrb[15].mxu0  ;;  %v1542_v61 = vpop.f32.mrb[15].mxu1 }
 0x11a   : > { %1442 = vst [vmem:[%s1973_s12 + $0x10] sm:$0xff] %v1374_v54   ;;  %1450 = vst [vmem:[%s1973_s12 + $0x50] sm:$0xff] %v1414_v55   ;;  %v587_v62 = vadd.f32 %v1492_v56, %v1966_v50  ;;  %v651_v63 = vadd.f32 %v1540_v57, %v1966_v50  ;;  %v1495_v0 = vadd.f32 %v1494_v60, %v1493_v58 }
 0x11b   : > { %v1543_v1 = vadd.f32 %v1542_v61, %v1541_v59 }
 0x11c   : > { %v590_v2 = vadd.f32 %v1495_v0, %v1966_v50  ;;  %v695_v4 = vmax.f32 %v587_v62, 0.0  ;;  %v711_v5 = vmax.f32 %v651_v63, 0.0 }
 0x11d   : > { %v654_v3 = vadd.f32 %v1543_v1, %v1966_v50 }
 0x11e   : > { %v696_v6 = vmax.f32 %v590_v2, 0.0  ;;  %v1496_v8 = vpop.f32.mrb[16].mxu0  ;;  %v1544_v9 = vpop.f32.mrb[16].mxu1 }
 0x11f   : > { %v712_v7 = vmax.f32 %v654_v3, 0.0  ;;  %v1497_v10 = vpop.f32.mrb[17].mxu0  ;;  %v1545_v11 = vpop.f32.mrb[17].mxu1 }
 0x120   : > { %v1379_v12 = vpack.c.bf16 %v696_v6, %v695_v4  ;;  %v1498_v14 = vadd.f32 %v1497_v10, %v1496_v8  ;;  %v1546_v15 = vadd.f32 %v1545_v11, %v1544_v9  ;;  %v1499_v16 = vpop.f32.mrb[18].mxu0  ;;  %v1547_v17 = vpop.f32.mrb[18].mxu1 }
 0x121   : > { %v1419_v13 = vpack.c.bf16 %v712_v7, %v711_v5  ;;  %v1500_v18 = vpop.f32.mrb[19].mxu0  ;;  %v1548_v19 = vpop.f32.mrb[19].mxu1 }
 0x122   : > { %1443 = vst [vmem:[%s1973_s12 + $0x18] sm:$0xff] %v1379_v12   ;;  %v595_v20 = vadd.f32 %v1498_v14, %v1966_v50  ;;  %v659_v21 = vadd.f32 %v1546_v15, %v1966_v50  ;;  %v1501_v22 = vadd.f32 %v1500_v18, %v1499_v16  ;;  %v1549_v23 = vadd.f32 %v1548_v19, %v1547_v17 }
 0x123   : > { %1451 = vst [vmem:[%s1973_s12 + $0x58] sm:$0xff] %v1419_v13  }
 0x124   : > { %v598_v24 = vadd.f32 %v1501_v22, %v1966_v50  ;;  %v662_v25 = vadd.f32 %v1549_v23, %v1966_v50  ;;  %v697_v26 = vmax.f32 %v595_v20, 0.0  ;;  %v713_v27 = vmax.f32 %v659_v21, 0.0 }
 0x126   : > { %v698_v28 = vmax.f32 %v598_v24, 0.0  ;;  %v714_v29 = vmax.f32 %v662_v25, 0.0  ;;  %v1502_v30 = vpop.f32.mrb[20].mxu0  ;;  %v1550_v31 = vpop.f32.mrb[20].mxu1 }
 0x127   : > { %v1503_v32 = vpop.f32.mrb[21].mxu0  ;;  %v1551_v33 = vpop.f32.mrb[21].mxu1 }
 0x128   : > { %v1384_v34 = vpack.c.bf16 %v698_v28, %v697_v26  ;;  %v1424_v35 = vpack.c.bf16 %v714_v29, %v713_v27  ;;  %v1504_v36 = vadd.f32 %v1503_v32, %v1502_v30  ;;  %v1552_v37 = vadd.f32 %v1551_v33, %v1550_v31  ;;  %v1505_v38 = vpop.f32.mrb[22].mxu0  ;;  %v1553_v39 = vpop.f32.mrb[22].mxu1 }
 0x129   : > { %v1506_v40 = vpop.f32.mrb[23].mxu0  ;;  %v1554_v41 = vpop.f32.mrb[23].mxu1 }
 0x12a   : > { %1444 = vst [vmem:[%s1973_s12 + $0x20] sm:$0xff] %v1384_v34   ;;  %1452 = vst [vmem:[%s1973_s12 + $0x60] sm:$0xff] %v1424_v35   ;;  %v603_v42 = vadd.f32 %v1504_v36, %v1966_v50  ;;  %v667_v43 = vadd.f32 %v1552_v37, %v1966_v50  ;;  %v1507_v44 = vadd.f32 %v1506_v40, %v1505_v38 }
 0x12b   : > { %v1555_v45 = vadd.f32 %v1554_v41, %v1553_v39 }
 0x12c   : > { %v606_v46 = vadd.f32 %v1507_v44, %v1966_v50  ;;  %v699_v48 = vmax.f32 %v603_v42, 0.0  ;;  %v715_v49 = vmax.f32 %v667_v43, 0.0 }
 0x12d   : > { %v670_v47 = vadd.f32 %v1555_v45, %v1966_v50 }
 0x12e   : > { %v700_v51 = vmax.f32 %v606_v46, 0.0  ;;  %v1508_v53 = vpop.f32.mrb[24].mxu0  ;;  %v1556_v54 = vpop.f32.mrb[24].mxu1 }
 0x12f   : > { %v716_v52 = vmax.f32 %v670_v47, 0.0  ;;  %v1509_v55 = vpop.f32.mrb[25].mxu0  ;;  %v1557_v56 = vpop.f32.mrb[25].mxu1 }
 0x130   : > { %v1389_v57 = vpack.c.bf16 %v700_v51, %v699_v48  ;;  %v1510_v59 = vadd.f32 %v1509_v55, %v1508_v53  ;;  %v1558_v60 = vadd.f32 %v1557_v56, %v1556_v54  ;;  %v1511_v61 = vpop.f32.mrb[26].mxu0  ;;  %v1559_v62 = vpop.f32.mrb[26].mxu1 }
 0x131   : > { %v1429_v58 = vpack.c.bf16 %v716_v52, %v715_v49  ;;  %v1512_v63 = vpop.f32.mrb[27].mxu0  ;;  %v1560_v0 = vpop.f32.mrb[27].mxu1 }
 0x132   : > { %1445 = vst [vmem:[%s1973_s12 + $0x28] sm:$0xff] %v1389_v57   ;;  %v611_v1 = vadd.f32 %v1510_v59, %v1966_v50  ;;  %v675_v2 = vadd.f32 %v1558_v60, %v1966_v50  ;;  %v1513_v3 = vadd.f32 %v1512_v63, %v1511_v61  ;;  %v1561_v4 = vadd.f32 %v1560_v0, %v1559_v62 }
 0x133   : > { %1453 = vst [vmem:[%s1973_s12 + $0x68] sm:$0xff] %v1429_v58  }
 0x134   : > { %v614_v5 = vadd.f32 %v1513_v3, %v1966_v50  ;;  %v678_v6 = vadd.f32 %v1561_v4, %v1966_v50  ;;  %v701_v7 = vmax.f32 %v611_v1, 0.0  ;;  %v717_v8 = vmax.f32 %v675_v2, 0.0 }
 0x136   : > { %v702_v9 = vmax.f32 %v614_v5, 0.0  ;;  %v718_v10 = vmax.f32 %v678_v6, 0.0  ;;  %v1514_v11 = vpop.f32.mrb[28].mxu0  ;;  %v1562_v12 = vpop.f32.mrb[28].mxu1 }
 0x137   : > { %v1515_v13 = vpop.f32.mrb[29].mxu0  ;;  %v1563_v14 = vpop.f32.mrb[29].mxu1 }
 0x138   : > { %v1394_v15 = vpack.c.bf16 %v702_v9, %v701_v7  ;;  %v1434_v16 = vpack.c.bf16 %v718_v10, %v717_v8  ;;  %v1516_v17 = vadd.f32 %v1515_v13, %v1514_v11  ;;  %v1564_v18 = vadd.f32 %v1563_v14, %v1562_v12  ;;  %v1517_v19 = vpop.f32.mrb[30].mxu0  ;;  %v1565_v20 = vpop.f32.mrb[30].mxu1 }
 0x139   : > { %v1518_v21 = vpop.f32.mrb[31].mxu0  ;;  %v1566_v22 = vpop.f32.mrb[31].mxu1 }
 0x13a   : > { %1446 = vst [vmem:[%s1973_s12 + $0x30] sm:$0xff] %v1394_v15   ;;  %1454 = vst [vmem:[%s1973_s12 + $0x70] sm:$0xff] %v1434_v16   ;;  %v619_v23 = vadd.f32 %v1516_v17, %v1966_v50  ;;  %v683_v24 = vadd.f32 %v1564_v18, %v1966_v50  ;;  %v1519_v25 = vadd.f32 %v1518_v21, %v1517_v19 }
 0x13b   : > { %v1567_v26 = vadd.f32 %v1566_v22, %v1565_v20 }
 0x13c   : > { %v622_v27 = vadd.f32 %v1519_v25, %v1966_v50  ;;  %v703_v29 = vmax.f32 %v619_v23, 0.0  ;;  %v719_v30 = vmax.f32 %v683_v24, 0.0 }
 0x13d   : > { %v686_v28 = vadd.f32 %v1567_v26, %v1966_v50  ;;  %887 = sbr.rel (!%p1869_p4) target bundleno = 394 (0x18a), region = 36 }
 0x13e   : > { %v704_v31 = vmax.f32 %v622_v27, 0.0 }
 0x13f   : > { %v720_v32 = vmax.f32 %v686_v28, 0.0 }
 0x140   : > { %v1399_v33 = vpack.c.bf16 %v704_v31, %v703_v29 }
 0x141   : > { %v1439_v34 = vpack.c.bf16 %v720_v32, %v719_v30 }
 0x142   : > { %1447 = vst [vmem:[%s1973_s12 + $0x38] sm:$0xff] %v1399_v33  }
 0x143   : > { %1455 = vst [vmem:[%s1973_s12 + $0x78] sm:$0xff] %v1439_v34  }
 0x144   : > { %s2166_s22 = smov (!%p890_p8, %s889_s22), 32 }
 0x145   : > { %s1310_s28 = sshll.u32 %s2166_s22, 6 }
 0x146   : > { %p1313_p9 = scmp.eq.s32.totalorder %s1310_s28, 0 }
 0x147   : > { %s2032_s29 = sshrl.u32 (!%p1313_p9), %s2166_s22, 5 }
 0x148   : > { %898 = sbr.rel (%p1313_p9) target bundleno = 394 (0x18a), region = 40  ;;  %p1314_p10 = scmp.le.s32.totalorder (!%p1313_p9), %s2032_s29, 0 }
 0x14f   : > { %1175 = sbr.rel (%p1314_p10) target bundleno = 373 (0x175), region = 112  ;;  %s2159_s15 = smov (!%p1314_p10), %s2026_s27 }
 0x150   : > { %s2160_s20 = smov (!%p1314_p10), %s1973_s12  ;;  %s2041_s23 = smov (!%p1314_p10), 0  }
 0x151   : > { %s2043_s30 = smov (!%p1314_p10), 0  }
 0x156 LB: >> { %v914_v50 = vld [vmem:[%s1798_s20] sm:$0xf]  ;;  %v916_v35 = vld [vmem:[%s1798_s20 + $0x4] sm:$0xf]  ;;  %v918_v36 = vld [vmem:[%s1798_s20 + $0x8] sm:$0xf]  ;;  %s1806_s30 = sphi %s2043_s30, %s908_s30   ;;  %s1802_s23 = sphi %s2041_s23, %s2161_s23   ;;  %s1798_s20 = sphi %s2160_s20, %s983_s20   ;;  %s1794_s15 = sphi %s2159_s15, %s984_s15  }
 0x157   : >> { %915 = vst [vmem:[%s1794_s15] sm:$0xf] %v914_v50  ;;  %917 = vst [vmem:[%s1794_s15 + $0x4] sm:$0xf] %v916_v35  ;;  %v920_v37 = vld [vmem:[%s1798_s20 + $0xc] sm:$0xf]  ;;  %s978_s4 = sadd.s32 1, %s1802_s23 }
 0x158   : >> { %919 = vst [vmem:[%s1794_s15 + $0x8] sm:$0xf] %v918_v36  ;;  %v922_v38 = vld [vmem:[%s1798_s20 + $0x10] sm:$0xf]  ;;  %v924_v39 = vld [vmem:[%s1798_s20 + $0x14] sm:$0xf]  ;;  %p979_p11 = scmp.ge.s32.totalorder %s978_s4, %s2032_s29 }
 0x159   : >> { %921 = vst [vmem:[%s1794_s15 + $0xc] sm:$0xf] %v920_v37  ;;  %923 = vst [vmem:[%s1794_s15 + $0x10] sm:$0xf] %v922_v38  ;;  %v926_v40 = vld [vmem:[%s1798_s20 + $0x18] sm:$0xf] }
 0x15a   : >> { %925 = vst [vmem:[%s1794_s15 + $0x14] sm:$0xf] %v924_v39  ;;  %v928_v41 = vld [vmem:[%s1798_s20 + $0x1c] sm:$0xf]  ;;  %v930_v42 = vld [vmem:[%s1798_s20 + $0x20] sm:$0xf] }
 0x15b   : >> { %927 = vst [vmem:[%s1794_s15 + $0x18] sm:$0xf] %v926_v40  ;;  %929 = vst [vmem:[%s1794_s15 + $0x1c] sm:$0xf] %v928_v41  ;;  %v932_v43 = vld [vmem:[%s1798_s20 + $0x24] sm:$0xf] }
 0x15c   : >> { %931 = vst [vmem:[%s1794_s15 + $0x20] sm:$0xf] %v930_v42  ;;  %v934_v44 = vld [vmem:[%s1798_s20 + $0x28] sm:$0xf]  ;;  %v936_v45 = vld [vmem:[%s1798_s20 + $0x2c] sm:$0xf] }
 0x15d   : >> { %933 = vst [vmem:[%s1794_s15 + $0x24] sm:$0xf] %v932_v43  ;;  %935 = vst [vmem:[%s1794_s15 + $0x28] sm:$0xf] %v934_v44  ;;  %v938_v46 = vld [vmem:[%s1798_s20 + $0x30] sm:$0xf] }
 0x15e   : >> { %937 = vst [vmem:[%s1794_s15 + $0x2c] sm:$0xf] %v936_v45  ;;  %v940_v47 = vld [vmem:[%s1798_s20 + $0x34] sm:$0xf]  ;;  %v942_v48 = vld [vmem:[%s1798_s20 + $0x38] sm:$0xf] }
 0x15f   : >> { %939 = vst [vmem:[%s1794_s15 + $0x30] sm:$0xf] %v938_v46  ;;  %941 = vst [vmem:[%s1794_s15 + $0x34] sm:$0xf] %v940_v47  ;;  %v944_v49 = vld [vmem:[%s1798_s20 + $0x3c] sm:$0xf] }
 0x160   : >> { %943 = vst [vmem:[%s1794_s15 + $0x38] sm:$0xf] %v942_v48  ;;  %v946_v51 = vld [vmem:[%s1798_s20 + $0x40] sm:$0xf]  ;;  %v948_v52 = vld [vmem:[%s1798_s20 + $0x44] sm:$0xf] }
 0x161   : >> { %945 = vst [vmem:[%s1794_s15 + $0x3c] sm:$0xf] %v944_v49  ;;  %947 = vst [vmem:[%s1794_s15 + $0x40] sm:$0xf] %v946_v51  ;;  %v950_v53 = vld [vmem:[%s1798_s20 + $0x48] sm:$0xf] }
 0x162   : >> { %949 = vst [vmem:[%s1794_s15 + $0x44] sm:$0xf] %v948_v52  ;;  %v952_v54 = vld [vmem:[%s1798_s20 + $0x4c] sm:$0xf]  ;;  %v954_v55 = vld [vmem:[%s1798_s20 + $0x50] sm:$0xf] }
 0x163   : >> { %951 = vst [vmem:[%s1794_s15 + $0x48] sm:$0xf] %v950_v53  ;;  %953 = vst [vmem:[%s1794_s15 + $0x4c] sm:$0xf] %v952_v54  ;;  %v956_v56 = vld [vmem:[%s1798_s20 + $0x54] sm:$0xf] }
 0x164   : >> { %955 = vst [vmem:[%s1794_s15 + $0x50] sm:$0xf] %v954_v55  ;;  %v958_v57 = vld [vmem:[%s1798_s20 + $0x58] sm:$0xf]  ;;  %v960_v58 = vld [vmem:[%s1798_s20 + $0x5c] sm:$0xf] }
 0x165   : >> { %957 = vst [vmem:[%s1794_s15 + $0x54] sm:$0xf] %v956_v56  ;;  %959 = vst [vmem:[%s1794_s15 + $0x58] sm:$0xf] %v958_v57  ;;  %v962_v59 = vld [vmem:[%s1798_s20 + $0x60] sm:$0xf] }
 0x166   : >> { %961 = vst [vmem:[%s1794_s15 + $0x5c] sm:$0xf] %v960_v58  ;;  %v964_v60 = vld [vmem:[%s1798_s20 + $0x64] sm:$0xf]  ;;  %v966_v61 = vld [vmem:[%s1798_s20 + $0x68] sm:$0xf] }
 0x167   : >> { %963 = vst [vmem:[%s1794_s15 + $0x60] sm:$0xf] %v962_v59  ;;  %965 = vst [vmem:[%s1794_s15 + $0x64] sm:$0xf] %v964_v60  ;;  %v968_v62 = vld [vmem:[%s1798_s20 + $0x6c] sm:$0xf] }
 0x168   : >> { %967 = vst [vmem:[%s1794_s15 + $0x68] sm:$0xf] %v966_v61  ;;  %v970_v63 = vld [vmem:[%s1798_s20 + $0x70] sm:$0xf]  ;;  %v972_v0 = vld [vmem:[%s1798_s20 + $0x74] sm:$0xf] }
 0x169   : >> { %969 = vst [vmem:[%s1794_s15 + $0x6c] sm:$0xf] %v968_v62  ;;  %971 = vst [vmem:[%s1794_s15 + $0x70] sm:$0xf] %v970_v63  ;;  %v974_v1 = vld [vmem:[%s1798_s20 + $0x78] sm:$0xf] }
 0x16a   : >> { %973 = vst [vmem:[%s1794_s15 + $0x74] sm:$0xf] %v972_v0  ;;  %v976_v2 = vld [vmem:[%s1798_s20 + $0x7c] sm:$0xf]  ;;  %975 = vst [vmem:[%s1794_s15 + $0x78] sm:$0xf] %v974_v1 }
 0x16b   : >> { %977 = vst [vmem:[%s1794_s15 + $0x7c] sm:$0xf] %v976_v2  ;;  %s2168_s4 = smov (%p979_p11, %s978_s4), 0  ;;  %s908_s30 = sadd.s32 1, %s1806_s30  }
 0x16c   : >> { %s1315_s5 = sshll.u32 %s2168_s4, 7  ;;  %p907_p12 = scmp.ge.s32.totalorder %s908_s30, %s2032_s29 }
 0x16d   : >> { %s983_s20 = scalar_lea.vmem %s1973_s12, %s1315_s5 [#allocation2]   ;;  %s984_s15 = scalar_lea.vmem %s2026_s27, %s1315_s5  }
 0x16e   : >> { %s2161_s23 = smov %s2168_s4  ;;  %910 = sbr.rel (!%p907_p12) target bundleno = 342 (0x156), region = 118 }
 0x175 PF: > { %s2136_s6 = sand.u32 31, %s2166_s22   ;;  %s1359_s7 = sshll.u32 %s2032_s29, 7 }
 0x176   : > { %s989_s8 = scalar_lea.vmem %s1973_s12, %s1359_s7 [#allocation2]   ;;  %s991_s9 = scalar_lea.vmem %s2026_s27, %s1359_s7  }
 0x177   : > { %p1320_p13 = scmp.le.s32.totalorder %s2136_s6, 0 }
 0x178   : > { %s1808_s10 = smov (!%p1320_p13), %s991_s9   ;;  %s1812_s11 = smov (!%p1320_p13), %s989_s8  }
 0x179   : > { %1189 = sbr.rel (%p1320_p13) target bundleno = 394 (0x18a), region = 123  ;;  %s1816_s14 = smov (!%p1320_p13), 0  }
 0x17a   : > { %s1820_s17 = smov (!%p1320_p13), 0  }
 0x180 LB: >> { %v1001_v3 = vld [vmem:[%s1814_s11] sm:$0xf]  ;;  %s1003_s18 = sadd.s32 1, %s1818_s14  ;;  %s995_s17 = sadd.s32 1, %s1822_s17   ;;  %s1822_s17 = sphi %s1820_s17, %s995_s17   ;;  %s1818_s14 = sphi %s1816_s14, %s1817_s14   ;;  %s1814_s11 = sphi %s1812_s11, %s1008_s11   ;;  %s1810_s10 = sphi %s1808_s10, %s1009_s10  }
 0x181   : >> { %1002 = vst [vmem:[%s1810_s10] sm:$0xf] %v1001_v3  ;;  %p1004_p0 = scmp.ge.s32.totalorder %s1003_s18, %s2136_s6  ;;  %p994_p1 = scmp.ge.s32.totalorder %s995_s17, %s2136_s6 }
 0x183   : >> { %s2170_s18 = smov (%p1004_p0, %s1003_s18), 0  ;;  %997 = sbr.rel (!%p994_p1) target bundleno = 384 (0x180), region = 129 }
 0x184   : >> { %s1321_s21 = sshll.u32 %s2170_s18, 2  ;;  %s1817_s14 = smov %s2170_s18  }
 0x185   : >> { %s1008_s11 = scalar_lea.vmem %s989_s8, %s1321_s21 [#allocation2]   ;;  %s1009_s10 = scalar_lea.vmem %s991_s9, %s1321_s21  }
 0x18a PF: > { %p10_p2 = scmp.ge.s32.totalorder %s1859_s16, 6   ;;  %s2162_s12 = smov %s1786_s13 }
 0x18b   : > { %s2163_s13 = smov %s1867_s19  ;;  %s2164_s14 = smov %s1859_s16 }
 0x18c   :  { %12 = sbr.rel (!%p10_p2) target bundleno = 2 (0x2), region = 140 }

// kernel: dqn_forward.5
= control target key start
LH: loop header
LB: loop body
LE: loop exit
PB: predicated region body
PF: predicated region fallthrough
CT: control target
= control target key end

     0   :  { %s5523_s1 = inlined_call_operand.vmem [shape: bf16[2048,128], index: 1, kind: input, shape index: {}]   ;;  %s5524_s0 = inlined_call_operand.vmem [shape: bf16[162,2048], index: 0, kind: input, shape index: {}]   ;;  %s5525_s2 = inlined_call_operand.vmem [shape: f32[1,128], index: 2, kind: input, shape index: {}]   ;;  %s5526_s3 = inlined_call_operand.vmem [shape: bf16[162,128], index: 3, kind: output, shape index: {}]  }
   0x1   :  { %v4223_v0 = vld [vmem:[%s5523_s1 + $0x40] sm:$0xff]   ;;  %v4227_v4 = vld [vmem:[%s5523_s1 + $0x48] sm:$0xff]   ;;  %v4231_v8 = vld [vmem:[%s5523_s1 + $0x50] sm:$0xff]  }
   0x2   :  { %v4224_v1 = vld [vmem:[%s5523_s1 + $0xc0] sm:$0xff]   ;;  %3567 = vmatprep.subr.bf16.mxu0 %v4223_v0  ;;  %v4228_v5 = vld [vmem:[%s5523_s1 + $0xc8] sm:$0xff]   ;;  %v4232_v9 = vld [vmem:[%s5523_s1 + $0xd0] sm:$0xff]  }
   0x3   :  { %v4225_v2 = vld [vmem:[%s5523_s1] sm:$0xff]   ;;  %3649 = vmatprep.subr.bf16.mxu1 %v4224_v1  ;;  %v4229_v6 = vld [vmem:[%s5523_s1 + $0x8] sm:$0xff]   ;;  %v4233_v10 = vld [vmem:[%s5523_s1 + $0x10] sm:$0xff]  }
   0x4   :  { %v4226_v3 = vld [vmem:[%s5523_s1 + $0x80] sm:$0xff]   ;;  %3568 = vmatpush3.bf16.msra.mxu0 %v4225_v2  ;;  %v4230_v7 = vld [vmem:[%s5523_s1 + $0x88] sm:$0xff]   ;;  %v4234_v11 = vld [vmem:[%s5523_s1 + $0x90] sm:$0xff]  }
   0x5   :  { %3650 = vmatpush3.bf16.msra.mxu1 %v4226_v3  ;;  %3569 = vmatprep.subr.bf16.mxu0 %v4227_v4  ;;  %v4235_v12 = vld [vmem:[%s5523_s1 + $0x58] sm:$0xff]   ;;  %v4239_v16 = vld [vmem:[%s5523_s1 + $0x60] sm:$0xff]   ;;  %v4243_v20 = vld [vmem:[%s5523_s1 + $0x68] sm:$0xff]  }
   0x6   :  { %3651 = vmatprep.subr.bf16.mxu1 %v4228_v5  ;;  %v4236_v13 = vld [vmem:[%s5523_s1 + $0xd8] sm:$0xff]   ;;  %v4240_v17 = vld [vmem:[%s5523_s1 + $0xe0] sm:$0xff]   ;;  %v4244_v21 = vld [vmem:[%s5523_s1 + $0xe8] sm:$0xff]  }
   0x7   :  { %v4237_v14 = vld [vmem:[%s5523_s1 + $0x18] sm:$0xff]   ;;  %v4241_v18 = vld [vmem:[%s5523_s1 + $0x20] sm:$0xff]   ;;  %v4245_v22 = vld [vmem:[%s5523_s1 + $0x28] sm:$0xff]  }
   0x8   :  { %3570 = vmatpush3.bf16.msra.mxu0 %v4229_v6  ;;  %v4238_v15 = vld [vmem:[%s5523_s1 + $0x98] sm:$0xff]   ;;  %v4242_v19 = vld [vmem:[%s5523_s1 + $0xa0] sm:$0xff]   ;;  %v4246_v23 = vld [vmem:[%s5523_s1 + $0xa8] sm:$0xff]  }
   0x9   :  { %3652 = vmatpush3.bf16.msra.mxu1 %v4230_v7  ;;  %3571 = vmatprep.subr.bf16.mxu0 %v4231_v8  ;;  %v4247_v24 = vld [vmem:[%s5523_s1 + $0x70] sm:$0xff]   ;;  %v4251_v28 = vld [vmem:[%s5523_s1 + $0x78] sm:$0xff]   ;;  %v15_v32 = vld [vmem:[%s5524_s0] sm:$0xff] }
   0xa   :  { %3653 = vmatprep.subr.bf16.mxu1 %v4232_v9  ;;  %v4248_v25 = vld [vmem:[%s5523_s1 + $0xf0] sm:$0xff]   ;;  %v4252_v29 = vld [vmem:[%s5523_s1 + $0xf8] sm:$0xff]   ;;  %v23_v33 = vld [vmem:[%s5524_s0 + $0x40] sm:$0xff] }
   0xb   :  { %v4249_v26 = vld [vmem:[%s5523_s1 + $0x30] sm:$0xff]   ;;  %v4253_v30 = vld [vmem:[%s5523_s1 + $0x38] sm:$0xff]   ;;  %v16_v34 = vld [vmem:[%s5524_s0 + $0x8] sm:$0xff]  ;;  %v3162_v35 = vcombine.low %v15_v32, %v23_v33  ;;  %v3163_v36 = vcombine.high %v15_v32, %v23_v33 }
   0xc   :  { %3572 = vmatpush3.bf16.msra.mxu0 %v4233_v10  ;;  %v4250_v27 = vld [vmem:[%s5523_s1 + $0xb0] sm:$0xff]   ;;  %v4254_v31 = vld [vmem:[%s5523_s1 + $0xb8] sm:$0xff]   ;;  %v24_v37 = vld [vmem:[%s5524_s0 + $0x48] sm:$0xff] }
   0xd   :  { %3654 = vmatpush3.bf16.msra.mxu1 %v4234_v11  ;;  %3573 = vmatprep.subr.bf16.mxu0 %v4235_v12  ;;  %v3164_v38 = vcombine.low %v16_v34, %v24_v37  ;;  %v3165_v39 = vcombine.high %v16_v34, %v24_v37  ;;  %v4255_v40 = vld [vmem:[%s5523_s1 + $0x140] sm:$0xff]   ;;  %v32_v47 = vld [vmem:[%s5524_s0 + $0x88] sm:$0xff]  ;;  %v4263_v62 = vld [vmem:[%s5523_s1 + $0x150] sm:$0xff]  }
   0xe   :  { %3655 = vmatprep.subr.bf16.mxu1 %v4236_v13  ;;  %2102 = vmatprep.mubr.bf16.mxu0 %v3163_v36  ;;  %v4256_v41 = vld [vmem:[%s5523_s1 + $0x100] sm:$0xff]   ;;  %v40_v48 = vld [vmem:[%s5524_s0 + $0xc8] sm:$0xff]  ;;  %v4264_v3 = vld [vmem:[%s5523_s1 + $0x110] sm:$0xff]  }
   0xf   :  { %2222 = vmatprep.mubr.bf16.mxu1 %v3165_v39  ;;  %v4257_v42 = vld [vmem:[%s5523_s1 + $0x1c0] sm:$0xff]   ;;  %v3181_v49 = vcombine.high %v32_v47, %v40_v48  ;;  %v4259_v50 = vld [vmem:[%s5523_s1 + $0x148] sm:$0xff]   ;;  %v3180_v53 = vcombine.low %v32_v47, %v40_v48  ;;  %v4265_v5 = vld [vmem:[%s5523_s1 + $0x1d0] sm:$0xff]  }
  0x10   :  { %3574 = vmatpush3.bf16.msra.mxu0 %v4237_v14  ;;  %v4258_v43 = vld [vmem:[%s5523_s1 + $0x180] sm:$0xff]   ;;  %v4260_v52 = vld [vmem:[%s5523_s1 + $0x108] sm:$0xff]   ;;  %v4266_v8 = vld [vmem:[%s5523_s1 + $0x190] sm:$0xff]  }
  0x11   :  { %3656 = vmatpush3.bf16.msra.mxu1 %v4238_v15  ;;  %3575 = vmatprep.subr.bf16.mxu0 %v4239_v16  ;;  %v31_v44 = vld [vmem:[%s5524_s0 + $0x80] sm:$0xff]  ;;  %v4261_v54 = vld [vmem:[%s5523_s1 + $0x1c8] sm:$0xff]   ;;  %v4267_v10 = vld [vmem:[%s5523_s1 + $0x158] sm:$0xff]  }
  0x12   :  { %3657 = vmatprep.subr.bf16.mxu1 %v4240_v17  ;;  %v39_v45 = vld [vmem:[%s5524_s0 + $0xc0] sm:$0xff]  ;;  %v4262_v55 = vld [vmem:[%s5523_s1 + $0x188] sm:$0xff]   ;;  %v4268_v12 = vld [vmem:[%s5523_s1 + $0x118] sm:$0xff]  }
  0x13   :  { %v3179_v46 = vcombine.high %v31_v44, %v39_v45  ;;  %v3178_v51 = vcombine.low %v31_v44, %v39_v45  ;;  %v47_v56 = vld [vmem:[%s5524_s0 + $0x100] sm:$0xff]  ;;  %v48_v58 = vld [vmem:[%s5524_s0 + $0x108] sm:$0xff]  ;;  %v4269_v13 = vld [vmem:[%s5523_s1 + $0x1d8] sm:$0xff]  }
  0x14   :  { %3576 = vmatpush3.bf16.msra.mxu0 %v4241_v18  ;;  %v55_v57 = vld [vmem:[%s5524_s0 + $0x140] sm:$0xff]  ;;  %v56_v59 = vld [vmem:[%s5524_s0 + $0x148] sm:$0xff]  ;;  %v4270_v15 = vld [vmem:[%s5523_s1 + $0x198] sm:$0xff]  }
  0x15   :  { %3658 = vmatpush3.bf16.msra.mxu1 %v4242_v19  ;;  %3577 = vmatprep.subr.bf16.mxu0 %v4243_v20  ;;  %v3195_v60 = vcombine.high %v47_v56, %v55_v57  ;;  %v3197_v61 = vcombine.high %v48_v58, %v56_v59  ;;  %v63_v63 = vld [vmem:[%s5524_s0 + $0x180] sm:$0xff]  ;;  %v64_v1 = vld [vmem:[%s5524_s0 + $0x188] sm:$0xff]  ;;  %v3194_v4 = vcombine.low %v47_v56, %v55_v57  ;;  %v4281_v44 = vld [vmem:[%s5523_s1 + $0x1f0] sm:$0xff]  }
  0x16   :  { %3659 = vmatprep.subr.bf16.mxu1 %v4244_v21  ;;  %v71_v0 = vld [vmem:[%s5524_s0 + $0x1c0] sm:$0xff]  ;;  %v72_v2 = vld [vmem:[%s5524_s0 + $0x1c8] sm:$0xff]  ;;  %v3196_v6 = vcombine.low %v48_v58, %v56_v59  ;;  %v4282_v45 = vld [vmem:[%s5523_s1 + $0x1b0] sm:$0xff]  }
  0x17   :  { %v3211_v7 = vcombine.high %v63_v63, %v71_v0  ;;  %v3213_v9 = vcombine.high %v64_v1, %v72_v2  ;;  %v79_v11 = vld [vmem:[%s5524_s0 + $0x200] sm:$0xff]  ;;  %v80_v16 = vld [vmem:[%s5524_s0 + $0x208] sm:$0xff]  ;;  %v3210_v18 = vcombine.low %v63_v63, %v71_v0  ;;  %v3212_v20 = vcombine.low %v64_v1, %v72_v2 }
  0x18   :  { %3578 = vmatpush3.bf16.msra.mxu0 %v4245_v22  ;;  %v87_v14 = vld [vmem:[%s5524_s0 + $0x240] sm:$0xff]  ;;  %v88_v17 = vld [vmem:[%s5524_s0 + $0x248] sm:$0xff] }
  0x19   :  { %3660 = vmatpush3.bf16.msra.mxu1 %v4246_v23  ;;  %3579 = vmatprep.subr.bf16.mxu0 %v4247_v24  ;;  %v4271_v19 = vld [vmem:[%s5523_s1 + $0x160] sm:$0xff]   ;;  %v3227_v21 = vcombine.high %v79_v11, %v87_v14  ;;  %v3229_v23 = vcombine.high %v80_v16, %v88_v17  ;;  %v4276_v32 = vld [vmem:[%s5523_s1 + $0x128] sm:$0xff]   ;;  %v3228_v33 = vcombine.low %v80_v16, %v88_v17 }
  0x1a   :  { %3661 = vmatprep.subr.bf16.mxu1 %v4248_v25  ;;  %v4272_v22 = vld [vmem:[%s5523_s1 + $0x120] sm:$0xff]   ;;  %v4278_v37 = vld [vmem:[%s5523_s1 + $0x1a8] sm:$0xff]  }
  0x1b   :  { %v4273_v24 = vld [vmem:[%s5523_s1 + $0x1e0] sm:$0xff]   ;;  %v128_v56 = vld [vmem:[%s5524_s0 + $0x388] sm:$0xff] }
  0x1c   :  { %3580 = vmatpush3.bf16.msra.mxu0 %v4249_v26  ;;  %v95_v25 = vld [vmem:[%s5524_s0 + $0x280] sm:$0xff]  ;;  %v136_v57 = vld [vmem:[%s5524_s0 + $0x3c8] sm:$0xff] }
  0x1d   :  { %3662 = vmatpush3.bf16.msra.mxu1 %v4250_v27  ;;  %3581 = vmatprep.subr.bf16.mxu0 %v4251_v28  ;;  %v103_v26 = vld [vmem:[%s5524_s0 + $0x2c0] sm:$0xff]  ;;  %v96_v28 = vld [vmem:[%s5524_s0 + $0x288] sm:$0xff] }
  0x1e   :  { %3663 = vmatprep.subr.bf16.mxu1 %v4252_v29  ;;  %v4274_v27 = vld [vmem:[%s5523_s1 + $0x1a0] sm:$0xff]   ;;  %v104_v29 = vld [vmem:[%s5524_s0 + $0x2c8] sm:$0xff]  ;;  %v3243_v34 = vcombine.high %v95_v25, %v103_v26 }
  0x1f   :  { %v3245_v36 = vcombine.high %v96_v28, %v104_v29  ;;  %v119_v39 = vld [vmem:[%s5524_s0 + $0x340] sm:$0xff]  ;;  %v3244_v47 = vcombine.low %v96_v28, %v104_v29  ;;  %v144_v2 = vld [vmem:[%s5524_s0 + $0x408] sm:$0xff] }
  0x20   :  { %3582 = vmatpush3.bf16.msra.mxu0 %v4253_v30  ;;  %v4275_v30 = vld [vmem:[%s5523_s1 + $0x168] sm:$0xff]   ;;  %v4291_v59 = vld [vmem:[%s5523_s1 + $0x240] sm:$0xff]  }
  0x21   :  { %3664 = vmatpush3.bf16.msra.mxu1 %v4254_v31  ;;  %3731 = vmatprep.subr.bf16.mxu0 %v4255_v40  ;;  %v3226_v31 = vcombine.low %v79_v11, %v87_v14  ;;  %v4279_v40 = vld [vmem:[%s5523_s1 + $0x170] sm:$0xff]   ;;  %v4293_v63 = vld [vmem:[%s5523_s1 + $0x2c0] sm:$0xff]   ;;  %v168_v11 = vld [vmem:[%s5524_s0 + $0x4c8] sm:$0xff] }
  0x22   :  { %3813 = vmatprep.subr.bf16.mxu1 %v4257_v42  ;;  %v120_v42 = vld [vmem:[%s5524_s0 + $0x348] sm:$0xff]  ;;  %v143_v0 = vld [vmem:[%s5524_s0 + $0x400] sm:$0xff] }
  0x23   :  { %2103 = vmatmul.mubr.bf16.vlgmr.msra.gmra.mrb[0].mxu0 %v3162_v35  ;;  %v4277_v35 = vld [vmem:[%s5523_s1 + $0x1e8] sm:$0xff]   ;;  %v151_v1 = vld [vmem:[%s5524_s0 + $0x440] sm:$0xff] }
  0x24   :  { %2223 = vmatmul.mubr.bf16.vlgmr.msra.gmra.mrb[0].mxu1 %v3164_v38  ;;  %3732 = vmatpush3.bf16.msra.mxu0 %v4256_v41  ;;  %v111_v38 = vld [vmem:[%s5524_s0 + $0x300] sm:$0xff]  ;;  %v112_v41 = vld [vmem:[%s5524_s0 + $0x308] sm:$0xff] }
  0x25   :  { %3814 = vmatpush3.bf16.msra.mxu1 %v4258_v43  ;;  %2110 = vmatprep.mubr.bf16.mxu0 %v3179_v46  ;;  %v4280_v43 = vld [vmem:[%s5523_s1 + $0x130] sm:$0xff]   ;;  %v3242_v46 = vcombine.low %v95_v25, %v103_v26  ;;  %v3259_v48 = vcombine.high %v111_v38, %v119_v39  ;;  %v3258_v58 = vcombine.low %v111_v38, %v119_v39  ;;  %v175_v16 = vld [vmem:[%s5524_s0 + $0x500] sm:$0x11]  ;;  %v176_v17 = vld [vmem:[%s5524_s0 + $0x508] sm:$0x11] }
  0x26   :  { %2230 = vmatprep.mubr.bf16.mxu1 %v3181_v49  ;;  %3733 = vmatprep.subr.bf16.mxu0 %v4259_v50  ;;  %v3261_v49 = vcombine.high %v112_v41, %v120_v42  ;;  %v4283_v50 = vld [vmem:[%s5523_s1 + $0x178] sm:$0xff]   ;;  %v3322_v26 = vcombine.low %v175_v16, %v175_v16  ;;  %v4295_v39 = vld [vmem:[%s5523_s1 + $0x248] sm:$0xff]  }
  0x27   :  { %3815 = vmatprep.subr.bf16.mxu1 %v4261_v54  ;;  %v127_v54 = vld [vmem:[%s5524_s0 + $0x380] sm:$0xff]  ;;  %v26_v25 = vld [vmem:[%s5524_s0 + $0x58] sm:$0xff] }
  0x28   :  { %3734 = vmatpush3.bf16.msra.mxu0 %v4260_v52  ;;  %v4287_v52 = vld [vmem:[%s5523_s1 + $0x1f8] sm:$0xff]  }
  0x29   :  { %3816 = vmatpush3.bf16.msra.mxu1 %v4262_v55  ;;  %3735 = vmatprep.subr.bf16.mxu0 %v4263_v62  ;;  %v135_v55 = vld [vmem:[%s5524_s0 + $0x3c0] sm:$0xff]  ;;  %v3277_v62 = vcombine.high %v128_v56, %v136_v57 }
  0x2a   :  { %3817 = vmatprep.subr.bf16.mxu1 %v4265_v5  ;;  %v3276_v5 = vcombine.low %v128_v56, %v136_v57  ;;  %v4303_v56 = vld [vmem:[%s5523_s1 + $0x258] sm:$0xff]   ;;  %v65_v57 = vld [vmem:[%s5524_s0 + $0x190] sm:$0xff] }
  0x2b   :  { %2111 = vmatmul.mubr.bf16.gmra.mrb[4].mxu0 %v3178_v51  ;;  %v4284_v51 = vld [vmem:[%s5523_s1 + $0x138] sm:$0xff]  }
  0x2c   :  { %2231 = vmatmul.mubr.bf16.gmra.mrb[4].mxu1 %v3180_v53  ;;  %2118 = vmatprep.mubr.bf16.mxu0 %v3195_v60  ;;  %v4290_v53 = vld [vmem:[%s5523_s1 + $0x1b8] sm:$0xff]   ;;  %v3260_v60 = vcombine.low %v112_v41, %v120_v42  ;;  %v4296_v41 = vld [vmem:[%s5523_s1 + $0x208] sm:$0xff]  }
  0x2d   :  { %2238 = vmatprep.mubr.bf16.mxu1 %v3197_v61  ;;  %3736 = vmatpush3.bf16.msra.mxu0 %v4264_v3  ;;  %v3275_v61 = vcombine.high %v127_v54, %v135_v55  ;;  %v152_v3 = vld [vmem:[%s5524_s0 + $0x448] sm:$0xff] }
  0x2e   :  { %3818 = vmatpush3.bf16.msra.mxu1 %v4266_v8  ;;  %3737 = vmatprep.subr.bf16.mxu0 %v4267_v10  ;;  %v159_v8 = vld [vmem:[%s5524_s0 + $0x480] sm:$0xff]  ;;  %v160_v10 = vld [vmem:[%s5524_s0 + $0x488] sm:$0xff] }
  0x2f   :  { %3819 = vmatprep.subr.bf16.mxu1 %v4269_v13  ;;  %v3292_v13 = vcombine.low %v144_v2, %v152_v3  ;;  %v4297_v42 = vld [vmem:[%s5523_s1 + $0x2c8] sm:$0xff]  }
  0x31   :  { %3738 = vmatpush3.bf16.msra.mxu0 %v4268_v12  ;;  %v3290_v12 = vcombine.low %v143_v0, %v151_v1 }
  0x32   :  { %3820 = vmatpush3.bf16.msra.mxu1 %v4270_v15  ;;  %3739 = vmatprep.subr.bf16.mxu0 %v4271_v19  ;;  %v3309_v15 = vcombine.high %v160_v10, %v168_v11  ;;  %v3308_v19 = vcombine.low %v160_v10, %v168_v11  ;;  %v4313_v10 = vld [vmem:[%s5523_s1 + $0x2e8] sm:$0xff]   ;;  %v89_v11 = vld [vmem:[%s5524_s0 + $0x250] sm:$0xff] }
  0x33   :  { %2119 = vmatmul.mubr.bf16.gmra.mrb[8].mxu0 %v3194_v4  ;;  %3821 = vmatprep.subr.bf16.mxu1 %v4273_v24  ;;  %v3274_v4 = vcombine.low %v127_v54, %v135_v55  ;;  %v18_v24 = vld [vmem:[%s5524_s0 + $0x18] sm:$0xff]  ;;  %v4300_v54 = vld [vmem:[%s5523_s1 + $0x210] sm:$0xff]  }
  0x34   :  { %2239 = vmatmul.mubr.bf16.gmra.mrb[8].mxu1 %v3196_v6  ;;  %2126 = vmatprep.mubr.bf16.mxu0 %v3211_v7  ;;  %v3291_v6 = vcombine.high %v143_v0, %v151_v1  ;;  %v3293_v7 = vcombine.high %v144_v2, %v152_v3  ;;  %v3169_v29 = vcombine.high %v18_v24, %v26_v25  ;;  %v4302_v55 = vld [vmem:[%s5523_s1 + $0x290] sm:$0xff]   ;;  %v4307_v0 = vld [vmem:[%s5523_s1 + $0x260] sm:$0xff]  }
  0x35   :  { %2246 = vmatprep.mubr.bf16.mxu1 %v3213_v9  ;;  %3740 = vmatpush3.bf16.msra.mxu0 %v4272_v22  ;;  %v167_v9 = vld [vmem:[%s5524_s0 + $0x4c0] sm:$0xff]  ;;  %v17_v22 = vld [vmem:[%s5524_s0 + $0x10] sm:$0xff] }
  0x36   :  { %3822 = vmatpush3.bf16.msra.mxu1 %v4274_v27  ;;  %3741 = vmatprep.subr.bf16.mxu0 %v4275_v30  ;;  %v3307_v14 = vcombine.high %v159_v8, %v167_v9  ;;  %v3324_v27 = vcombine.low %v176_v17, %v176_v17  ;;  %v33_v30 = vld [vmem:[%s5524_s0 + $0x90] sm:$0xff]  ;;  %v4309_v2 = vld [vmem:[%s5523_s1 + $0x2e0] sm:$0xff]  }
  0x37   :  { %3823 = vmatprep.subr.bf16.mxu1 %v4277_v35  ;;  %v3168_v35 = vcombine.low %v18_v24, %v26_v25  ;;  %v4319_v24 = vld [vmem:[%s5523_s1 + $0x278] sm:$0xff]   ;;  %v97_v25 = vld [vmem:[%s5524_s0 + $0x290] sm:$0xff] }
  0x39   :  { %3742 = vmatpush3.bf16.msra.mxu0 %v4276_v32  ;;  %v34_v32 = vld [vmem:[%s5524_s0 + $0x98] sm:$0xff] }
  0x3a   :  { %3824 = vmatpush3.bf16.msra.mxu1 %v4278_v37  ;;  %3743 = vmatprep.subr.bf16.mxu0 %v4279_v40  ;;  %v4294_v37 = vld [vmem:[%s5523_s1 + $0x280] sm:$0xff]  }
  0x3b   :  { %2127 = vmatmul.mubr.bf16.gmra.mrb[12].mxu0 %v3210_v18  ;;  %3825 = vmatprep.subr.bf16.mxu1 %v4281_v44  ;;  %v3306_v18 = vcombine.low %v159_v8, %v167_v9  ;;  %v49_v44 = vld [vmem:[%s5524_s0 + $0x110] sm:$0xff]  ;;  %v4311_v8 = vld [vmem:[%s5523_s1 + $0x268] sm:$0xff]  }
  0x3c   :  { %2247 = vmatmul.mubr.bf16.gmra.mrb[12].mxu1 %v3212_v20  ;;  %2134 = vmatprep.mubr.bf16.mxu0 %v3227_v21  ;;  %v3323_v20 = vcombine.high %v175_v16, %v175_v16  ;;  %v3325_v21 = vcombine.high %v176_v17, %v176_v17  ;;  %v81_v9 = vld [vmem:[%s5524_s0 + $0x210] sm:$0xff] }
  0x3d   :  { %2254 = vmatprep.mubr.bf16.mxu1 %v3229_v23  ;;  %3744 = vmatpush3.bf16.msra.mxu0 %v4280_v43  ;;  %v25_v23 = vld [vmem:[%s5524_s0 + $0x50] sm:$0xff]  ;;  %v4298_v43 = vld [vmem:[%s5523_s1 + $0x288] sm:$0xff]  }
  0x3e   :  { %3826 = vmatpush3.bf16.msra.mxu1 %v4282_v45  ;;  %3745 = vmatprep.subr.bf16.mxu0 %v4283_v50  ;;  %v3167_v28 = vcombine.high %v17_v22, %v25_v23  ;;  %v57_v45 = vld [vmem:[%s5524_s0 + $0x150] sm:$0xff] }
  0x3f   :  { %3827 = vmatprep.subr.bf16.mxu1 %v4287_v52  ;;  %v3199_v52 = vcombine.high %v49_v44, %v57_v45  ;;  %v3198_v1 = vcombine.low %v49_v44, %v57_v45  ;;  %v4315_v16 = vld [vmem:[%s5523_s1 + $0x270] sm:$0xff]  }
  0x41   :  { %3746 = vmatpush3.bf16.msra.mxu0 %v4284_v51 }
  0x42   :  { %3828 = vmatpush3.bf16.msra.mxu1 %v4290_v53  ;;  %3895 = vmatprep.subr.bf16.mxu0 %v4291_v59  ;;  %v73_v59 = vld [vmem:[%s5524_s0 + $0x1d0] sm:$0xff] }
  0x43   :  { %2135 = vmatmul.mubr.bf16.gmra.mrb[16].mxu0 %v3226_v31  ;;  %3977 = vmatprep.subr.bf16.mxu1 %v4293_v63  ;;  %v41_v31 = vld [vmem:[%s5524_s0 + $0xd0] sm:$0xff]  ;;  %v4306_v63 = vld [vmem:[%s5523_s1 + $0x298] sm:$0xff]   ;;  %v3214_v17 = vcombine.low %v65_v57, %v73_v59 }
  0x44   :  { %2255 = vmatmul.mubr.bf16.gmra.mrb[16].mxu1 %v3228_v33  ;;  %2142 = vmatprep.mubr.bf16.mxu0 %v3243_v34  ;;  %v3166_v33 = vcombine.low %v17_v22, %v25_v23  ;;  %v42_v34 = vld [vmem:[%s5524_s0 + $0xd8] sm:$0xff]  ;;  %v3183_v38 = vcombine.high %v33_v30, %v41_v31  ;;  %v3182_v50 = vcombine.low %v33_v30, %v41_v31  ;;  %v4316_v22 = vld [vmem:[%s5523_s1 + $0x230] sm:$0xff]  }
  0x45   :  { %2262 = vmatprep.mubr.bf16.mxu1 %v3245_v36  ;;  %v4292_v36 = vld [vmem:[%s5523_s1 + $0x200] sm:$0xff]   ;;  %v3185_v40 = vcombine.high %v34_v32, %v42_v34  ;;  %v3184_v51 = vcombine.low %v34_v32, %v42_v34  ;;  %v4318_v23 = vld [vmem:[%s5523_s1 + $0x2b0] sm:$0xff]   ;;  %v106_v30 = vld [vmem:[%s5524_s0 + $0x2d8] sm:$0xff] }
  0x46   :  { %v4326_v31 = vld [vmem:[%s5523_s1 + $0x2b8] sm:$0xff]   ;;  %v4327_v32 = vld [vmem:[%s5523_s1 + $0x340] sm:$0xff]  }
  0x47   :  { %v4329_v34 = vld [vmem:[%s5523_s1 + $0x3c0] sm:$0xff]  }
  0x4b   :  { %2143 = vmatmul.mubr.bf16.gmra.mrb[20].mxu0 %v3242_v46  ;;  %v50_v46 = vld [vmem:[%s5524_s0 + $0x118] sm:$0xff] }
  0x4c   :  { %2263 = vmatmul.mubr.bf16.gmra.mrb[20].mxu1 %v3244_v47  ;;  %2150 = vmatprep.mubr.bf16.mxu0 %v3259_v48  ;;  %v58_v47 = vld [vmem:[%s5524_s0 + $0x158] sm:$0xff]  ;;  %v4299_v48 = vld [vmem:[%s5523_s1 + $0x250] sm:$0xff]  }
  0x4d   :  { %2270 = vmatprep.mubr.bf16.mxu1 %v3261_v49  ;;  %v4301_v49 = vld [vmem:[%s5523_s1 + $0x2d0] sm:$0xff]   ;;  %v3201_v53 = vcombine.high %v50_v46, %v58_v47  ;;  %v3200_v3 = vcombine.low %v50_v46, %v58_v47 }
  0x4e   :  { %v129_v46 = vld [vmem:[%s5524_s0 + $0x390] sm:$0xff] }
  0x4f   :  { %v137_v47 = vld [vmem:[%s5524_s0 + $0x3d0] sm:$0xff] }
  0x53   :  { %2151 = vmatmul.mubr.bf16.gmra.mrb[24].mxu0 %v3258_v58  ;;  %v4305_v58 = vld [vmem:[%s5523_s1 + $0x2d8] sm:$0xff]  }
  0x54   :  { %2271 = vmatmul.mubr.bf16.gmra.mrb[24].mxu1 %v3260_v60  ;;  %2158 = vmatprep.mubr.bf16.mxu0 %v3275_v61  ;;  %v66_v60 = vld [vmem:[%s5524_s0 + $0x198] sm:$0xff] }
  0x55   :  { %2278 = vmatprep.mubr.bf16.mxu1 %v3277_v62  ;;  %v4304_v61 = vld [vmem:[%s5523_s1 + $0x218] sm:$0xff]  }
  0x56   :  { %v74_v62 = vld [vmem:[%s5524_s0 + $0x1d8] sm:$0xff] }
  0x5b   :  { %2159 = vmatmul.mubr.bf16.gmra.mrb[28].mxu0 %v3274_v4  ;;  %v3215_v4 = vcombine.high %v65_v57, %v73_v59  ;;  %v154_v57 = vld [vmem:[%s5524_s0 + $0x458] sm:$0xff] }
  0x5c   :  { %2279 = vmatmul.mubr.bf16.gmra.mrb[28].mxu1 %v3276_v5  ;;  %2166 = vmatprep.mubr.bf16.mxu0 %v3291_v6  ;;  %v4308_v5 = vld [vmem:[%s5523_s1 + $0x220] sm:$0xff]   ;;  %v3217_v6 = vcombine.high %v66_v60, %v74_v62 }
  0x5d   :  { %2286 = vmatprep.mubr.bf16.mxu1 %v3293_v7  ;;  %v4310_v7 = vld [vmem:[%s5523_s1 + $0x2a0] sm:$0xff]  }
  0x63   :  { %2167 = vmatmul.mubr.bf16.gmra.mrb[32].mxu0 %v3290_v12  ;;  %v82_v12 = vld [vmem:[%s5524_s0 + $0x218] sm:$0xff] }
  0x64   :  { %2287 = vmatmul.mubr.bf16.gmra.mrb[32].mxu1 %v3292_v13  ;;  %2174 = vmatprep.mubr.bf16.mxu0 %v3307_v14  ;;  %v90_v13 = vld [vmem:[%s5524_s0 + $0x258] sm:$0xff]  ;;  %v4312_v14 = vld [vmem:[%s5523_s1 + $0x228] sm:$0xff]  }
  0x65   :  { %2294 = vmatprep.mubr.bf16.mxu1 %v3309_v15  ;;  %v4314_v15 = vld [vmem:[%s5523_s1 + $0x2a8] sm:$0xff]  }
  0x6b   :  { %2175 = vmatmul.mubr.bf16.gmra.mrb[36].mxu0 %v3306_v18  ;;  %v4317_v18 = vld [vmem:[%s5523_s1 + $0x2f0] sm:$0xff]  }
  0x6c   :  { %2295 = vmatmul.mubr.bf16.gmra.mrb[36].mxu1 %v3308_v19  ;;  %2182 = vmatprep.mubr.bf16.mxu0 %v3323_v20  ;;  %v3216_v19 = vcombine.low %v66_v60, %v74_v62  ;;  %v3231_v20 = vcombine.high %v81_v9, %v89_v11  ;;  %v161_v62 = vld [vmem:[%s5524_s0 + $0x490] sm:$0xff] }
  0x6d   :  { %2302 = vmatprep.mubr.bf16.mxu1 %v3325_v21  ;;  %v3233_v21 = vcombine.high %v82_v12, %v90_v13 }
  0x73   :  { %2183 = vmatmul.mubr.bf16.gmra.mrb[40].mxu0 %v3322_v26  ;;  %v105_v26 = vld [vmem:[%s5524_s0 + $0x2d0] sm:$0xff] }
  0x74   :  { %2303 = vmatmul.mubr.bf16.gmra.mrb[40].mxu1 %v3324_v27  ;;  %2342 = vmatprep.mubr.bf16.mxu0 %v3167_v28  ;;  %v4323_v27 = vld [vmem:[%s5523_s1 + $0x2f8] sm:$0xff]  }
  0x75   :  { %2462 = vmatprep.mubr.bf16.mxu1 %v3169_v29  ;;  %v98_v28 = vld [vmem:[%s5524_s0 + $0x298] sm:$0xff] }
  0x76   :  { %v4320_v29 = vld [vmem:[%s5523_s1 + $0x238] sm:$0xff]  }
  0x7b   :  { %2343 = vmatmul.mubr.bf16.vlgmr.msra.gmra.mrb[44].mxu0 %v3166_v33  ;;  %v3230_v33 = vcombine.low %v81_v9, %v89_v11 }
  0x7c   :  { %2463 = vmatmul.mubr.bf16.vlgmr.msra.gmra.mrb[44].mxu1 %v3168_v35  ;;  %3896 = vmatpush3.bf16.msra.mxu0 %v4292_v36  ;;  %v3232_v35 = vcombine.low %v82_v12, %v90_v13  ;;  %v3247_v36 = vcombine.high %v97_v25, %v105_v26  ;;  %v19_v12 = vld [vmem:[%s5524_s0 + $0x20] sm:$0xff] }
  0x7d   :  { %3978 = vmatpush3.bf16.msra.mxu1 %v4294_v37  ;;  %2350 = vmatprep.mubr.bf16.mxu0 %v3183_v38  ;;  %v3249_v37 = vcombine.high %v98_v28, %v106_v30  ;;  %v113_v38 = vld [vmem:[%s5524_s0 + $0x310] sm:$0xff]  ;;  %v27_v13 = vld [vmem:[%s5524_s0 + $0x60] sm:$0xff] }
  0x7e   :  { %2470 = vmatprep.mubr.bf16.mxu1 %v3185_v40  ;;  %3897 = vmatprep.subr.bf16.mxu0 %v4295_v39  ;;  %v121_v39 = vld [vmem:[%s5524_s0 + $0x350] sm:$0xff]  ;;  %v114_v40 = vld [vmem:[%s5524_s0 + $0x318] sm:$0xff] }
  0x7f   :  { %3979 = vmatprep.subr.bf16.mxu1 %v4297_v42  ;;  %v3246_v42 = vcombine.low %v97_v25, %v105_v26  ;;  %v3263_v44 = vcombine.high %v113_v38, %v121_v39  ;;  %v4328_v26 = vld [vmem:[%s5523_s1 + $0x300] sm:$0xff]  }
  0x80   :  { %3898 = vmatpush3.bf16.msra.mxu0 %v4296_v41  ;;  %v122_v41 = vld [vmem:[%s5524_s0 + $0x358] sm:$0xff] }
  0x81   :  { %3980 = vmatpush3.bf16.msra.mxu1 %v4298_v43  ;;  %3899 = vmatprep.subr.bf16.mxu0 %v4299_v48  ;;  %v3248_v43 = vcombine.low %v98_v28, %v106_v30  ;;  %v3265_v45 = vcombine.high %v114_v40, %v122_v41  ;;  %v130_v48 = vld [vmem:[%s5524_s0 + $0x398] sm:$0xff]  ;;  %v4331_v30 = vld [vmem:[%s5523_s1 + $0x348] sm:$0xff]  }
  0x82   :  { %3981 = vmatprep.subr.bf16.mxu1 %v4301_v49  ;;  %v138_v49 = vld [vmem:[%s5524_s0 + $0x3d8] sm:$0xff] }
  0x83   :  { %2351 = vmatmul.mubr.bf16.gmra.mrb[48].mxu0 %v3182_v50  ;;  %v3262_v50 = vcombine.low %v113_v38, %v121_v39  ;;  %v3280_v59 = vcombine.low %v130_v48, %v138_v49  ;;  %v60_v38 = vld [vmem:[%s5524_s0 + $0x168] sm:$0xff]  ;;  %v4337_v39 = vld [vmem:[%s5523_s1 + $0x3d0] sm:$0xff]  }
  0x84   :  { %2471 = vmatmul.mubr.bf16.gmra.mrb[48].mxu1 %v3184_v51  ;;  %2358 = vmatprep.mubr.bf16.mxu0 %v3199_v52  ;;  %v3264_v51 = vcombine.low %v114_v40, %v122_v41  ;;  %v3279_v52 = vcombine.high %v129_v46, %v137_v47 }
  0x85   :  { %2478 = vmatprep.mubr.bf16.mxu1 %v3201_v53  ;;  %3900 = vmatpush3.bf16.msra.mxu0 %v4300_v54  ;;  %v3281_v53 = vcombine.high %v130_v48, %v138_v49  ;;  %v145_v54 = vld [vmem:[%s5524_s0 + $0x410] sm:$0xff]  ;;  %v67_v48 = vld [vmem:[%s5524_s0 + $0x1a0] sm:$0xff] }
  0x86   :  { %3982 = vmatpush3.bf16.msra.mxu1 %v4302_v55  ;;  %3901 = vmatprep.subr.bf16.mxu0 %v4303_v56  ;;  %v153_v55 = vld [vmem:[%s5524_s0 + $0x450] sm:$0xff]  ;;  %v146_v56 = vld [vmem:[%s5524_s0 + $0x418] sm:$0xff]  ;;  %v75_v49 = vld [vmem:[%s5524_s0 + $0x1e0] sm:$0xff] }
  0x87   :  { %3983 = vmatprep.subr.bf16.mxu1 %v4305_v58  ;;  %v3278_v58 = vcombine.low %v129_v46, %v137_v47  ;;  %v3295_v60 = vcombine.high %v145_v54, %v153_v55  ;;  %v4339_v46 = vld [vmem:[%s5523_s1 + $0x358] sm:$0xff]  }
  0x88   :  { %v4341_v47 = vld [vmem:[%s5523_s1 + $0x3d8] sm:$0xff]  }
  0x89   :  { %3902 = vmatpush3.bf16.msra.mxu0 %v4304_v61  ;;  %v3297_v61 = vcombine.high %v146_v56, %v154_v57 }
  0x8a   :  { %3984 = vmatpush3.bf16.msra.mxu1 %v4306_v63  ;;  %3903 = vmatprep.subr.bf16.mxu0 %v4307_v0  ;;  %v169_v63 = vld [vmem:[%s5524_s0 + $0x4d0] sm:$0xff]  ;;  %v162_v0 = vld [vmem:[%s5524_s0 + $0x498] sm:$0xff] }
  0x8b   :  { %2359 = vmatmul.mubr.bf16.gmra.mrb[52].mxu0 %v3198_v1  ;;  %3985 = vmatprep.subr.bf16.mxu1 %v4309_v2  ;;  %v170_v1 = vld [vmem:[%s5524_s0 + $0x4d8] sm:$0xff]  ;;  %v3294_v2 = vcombine.low %v145_v54, %v153_v55  ;;  %v4343_v54 = vld [vmem:[%s5523_s1 + $0x360] sm:$0xff]  }
  0x8c   :  { %2479 = vmatmul.mubr.bf16.gmra.mrb[52].mxu1 %v3200_v3  ;;  %2366 = vmatprep.mubr.bf16.mxu0 %v3215_v4  ;;  %v3296_v3 = vcombine.low %v146_v56, %v154_v57  ;;  %v3311_v4 = vcombine.high %v161_v62, %v169_v63  ;;  %v3312_v9 = vcombine.low %v162_v0, %v170_v1  ;;  %v4345_v56 = vld [vmem:[%s5523_s1 + $0x3e0] sm:$0xff]  }
  0x8d   :  { %2486 = vmatprep.mubr.bf16.mxu1 %v3217_v6  ;;  %3904 = vmatpush3.bf16.msra.mxu0 %v4308_v5  ;;  %v3313_v5 = vcombine.high %v162_v0, %v170_v1  ;;  %v177_v6 = vld [vmem:[%s5524_s0 + $0x510] sm:$0x11]  ;;  %v83_v0 = vld [vmem:[%s5524_s0 + $0x220] sm:$0xff] }
  0x8e   :  { %3986 = vmatpush3.bf16.msra.mxu1 %v4310_v7  ;;  %3905 = vmatprep.subr.bf16.mxu0 %v4311_v8  ;;  %v178_v7 = vld [vmem:[%s5524_s0 + $0x518] sm:$0x11]  ;;  %v3310_v8 = vcombine.low %v161_v62, %v169_v63  ;;  %v4347_v62 = vld [vmem:[%s5523_s1 + $0x368] sm:$0xff]   ;;  %v91_v1 = vld [vmem:[%s5524_s0 + $0x260] sm:$0xff] }
  0x8f   :  { %3987 = vmatprep.subr.bf16.mxu1 %v4313_v10  ;;  %v3327_v10 = vcombine.high %v177_v6, %v177_v6  ;;  %v3329_v11 = vcombine.high %v178_v7, %v178_v7  ;;  %v4349_v63 = vld [vmem:[%s5523_s1 + $0x3e8] sm:$0xff]  }
  0x91   :  { %3906 = vmatpush3.bf16.msra.mxu0 %v4312_v14  ;;  %v20_v14 = vld [vmem:[%s5524_s0 + $0x28] sm:$0xff] }
  0x92   :  { %3988 = vmatpush3.bf16.msra.mxu1 %v4314_v15  ;;  %3907 = vmatprep.subr.bf16.mxu0 %v4315_v16  ;;  %v28_v15 = vld [vmem:[%s5524_s0 + $0x68] sm:$0xff]  ;;  %v3326_v16 = vcombine.low %v177_v6, %v177_v6  ;;  %v4351_v6 = vld [vmem:[%s5523_s1 + $0x370] sm:$0xff]  }
  0x93   :  { %2367 = vmatmul.mubr.bf16.gmra.mrb[56].mxu0 %v3214_v17  ;;  %3989 = vmatprep.subr.bf16.mxu1 %v4317_v18  ;;  %v3328_v17 = vcombine.low %v178_v7, %v178_v7  ;;  %v3171_v18 = vcombine.high %v19_v12, %v27_v13  ;;  %v3172_v25 = vcombine.low %v20_v14, %v28_v15 }
  0x94   :  { %2487 = vmatmul.mubr.bf16.gmra.mrb[56].mxu1 %v3216_v19  ;;  %2374 = vmatprep.mubr.bf16.mxu0 %v3231_v20  ;;  %v3173_v19 = vcombine.high %v20_v14, %v28_v15  ;;  %v35_v20 = vld [vmem:[%s5524_s0 + $0xa0] sm:$0xff]  ;;  %v3218_v7 = vcombine.low %v67_v48, %v75_v49  ;;  %v4355_v14 = vld [vmem:[%s5523_s1 + $0x378] sm:$0xff]  }
  0x95   :  { %2494 = vmatprep.mubr.bf16.mxu1 %v3233_v21  ;;  %3908 = vmatpush3.bf16.msra.mxu0 %v4316_v22  ;;  %v43_v21 = vld [vmem:[%s5524_s0 + $0xe0] sm:$0xff]  ;;  %v3170_v22 = vcombine.low %v19_v12, %v27_v13  ;;  %v4352_v12 = vld [vmem:[%s5523_s1 + $0x330] sm:$0xff]   ;;  %v4359_v15 = vld [vmem:[%s5523_s1 + $0x3f8] sm:$0xff]  }
  0x96   :  { %3990 = vmatpush3.bf16.msra.mxu1 %v4318_v23  ;;  %3909 = vmatprep.subr.bf16.mxu0 %v4319_v24  ;;  %v36_v23 = vld [vmem:[%s5524_s0 + $0xa8] sm:$0xff]  ;;  %v3187_v28 = vcombine.high %v35_v20, %v43_v21  ;;  %v3186_v40 = vcombine.low %v35_v20, %v43_v21  ;;  %v4354_v13 = vld [vmem:[%s5523_s1 + $0x3b0] sm:$0xff]   ;;  %v4362_v21 = vld [vmem:[%s5523_s1 + $0x3b8] sm:$0xff]  }
  0x97   :  { %3991 = vmatprep.subr.bf16.mxu1 %v4323_v27  ;;  %v44_v24 = vld [vmem:[%s5524_s0 + $0xe8] sm:$0xff]  ;;  %v4330_v27 = vld [vmem:[%s5523_s1 + $0x380] sm:$0xff]  }
  0x98   :  { %v3188_v41 = vcombine.low %v36_v23, %v44_v24  ;;  %v108_v20 = vld [vmem:[%s5524_s0 + $0x2e8] sm:$0xff] }
  0x99   :  { %3910 = vmatpush3.bf16.msra.mxu0 %v4320_v29  ;;  %v3189_v29 = vcombine.high %v36_v23, %v44_v24 }
  0x9a   :  { %3992 = vmatpush3.bf16.msra.mxu1 %v4326_v31  ;;  %4059 = vmatprep.subr.bf16.mxu0 %v4327_v32  ;;  %v4333_v31 = vld [vmem:[%s5523_s1 + $0x3c8] sm:$0xff]  }
  0x9b   :  { %2375 = vmatmul.mubr.bf16.gmra.mrb[60].mxu0 %v3230_v33  ;;  %4141 = vmatprep.subr.bf16.mxu1 %v4329_v34  ;;  %v4332_v32 = vld [vmem:[%s5523_s1 + $0x308] sm:$0xff]   ;;  %v51_v34 = vld [vmem:[%s5524_s0 + $0x120] sm:$0xff] }
  0x9c   :  { %2495 = vmatmul.mubr.bf16.gmra.mrb[60].mxu1 %v3232_v35  ;;  %2382 = vmatprep.mubr.bf16.mxu0 %v3247_v36  ;;  %v4334_v33 = vld [vmem:[%s5523_s1 + $0x388] sm:$0xff]   ;;  %v59_v35 = vld [vmem:[%s5524_s0 + $0x160] sm:$0xff]  ;;  %v4335_v36 = vld [vmem:[%s5523_s1 + $0x350] sm:$0xff]  }
  0x9d   :  { %2502 = vmatprep.mubr.bf16.mxu1 %v3249_v37  ;;  %v52_v37 = vld [vmem:[%s5524_s0 + $0x128] sm:$0xff]  ;;  %v3202_v55 = vcombine.low %v51_v34, %v59_v35 }
  0x9e   :  { %v3204_v57 = vcombine.low %v52_v37, %v60_v38 }
  0xa3   :  { %2383 = vmatmul.mubr.bf16.gmra.mrb[64].mxu0 %v3246_v42  ;;  %v3203_v42 = vcombine.high %v51_v34, %v59_v35 }
  0xa4   :  { %2503 = vmatmul.mubr.bf16.gmra.mrb[64].mxu1 %v3248_v43  ;;  %2390 = vmatprep.mubr.bf16.mxu0 %v3263_v44  ;;  %v3205_v43 = vcombine.high %v52_v37, %v60_v38  ;;  %v4336_v44 = vld [vmem:[%s5523_s1 + $0x310] sm:$0xff]  }
  0xa5   :  { %2510 = vmatprep.mubr.bf16.mxu1 %v3265_v45  ;;  %v4338_v45 = vld [vmem:[%s5523_s1 + $0x390] sm:$0xff]  }
  0xab   :  { %2391 = vmatmul.mubr.bf16.gmra.mrb[68].mxu0 %v3262_v50  ;;  %v68_v50 = vld [vmem:[%s5524_s0 + $0x1a8] sm:$0xff] }
  0xac   :  { %2511 = vmatmul.mubr.bf16.gmra.mrb[68].mxu1 %v3264_v51  ;;  %2398 = vmatprep.mubr.bf16.mxu0 %v3279_v52  ;;  %v4340_v51 = vld [vmem:[%s5523_s1 + $0x318] sm:$0xff]   ;;  %v76_v52 = vld [vmem:[%s5524_s0 + $0x1e8] sm:$0xff] }
  0xad   :  { %2518 = vmatprep.mubr.bf16.mxu1 %v3281_v53  ;;  %v4342_v53 = vld [vmem:[%s5523_s1 + $0x398] sm:$0xff]  }
  0xb3   :  { %2399 = vmatmul.mubr.bf16.gmra.mrb[72].mxu0 %v3278_v58  ;;  %v3219_v58 = vcombine.high %v67_v48, %v75_v49 }
  0xb4   :  { %2519 = vmatmul.mubr.bf16.gmra.mrb[72].mxu1 %v3280_v59  ;;  %2406 = vmatprep.mubr.bf16.mxu0 %v3295_v60  ;;  %v3221_v59 = vcombine.high %v68_v50, %v76_v52  ;;  %v4344_v60 = vld [vmem:[%s5523_s1 + $0x320] sm:$0xff]  }
  0xb5   :  { %2526 = vmatprep.mubr.bf16.mxu1 %v3297_v61  ;;  %v4346_v61 = vld [vmem:[%s5523_s1 + $0x3a0] sm:$0xff]  }
  0xbb   :  { %2407 = vmatmul.mubr.bf16.gmra.mrb[76].mxu0 %v3294_v2  ;;  %v84_v2 = vld [vmem:[%s5524_s0 + $0x228] sm:$0xff] }
  0xbc   :  { %2527 = vmatmul.mubr.bf16.gmra.mrb[76].mxu1 %v3296_v3  ;;  %2414 = vmatprep.mubr.bf16.mxu0 %v3311_v4  ;;  %v4348_v3 = vld [vmem:[%s5523_s1 + $0x328] sm:$0xff]  }
  0xbd   :  { %2534 = vmatprep.mubr.bf16.mxu1 %v3313_v5  ;;  %v92_v4 = vld [vmem:[%s5524_s0 + $0x268] sm:$0xff] }
  0xbe   :  { %v4350_v5 = vld [vmem:[%s5523_s1 + $0x3a8] sm:$0xff]   ;;  %v3236_v23 = vcombine.low %v84_v2, %v92_v4 }
  0xc3   :  { %2415 = vmatmul.mubr.bf16.gmra.mrb[80].mxu0 %v3310_v8  ;;  %v4353_v8 = vld [vmem:[%s5523_s1 + $0x3f0] sm:$0xff]  }
  0xc4   :  { %2535 = vmatmul.mubr.bf16.gmra.mrb[80].mxu1 %v3312_v9  ;;  %2422 = vmatprep.mubr.bf16.mxu0 %v3327_v10  ;;  %v3220_v9 = vcombine.low %v68_v50, %v76_v52  ;;  %v3235_v10 = vcombine.high %v83_v0, %v91_v1  ;;  %v131_v50 = vld [vmem:[%s5524_s0 + $0x3a0] sm:$0xff] }
  0xc5   :  { %2542 = vmatprep.mubr.bf16.mxu1 %v3329_v11  ;;  %v3237_v11 = vcombine.high %v84_v2, %v92_v4 }
  0xcb   :  { %2423 = vmatmul.mubr.bf16.gmra.mrb[84].mxu0 %v3326_v16  ;;  %v99_v16 = vld [vmem:[%s5524_s0 + $0x2a0] sm:$0xff] }
  0xcc   :  { %2543 = vmatmul.mubr.bf16.gmra.mrb[84].mxu1 %v3328_v17  ;;  %2582 = vmatprep.mubr.bf16.mxu0 %v3171_v18  ;;  %v107_v17 = vld [vmem:[%s5524_s0 + $0x2e0] sm:$0xff]  ;;  %v4356_v18 = vld [vmem:[%s5523_s1 + $0x338] sm:$0xff]  }
  0xcd   :  { %2702 = vmatprep.mubr.bf16.mxu1 %v3173_v19  ;;  %v100_v19 = vld [vmem:[%s5524_s0 + $0x2a8] sm:$0xff]  ;;  %v3251_v24 = vcombine.high %v99_v16, %v107_v17  ;;  %v3250_v34 = vcombine.low %v99_v16, %v107_v17 }
  0xce   :  { %v3252_v38 = vcombine.low %v100_v19, %v108_v20 }
  0xd3   :  { %2583 = vmatmul.mubr.bf16.vlgmr.msra.gmra.mrb[88].mxu0 %v3170_v22  ;;  %v3234_v22 = vcombine.low %v83_v0, %v91_v1 }
  0xd4   :  { %2703 = vmatmul.mubr.bf16.vlgmr.msra.gmra.mrb[88].mxu1 %v3172_v25  ;;  %4060 = vmatpush3.bf16.msra.mxu0 %v4328_v26  ;;  %v3253_v25 = vcombine.high %v100_v19, %v108_v20  ;;  %v115_v26 = vld [vmem:[%s5524_s0 + $0x320] sm:$0xff] }
  0xd5   :  { %4142 = vmatpush3.bf16.msra.mxu1 %v4330_v27  ;;  %2590 = vmatprep.mubr.bf16.mxu0 %v3187_v28  ;;  %v123_v27 = vld [vmem:[%s5524_s0 + $0x360] sm:$0xff] }
  0xd6   :  { %2710 = vmatprep.mubr.bf16.mxu1 %v3189_v29  ;;  %4061 = vmatprep.subr.bf16.mxu0 %v4331_v30  ;;  %v116_v29 = vld [vmem:[%s5524_s0 + $0x328] sm:$0xff] }
  0xd7   :  { %4143 = vmatprep.subr.bf16.mxu1 %v4333_v31  ;;  %v124_v30 = vld [vmem:[%s5524_s0 + $0x368] sm:$0xff] }
  0xd8   :  { %4062 = vmatpush3.bf16.msra.mxu0 %v4332_v32  ;;  %v5110_v32 = vld [vmem:[%s5525_s2] ss:$0 sm:$0xff] }
  0xd9   :  { %4144 = vmatpush3.bf16.msra.mxu1 %v4334_v33  ;;  %4063 = vmatprep.subr.bf16.mxu0 %v4335_v36 }
  0xda   :  { %4145 = vmatprep.subr.bf16.mxu1 %v4337_v39  ;;  %v3267_v39 = vcombine.high %v115_v26, %v123_v27 }
  0xdb   :  { %2591 = vmatmul.mubr.bf16.gmra.mrb[92].mxu0 %v3186_v40 }
  0xdc   :  { %2711 = vmatmul.mubr.bf16.gmra.mrb[92].mxu1 %v3188_v41  ;;  %2598 = vmatprep.mubr.bf16.mxu0 %v3203_v42 }
  0xdd   :  { %2718 = vmatprep.mubr.bf16.mxu1 %v3205_v43  ;;  %4064 = vmatpush3.bf16.msra.mxu0 %v4336_v44  ;;  %v3269_v43 = vcombine.high %v116_v29, %v124_v30 }
  0xde   :  { %4146 = vmatpush3.bf16.msra.mxu1 %v4338_v45  ;;  %4065 = vmatprep.subr.bf16.mxu0 %v4339_v46 }
  0xdf   :  { %4147 = vmatprep.subr.bf16.mxu1 %v4341_v47 }
  0xe1   :  { %4066 = vmatpush3.bf16.msra.mxu0 %v4340_v51  ;;  %v139_v51 = vld [vmem:[%s5524_s0 + $0x3e0] sm:$0xff] }
  0xe2   :  { %4148 = vmatpush3.bf16.msra.mxu1 %v4342_v53  ;;  %4067 = vmatprep.subr.bf16.mxu0 %v4343_v54  ;;  %v132_v54 = vld [vmem:[%s5524_s0 + $0x3a8] sm:$0xff] }
  0xe3   :  { %2599 = vmatmul.mubr.bf16.gmra.mrb[96].mxu0 %v3202_v55  ;;  %4149 = vmatprep.subr.bf16.mxu1 %v4345_v56  ;;  %v140_v55 = vld [vmem:[%s5524_s0 + $0x3e8] sm:$0xff] }
  0xe4   :  { %2719 = vmatmul.mubr.bf16.gmra.mrb[96].mxu1 %v3204_v57  ;;  %2606 = vmatprep.mubr.bf16.mxu0 %v3219_v58  ;;  %v3266_v58 = vcombine.low %v115_v26, %v123_v27 }
  0xe5   :  { %2726 = vmatprep.mubr.bf16.mxu1 %v3221_v59  ;;  %4068 = vmatpush3.bf16.msra.mxu0 %v4344_v60 }
  0xe6   :  { %4150 = vmatpush3.bf16.msra.mxu1 %v4346_v61  ;;  %4069 = vmatprep.subr.bf16.mxu0 %v4347_v62  ;;  %v3268_v62 = vcombine.low %v116_v29, %v124_v30 }
  0xe7   :  { %4151 = vmatprep.subr.bf16.mxu1 %v4349_v63  ;;  %v3283_v63 = vcombine.high %v131_v50, %v139_v51 }
  0xe9   :  { %4070 = vmatpush3.bf16.msra.mxu0 %v4348_v3  ;;  %v3285_v3 = vcombine.high %v132_v54, %v140_v55 }
  0xea   :  { %4152 = vmatpush3.bf16.msra.mxu1 %v4350_v5  ;;  %4071 = vmatprep.subr.bf16.mxu0 %v4351_v6 }
  0xeb   :  { %2607 = vmatmul.mubr.bf16.gmra.mrb[100].mxu0 %v3218_v7  ;;  %4153 = vmatprep.subr.bf16.mxu1 %v4353_v8 }
  0xec   :  { %2727 = vmatmul.mubr.bf16.gmra.mrb[100].mxu1 %v3220_v9  ;;  %2614 = vmatprep.mubr.bf16.mxu0 %v3235_v10  ;;  %v147_v10 = vld [vmem:[%s5524_s0 + $0x420] sm:$0xff] }
  0xed   :  { %2734 = vmatprep.mubr.bf16.mxu1 %v3237_v11  ;;  %4072 = vmatpush3.bf16.msra.mxu0 %v4352_v12  ;;  %v155_v11 = vld [vmem:[%s5524_s0 + $0x460] sm:$0xff] }
  0xee   :  { %4154 = vmatpush3.bf16.msra.mxu1 %v4354_v13  ;;  %4073 = vmatprep.subr.bf16.mxu0 %v4355_v14  ;;  %v148_v14 = vld [vmem:[%s5524_s0 + $0x428] sm:$0xff] }
  0xef   :  { %4155 = vmatprep.subr.bf16.mxu1 %v4359_v15  ;;  %v156_v15 = vld [vmem:[%s5524_s0 + $0x468] sm:$0xff] }
  0xf0   :  { %v3301_v27 = vcombine.high %v148_v14, %v156_v15 }
  0xf1   :  { %4074 = vmatpush3.bf16.msra.mxu0 %v4356_v18  ;;  %v3282_v18 = vcombine.low %v131_v50, %v139_v51 }
  0xf2   :  { %4156 = vmatpush3.bf16.msra.mxu1 %v4362_v21 }
  0xf3   :  { %2615 = vmatmul.mubr.bf16.gmra.mrb[104].mxu0 %v3234_v22  ;;  %v3284_v22 = vcombine.low %v132_v54, %v140_v55 }
  0xf4   :  { %2735 = vmatmul.mubr.bf16.gmra.mrb[104].mxu1 %v3236_v23  ;;  %2622 = vmatprep.mubr.bf16.mxu0 %v3251_v24  ;;  %v3299_v23 = vcombine.high %v147_v10, %v155_v11 }
  0xf5   :  { %2742 = vmatprep.mubr.bf16.mxu1 %v3253_v25 }
  0xf6   :  { %v3583_v28 = vpop.f32.mrb[0].mxu0 }
  0xf7   :  { %v3665_v31 = vpop.f32.mrb[0].mxu1  ;;  %v3584_v33 = vpop.f32.mrb[1].mxu0 }
  0xf8   :  { %v3585_v35 = vadd.f32 %v3584_v33, %v3583_v28  ;;  %v3666_v36 = vpop.f32.mrb[1].mxu1  ;;  %v3586_v37 = vpop.f32.mrb[2].mxu0 }
  0xf9   :  { %v3667_v40 = vadd.f32 %v3666_v36, %v3665_v31  ;;  %v3668_v41 = vpop.f32.mrb[2].mxu1  ;;  %v3587_v42 = vpop.f32.mrb[3].mxu0  ;;  %v171_v36 = vld [vmem:[%s5524_s0 + $0x4e0] sm:$0xff] }
  0xfa   :  { %v2105_v44 = vadd.f32 %v3585_v35, %v5110_v32  ;;  %v3588_v45 = vadd.f32 %v3587_v42, %v3586_v37  ;;  %v3669_v46 = vpop.f32.mrb[3].mxu1  ;;  %v163_v35 = vld [vmem:[%s5524_s0 + $0x4a0] sm:$0xff] }
  0xfb   :  { %v3670_v47 = vadd.f32 %v3669_v46, %v3668_v41  ;;  %2623 = vmatmul.mubr.bf16.gmra.mrb[108].mxu0 %v3250_v34 }
  0xfc   :  { %v5113_v48 = vadd.f32 %v3667_v40, %v2105_v44  ;;  %v2108_v49 = vadd.f32 %v3588_v45, %v5110_v32  ;;  %2743 = vmatmul.mubr.bf16.gmra.mrb[108].mxu1 %v3252_v38  ;;  %2630 = vmatprep.mubr.bf16.mxu0 %v3267_v39  ;;  %v164_v39 = vld [vmem:[%s5524_s0 + $0x4a8] sm:$0xff] }
  0xfd   :  { %2750 = vmatprep.mubr.bf16.mxu1 %v3269_v43  ;;  %v172_v40 = vld [vmem:[%s5524_s0 + $0x4e8] sm:$0xff]  ;;  %v3298_v43 = vcombine.low %v147_v10, %v155_v11 }
  0xfe   :  { %v5122_v52 = vadd.f32 %v3670_v47, %v2108_v49  ;;  %v3589_v53 = vpop.f32.mrb[4].mxu0  ;;  %v3300_v47 = vcombine.low %v148_v14, %v156_v15  ;;  %v3315_v49 = vcombine.high %v163_v35, %v171_v36  ;;  %v3317_v54 = vcombine.high %v164_v39, %v172_v40 }
  0xff   :  { %v3671_v56 = vpop.f32.mrb[4].mxu1  ;;  %v3590_v57 = vpop.f32.mrb[5].mxu0 }
 0x100   :  { %v3591_v59 = vadd.f32 %v3590_v57, %v3589_v53  ;;  %v3672_v60 = vpop.f32.mrb[5].mxu1  ;;  %v3592_v61 = vpop.f32.mrb[6].mxu0 }
 0x101   :  { %v3673_v0 = vadd.f32 %v3672_v60, %v3671_v56  ;;  %v3674_v1 = vpop.f32.mrb[6].mxu1  ;;  %v3593_v2 = vpop.f32.mrb[7].mxu0 }
 0x102   :  { %v2113_v4 = vadd.f32 %v3591_v59, %v5110_v32  ;;  %v3594_v5 = vadd.f32 %v3593_v2, %v3592_v61  ;;  %v3675_v6 = vpop.f32.mrb[7].mxu1  ;;  %v179_v61 = vld [vmem:[%s5524_s0 + $0x520] sm:$0x11] }
 0x103   :  { %v3676_v7 = vadd.f32 %v3675_v6, %v3674_v1  ;;  %2631 = vmatmul.mubr.bf16.gmra.mrb[112].mxu0 %v3266_v58 }
 0x104   :  { %v5131_v8 = vadd.f32 %v3673_v0, %v2113_v4  ;;  %v2116_v9 = vadd.f32 %v3594_v5, %v5110_v32  ;;  %2751 = vmatmul.mubr.bf16.gmra.mrb[112].mxu1 %v3268_v62  ;;  %2638 = vmatprep.mubr.bf16.mxu0 %v3283_v63  ;;  %v180_v0 = vld [vmem:[%s5524_s0 + $0x528] sm:$0x11] }
 0x105   :  { %2758 = vmatprep.mubr.bf16.mxu1 %v3285_v3  ;;  %v3314_v3 = vcombine.low %v163_v35, %v171_v36  ;;  %v3333_v14 = vcombine.high %v180_v0, %v180_v0  ;;  %v3332_v35 = vcombine.low %v180_v0, %v180_v0 }
 0x106   :  { %v5140_v12 = vadd.f32 %v3676_v7, %v2116_v9  ;;  %v3595_v13 = vpop.f32.mrb[8].mxu0  ;;  %v3316_v7 = vcombine.low %v164_v39, %v172_v40  ;;  %v3331_v9 = vcombine.high %v179_v61, %v179_v61 }
 0x107   :  { %v3677_v16 = vpop.f32.mrb[8].mxu1  ;;  %v3596_v17 = vpop.f32.mrb[9].mxu0 }
 0x108   :  { %v3597_v19 = vadd.f32 %v3596_v17, %v3595_v13  ;;  %v3678_v20 = vpop.f32.mrb[9].mxu1  ;;  %v3598_v21 = vpop.f32.mrb[10].mxu0 }
 0x109   :  { %v3679_v24 = vadd.f32 %v3678_v20, %v3677_v16  ;;  %v3680_v25 = vpop.f32.mrb[10].mxu1  ;;  %v3599_v26 = vpop.f32.mrb[11].mxu0 }
 0x10a   :  { %v2121_v28 = vadd.f32 %v3597_v19, %v5110_v32  ;;  %v3600_v29 = vadd.f32 %v3599_v26, %v3598_v21  ;;  %v3681_v30 = vpop.f32.mrb[11].mxu1  ;;  %v21_v21 = vld [vmem:[%s5524_s0 + $0x30] sm:$0xff]  ;;  %v30_v26 = vld [vmem:[%s5524_s0 + $0x78] sm:$0xff] }
 0x10b   :  { %v3682_v31 = vadd.f32 %v3681_v30, %v3680_v25  ;;  %2639 = vmatmul.mubr.bf16.gmra.mrb[116].mxu0 %v3282_v18  ;;  %v22_v25 = vld [vmem:[%s5524_s0 + $0x38] sm:$0xff] }
 0x10c   :  { %v5149_v33 = vadd.f32 %v3679_v24, %v2121_v28  ;;  %v2124_v34 = vadd.f32 %v3600_v29, %v5110_v32  ;;  %2759 = vmatmul.mubr.bf16.gmra.mrb[116].mxu1 %v3284_v22  ;;  %2646 = vmatprep.mubr.bf16.mxu0 %v3299_v23  ;;  %v29_v22 = vld [vmem:[%s5524_s0 + $0x70] sm:$0xff]  ;;  %v3330_v29 = vcombine.low %v179_v61, %v179_v61 }
 0x10d   :  { %2766 = vmatprep.mubr.bf16.mxu1 %v3301_v27  ;;  %v3175_v36 = vcombine.high %v21_v21, %v29_v22  ;;  %v3176_v0 = vcombine.low %v22_v25, %v30_v26 }
 0x10e   :  { %v5158_v37 = vadd.f32 %v3682_v31, %v2124_v34  ;;  %v3601_v38 = vpop.f32.mrb[12].mxu0 }
 0x10f   :  { %v3683_v41 = vpop.f32.mrb[12].mxu1  ;;  %v3602_v42 = vpop.f32.mrb[13].mxu0 }
 0x110   :  { %v3603_v44 = vadd.f32 %v3602_v42, %v3601_v38  ;;  %v3684_v45 = vpop.f32.mrb[13].mxu1  ;;  %v3604_v46 = vpop.f32.mrb[14].mxu0 }
 0x111   :  { %v3685_v50 = vadd.f32 %v3684_v45, %v3683_v41  ;;  %v3686_v51 = vpop.f32.mrb[14].mxu1  ;;  %v3605_v53 = vpop.f32.mrb[15].mxu0  ;;  %v3177_v41 = vcombine.high %v22_v25, %v30_v26 }
 0x112   :  { %v2129_v55 = vadd.f32 %v3603_v44, %v5110_v32  ;;  %v3606_v56 = vadd.f32 %v3605_v53, %v3604_v46  ;;  %v3687_v57 = vpop.f32.mrb[15].mxu1 }
 0x113   :  { %v3688_v58 = vadd.f32 %v3687_v57, %v3686_v51  ;;  %2647 = vmatmul.mubr.bf16.gmra.mrb[120].mxu0 %v3298_v43 }
 0x114   :  { %v5167_v59 = vadd.f32 %v3685_v50, %v2129_v55  ;;  %v2132_v60 = vadd.f32 %v3606_v56, %v5110_v32  ;;  %2767 = vmatmul.mubr.bf16.gmra.mrb[120].mxu1 %v3300_v47  ;;  %2654 = vmatprep.mubr.bf16.mxu0 %v3315_v49  ;;  %v37_v49 = vld [vmem:[%s5524_s0 + $0xb0] sm:$0xff]  ;;  %v46_v55 = vld [vmem:[%s5524_s0 + $0xf8] sm:$0xff] }
 0x115   :  { %2774 = vmatprep.mubr.bf16.mxu1 %v3317_v54  ;;  %v45_v50 = vld [vmem:[%s5524_s0 + $0xf0] sm:$0xff]  ;;  %v38_v54 = vld [vmem:[%s5524_s0 + $0xb8] sm:$0xff] }
 0x116   :  { %v5173_v62 = vadd.f32 %v3688_v58, %v2132_v60  ;;  %v3607_v63 = vpop.f32.mrb[16].mxu0  ;;  %v3174_v58 = vcombine.low %v21_v21, %v29_v22 }
 0x117   :  { %v3689_v1 = vpop.f32.mrb[16].mxu1  ;;  %v3608_v2 = vpop.f32.mrb[17].mxu0 }
 0x118   :  { %v3609_v4 = vadd.f32 %v3608_v2, %v3607_v63  ;;  %v3690_v5 = vpop.f32.mrb[17].mxu1  ;;  %v3610_v6 = vpop.f32.mrb[18].mxu0 }
 0x119   :  { %v3691_v10 = vadd.f32 %v3690_v5, %v3689_v1  ;;  %v3692_v11 = vpop.f32.mrb[18].mxu1  ;;  %v3611_v13 = vpop.f32.mrb[19].mxu0  ;;  %v3191_v1 = vcombine.high %v37_v49, %v45_v50  ;;  %v3193_v5 = vcombine.high %v38_v54, %v46_v55 }
 0x11a   :  { %v2137_v15 = vadd.f32 %v3609_v4, %v5110_v32  ;;  %v3612_v16 = vadd.f32 %v3611_v13, %v3610_v6  ;;  %v3693_v17 = vpop.f32.mrb[19].mxu1 }
 0x11b   :  { %v3694_v18 = vadd.f32 %v3693_v17, %v3692_v11  ;;  %2655 = vmatmul.mubr.bf16.gmra.mrb[124].mxu0 %v3314_v3 }
 0x11c   :  { %v5179_v19 = vadd.f32 %v3691_v10, %v2137_v15  ;;  %v2140_v20 = vadd.f32 %v3612_v16, %v5110_v32  ;;  %2775 = vmatmul.mubr.bf16.gmra.mrb[124].mxu1 %v3316_v7  ;;  %2662 = vmatprep.mubr.bf16.mxu0 %v3331_v9  ;;  %v61_v15 = vld [vmem:[%s5524_s0 + $0x170] sm:$0xff] }
 0x11d   :  { %2782 = vmatprep.mubr.bf16.mxu1 %v3333_v14  ;;  %v53_v14 = vld [vmem:[%s5524_s0 + $0x130] sm:$0xff] }
 0x11e   :  { %v5188_v23 = vadd.f32 %v3694_v18, %v2140_v20  ;;  %v3613_v24 = vpop.f32.mrb[20].mxu0  ;;  %v54_v18 = vld [vmem:[%s5524_s0 + $0x138] sm:$0xff] }
 0x11f   :  { %v3695_v27 = vpop.f32.mrb[20].mxu1  ;;  %v3614_v28 = vpop.f32.mrb[21].mxu0  ;;  %v62_v20 = vld [vmem:[%s5524_s0 + $0x178] sm:$0xff] }
 0x120   :  { %v3615_v30 = vadd.f32 %v3614_v28, %v3613_v24  ;;  %v3696_v31 = vpop.f32.mrb[21].mxu1  ;;  %v3616_v34 = vpop.f32.mrb[22].mxu0  ;;  %v3190_v24 = vcombine.low %v37_v49, %v45_v50  ;;  %v3192_v28 = vcombine.low %v38_v54, %v46_v55  ;;  %v70_v49 = vld [vmem:[%s5524_s0 + $0x1b8] sm:$0xff]  ;;  %v3206_v55 = vcombine.low %v53_v14, %v61_v15 }
 0x121   :  { %v3697_v38 = vadd.f32 %v3696_v31, %v3695_v27  ;;  %v3698_v39 = vpop.f32.mrb[22].mxu1  ;;  %v3617_v40 = vpop.f32.mrb[23].mxu0  ;;  %v78_v50 = vld [vmem:[%s5524_s0 + $0x1f8] sm:$0xff] }
 0x122   :  { %v2145_v42 = vadd.f32 %v3615_v30, %v5110_v32  ;;  %v3618_v43 = vadd.f32 %v3617_v40, %v3616_v34  ;;  %v3699_v44 = vpop.f32.mrb[23].mxu1 }
 0x123   :  { %v3700_v45 = vadd.f32 %v3699_v44, %v3698_v39  ;;  %2663 = vmatmul.mubr.bf16.gmra.mrb[128].mxu0 %v3330_v29  ;;  %v3207_v29 = vcombine.high %v53_v14, %v61_v15  ;;  %v77_v44 = vld [vmem:[%s5524_s0 + $0x1f0] sm:$0xff] }
 0x124   :  { %v5197_v46 = vadd.f32 %v3697_v38, %v2145_v42  ;;  %v2148_v47 = vadd.f32 %v3618_v43, %v5110_v32  ;;  %2783 = vmatmul.mubr.bf16.gmra.mrb[128].mxu1 %v3332_v35  ;;  %2822 = vmatprep.mubr.bf16.mxu0 %v3175_v36  ;;  %v3209_v35 = vcombine.high %v54_v18, %v62_v20  ;;  %v69_v43 = vld [vmem:[%s5524_s0 + $0x1b0] sm:$0xff] }
 0x125   :  { %2942 = vmatprep.mubr.bf16.mxu1 %v3177_v41 }
 0x126   :  { %v5206_v51 = vadd.f32 %v3700_v45, %v2148_v47  ;;  %v3619_v53 = vpop.f32.mrb[24].mxu0 }
 0x127   :  { %v3701_v56 = vpop.f32.mrb[24].mxu1  ;;  %v3620_v57 = vpop.f32.mrb[25].mxu0 }
 0x128   :  { %v3621_v60 = vadd.f32 %v3620_v57, %v3619_v53  ;;  %v3702_v61 = vpop.f32.mrb[25].mxu1  ;;  %v3622_v63 = vpop.f32.mrb[26].mxu0 }
 0x129   :  { %v3703_v2 = vadd.f32 %v3702_v61, %v3701_v56  ;;  %v3704_v3 = vpop.f32.mrb[26].mxu1  ;;  %v3623_v4 = vpop.f32.mrb[27].mxu0  ;;  %v3223_v61 = vcombine.high %v69_v43, %v77_v44 }
 0x12a   :  { %v2153_v6 = vadd.f32 %v3621_v60, %v5110_v32  ;;  %v3624_v7 = vadd.f32 %v3623_v4, %v3622_v63  ;;  %v3705_v9 = vpop.f32.mrb[27].mxu1  ;;  %v3208_v60 = vcombine.low %v54_v18, %v62_v20  ;;  %v94_v18 = vld [vmem:[%s5524_s0 + $0x278] sm:$0xff] }
 0x12b   :  { %v3706_v10 = vadd.f32 %v3705_v9, %v3704_v3  ;;  %2823 = vmatmul.mubr.bf16.vlgmr.msra.gmra.mrb[132].mxu0 %v3174_v58 }
 0x12c   :  { %v5215_v11 = vadd.f32 %v3703_v2, %v2153_v6  ;;  %v2156_v13 = vadd.f32 %v3624_v7, %v5110_v32  ;;  %2943 = vmatmul.mubr.bf16.vlgmr.msra.gmra.mrb[132].mxu1 %v3176_v0  ;;  %2830 = vmatprep.mubr.bf16.mxu0 %v3191_v1  ;;  %v3225_v2 = vcombine.high %v70_v49, %v78_v50 }
 0x12d   :  { %2950 = vmatprep.mubr.bf16.mxu1 %v3193_v5 }
 0x12e   :  { %v5224_v16 = vadd.f32 %v3706_v10, %v2156_v13  ;;  %v3625_v17 = vpop.f32.mrb[28].mxu0  ;;  %v85_v10 = vld [vmem:[%s5524_s0 + $0x230] sm:$0xff] }
 0x12f   :  { %v3707_v21 = vpop.f32.mrb[28].mxu1  ;;  %v3626_v22 = vpop.f32.mrb[29].mxu0  ;;  %v93_v13 = vld [vmem:[%s5524_s0 + $0x270] sm:$0xff] }
 0x130   :  { %v3627_v25 = vadd.f32 %v3626_v22, %v3625_v17  ;;  %v3708_v26 = vpop.f32.mrb[29].mxu1  ;;  %v3628_v27 = vpop.f32.mrb[30].mxu0  ;;  %v86_v17 = vld [vmem:[%s5524_s0 + $0x238] sm:$0xff]  ;;  %v3222_v22 = vcombine.low %v69_v43, %v77_v44  ;;  %v101_v43 = vld [vmem:[%s5524_s0 + $0x2b0] sm:$0xff] }
 0x131   :  { %v3709_v30 = vadd.f32 %v3708_v26, %v3707_v21  ;;  %v3710_v31 = vpop.f32.mrb[30].mxu1  ;;  %v3629_v34 = vpop.f32.mrb[31].mxu0  ;;  %v109_v44 = vld [vmem:[%s5524_s0 + $0x2f0] sm:$0xff] }
 0x132   :  { %v2161_v36 = vadd.f32 %v3627_v25, %v5110_v32  ;;  %v3630_v38 = vadd.f32 %v3629_v34, %v3628_v27  ;;  %v3711_v39 = vpop.f32.mrb[31].mxu1  ;;  %v3224_v27 = vcombine.low %v70_v49, %v78_v50  ;;  %v3241_v34 = vcombine.high %v86_v17, %v94_v18  ;;  %v102_v50 = vld [vmem:[%s5524_s0 + $0x2b8] sm:$0xff] }
 0x133   :  { %v3712_v40 = vadd.f32 %v3711_v39, %v3710_v31  ;;  %2831 = vmatmul.mubr.bf16.gmra.mrb[136].mxu0 %v3190_v24 }
 0x134   :  { %v5233_v41 = vadd.f32 %v3709_v30, %v2161_v36  ;;  %v2164_v42 = vadd.f32 %v3630_v38, %v5110_v32  ;;  %2951 = vmatmul.mubr.bf16.gmra.mrb[136].mxu1 %v3192_v28  ;;  %2838 = vmatprep.mubr.bf16.mxu0 %v3207_v29  ;;  %v3239_v28 = vcombine.high %v85_v10, %v93_v13 }
 0x135   :  { %2958 = vmatprep.mubr.bf16.mxu1 %v3209_v35 }
 0x136   :  { %v5242_v45 = vadd.f32 %v3712_v40, %v2164_v42  ;;  %v3631_v47 = vpop.f32.mrb[32].mxu0 }
 0x137   :  { %v3713_v53 = vpop.f32.mrb[32].mxu1  ;;  %v3632_v54 = vpop.f32.mrb[33].mxu0 }
 0x138   :  { %v3633_v56 = vadd.f32 %v3632_v54, %v3631_v47  ;;  %v3714_v57 = vpop.f32.mrb[33].mxu1  ;;  %v3634_v58 = vpop.f32.mrb[34].mxu0 }
 0x139   :  { %v3715_v63 = vadd.f32 %v3714_v57, %v3713_v53  ;;  %v3716_v0 = vpop.f32.mrb[34].mxu1  ;;  %v3635_v1 = vpop.f32.mrb[35].mxu0  ;;  %v110_v53 = vld [vmem:[%s5524_s0 + $0x2f8] sm:$0xff] }
 0x13a   :  { %v2169_v3 = vadd.f32 %v3633_v56, %v5110_v32  ;;  %v3636_v4 = vadd.f32 %v3635_v1, %v3634_v58  ;;  %v3717_v5 = vpop.f32.mrb[35].mxu1  ;;  %v3238_v56 = vcombine.low %v85_v10, %v93_v13  ;;  %v125_v10 = vld [vmem:[%s5524_s0 + $0x370] sm:$0xff] }
 0x13b   :  { %v3718_v6 = vadd.f32 %v3717_v5, %v3716_v0  ;;  %2839 = vmatmul.mubr.bf16.gmra.mrb[140].mxu0 %v3206_v55 }
 0x13c   :  { %v5251_v7 = vadd.f32 %v3715_v63, %v2169_v3  ;;  %v2172_v9 = vadd.f32 %v3636_v4, %v5110_v32  ;;  %2959 = vmatmul.mubr.bf16.gmra.mrb[140].mxu1 %v3208_v60  ;;  %2846 = vmatprep.mubr.bf16.mxu0 %v3223_v61  ;;  %v3240_v61 = vcombine.low %v86_v17, %v94_v18 }
 0x13d   :  { %2966 = vmatprep.mubr.bf16.mxu1 %v3225_v2  ;;  %v3255_v63 = vcombine.high %v101_v43, %v109_v44  ;;  %v3257_v3 = vcombine.high %v102_v50, %v110_v53 }
 0x13e   :  { %v5260_v14 = vadd.f32 %v3718_v6, %v2172_v9  ;;  %v3637_v15 = vpop.f32.mrb[36].mxu0  ;;  %v117_v9 = vld [vmem:[%s5524_s0 + $0x330] sm:$0xff] }
 0x13f   :  { %v3719_v20 = vpop.f32.mrb[36].mxu1  ;;  %v3638_v21 = vpop.f32.mrb[37].mxu0 }
 0x140   :  { %v3639_v24 = vadd.f32 %v3638_v21, %v3637_v15  ;;  %v3720_v25 = vpop.f32.mrb[37].mxu1  ;;  %v3640_v26 = vpop.f32.mrb[38].mxu0  ;;  %v126_v15 = vld [vmem:[%s5524_s0 + $0x378] sm:$0xff] }
 0x141   :  { %v3721_v29 = vadd.f32 %v3720_v25, %v3719_v20  ;;  %v3722_v30 = vpop.f32.mrb[38].mxu1  ;;  %v3641_v31 = vpop.f32.mrb[39].mxu0  ;;  %v3254_v20 = vcombine.low %v101_v43, %v109_v44  ;;  %v3256_v25 = vcombine.low %v102_v50, %v110_v53  ;;  %v141_v43 = vld [vmem:[%s5524_s0 + $0x3f0] sm:$0xff] }
 0x142   :  { %v2177_v35 = vadd.f32 %v3639_v24, %v5110_v32  ;;  %v3642_v36 = vadd.f32 %v3641_v31, %v3640_v26  ;;  %v3723_v38 = vpop.f32.mrb[39].mxu1  ;;  %v3271_v26 = vcombine.high %v117_v9, %v125_v10 }
 0x143   :  { %v3724_v39 = vadd.f32 %v3723_v38, %v3722_v30  ;;  %2847 = vmatmul.mubr.bf16.gmra.mrb[144].mxu0 %v3222_v22 }
 0x144   :  { %v5269_v40 = vadd.f32 %v3721_v29, %v2177_v35  ;;  %v2180_v42 = vadd.f32 %v3642_v36, %v5110_v32  ;;  %2967 = vmatmul.mubr.bf16.gmra.mrb[144].mxu1 %v3224_v27  ;;  %2854 = vmatprep.mubr.bf16.mxu0 %v3239_v28 }
 0x145   :  { %2974 = vmatprep.mubr.bf16.mxu1 %v3241_v34 }
 0x146   :  { %v5278_v47 = vadd.f32 %v3724_v39, %v2180_v42  ;;  %v3643_v49 = vpop.f32.mrb[40].mxu0  ;;  %v133_v42 = vld [vmem:[%s5524_s0 + $0x3b0] sm:$0xff] }
 0x147   :  { %v3725_v54 = vpop.f32.mrb[40].mxu1  ;;  %v3644_v55 = vpop.f32.mrb[41].mxu0 }
 0x148   :  { %v3645_v57 = vadd.f32 %v3644_v55, %v3643_v49  ;;  %v3726_v58 = vpop.f32.mrb[41].mxu1  ;;  %v3646_v60 = vpop.f32.mrb[42].mxu0  ;;  %v134_v49 = vld [vmem:[%s5524_s0 + $0x3b8] sm:$0xff] }
 0x149   :  { %v3727_v0 = vadd.f32 %v3726_v58, %v3725_v54  ;;  %v3728_v1 = vpop.f32.mrb[42].mxu1  ;;  %v3647_v2 = vpop.f32.mrb[43].mxu0  ;;  %v3270_v54 = vcombine.low %v117_v9, %v125_v10  ;;  %v3287_v60 = vcombine.high %v133_v42, %v141_v43  ;;  %v149_v9 = vld [vmem:[%s5524_s0 + $0x430] sm:$0xff] }
 0x14a   :  { %v2185_v4 = vadd.f32 %v3645_v57, %v5110_v32  ;;  %v3729_v5 = vpop.f32.mrb[43].mxu1  ;;  %v118_v32 = vld [vmem:[%s5524_s0 + $0x338] sm:$0xff]  ;;  %v157_v10 = vld [vmem:[%s5524_s0 + $0x470] sm:$0xff] }
 0x14b   :  { %2855 = vmatmul.mubr.bf16.gmra.mrb[148].mxu0 %v3238_v56  ;;  %v3273_v30 = vcombine.high %v118_v32, %v126_v15  ;;  %v3272_v58 = vcombine.low %v118_v32, %v126_v15  ;;  %v150_v15 = vld [vmem:[%s5524_s0 + $0x438] sm:$0xff] }
 0x14c   :  { %v5287_v6 = vadd.f32 %v3727_v0, %v2185_v4  ;;  %2975 = vmatmul.mubr.bf16.gmra.mrb[148].mxu1 %v3240_v61  ;;  %2862 = vmatprep.mubr.bf16.mxu0 %v3255_v63 }
 0x14d   :  { %2982 = vmatprep.mubr.bf16.mxu1 %v3257_v3 }
 0x14e   :  { %v3747_v13 = vpop.f32.mrb[44].mxu0 }
 0x14f   :  { %v3829_v17 = vpop.f32.mrb[44].mxu1  ;;  %v3748_v18 = vpop.f32.mrb[45].mxu0 }
 0x150   :  { %v3749_v21 = vadd.f32 %v3748_v18, %v3747_v13  ;;  %v3830_v22 = vpop.f32.mrb[45].mxu1  ;;  %v3750_v24 = vpop.f32.mrb[46].mxu0 }
 0x151   :  { %v3831_v27 = vadd.f32 %v3830_v22, %v3829_v17  ;;  %v3832_v28 = vpop.f32.mrb[46].mxu1  ;;  %v3751_v29 = vpop.f32.mrb[47].mxu0 }
 0x152   :  { %v2345_v31 = vadd.f32 %v3749_v21, %v5113_v48  ;;  %v3752_v34 = vadd.f32 %v3751_v29, %v3750_v24  ;;  %v3833_v35 = vpop.f32.mrb[47].mxu1  ;;  %v3286_v21 = vcombine.low %v133_v42, %v141_v43  ;;  %v165_v42 = vld [vmem:[%s5524_s0 + $0x4b0] sm:$0xff] }
 0x153   :  { %v3834_v36 = vadd.f32 %v3833_v35, %v3832_v28  ;;  %2863 = vmatmul.mubr.bf16.gmra.mrb[152].mxu0 %v3254_v20  ;;  %v173_v43 = vld [vmem:[%s5524_s0 + $0x4f0] sm:$0xff] }
 0x154   :  { %v5302_v38 = vadd.f32 %v3831_v27, %v2345_v31  ;;  %v2348_v39 = vadd.f32 %v3752_v34, %v5122_v52  ;;  %2983 = vmatmul.mubr.bf16.gmra.mrb[152].mxu1 %v3256_v25  ;;  %2870 = vmatprep.mubr.bf16.mxu0 %v3271_v26  ;;  %v142_v52 = vld [vmem:[%s5524_s0 + $0x3f8] sm:$0xff]  ;;  %v3303_v27 = vcombine.high %v149_v9, %v157_v10 }
 0x155   :  { %2990 = vmatprep.mubr.bf16.mxu1 %v3273_v30  ;;  %v3289_v1 = vcombine.high %v134_v49, %v142_v52  ;;  %v3288_v26 = vcombine.low %v134_v49, %v142_v52  ;;  %v166_v52 = vld [vmem:[%s5524_s0 + $0x4b8] sm:$0xff] }
 0x156   :  { %v5311_v48 = vadd.f32 %v3834_v36, %v2348_v39  ;;  %v3753_v44 = vpop.f32.mrb[48].mxu0 }
 0x157   :  { %v3835_v50 = vpop.f32.mrb[48].mxu1  ;;  %v3754_v53 = vpop.f32.mrb[49].mxu0 }
 0x158   :  { %v3755_v55 = vadd.f32 %v3754_v53, %v3753_v44  ;;  %v3836_v56 = vpop.f32.mrb[49].mxu1  ;;  %v3756_v57 = vpop.f32.mrb[50].mxu0 }
 0x159   :  { %v3837_v61 = vadd.f32 %v3836_v56, %v3835_v50  ;;  %v3838_v63 = vpop.f32.mrb[50].mxu1  ;;  %v3757_v0 = vpop.f32.mrb[51].mxu0 }
 0x15a   :  { %v2353_v2 = vadd.f32 %v3755_v55, %v5131_v8  ;;  %v3758_v3 = vadd.f32 %v3757_v0, %v3756_v57  ;;  %v3839_v4 = vpop.f32.mrb[51].mxu1  ;;  %v3302_v55 = vcombine.low %v149_v9, %v157_v10  ;;  %v181_v9 = vld [vmem:[%s5524_s0 + $0x530] sm:$0x11] }
 0x15b   :  { %v3840_v5 = vadd.f32 %v3839_v4, %v3838_v63  ;;  %2871 = vmatmul.mubr.bf16.gmra.mrb[156].mxu0 %v3270_v54 }
 0x15c   :  { %v5320_v13 = vadd.f32 %v3837_v61, %v2353_v2  ;;  %v2356_v17 = vadd.f32 %v3758_v3, %v5140_v12  ;;  %2991 = vmatmul.mubr.bf16.gmra.mrb[156].mxu1 %v3272_v58  ;;  %2878 = vmatprep.mubr.bf16.mxu0 %v3287_v60  ;;  %v158_v12 = vld [vmem:[%s5524_s0 + $0x478] sm:$0xff]  ;;  %v3319_v61 = vcombine.high %v165_v42, %v173_v43 }
 0x15d   :  { %2998 = vmatprep.mubr.bf16.mxu1 %v3289_v1  ;;  %v3305_v31 = vcombine.high %v150_v15, %v158_v12  ;;  %v3304_v60 = vcombine.low %v150_v15, %v158_v12 }
 0x15e   :  { %v5329_v8 = vadd.f32 %v3840_v5, %v2356_v17  ;;  %v3759_v32 = vpop.f32.mrb[52].mxu0 }
 0x15f   :  { %v3841_v18 = vpop.f32.mrb[52].mxu1  ;;  %v3760_v20 = vpop.f32.mrb[53].mxu0 }
 0x160   :  { %v3761_v22 = vadd.f32 %v3760_v20, %v3759_v32  ;;  %v3842_v24 = vpop.f32.mrb[53].mxu1  ;;  %v3762_v25 = vpop.f32.mrb[54].mxu0 }
 0x161   :  { %v3843_v28 = vadd.f32 %v3842_v24, %v3841_v18  ;;  %v3844_v29 = vpop.f32.mrb[54].mxu1  ;;  %v3763_v30 = vpop.f32.mrb[55].mxu0 }
 0x162   :  { %v2361_v34 = vadd.f32 %v3761_v22, %v5149_v33  ;;  %v3764_v35 = vadd.f32 %v3763_v30, %v3762_v25  ;;  %v3845_v36 = vpop.f32.mrb[55].mxu1 }
 0x163   :  { %v3846_v39 = vadd.f32 %v3845_v36, %v3844_v29  ;;  %2879 = vmatmul.mubr.bf16.gmra.mrb[160].mxu0 %v3286_v21  ;;  %v3318_v21 = vcombine.low %v165_v42, %v173_v43 }
 0x164   :  { %v5338_v44 = vadd.f32 %v3843_v28, %v2361_v34  ;;  %v2364_v50 = vadd.f32 %v3764_v35, %v5158_v37  ;;  %2999 = vmatmul.mubr.bf16.gmra.mrb[160].mxu1 %v3288_v26  ;;  %2886 = vmatprep.mubr.bf16.mxu0 %v3303_v27  ;;  %v174_v37 = vld [vmem:[%s5524_s0 + $0x4f8] sm:$0xff]  ;;  %v3335_v26 = vcombine.high %v181_v9, %v181_v9 }
 0x165   :  { %3006 = vmatprep.mubr.bf16.mxu1 %v3305_v31  ;;  %v3321_v2 = vcombine.high %v166_v52, %v174_v37  ;;  %v3320_v25 = vcombine.low %v166_v52, %v174_v37  ;;  %v3334_v37 = vcombine.low %v181_v9, %v181_v9 }
 0x166   :  { %v5347_v33 = vadd.f32 %v3846_v39, %v2364_v50  ;;  %v3765_v49 = vpop.f32.mrb[56].mxu0 }
 0x167   :  { %v3847_v53 = vpop.f32.mrb[56].mxu1  ;;  %v3766_v54 = vpop.f32.mrb[57].mxu0 }
 0x168   :  { %v3767_v56 = vadd.f32 %v3766_v54, %v3765_v49  ;;  %v3848_v57 = vpop.f32.mrb[57].mxu1  ;;  %v3768_v58 = vpop.f32.mrb[58].mxu0 }
 0x169   :  { %v3849_v63 = vadd.f32 %v3848_v57, %v3847_v53  ;;  %v3850_v0 = vpop.f32.mrb[58].mxu1  ;;  %v3769_v1 = vpop.f32.mrb[59].mxu0 }
 0x16a   :  { %v2369_v3 = vadd.f32 %v3767_v56, %v5167_v59  ;;  %v3770_v4 = vadd.f32 %v3769_v1, %v3768_v58  ;;  %v3851_v5 = vpop.f32.mrb[59].mxu1  ;;  %v182_v59 = vld [vmem:[%s5524_s0 + $0x538] sm:$0x11] }
 0x16b   :  { %v3852_v17 = vadd.f32 %v3851_v5, %v3850_v0  ;;  %2887 = vmatmul.mubr.bf16.gmra.mrb[164].mxu0 %v3302_v55  ;;  %v3337_v30 = vcombine.high %v182_v59, %v182_v59  ;;  %v3336_v55 = vcombine.low %v182_v59, %v182_v59 }
 0x16c   :  { %v5356_v32 = vadd.f32 %v3849_v63, %v2369_v3  ;;  %v2372_v18 = vadd.f32 %v3770_v4, %v5173_v62  ;;  %3007 = vmatmul.mubr.bf16.gmra.mrb[164].mxu1 %v3304_v60  ;;  %2894 = vmatprep.mubr.bf16.mxu0 %v3319_v61 }
 0x16d   :  { %3014 = vmatprep.mubr.bf16.mxu1 %v3321_v2 }
 0x16e   :  { %v5362_v10 = vadd.f32 %v3852_v17, %v2372_v18  ;;  %v3771_v15 = vpop.f32.mrb[60].mxu0 }
 0x16f   :  { %v3853_v12 = vpop.f32.mrb[60].mxu1  ;;  %v3772_v20 = vpop.f32.mrb[61].mxu0 }
 0x170   :  { %v3773_v22 = vadd.f32 %v3772_v20, %v3771_v15  ;;  %v3854_v24 = vpop.f32.mrb[61].mxu1  ;;  %v3774_v62 = vpop.f32.mrb[62].mxu0 }
 0x171   :  { %v3855_v27 = vadd.f32 %v3854_v24, %v3853_v12  ;;  %v3856_v28 = vpop.f32.mrb[62].mxu1  ;;  %v3775_v29 = vpop.f32.mrb[63].mxu0 }
 0x172   :  { %v2377_v31 = vadd.f32 %v3773_v22, %v5179_v19  ;;  %v3776_v34 = vadd.f32 %v3775_v29, %v3774_v62  ;;  %v3857_v35 = vpop.f32.mrb[63].mxu1 }
 0x173   :  { %v3858_v36 = vadd.f32 %v3857_v35, %v3856_v28  ;;  %2895 = vmatmul.mubr.bf16.gmra.mrb[168].mxu0 %v3318_v21 }
 0x174   :  { %v5368_v39 = vadd.f32 %v3855_v27, %v2377_v31  ;;  %v2380_v50 = vadd.f32 %v3776_v34, %v5188_v23  ;;  %3015 = vmatmul.mubr.bf16.gmra.mrb[168].mxu1 %v3320_v25  ;;  %2902 = vmatprep.mubr.bf16.mxu0 %v3335_v26 }
 0x175   :  { %3022 = vmatprep.mubr.bf16.mxu1 %v3337_v30 }
 0x176   :  { %v5371_v42 = vadd.f32 %v3858_v36, %v2380_v50  ;;  %v3777_v43 = vpop.f32.mrb[64].mxu0 }
 0x177   :  { %v3859_v49 = vpop.f32.mrb[64].mxu1  ;;  %v3778_v52 = vpop.f32.mrb[65].mxu0 }
 0x178   :  { %v3779_v53 = vadd.f32 %v3778_v52, %v3777_v43  ;;  %v3860_v54 = vpop.f32.mrb[65].mxu1  ;;  %v3780_v19 = vpop.f32.mrb[66].mxu0 }
 0x179   :  { %v3861_v56 = vadd.f32 %v3860_v54, %v3859_v49  ;;  %v3862_v57 = vpop.f32.mrb[66].mxu1  ;;  %v3781_v58 = vpop.f32.mrb[67].mxu0 }
 0x17a   :  { %v2385_v60 = vadd.f32 %v3779_v53, %v5197_v46  ;;  %v3782_v61 = vadd.f32 %v3781_v58, %v3780_v19  ;;  %v3863_v23 = vpop.f32.mrb[67].mxu1 }
 0x17b   :  { %v3864_v63 = vadd.f32 %v3863_v23, %v3862_v57  ;;  %2903 = vmatmul.mubr.bf16.gmra.mrb[172].mxu0 %v3334_v37 }
 0x17c   :  { %v5374_v0 = vadd.f32 %v3861_v56, %v2385_v60  ;;  %v2388_v1 = vadd.f32 %v3782_v61, %v5206_v51  ;;  %3023 = vmatmul.mubr.bf16.gmra.mrb[172].mxu1 %v3336_v55 }
 0x17e   :  { %v5377_v2 = vadd.f32 %v3864_v63, %v2388_v1  ;;  %v3783_v3 = vpop.f32.mrb[68].mxu0 }
 0x17f   :  { %v3865_v4 = vpop.f32.mrb[68].mxu1  ;;  %v3784_v5 = vpop.f32.mrb[69].mxu0 }
 0x180   :  { %v3785_v17 = vadd.f32 %v3784_v5, %v3783_v3  ;;  %v3866_v18 = vpop.f32.mrb[69].mxu1  ;;  %v3786_v9 = vpop.f32.mrb[70].mxu0 }
 0x181   :  { %v3867_v15 = vadd.f32 %v3866_v18, %v3865_v4  ;;  %v3868_v59 = vpop.f32.mrb[70].mxu1  ;;  %v3787_v46 = vpop.f32.mrb[71].mxu0 }
 0x182   :  { %v2393_v12 = vadd.f32 %v3785_v17, %v5215_v11  ;;  %v3788_v20 = vadd.f32 %v3787_v46, %v3786_v9  ;;  %v3869_v21 = vpop.f32.mrb[71].mxu1 }
 0x183   :  { %v3870_v22 = vadd.f32 %v3869_v21, %v3868_v59 }
 0x184   :  { %v5380_v24 = vadd.f32 %v3867_v15, %v2393_v12  ;;  %v2396_v51 = vadd.f32 %v3788_v20, %v5224_v16 }
 0x186   :  { %v5383_v62 = vadd.f32 %v3870_v22, %v2396_v51  ;;  %v3789_v25 = vpop.f32.mrb[72].mxu0 }
 0x187   :  { %v3871_v26 = vpop.f32.mrb[72].mxu1  ;;  %v3790_v27 = vpop.f32.mrb[73].mxu0 }
 0x188   :  { %v3791_v28 = vadd.f32 %v3790_v27, %v3789_v25  ;;  %v3872_v29 = vpop.f32.mrb[73].mxu1  ;;  %v3792_v30 = vpop.f32.mrb[74].mxu0 }
 0x189   :  { %v3873_v31 = vadd.f32 %v3872_v29, %v3871_v26  ;;  %v3874_v34 = vpop.f32.mrb[74].mxu1  ;;  %v3793_v35 = vpop.f32.mrb[75].mxu0 }
 0x18a   :  { %v2401_v11 = vadd.f32 %v3791_v28, %v5233_v41  ;;  %v3794_v36 = vadd.f32 %v3793_v35, %v3792_v30  ;;  %v3875_v50 = vpop.f32.mrb[75].mxu1 }
 0x18b   :  { %v3876_v43 = vadd.f32 %v3875_v50, %v3874_v34 }
 0x18c   :  { %v5386_v49 = vadd.f32 %v3873_v31, %v2401_v11  ;;  %v2404_v16 = vadd.f32 %v3794_v36, %v5242_v45 }
 0x18e   :  { %v5389_v52 = vadd.f32 %v3876_v43, %v2404_v16  ;;  %v3795_v37 = vpop.f32.mrb[76].mxu0 }
 0x18f   :  { %v3877_v53 = vpop.f32.mrb[76].mxu1  ;;  %v3796_v54 = vpop.f32.mrb[77].mxu0 }
 0x190   :  { %v3797_v19 = vadd.f32 %v3796_v54, %v3795_v37  ;;  %v3878_v55 = vpop.f32.mrb[77].mxu1  ;;  %v3798_v56 = vpop.f32.mrb[78].mxu0 }
 0x191   :  { %v3879_v57 = vadd.f32 %v3878_v55, %v3877_v53  ;;  %v3880_v58 = vpop.f32.mrb[78].mxu1  ;;  %v3799_v60 = vpop.f32.mrb[79].mxu0 }
 0x192   :  { %v2409_v41 = vadd.f32 %v3797_v19, %v5251_v7  ;;  %v3800_v61 = vadd.f32 %v3799_v60, %v3798_v56  ;;  %v3881_v23 = vpop.f32.mrb[79].mxu1 }
 0x193   :  { %v3882_v63 = vadd.f32 %v3881_v23, %v3880_v58 }
 0x194   :  { %v5392_v1 = vadd.f32 %v3879_v57, %v2409_v41  ;;  %v2412_v45 = vadd.f32 %v3800_v61, %v5260_v14 }
 0x196   :  { %v5395_v3 = vadd.f32 %v3882_v63, %v2412_v45  ;;  %v3801_v4 = vpop.f32.mrb[80].mxu0 }
 0x197   :  { %v3883_v5 = vpop.f32.mrb[80].mxu1  ;;  %v3802_v17 = vpop.f32.mrb[81].mxu0 }
 0x198   :  { %v3803_v18 = vadd.f32 %v3802_v17, %v3801_v4  ;;  %v3884_v9 = vpop.f32.mrb[81].mxu1  ;;  %v3804_v15 = vpop.f32.mrb[82].mxu0 }
 0x199   :  { %v3885_v59 = vadd.f32 %v3884_v9, %v3883_v5  ;;  %v3886_v46 = vpop.f32.mrb[82].mxu1  ;;  %v3805_v12 = vpop.f32.mrb[83].mxu0 }
 0x19a   :  { %v2417_v7 = vadd.f32 %v3803_v18, %v5269_v40  ;;  %v3806_v20 = vadd.f32 %v3805_v12, %v3804_v15  ;;  %v3887_v21 = vpop.f32.mrb[83].mxu1 }
 0x19b   :  { %v3888_v22 = vadd.f32 %v3887_v21, %v3886_v46 }
 0x19c   :  { %v5398_v51 = vadd.f32 %v3885_v59, %v2417_v7  ;;  %v2420_v14 = vadd.f32 %v3806_v20, %v5278_v47 }
 0x19e   :  { %v5401_v25 = vadd.f32 %v3888_v22, %v2420_v14  ;;  %v3807_v26 = vpop.f32.mrb[84].mxu0 }
 0x19f   :  { %v3889_v27 = vpop.f32.mrb[84].mxu1  ;;  %v3808_v28 = vpop.f32.mrb[85].mxu0 }
 0x1a0   :  { %v3809_v29 = vadd.f32 %v3808_v28, %v3807_v26  ;;  %v3890_v30 = vpop.f32.mrb[85].mxu1  ;;  %v3810_v31 = vpop.f32.mrb[86].mxu0 }
 0x1a1   :  { %v3891_v34 = vadd.f32 %v3890_v30, %v3889_v27  ;;  %v3892_v35 = vpop.f32.mrb[86].mxu1  ;;  %v3811_v11 = vpop.f32.mrb[87].mxu0 }
 0x1a2   :  { %v2425_v40 = vadd.f32 %v3809_v29, %v5287_v6  ;;  %v3893_v36 = vpop.f32.mrb[87].mxu1 }
 0x1a4   :  { %v5404_v50 = vadd.f32 %v3891_v34, %v2425_v40 }
 0x1a6   :  { %v3911_v43 = vpop.f32.mrb[88].mxu0 }
 0x1a7   :  { %v3993_v16 = vpop.f32.mrb[88].mxu1  ;;  %v3912_v37 = vpop.f32.mrb[89].mxu0 }
 0x1a8   :  { %v3913_v47 = vadd.f32 %v3912_v37, %v3911_v43  ;;  %v3994_v53 = vpop.f32.mrb[89].mxu1  ;;  %v3914_v54 = vpop.f32.mrb[90].mxu0 }
 0x1a9   :  { %v3995_v19 = vadd.f32 %v3994_v53, %v3993_v16  ;;  %v3996_v55 = vpop.f32.mrb[90].mxu1  ;;  %v3915_v56 = vpop.f32.mrb[91].mxu0 }
 0x1aa   :  { %v2585_v57 = vadd.f32 %v3913_v47, %v5302_v38  ;;  %v3916_v58 = vadd.f32 %v3915_v56, %v3914_v54  ;;  %v3997_v60 = vpop.f32.mrb[91].mxu1 }
 0x1ab   :  { %v3998_v41 = vadd.f32 %v3997_v60, %v3996_v55 }
 0x1ac   :  { %v5407_v61 = vadd.f32 %v3995_v19, %v2585_v57  ;;  %v2588_v6 = vadd.f32 %v3916_v58, %v5311_v48 }
 0x1ae   :  { %v5410_v23 = vadd.f32 %v3998_v41, %v2588_v6  ;;  %v3917_v63 = vpop.f32.mrb[92].mxu0 }
 0x1af   :  { %v3999_v45 = vpop.f32.mrb[92].mxu1  ;;  %v3918_v4 = vpop.f32.mrb[93].mxu0 }
 0x1b0   :  { %v3919_v5 = vadd.f32 %v3918_v4, %v3917_v63  ;;  %v4000_v17 = vpop.f32.mrb[93].mxu1  ;;  %v3920_v18 = vpop.f32.mrb[94].mxu0 }
 0x1b1   :  { %v4001_v9 = vadd.f32 %v4000_v17, %v3999_v45  ;;  %v4002_v15 = vpop.f32.mrb[94].mxu1  ;;  %v3921_v59 = vpop.f32.mrb[95].mxu0 }
 0x1b2   :  { %v2593_v38 = vadd.f32 %v3919_v5, %v5320_v13  ;;  %v3922_v46 = vadd.f32 %v3921_v59, %v3920_v18  ;;  %v4003_v12 = vpop.f32.mrb[95].mxu1 }
 0x1b3   :  { %v4004_v7 = vadd.f32 %v4003_v12, %v4002_v15 }
 0x1b4   :  { %v5413_v20 = vadd.f32 %v4001_v9, %v2593_v38  ;;  %v2596_v48 = vadd.f32 %v3922_v46, %v5329_v8 }
 0x1b6   :  { %v5416_v21 = vadd.f32 %v4004_v7, %v2596_v48  ;;  %v3923_v22 = vpop.f32.mrb[96].mxu0 }
 0x1b7   :  { %v4005_v14 = vpop.f32.mrb[96].mxu1  ;;  %v3924_v26 = vpop.f32.mrb[97].mxu0 }
 0x1b8   :  { %v3925_v27 = vadd.f32 %v3924_v26, %v3923_v22  ;;  %v4006_v28 = vpop.f32.mrb[97].mxu1  ;;  %v3926_v29 = vpop.f32.mrb[98].mxu0 }
 0x1b9   :  { %v4007_v30 = vadd.f32 %v4006_v28, %v4005_v14  ;;  %v4008_v31 = vpop.f32.mrb[98].mxu1  ;;  %v3927_v34 = vpop.f32.mrb[99].mxu0 }
 0x1ba   :  { %v2601_v13 = vadd.f32 %v3925_v27, %v5338_v44  ;;  %v3928_v35 = vadd.f32 %v3927_v34, %v3926_v29  ;;  %v4009_v11 = vpop.f32.mrb[99].mxu1 }
 0x1bb   :  { %v4010_v40 = vadd.f32 %v4009_v11, %v4008_v31 }
 0x1bc   :  { %v5419_v36 = vadd.f32 %v4007_v30, %v2601_v13  ;;  %v2604_v8 = vadd.f32 %v3928_v35, %v5347_v33 }
 0x1be   :  { %v5422_v43 = vadd.f32 %v4010_v40, %v2604_v8  ;;  %v3929_v16 = vpop.f32.mrb[100].mxu0 }
 0x1bf   :  { %v4011_v37 = vpop.f32.mrb[100].mxu1  ;;  %v3930_v47 = vpop.f32.mrb[101].mxu0 }
 0x1c0   :  { %v3931_v53 = vadd.f32 %v3930_v47, %v3929_v16  ;;  %v4012_v54 = vpop.f32.mrb[101].mxu1  ;;  %v3932_v19 = vpop.f32.mrb[102].mxu0 }
 0x1c1   :  { %v4013_v55 = vadd.f32 %v4012_v54, %v4011_v37  ;;  %v4014_v56 = vpop.f32.mrb[102].mxu1  ;;  %v3933_v57 = vpop.f32.mrb[103].mxu0 }
 0x1c2   :  { %v2609_v44 = vadd.f32 %v3931_v53, %v5356_v32  ;;  %v3934_v58 = vadd.f32 %v3933_v57, %v3932_v19  ;;  %v4015_v60 = vpop.f32.mrb[103].mxu1 }
 0x1c3   :  { %v4016_v41 = vadd.f32 %v4015_v60, %v4014_v56 }
 0x1c4   :  { %v5425_v6 = vadd.f32 %v4013_v55, %v2609_v44  ;;  %v2612_v33 = vadd.f32 %v3934_v58, %v5362_v10 }
 0x1c6   :  { %v5428_v63 = vadd.f32 %v4016_v41, %v2612_v33  ;;  %v3935_v45 = vpop.f32.mrb[104].mxu0 }
 0x1c7   :  { %v4017_v4 = vpop.f32.mrb[104].mxu1  ;;  %v3936_v5 = vpop.f32.mrb[105].mxu0 }
 0x1c8   :  { %v3937_v17 = vadd.f32 %v3936_v5, %v3935_v45  ;;  %v4018_v18 = vpop.f32.mrb[105].mxu1  ;;  %v3938_v9 = vpop.f32.mrb[106].mxu0 }
 0x1c9   :  { %v4019_v15 = vadd.f32 %v4018_v18, %v4017_v4  ;;  %v4020_v59 = vpop.f32.mrb[106].mxu1  ;;  %v3939_v38 = vpop.f32.mrb[107].mxu0 }
 0x1ca   :  { %v2617_v32 = vadd.f32 %v3937_v17, %v5368_v39  ;;  %v3940_v46 = vadd.f32 %v3939_v38, %v3938_v9  ;;  %v4021_v12 = vpop.f32.mrb[107].mxu1 }
 0x1cb   :  { %v4022_v7 = vadd.f32 %v4021_v12, %v4020_v59 }
 0x1cc   :  { %v5431_v48 = vadd.f32 %v4019_v15, %v2617_v32  ;;  %v2620_v10 = vadd.f32 %v3940_v46, %v5371_v42 }
 0x1ce   :  { %v5434_v22 = vadd.f32 %v4022_v7, %v2620_v10  ;;  %v3941_v14 = vpop.f32.mrb[108].mxu0 }
 0x1cf   :  { %v4023_v26 = vpop.f32.mrb[108].mxu1  ;;  %v3942_v27 = vpop.f32.mrb[109].mxu0 }
 0x1d0   :  { %v3943_v28 = vadd.f32 %v3942_v27, %v3941_v14  ;;  %v4024_v29 = vpop.f32.mrb[109].mxu1  ;;  %v3944_v30 = vpop.f32.mrb[110].mxu0 }
 0x1d1   :  { %v4025_v31 = vadd.f32 %v4024_v29, %v4023_v26  ;;  %v4026_v34 = vpop.f32.mrb[110].mxu1  ;;  %v3945_v13 = vpop.f32.mrb[111].mxu0 }
 0x1d2   :  { %v2625_v39 = vadd.f32 %v3943_v28, %v5374_v0  ;;  %v3946_v35 = vadd.f32 %v3945_v13, %v3944_v30  ;;  %v4027_v11 = vpop.f32.mrb[111].mxu1 }
 0x1d3   :  { %v4028_v40 = vadd.f32 %v4027_v11, %v4026_v34 }
 0x1d4   :  { %v5437_v8 = vadd.f32 %v4025_v31, %v2625_v39  ;;  %v2628_v42 = vadd.f32 %v3946_v35, %v5377_v2 }
 0x1d6   :  { %v5440_v16 = vadd.f32 %v4028_v40, %v2628_v42  ;;  %v3947_v37 = vpop.f32.mrb[112].mxu0 }
 0x1d7   :  { %v4029_v47 = vpop.f32.mrb[112].mxu1  ;;  %v3948_v53 = vpop.f32.mrb[113].mxu0 }
 0x1d8   :  { %v3949_v54 = vadd.f32 %v3948_v53, %v3947_v37  ;;  %v4030_v19 = vpop.f32.mrb[113].mxu1  ;;  %v3950_v55 = vpop.f32.mrb[114].mxu0 }
 0x1d9   :  { %v4031_v56 = vadd.f32 %v4030_v19, %v4029_v47  ;;  %v4032_v57 = vpop.f32.mrb[114].mxu1  ;;  %v3951_v44 = vpop.f32.mrb[115].mxu0 }
 0x1da   :  { %v2633_v0 = vadd.f32 %v3949_v54, %v5380_v24  ;;  %v3952_v58 = vadd.f32 %v3951_v44, %v3950_v55  ;;  %v4033_v60 = vpop.f32.mrb[115].mxu1 }
 0x1db   :  { %v4034_v41 = vadd.f32 %v4033_v60, %v4032_v57 }
 0x1dc   :  { %v5443_v33 = vadd.f32 %v4031_v56, %v2633_v0  ;;  %v2636_v2 = vadd.f32 %v3952_v58, %v5383_v62 }
 0x1de   :  { %v5446_v45 = vadd.f32 %v4034_v41, %v2636_v2  ;;  %v3953_v4 = vpop.f32.mrb[116].mxu0 }
 0x1df   :  { %v4035_v5 = vpop.f32.mrb[116].mxu1  ;;  %v3954_v17 = vpop.f32.mrb[117].mxu0 }
 0x1e0   :  { %v3955_v18 = vadd.f32 %v3954_v17, %v3953_v4  ;;  %v4036_v9 = vpop.f32.mrb[117].mxu1  ;;  %v3956_v15 = vpop.f32.mrb[118].mxu0 }
 0x1e1   :  { %v4037_v59 = vadd.f32 %v4036_v9, %v4035_v5  ;;  %v4038_v38 = vpop.f32.mrb[118].mxu1  ;;  %v3957_v32 = vpop.f32.mrb[119].mxu0 }
 0x1e2   :  { %v2641_v24 = vadd.f32 %v3955_v18, %v5386_v49  ;;  %v3958_v46 = vadd.f32 %v3957_v32, %v3956_v15  ;;  %v4039_v12 = vpop.f32.mrb[119].mxu1 }
 0x1e3   :  { %v4040_v7 = vadd.f32 %v4039_v12, %v4038_v38 }
 0x1e4   :  { %v5449_v10 = vadd.f32 %v4037_v59, %v2641_v24  ;;  %v2644_v62 = vadd.f32 %v3958_v46, %v5389_v52 }
 0x1e6   :  { %v5452_v14 = vadd.f32 %v4040_v7, %v2644_v62  ;;  %v3959_v26 = vpop.f32.mrb[120].mxu0 }
 0x1e7   :  { %v4041_v27 = vpop.f32.mrb[120].mxu1  ;;  %v3960_v28 = vpop.f32.mrb[121].mxu0 }
 0x1e8   :  { %v3961_v29 = vadd.f32 %v3960_v28, %v3959_v26  ;;  %v4042_v30 = vpop.f32.mrb[121].mxu1  ;;  %v3962_v31 = vpop.f32.mrb[122].mxu0 }
 0x1e9   :  { %v4043_v34 = vadd.f32 %v4042_v30, %v4041_v27  ;;  %v4044_v13 = vpop.f32.mrb[122].mxu1  ;;  %v3963_v39 = vpop.f32.mrb[123].mxu0 }
 0x1ea   :  { %v2649_v49 = vadd.f32 %v3961_v29, %v5392_v1  ;;  %v3964_v35 = vadd.f32 %v3963_v39, %v3962_v31  ;;  %v4045_v11 = vpop.f32.mrb[123].mxu1 }
 0x1eb   :  { %v4046_v40 = vadd.f32 %v4045_v11, %v4044_v13 }
 0x1ec   :  { %v5455_v42 = vadd.f32 %v4043_v34, %v2649_v49  ;;  %v2652_v52 = vadd.f32 %v3964_v35, %v5395_v3 }
 0x1ee   :  { %v5458_v37 = vadd.f32 %v4046_v40, %v2652_v52  ;;  %v3965_v47 = vpop.f32.mrb[124].mxu0 }
 0x1ef   :  { %v4047_v53 = vpop.f32.mrb[124].mxu1  ;;  %v3966_v54 = vpop.f32.mrb[125].mxu0 }
 0x1f0   :  { %v3967_v19 = vadd.f32 %v3966_v54, %v3965_v47  ;;  %v4048_v55 = vpop.f32.mrb[125].mxu1  ;;  %v3968_v56 = vpop.f32.mrb[126].mxu0 }
 0x1f1   :  { %v4049_v57 = vadd.f32 %v4048_v55, %v4047_v53  ;;  %v4050_v44 = vpop.f32.mrb[126].mxu1  ;;  %v3969_v0 = vpop.f32.mrb[127].mxu0 }
 0x1f2   :  { %v2657_v1 = vadd.f32 %v3967_v19, %v5398_v51  ;;  %v3970_v58 = vadd.f32 %v3969_v0, %v3968_v56  ;;  %v4051_v60 = vpop.f32.mrb[127].mxu1 }
 0x1f3   :  { %v4052_v41 = vadd.f32 %v4051_v60, %v4050_v44 }
 0x1f4   :  { %v5461_v2 = vadd.f32 %v4049_v57, %v2657_v1  ;;  %v2660_v3 = vadd.f32 %v3970_v58, %v5401_v25 }
 0x1f6   :  { %v5464_v4 = vadd.f32 %v4052_v41, %v2660_v3  ;;  %v3971_v5 = vpop.f32.mrb[128].mxu0 }
 0x1f7   :  { %v4053_v17 = vpop.f32.mrb[128].mxu1  ;;  %v3972_v18 = vpop.f32.mrb[129].mxu0 }
 0x1f8   :  { %v3973_v9 = vadd.f32 %v3972_v18, %v3971_v5  ;;  %v4054_v15 = vpop.f32.mrb[129].mxu1  ;;  %v3974_v59 = vpop.f32.mrb[130].mxu0 }
 0x1f9   :  { %v4055_v38 = vadd.f32 %v4054_v15, %v4053_v17  ;;  %v4056_v32 = vpop.f32.mrb[130].mxu1  ;;  %v3975_v24 = vpop.f32.mrb[131].mxu0 }
 0x1fa   :  { %v2665_v51 = vadd.f32 %v3973_v9, %v5404_v50  ;;  %v4057_v46 = vpop.f32.mrb[131].mxu1 }
 0x1fc   :  { %v5467_v12 = vadd.f32 %v4055_v38, %v2665_v51 }
 0x1fe   :  { %v4075_v7 = vpop.f32.mrb[132].mxu0 }
 0x1ff   :  { %v4157_v62 = vpop.f32.mrb[132].mxu1  ;;  %v4076_v26 = vpop.f32.mrb[133].mxu0 }
 0x200   :  { %v4077_v25 = vadd.f32 %v4076_v26, %v4075_v7  ;;  %v4158_v27 = vpop.f32.mrb[133].mxu1  ;;  %v4078_v28 = vpop.f32.mrb[134].mxu0 }
 0x201   :  { %v4159_v29 = vadd.f32 %v4158_v27, %v4157_v62  ;;  %v4160_v30 = vpop.f32.mrb[134].mxu1  ;;  %v4079_v31 = vpop.f32.mrb[135].mxu0 }
 0x202   :  { %v2825_v34 = vadd.f32 %v4077_v25, %v5407_v61  ;;  %v4080_v13 = vadd.f32 %v4079_v31, %v4078_v28  ;;  %v4161_v39 = vpop.f32.mrb[135].mxu1 }
 0x203   :  { %v4162_v49 = vadd.f32 %v4161_v39, %v4160_v30 }
 0x204   :  { %v2945_v35 = vadd.f32 %v4159_v29, %v2825_v34  ;;  %v2828_v50 = vadd.f32 %v4080_v13, %v5410_v23 }
 0x206   :  { %v2948_v11 = vadd.f32 %v4162_v49, %v2828_v50  ;;  %v4081_v40 = vpop.f32.mrb[136].mxu0  ;;  %v3030_v53 = vmax.f32 %v2945_v35, 0.0 }
 0x207   :  { %v4163_v52 = vpop.f32.mrb[136].mxu1  ;;  %v4082_v47 = vpop.f32.mrb[137].mxu0 }
 0x208   :  { %v3031_v54 = vmax.f32 %v2948_v11, 0.0  ;;  %v4083_v19 = vadd.f32 %v4082_v47, %v4081_v40  ;;  %v4164_v55 = vpop.f32.mrb[137].mxu1  ;;  %v4084_v56 = vpop.f32.mrb[138].mxu0 }
 0x209   :  { %v4165_v57 = vadd.f32 %v4164_v55, %v4163_v52  ;;  %v4166_v44 = vpop.f32.mrb[138].mxu1  ;;  %v4085_v0 = vpop.f32.mrb[139].mxu0 }
 0x20a   :  { %v3511_v1 = vpack.c.bf16 %v3031_v54, %v3030_v53  ;;  %v2833_v61 = vadd.f32 %v4083_v19, %v5413_v20  ;;  %v4086_v58 = vadd.f32 %v4085_v0, %v4084_v56  ;;  %v4167_v60 = vpop.f32.mrb[139].mxu1 }
 0x20b   :  { %v4168_v41 = vadd.f32 %v4167_v60, %v4166_v44 }
 0x20c   :  { %3512 = vst [vmem:[%s5526_s3] sm:$0xff] %v3511_v1   ;;  %v2953_v23 = vadd.f32 %v4165_v57, %v2833_v61  ;;  %v2836_v3 = vadd.f32 %v4086_v58, %v5416_v21 }
 0x20e   :  { %v2956_v5 = vadd.f32 %v4168_v41, %v2836_v3  ;;  %v4087_v17 = vpop.f32.mrb[140].mxu0  ;;  %v3032_v15 = vmax.f32 %v2953_v23, 0.0 }
 0x20f   :  { %v4169_v18 = vpop.f32.mrb[140].mxu1  ;;  %v4088_v9 = vpop.f32.mrb[141].mxu0 }
 0x210   :  { %v3033_v59 = vmax.f32 %v2956_v5, 0.0  ;;  %v4089_v38 = vadd.f32 %v4088_v9, %v4087_v17  ;;  %v4170_v32 = vpop.f32.mrb[141].mxu1  ;;  %v4090_v24 = vpop.f32.mrb[142].mxu0 }
 0x211   :  { %v4171_v20 = vadd.f32 %v4170_v32, %v4169_v18  ;;  %v4172_v51 = vpop.f32.mrb[142].mxu1  ;;  %v4091_v46 = vpop.f32.mrb[143].mxu0 }
 0x212   :  { %v3516_v7 = vpack.c.bf16 %v3033_v59, %v3032_v15  ;;  %v2841_v62 = vadd.f32 %v4089_v38, %v5419_v36  ;;  %v4092_v26 = vadd.f32 %v4091_v46, %v4090_v24  ;;  %v4173_v25 = vpop.f32.mrb[143].mxu1 }
 0x213   :  { %v4174_v27 = vadd.f32 %v4173_v25, %v4172_v51 }
 0x214   :  { %3558 = vst [vmem:[%s5526_s3 + $0x8] sm:$0xff] %v3516_v7   ;;  %v2961_v21 = vadd.f32 %v4171_v20, %v2841_v62  ;;  %v2844_v28 = vadd.f32 %v4092_v26, %v5422_v43 }
 0x216   :  { %v2964_v29 = vadd.f32 %v4174_v27, %v2844_v28  ;;  %v4093_v30 = vpop.f32.mrb[144].mxu0  ;;  %v3034_v13 = vmax.f32 %v2961_v21, 0.0 }
 0x217   :  { %v4175_v31 = vpop.f32.mrb[144].mxu1  ;;  %v4094_v34 = vpop.f32.mrb[145].mxu0 }
 0x218   :  { %v3035_v39 = vmax.f32 %v2964_v29, 0.0  ;;  %v4095_v49 = vadd.f32 %v4094_v34, %v4093_v30  ;;  %v4176_v35 = vpop.f32.mrb[145].mxu1  ;;  %v4096_v50 = vpop.f32.mrb[146].mxu0 }
 0x219   :  { %v4177_v36 = vadd.f32 %v4176_v35, %v4175_v31  ;;  %v4178_v11 = vpop.f32.mrb[146].mxu1  ;;  %v4097_v40 = vpop.f32.mrb[147].mxu0 }
 0x21a   :  { %v3521_v52 = vpack.c.bf16 %v3035_v39, %v3034_v13  ;;  %v2849_v47 = vadd.f32 %v4095_v49, %v5425_v6  ;;  %v4098_v53 = vadd.f32 %v4097_v40, %v4096_v50  ;;  %v4179_v54 = vpop.f32.mrb[147].mxu1 }
 0x21b   :  { %v4180_v19 = vadd.f32 %v4179_v54, %v4178_v11 }
 0x21c   :  { %3559 = vst [vmem:[%s5526_s3 + $0x10] sm:$0xff] %v3521_v52   ;;  %v2969_v43 = vadd.f32 %v4177_v36, %v2849_v47  ;;  %v2852_v55 = vadd.f32 %v4098_v53, %v5428_v63 }
 0x21e   :  { %v2972_v56 = vadd.f32 %v4180_v19, %v2852_v55  ;;  %v4099_v57 = vpop.f32.mrb[148].mxu0  ;;  %v3036_v1 = vmax.f32 %v2969_v43, 0.0 }
 0x21f   :  { %v4181_v44 = vpop.f32.mrb[148].mxu1  ;;  %v4100_v0 = vpop.f32.mrb[149].mxu0 }
 0x220   :  { %v3037_v61 = vmax.f32 %v2972_v56, 0.0  ;;  %v4101_v58 = vadd.f32 %v4100_v0, %v4099_v57  ;;  %v4182_v60 = vpop.f32.mrb[149].mxu1  ;;  %v4102_v41 = vpop.f32.mrb[150].mxu0 }
 0x221   :  { %v4183_v6 = vadd.f32 %v4182_v60, %v4181_v44  ;;  %v4184_v23 = vpop.f32.mrb[150].mxu1  ;;  %v4103_v3 = vpop.f32.mrb[151].mxu0 }
 0x222   :  { %v3526_v5 = vpack.c.bf16 %v3037_v61, %v3036_v1  ;;  %v2857_v17 = vadd.f32 %v4101_v58, %v5431_v48  ;;  %v4104_v18 = vadd.f32 %v4103_v3, %v4102_v41  ;;  %v4185_v9 = vpop.f32.mrb[151].mxu1 }
 0x223   :  { %v4186_v15 = vadd.f32 %v4185_v9, %v4184_v23 }
 0x224   :  { %3560 = vst [vmem:[%s5526_s3 + $0x18] sm:$0xff] %v3526_v5   ;;  %v2977_v63 = vadd.f32 %v4183_v6, %v2857_v17  ;;  %v2860_v59 = vadd.f32 %v4104_v18, %v5434_v22 }
 0x226   :  { %v2980_v38 = vadd.f32 %v4186_v15, %v2860_v59  ;;  %v4105_v32 = vpop.f32.mrb[152].mxu0  ;;  %v3038_v51 = vmax.f32 %v2977_v63, 0.0 }
 0x227   :  { %v4187_v24 = vpop.f32.mrb[152].mxu1  ;;  %v4106_v20 = vpop.f32.mrb[153].mxu0 }
 0x228   :  { %v3039_v46 = vmax.f32 %v2980_v38, 0.0  ;;  %v4107_v7 = vadd.f32 %v4106_v20, %v4105_v32  ;;  %v4188_v62 = vpop.f32.mrb[153].mxu1  ;;  %v4108_v26 = vpop.f32.mrb[154].mxu0 }
 0x229   :  { %v4189_v48 = vadd.f32 %v4188_v62, %v4187_v24  ;;  %v4190_v25 = vpop.f32.mrb[154].mxu1  ;;  %v4109_v27 = vpop.f32.mrb[155].mxu0 }
 0x22a   :  { %v3531_v21 = vpack.c.bf16 %v3039_v46, %v3038_v51  ;;  %v2865_v28 = vadd.f32 %v4107_v7, %v5437_v8  ;;  %v4110_v29 = vadd.f32 %v4109_v27, %v4108_v26  ;;  %v4191_v30 = vpop.f32.mrb[155].mxu1 }
 0x22b   :  { %v4192_v31 = vadd.f32 %v4191_v30, %v4190_v25 }
 0x22c   :  { %3561 = vst [vmem:[%s5526_s3 + $0x20] sm:$0xff] %v3531_v21   ;;  %v2985_v22 = vadd.f32 %v4189_v48, %v2865_v28  ;;  %v2868_v34 = vadd.f32 %v4110_v29, %v5440_v16 }
 0x22e   :  { %v2988_v13 = vadd.f32 %v4192_v31, %v2868_v34  ;;  %v4111_v39 = vpop.f32.mrb[156].mxu0  ;;  %v3040_v50 = vmax.f32 %v2985_v22, 0.0 }
 0x22f   :  { %v4193_v49 = vpop.f32.mrb[156].mxu1  ;;  %v4112_v35 = vpop.f32.mrb[157].mxu0 }
 0x230   :  { %v3041_v36 = vmax.f32 %v2988_v13, 0.0  ;;  %v4113_v11 = vadd.f32 %v4112_v35, %v4111_v39  ;;  %v4194_v40 = vpop.f32.mrb[157].mxu1  ;;  %v4114_v52 = vpop.f32.mrb[158].mxu0 }
 0x231   :  { %v4195_v8 = vadd.f32 %v4194_v40, %v4193_v49  ;;  %v4196_v47 = vpop.f32.mrb[158].mxu1  ;;  %v4115_v53 = vpop.f32.mrb[159].mxu0 }
 0x232   :  { %v3536_v54 = vpack.c.bf16 %v3041_v36, %v3040_v50  ;;  %v2873_v19 = vadd.f32 %v4113_v11, %v5443_v33  ;;  %v4116_v43 = vadd.f32 %v4115_v53, %v4114_v52  ;;  %v4197_v55 = vpop.f32.mrb[159].mxu1 }
 0x233   :  { %v4198_v56 = vadd.f32 %v4197_v55, %v4196_v47 }
 0x234   :  { %3562 = vst [vmem:[%s5526_s3 + $0x28] sm:$0xff] %v3536_v54   ;;  %v2993_v16 = vadd.f32 %v4195_v8, %v2873_v19  ;;  %v2876_v57 = vadd.f32 %v4116_v43, %v5446_v45 }
 0x236   :  { %v2996_v44 = vadd.f32 %v4198_v56, %v2876_v57  ;;  %v4117_v0 = vpop.f32.mrb[160].mxu0  ;;  %v3042_v58 = vmax.f32 %v2993_v16, 0.0 }
 0x237   :  { %v4199_v1 = vpop.f32.mrb[160].mxu1  ;;  %v4118_v61 = vpop.f32.mrb[161].mxu0 }
 0x238   :  { %v3043_v60 = vmax.f32 %v2996_v44, 0.0  ;;  %v4119_v41 = vadd.f32 %v4118_v61, %v4117_v0  ;;  %v4200_v6 = vpop.f32.mrb[161].mxu1  ;;  %v4120_v23 = vpop.f32.mrb[162].mxu0 }
 0x239   :  { %v4201_v33 = vadd.f32 %v4200_v6, %v4199_v1  ;;  %v4202_v3 = vpop.f32.mrb[162].mxu1  ;;  %v4121_v5 = vpop.f32.mrb[163].mxu0 }
 0x23a   :  { %v3541_v17 = vpack.c.bf16 %v3043_v60, %v3042_v58  ;;  %v2881_v18 = vadd.f32 %v4119_v41, %v5449_v10  ;;  %v4122_v9 = vadd.f32 %v4121_v5, %v4120_v23  ;;  %v4203_v15 = vpop.f32.mrb[163].mxu1 }
 0x23b   :  { %v4204_v63 = vadd.f32 %v4203_v15, %v4202_v3 }
 0x23c   :  { %3563 = vst [vmem:[%s5526_s3 + $0x30] sm:$0xff] %v3541_v17   ;;  %v3001_v45 = vadd.f32 %v4201_v33, %v2881_v18  ;;  %v2884_v59 = vadd.f32 %v4122_v9, %v5452_v14 }
 0x23e   :  { %v3004_v38 = vadd.f32 %v4204_v63, %v2884_v59  ;;  %v4123_v32 = vpop.f32.mrb[164].mxu0  ;;  %v3044_v51 = vmax.f32 %v3001_v45, 0.0 }
 0x23f   :  { %v4205_v24 = vpop.f32.mrb[164].mxu1  ;;  %v4124_v20 = vpop.f32.mrb[165].mxu0 }
 0x240   :  { %v3045_v46 = vmax.f32 %v3004_v38, 0.0  ;;  %v4125_v7 = vadd.f32 %v4124_v20, %v4123_v32  ;;  %v4206_v62 = vpop.f32.mrb[165].mxu1  ;;  %v4126_v26 = vpop.f32.mrb[166].mxu0 }
 0x241   :  { %v4207_v10 = vadd.f32 %v4206_v62, %v4205_v24  ;;  %v4208_v48 = vpop.f32.mrb[166].mxu1  ;;  %v4127_v25 = vpop.f32.mrb[167].mxu0 }
 0x242   :  { %v3546_v27 = vpack.c.bf16 %v3045_v46, %v3044_v51  ;;  %v2889_v21 = vadd.f32 %v4125_v7, %v5455_v42  ;;  %v4128_v28 = vadd.f32 %v4127_v25, %v4126_v26  ;;  %v4209_v29 = vpop.f32.mrb[167].mxu1 }
 0x243   :  { %v4210_v30 = vadd.f32 %v4209_v29, %v4208_v48 }
 0x244   :  { %3564 = vst [vmem:[%s5526_s3 + $0x38] sm:$0xff] %v3546_v27   ;;  %v3009_v14 = vadd.f32 %v4207_v10, %v2889_v21  ;;  %v2892_v31 = vadd.f32 %v4128_v28, %v5458_v37 }
 0x246   :  { %v3012_v22 = vadd.f32 %v4210_v30, %v2892_v31  ;;  %v4129_v34 = vpop.f32.mrb[168].mxu0  ;;  %v3046_v49 = vmax.f32 %v3009_v14, 0.0 }
 0x247   :  { %v4211_v13 = vpop.f32.mrb[168].mxu1  ;;  %v4130_v39 = vpop.f32.mrb[169].mxu0 }
 0x248   :  { %v3047_v35 = vmax.f32 %v3012_v22, 0.0  ;;  %v4131_v50 = vadd.f32 %v4130_v39, %v4129_v34  ;;  %v4212_v36 = vpop.f32.mrb[169].mxu1  ;;  %v4132_v11 = vpop.f32.mrb[170].mxu0 }
 0x249   :  { %v4213_v42 = vadd.f32 %v4212_v36, %v4211_v13  ;;  %v4214_v40 = vpop.f32.mrb[170].mxu1  ;;  %v4133_v52 = vpop.f32.mrb[171].mxu0 }
 0x24a   :  { %v3551_v8 = vpack.c.bf16 %v3047_v35, %v3046_v49  ;;  %v2897_v47 = vadd.f32 %v4131_v50, %v5461_v2  ;;  %v4134_v53 = vadd.f32 %v4133_v52, %v4132_v11  ;;  %v4215_v54 = vpop.f32.mrb[171].mxu1 }
 0x24b   :  { %v4216_v19 = vadd.f32 %v4215_v54, %v4214_v40 }
 0x24c   :  { %3565 = vst [vmem:[%s5526_s3 + $0x40] sm:$0xff] %v3551_v8   ;;  %v3017_v37 = vadd.f32 %v4213_v42, %v2897_v47  ;;  %v2900_v43 = vadd.f32 %v4134_v53, %v5464_v4 }
 0x24e   :  { %v3020_v55 = vadd.f32 %v4216_v19, %v2900_v43  ;;  %v4135_v56 = vpop.f32.mrb[172].mxu0  ;;  %v3048_v44 = vmax.f32 %v3017_v37, 0.0 }
 0x24f   :  { %v4217_v16 = vpop.f32.mrb[172].mxu1  ;;  %v4136_v57 = vpop.f32.mrb[173].mxu0 }
 0x250   :  { %v3049_v0 = vmax.f32 %v3020_v55, 0.0  ;;  %v4137_v1 = vadd.f32 %v4136_v57, %v4135_v56  ;;  %v4218_v61 = vpop.f32.mrb[173].mxu1  ;;  %v4138_v58 = vpop.f32.mrb[174].mxu0 }
 0x251   :  { %v4219_v2 = vadd.f32 %v4218_v61, %v4217_v16  ;;  %v4220_v60 = vpop.f32.mrb[174].mxu1  ;;  %v4139_v41 = vpop.f32.mrb[175].mxu0 }
 0x252   :  { %v3556_v6 = vpack.c.bf16 %v3049_v0, %v3048_v44  ;;  %v2905_v23 = vadd.f32 %v4137_v1, %v5467_v12  ;;  %v4221_v33 = vpop.f32.mrb[175].mxu1 }
 0x254   :  { %3566 = vst [vmem:[%s5526_s3 + $0x48] sm:$0xff] %v3556_v6   ;;  %v3025_v4 = vadd.f32 %v4219_v2, %v2905_v23 }
 0x256   :  { %v3050_v3 = vmax.f32 %v3025_v4, 0.0 }
 0x258   :  { %v3507_v5 = vpack.c.bf16 %v3050_v3, %v3050_v3 }
 0x25a   :  { %3156 = vst [vmem:[%s5526_s3 + $0x50] sm:$0x1] %v3507_v5 }

// kernel: dqn_forward.6
= control target key start
LH: loop header
LB: loop body
LE: loop exit
PB: predicated region body
PF: predicated region fallthrough
CT: control target
= control target key end

     0   :  { %vm2160_vm0 = vmmov 0   ;;  %s2695_s1 = inlined_call_operand.vmem [shape: bf16[1152,128], index: 1, kind: input, shape index: {}]   ;;  %s2696_s0 = inlined_call_operand.vmem [shape: bf16[98,1152], index: 0, kind: input, shape index: {}]   ;;  %s2697_s2 = inlined_call_operand.vmem [shape: f32[1,128], index: 2, kind: input, shape index: {}]   ;;  %s2698_s3 = inlined_call_operand.vmem [shape: bf16[98,128], index: 3, kind: output, shape index: {}]  }
   0x1   :  { %v2000_v0 = vld [vmem:[%s2695_s1 + $0x40] sm:$0xff]   ;;  %v2002_v2 = vld [vmem:[%s2695_s1 + $0x48] sm:$0xff]   ;;  %v2004_v4 = vld [vmem:[%s2695_s1 + $0x50] sm:$0xff]  }
   0x2   :  { %v2001_v1 = vld [vmem:[%s2695_s1] sm:$0xff]   ;;  %1982 = vmatprep.subr.bf16.mxu1 %v2000_v0  ;;  %1691 = vmatprep.subr.bf16.mxu0 %v2000_v0  ;;  %v2003_v3 = vld [vmem:[%s2695_s1 + $0x8] sm:$0xff]   ;;  %v2005_v5 = vld [vmem:[%s2695_s1 + $0x10] sm:$0xff]  }
   0x3   :  { %1990 = vmatpush3.bf16.msra.mxu1 %v2001_v1  ;;  %1692 = vmatpush3.bf16.msra.mxu0 %v2001_v1  ;;  %v2006_v6 = vld [vmem:[%s2695_s1 + $0x58] sm:$0xff]   ;;  %v2008_v8 = vld [vmem:[%s2695_s1 + $0x60] sm:$0xff]   ;;  %v2010_v10 = vld [vmem:[%s2695_s1 + $0x68] sm:$0xff]  }
   0x4   :  { %1983 = vmatprep.subr.bf16.mxu1 %v2002_v2  ;;  %1693 = vmatprep.subr.bf16.mxu0 %v2002_v2  ;;  %v2007_v7 = vld [vmem:[%s2695_s1 + $0x18] sm:$0xff]   ;;  %v2009_v9 = vld [vmem:[%s2695_s1 + $0x20] sm:$0xff]   ;;  %v2011_v12 = vld [vmem:[%s2695_s1 + $0x28] sm:$0xff]  }
   0x5   :  { %v2018_v11 = vld [vmem:[%s2696_s0 + $0x124] ss:$36 sps:$4 sm:$0xff]   ;;  %v2012_v14 = vld [vmem:[%s2695_s1 + $0x70] sm:$0xff]   ;;  %v2014_v16 = vld [vmem:[%s2695_s1 + $0x78] sm:$0xff]  }
   0x6   :  { %v2022_v13 = vld [vmem:[%s2696_s0 + $0x4] ss:$36 sps:$4 sm:$0xff]   ;;  %1035 = vmatprep.mubr.bf16.mxu1 %v2018_v11  ;;  %v2013_v15 = vld [vmem:[%s2695_s1 + $0x30] sm:$0xff]   ;;  %v2015_v17 = vld [vmem:[%s2695_s1 + $0x38] sm:$0xff]  }
   0x7   :  { %1991 = vmatpush3.bf16.msra.mxu1 %v2003_v3  ;;  %1694 = vmatpush3.bf16.msra.mxu0 %v2003_v3  ;;  %v2019_v18 = vld [vmem:[%s2695_s1 + $0xc0] sm:$0xff]   ;;  %v2026_v24 = vld [vmem:[%s2695_s1 + $0xc8] sm:$0xff]   ;;  %v2030_v30 = vld [vmem:[%s2695_s1 + $0xd0] sm:$0xff]  }
   0x8   :  { %1984 = vmatprep.subr.bf16.mxu1 %v2004_v4  ;;  %1695 = vmatprep.subr.bf16.mxu0 %v2004_v4  ;;  %v2016_v19 = vld [vmem:[%s2696_s0 + $0x120] ss:$36 sps:$4 sm:$0xff]   ;;  %v2028_v25 = vld [vmem:[%s2695_s1 + $0x148] sm:$0xff]   ;;  %v2035_v31 = vld [vmem:[%s2695_s1 + $0x150] sm:$0xff]  }
   0x9   :  { %1003 = vmatprep.mubr.bf16.mxu0 %v2022_v13  ;;  %v2020_v20 = vld [vmem:[%s2696_s0] ss:$36 sps:$4 sm:$0xff]   ;;  %v2031_v26 = vld [vmem:[%s2696_s0 + $0x4c] ss:$36 sps:$4 sm:$0xff]   ;;  %v2037_v36 = vld [vmem:[%s2695_s1 + $0xd8] sm:$0xff]  }
   0xa   :  { %v2024_v21 = vld [vmem:[%s2695_s1 + $0x140] sm:$0xff]   ;;  %v2027_v27 = vld [vmem:[%s2695_s1 + $0x88] sm:$0xff]   ;;  %v2033_v32 = vld [vmem:[%s2695_s1 + $0x90] sm:$0xff]  }
   0xb   :  { %1992 = vmatpush3.bf16.msra.mxu1 %v2005_v5  ;;  %1696 = vmatpush3.bf16.msra.mxu0 %v2005_v5  ;;  %v2023_v22 = vld [vmem:[%s2695_s1 + $0x80] sm:$0xff]   ;;  %v2038_v28 = vld [vmem:[%s2696_s0 + $0x16c] ss:$36 sps:$4 sm:$0xff]   ;;  %v2042_v37 = vld [vmem:[%s2695_s1 + $0x158] sm:$0xff]  }
   0xc   :  { %1985 = vmatprep.subr.bf16.mxu1 %v2006_v6  ;;  %1697 = vmatprep.subr.bf16.mxu0 %v2006_v6  ;;  %v2025_v23 = vld [vmem:[%s2695_s1 + $0x100] sm:$0xff]   ;;  %v2029_v29 = vld [vmem:[%s2695_s1 + $0x108] sm:$0xff]   ;;  %v2036_v35 = vld [vmem:[%s2695_s1 + $0x110] sm:$0xff]  }
   0xd   :  { %v2034_v33 = vld [vmem:[%s2696_s0 + $0x48] ss:$36 sps:$4 sm:$0xff]   ;;  %v2040_v38 = vld [vmem:[%s2695_s1 + $0x98] sm:$0xff]   ;;  %v2044_v41 = vld [vmem:[%s2695_s1 + $0xe0] sm:$0xff]  }
   0xe   :  { %v2041_v34 = vld [vmem:[%s2696_s0 + $0x168] ss:$36 sps:$4 sm:$0xff]   ;;  %v2045_v39 = vld [vmem:[%s2696_s0 + $0x94] ss:$36 sps:$4 sm:$0xff]   ;;  %v2049_v43 = vld [vmem:[%s2695_s1 + $0x160] sm:$0xff]  }
   0xf   :  { %1993 = vmatpush3.bf16.msra.mxu1 %v2007_v7  ;;  %1698 = vmatpush3.bf16.msra.mxu0 %v2007_v7  ;;  %v2043_v40 = vld [vmem:[%s2695_s1 + $0x118] sm:$0xff]   ;;  %v75_v42 = vld [vmem:[%s2696_s0 + $0x1b0] sm:$0x11]  ;;  %v2047_v45 = vld [vmem:[%s2695_s1 + $0xa0] sm:$0xff]   ;;  %v2159_v7 = vmov 0.0  }
  0x10   :  { %1986 = vmatprep.subr.bf16.mxu1 %v2008_v8  ;;  %1699 = vmatprep.subr.bf16.mxu0 %v2008_v8  ;;  %v1550_v44 = vcombine.high %v75_v42, %v75_v42  ;;  %v2048_v46 = vld [vmem:[%s2696_s0 + $0x90] ss:$36 sps:$4 sm:$0xff]   ;;  %v2050_v47 = vld [vmem:[%s2695_s1 + $0x120] sm:$0xff]   ;;  %v1549_v48 = vcombine.low %v75_v42, %v75_v42  ;;  %v2051_v49 = vld [vmem:[%s2695_s1 + $0xe8] sm:$0xff]  }
  0x11   :  { %v2055_v50 = vld [vmem:[%s2695_s1 + $0x168] sm:$0xff]   ;;  %v2058_v52 = vld [vmem:[%s2696_s0 + $0xdc] ss:$36 sps:$4 sm:$0xff]   ;;  %v2057_v54 = vld [vmem:[%s2695_s1 + $0xf0] sm:$0xff]  }
  0x12   :  { %v2053_v51 = vld [vmem:[%s2695_s1 + $0xa8] sm:$0xff]   ;;  %v2062_v55 = vld [vmem:[%s2695_s1 + $0x170] sm:$0xff]   ;;  %v2061_v57 = vld [vmem:[%s2696_s0 + $0xd8] ss:$36 sps:$4 sm:$0xff]  }
  0x13   :  { %1994 = vmatpush3.bf16.msra.mxu1 %v2009_v9  ;;  %1700 = vmatpush3.bf16.msra.mxu0 %v2009_v9  ;;  %v2056_v53 = vld [vmem:[%s2695_s1 + $0x128] sm:$0xff]   ;;  %v2060_v56 = vld [vmem:[%s2695_s1 + $0xb0] sm:$0xff]   ;;  %v2064_v59 = vld [vmem:[%s2695_s1 + $0xf8] sm:$0xff]  }
  0x14   :  { %1987 = vmatprep.subr.bf16.mxu1 %v2010_v10  ;;  %1701 = vmatprep.subr.bf16.mxu0 %v2010_v10  ;;  %v2063_v58 = vld [vmem:[%s2695_s1 + $0x130] sm:$0xff]   ;;  %v2066_v60 = vld [vmem:[%s2695_s1 + $0x178] sm:$0xff]   ;;  %v2071_v0 = vld [vmem:[%s2695_s1 + $0x1c0] sm:$0xff]  }
  0x15   :  { %v2069_v61 = vld [vmem:[%s2696_s0 + $0xc] ss:$36 sps:$4 sm:$0xff]   ;;  %v2065_v62 = vld [vmem:[%s2695_s1 + $0xb8] sm:$0xff]   ;;  %v2075_v4 = vld [vmem:[%s2695_s1 + $0x180] sm:$0xff]  }
  0x16   :  { %v2070_v63 = vld [vmem:[%s2695_s1 + $0x138] sm:$0xff]   ;;  %v2067_v2 = vld [vmem:[%s2696_s0 + $0x8] ss:$36 sps:$4 sm:$0xff]   ;;  %v2072_v3 = vld [vmem:[%s2696_s0 + $0x10] ss:$36 sps:$4 sm:$0xff]  }
  0x17   :  { %1995 = vmatpush3.bf16.msra.mxu1 %v2011_v12  ;;  %1702 = vmatpush3.bf16.msra.mxu0 %v2011_v12  ;;  %v2074_v1 = vld [vmem:[%s2696_s0 + $0x14] ss:$36 sps:$4 sm:$0xff]   ;;  %v2076_v5 = vld [vmem:[%s2695_s1 + $0x200] sm:$0xff]   ;;  %v2079_v8 = vld [vmem:[%s2695_s1 + $0x1c8] sm:$0xff]  }
  0x18   :  { %1988 = vmatprep.subr.bf16.mxu1 %v2012_v14  ;;  %1703 = vmatprep.subr.bf16.mxu0 %v2012_v14  ;;  %v2077_v6 = vld [vmem:[%s2696_s0 + $0x54] ss:$36 sps:$4 sm:$0xff]   ;;  %v2081_v9 = vld [vmem:[%s2695_s1 + $0x188] sm:$0xff]   ;;  %v2082_v10 = vld [vmem:[%s2696_s0 + $0x5c] ss:$36 sps:$4 sm:$0xff]  }
  0x19   :  { %v2085_v11 = vld [vmem:[%s2695_s1 + $0x208] sm:$0xff]   ;;  %v2086_v12 = vld [vmem:[%s2695_s1 + $0x1d0] sm:$0xff]   ;;  %v2084_v14 = vld [vmem:[%s2696_s0 + $0x58] ss:$36 sps:$4 sm:$0xff]  }
  0x1a   :  { %v2080_v13 = vld [vmem:[%s2696_s0 + $0x50] ss:$36 sps:$4 sm:$0xff]   ;;  %v2128_v42 = vld [vmem:[%s2695_s1 + $0x1f8] sm:$0xff]  }
  0x1b   :  { %1996 = vmatpush3.bf16.msra.mxu1 %v2013_v15  ;;  %1704 = vmatpush3.bf16.msra.mxu0 %v2013_v15  ;;  %v2087_v15 = vld [vmem:[%s2696_s0 + $0x9c] ss:$36 sps:$4 sm:$0xff]  }
  0x1c   :  { %1989 = vmatprep.subr.bf16.mxu1 %v2014_v16  ;;  %1705 = vmatprep.subr.bf16.mxu0 %v2014_v16  ;;  %v2089_v16 = vld [vmem:[%s2695_s1 + $0x190] sm:$0xff]  }
  0x1f   :  { %1997 = vmatpush3.bf16.msra.mxu1 %v2015_v17  ;;  %1706 = vmatpush3.bf16.msra.mxu0 %v2015_v17  ;;  %v2091_v17 = vld [vmem:[%s2696_s0 + $0xa4] ss:$36 sps:$4 sm:$0xff]  }
  0x20   :  { %1749 = vmatprep.subr.bf16.mxu1 %v2019_v18  ;;  %1807 = vmatprep.subr.bf16.mxu0 %v2024_v21  ;;  %v2094_v18 = vld [vmem:[%s2695_s1 + $0x210] sm:$0xff]   ;;  %v2090_v21 = vld [vmem:[%s2696_s0 + $0x98] ss:$36 sps:$4 sm:$0xff]  }
  0x22   :  { %1036 = vmatmul.mubr.bf16.vlgmr.msra.gmra.mrb[0].mxu1 %v2016_v19  ;;  %1004 = vmatmul.mubr.bf16.vlgmr.msra.gmra.mrb[0].mxu0 %v2020_v20  ;;  %v2095_v19 = vld [vmem:[%s2695_s1 + $0x1d8] sm:$0xff]  }
  0x23   :  { %1750 = vmatpush3.bf16.msra.mxu1 %v2023_v22  ;;  %1808 = vmatpush3.bf16.msra.mxu0 %v2025_v23  ;;  %v2096_v20 = vld [vmem:[%s2695_s1 + $0x198] sm:$0xff]   ;;  %v2093_v22 = vld [vmem:[%s2696_s0 + $0xa0] ss:$36 sps:$4 sm:$0xff]  }
  0x24   :  { %1751 = vmatprep.subr.bf16.mxu1 %v2026_v24  ;;  %1809 = vmatprep.subr.bf16.mxu0 %v2028_v25  ;;  %v2097_v23 = vld [vmem:[%s2696_s0 + $0xe4] ss:$36 sps:$4 sm:$0xff]   ;;  %v2100_v24 = vld [vmem:[%s2696_s0 + $0xec] ss:$36 sps:$4 sm:$0xff]   ;;  %v2103_v25 = vld [vmem:[%s2695_s1 + $0x218] sm:$0xff]  }
  0x25   :  { %1011 = vmatprep.mubr.bf16.mxu0 %v2031_v26  ;;  %1043 = vmatprep.mubr.bf16.mxu1 %v2038_v28  ;;  %v2104_v26 = vld [vmem:[%s2695_s1 + $0x1e0] sm:$0xff]  }
  0x26   :  { %v2099_v28 = vld [vmem:[%s2696_s0 + $0xe0] ss:$36 sps:$4 sm:$0xff]  }
  0x27   :  { %1752 = vmatpush3.bf16.msra.mxu1 %v2027_v27  ;;  %1810 = vmatpush3.bf16.msra.mxu0 %v2029_v29  ;;  %v2105_v27 = vld [vmem:[%s2695_s1 + $0x1a0] sm:$0xff]   ;;  %v2102_v29 = vld [vmem:[%s2696_s0 + $0xe8] ss:$36 sps:$4 sm:$0xff]  }
  0x28   :  { %1753 = vmatprep.subr.bf16.mxu1 %v2030_v30  ;;  %1811 = vmatprep.subr.bf16.mxu0 %v2035_v31  ;;  %v2112_v30 = vld [vmem:[%s2695_s1 + $0x220] sm:$0xff]   ;;  %v2113_v31 = vld [vmem:[%s2695_s1 + $0x1e8] sm:$0xff]  }
  0x2a   :  { %1012 = vmatmul.mubr.bf16.gmra.mrb[4].mxu0 %v2034_v33  ;;  %1044 = vmatmul.mubr.bf16.gmra.mrb[4].mxu1 %v2041_v34  ;;  %v2106_v33 = vld [vmem:[%s2696_s0 + $0x12c] ss:$36 sps:$4 sm:$0xff]   ;;  %v2109_v34 = vld [vmem:[%s2696_s0 + $0x134] ss:$36 sps:$4 sm:$0xff]  }
  0x2b   :  { %1754 = vmatpush3.bf16.msra.mxu1 %v2033_v32  ;;  %1812 = vmatpush3.bf16.msra.mxu0 %v2036_v35  ;;  %v2114_v32 = vld [vmem:[%s2695_s1 + $0x1a8] sm:$0xff]  }
  0x2c   :  { %1755 = vmatprep.subr.bf16.mxu1 %v2037_v36  ;;  %1813 = vmatprep.subr.bf16.mxu0 %v2042_v37  ;;  %v2120_v35 = vld [vmem:[%s2695_s1 + $0x228] sm:$0xff]   ;;  %v2122_v36 = vld [vmem:[%s2695_s1 + $0x1f0] sm:$0xff]  }
  0x2d   :  { %1019 = vmatprep.mubr.bf16.mxu0 %v2045_v39  ;;  %1051 = vmatprep.mubr.bf16.mxu1 %v1550_v44  ;;  %v2108_v37 = vld [vmem:[%s2696_s0 + $0x128] ss:$36 sps:$4 sm:$0xff]   ;;  %v2123_v39 = vld [vmem:[%s2695_s1 + $0x1b0] sm:$0xff]   ;;  %v2130_v44 = vld [vmem:[%s2695_s1 + $0x1b8] sm:$0xff]  }
  0x2f   :  { %1756 = vmatpush3.bf16.msra.mxu1 %v2040_v38  ;;  %1814 = vmatpush3.bf16.msra.mxu0 %v2043_v40  ;;  %v2111_v38 = vld [vmem:[%s2696_s0 + $0x130] ss:$36 sps:$4 sm:$0xff]  }
  0x30   :  { %1757 = vmatprep.subr.bf16.mxu1 %v2044_v41  ;;  %1815 = vmatprep.subr.bf16.mxu0 %v2049_v43  ;;  %v2115_v40 = vld [vmem:[%s2696_s0 + $0x174] ss:$36 sps:$4 sm:$0xff]   ;;  %v2118_v43 = vld [vmem:[%s2696_s0 + $0x17c] ss:$36 sps:$4 sm:$0xff]  }
  0x31   :  { %v2126_v41 = vld [vmem:[%s2695_s1 + $0x230] sm:$0xff]  }
  0x32   :  { %1020 = vmatmul.mubr.bf16.gmra.mrb[8].mxu0 %v2048_v46  ;;  %1052 = vmatmul.mubr.bf16.gmra.mrb[8].mxu1 %v1549_v48  ;;  %v76_v46 = vld [vmem:[%s2696_s0 + $0x1b8] sm:$0x11]  ;;  %v2117_v48 = vld [vmem:[%s2696_s0 + $0x170] ss:$36 sps:$4 sm:$0xff]  }
  0x33   :  { %1758 = vmatpush3.bf16.msra.mxu1 %v2047_v45  ;;  %1816 = vmatpush3.bf16.msra.mxu0 %v2050_v47  ;;  %v2134_v45 = vld [vmem:[%s2695_s1 + $0x238] sm:$0xff]   ;;  %v77_v47 = vld [vmem:[%s2696_s0 + $0x1c0] sm:$0x11] }
  0x34   :  { %1759 = vmatprep.subr.bf16.mxu1 %v2051_v49  ;;  %1817 = vmatprep.subr.bf16.mxu0 %v2055_v50  ;;  %v2121_v49 = vld [vmem:[%s2696_s0 + $0x178] ss:$36 sps:$4 sm:$0xff]   ;;  %v1552_v50 = vcombine.high %v76_v46, %v76_v46 }
  0x35   :  { %1027 = vmatprep.mubr.bf16.mxu0 %v2058_v52  ;;  %1091 = vmatprep.mubr.bf16.mxu1 %v2069_v61  ;;  %v1551_v52 = vcombine.low %v76_v46, %v76_v46  ;;  %v2142_v61 = vld [vmem:[%s2696_s0 + $0xa8] ss:$36 sps:$4 sm:$0xff]  }
  0x37   :  { %1760 = vmatpush3.bf16.msra.mxu1 %v2053_v51  ;;  %1818 = vmatpush3.bf16.msra.mxu0 %v2056_v53  ;;  %v1554_v51 = vcombine.high %v77_v47, %v77_v47  ;;  %v1553_v53 = vcombine.low %v77_v47, %v77_v47 }
  0x38   :  { %1761 = vmatprep.subr.bf16.mxu1 %v2057_v54  ;;  %1819 = vmatprep.subr.bf16.mxu0 %v2062_v55  ;;  %v2133_v54 = vld [vmem:[%s2696_s0 + $0x1c] ss:$36 sps:$4 sm:$0xff]  }
  0x39   :  { %v2131_v55 = vld [vmem:[%s2696_s0 + $0x18] ss:$36 sps:$4 sm:$0xff]  }
  0x3a   :  { %1028 = vmatmul.mubr.bf16.gmra.mrb[12].mxu0 %v2061_v57  ;;  %v2136_v57 = vld [vmem:[%s2696_s0 + $0x64] ss:$36 sps:$4 sm:$0xff]  }
  0x3b   :  { %1762 = vmatpush3.bf16.msra.mxu1 %v2060_v56  ;;  %1820 = vmatpush3.bf16.msra.mxu0 %v2063_v58  ;;  %v2135_v56 = vld [vmem:[%s2696_s0 + $0x20] ss:$36 sps:$4 sm:$0xff]  }
  0x3c   :  { %1763 = vmatprep.subr.bf16.mxu1 %v2064_v59  ;;  %1821 = vmatprep.subr.bf16.mxu0 %v2066_v60  ;;  %v2138_v58 = vld [vmem:[%s2696_s0 + $0x60] ss:$36 sps:$4 sm:$0xff]   ;;  %v2139_v59 = vld [vmem:[%s2696_s0 + $0x68] ss:$36 sps:$4 sm:$0xff]  }
  0x3d   :  { %1179 = vmatprep.mubr.bf16.mxu0 %v2074_v1  ;;  %v2140_v60 = vld [vmem:[%s2696_s0 + $0xac] ss:$36 sps:$4 sm:$0xff]   ;;  %v2147_v1 = vld [vmem:[%s2696_s0 + $0xf8] ss:$36 sps:$4 sm:$0xff]  }
  0x3f   :  { %1764 = vmatpush3.bf16.msra.mxu1 %v2065_v62  ;;  %1822 = vmatpush3.bf16.msra.mxu0 %v2070_v63  ;;  %v2143_v62 = vld [vmem:[%s2696_s0 + $0xb0] ss:$36 sps:$4 sm:$0xff]  }
  0x40   :  { %1865 = vmatprep.subr.bf16.mxu1 %v2071_v0  ;;  %1938 = vmatprep.subr.bf16.mxu0 %v2159_v7  ;;  %v2144_v63 = vld [vmem:[%s2696_s0 + $0xf4] ss:$36 sps:$4 sm:$0xff]  }
  0x41   :  { %v2146_v0 = vld [vmem:[%s2696_s0 + $0xf0] ss:$36 sps:$4 sm:$0xff]  }
  0x42   :  { %1092 = vmatmul.mubr.bf16.vlgmr.msra.gmra.mrb[12].mxu1 %v2067_v2  ;;  %1180 = vmatmul.mubr.bf16.vlgmr.msra.gmra.mrb[16].mxu0 %v2072_v3  ;;  %v2148_v2 = vld [vmem:[%s2696_s0 + $0x13c] ss:$36 sps:$4 sm:$0xff]  }
  0x43   :  { %1866 = vmatpush3.bf16.msra.mxu1 %v2075_v4  ;;  %1939 = vmatpush3.bf16.msra.mxu0 %v2076_v5  ;;  %v2150_v3 = vld [vmem:[%s2696_s0 + $0x138] ss:$36 sps:$4 sm:$0xff]   ;;  %v2151_v4 = vld [vmem:[%s2696_s0 + $0x140] ss:$36 sps:$4 sm:$0xff]  }
  0x44   :  { %1099 = vmatprep.mubr.bf16.mxu1 %v2077_v6  ;;  %1867 = vmatprep.subr.bf16.mxu1 %v2079_v8  ;;  %v2152_v5 = vld [vmem:[%s2696_s0 + $0x184] ss:$36 sps:$4 sm:$0xff]  }
  0x45   :  { %1187 = vmatprep.mubr.bf16.mxu0 %v2082_v10  ;;  %1940 = vmatprep.subr.bf16.mxu0 %v2159_v7  ;;  %v78_v6 = vld [vmem:[%s2696_s0 + $0x1c8] sm:$0x11]  ;;  %v2154_v8 = vld [vmem:[%s2696_s0 + $0x180] ss:$36 sps:$4 sm:$0xff]  }
  0x46   :  { %v1556_v10 = vcombine.high %v78_v6, %v78_v6 }
  0x47   :  { %1868 = vmatpush3.bf16.msra.mxu1 %v2081_v9  ;;  %1941 = vmatpush3.bf16.msra.mxu0 %v2085_v11  ;;  %v2155_v9 = vld [vmem:[%s2696_s0 + $0x188] ss:$36 sps:$4 sm:$0xff]   ;;  %v1555_v11 = vcombine.low %v78_v6, %v78_v6 }
  0x48   :  { %1869 = vmatprep.subr.bf16.mxu1 %v2086_v12  ;;  %1942 = vmatprep.subr.bf16.mxu0 %v2159_v7  ;;  %v2158_v12 = vld [vmem:[%s2696_s0 + $0x1d0] ss:$0 sps:$4 sm:$0x11]  }
  0x4a   :  { %1100 = vmatmul.mubr.bf16.gmra.mrb[16].mxu1 %v2080_v13  ;;  %1188 = vmatmul.mubr.bf16.gmra.mrb[20].mxu0 %v2084_v14 }
  0x4b   :  { %1107 = vmatprep.mubr.bf16.mxu1 %v2087_v15  ;;  %1870 = vmatpush3.bf16.msra.mxu1 %v2089_v16 }
  0x4c   :  { %1195 = vmatprep.mubr.bf16.mxu0 %v2091_v17  ;;  %1943 = vmatpush3.bf16.msra.mxu0 %v2094_v18 }
  0x4d   :  { %1871 = vmatprep.subr.bf16.mxu1 %v2095_v19  ;;  %1944 = vmatprep.subr.bf16.mxu0 %v2159_v7 }
  0x4f   :  { %1872 = vmatpush3.bf16.msra.mxu1 %v2096_v20 }
  0x50   :  { %1945 = vmatpush3.bf16.msra.mxu0 %v2103_v25  ;;  %1873 = vmatprep.subr.bf16.mxu1 %v2104_v26 }
  0x51   :  { %1946 = vmatprep.subr.bf16.mxu0 %v2159_v7 }
  0x52   :  { %1108 = vmatmul.mubr.bf16.gmra.mrb[20].mxu1 %v2090_v21  ;;  %1196 = vmatmul.mubr.bf16.gmra.mrb[24].mxu0 %v2093_v22 }
  0x53   :  { %1115 = vmatprep.mubr.bf16.mxu1 %v2097_v23  ;;  %1203 = vmatprep.mubr.bf16.mxu0 %v2100_v24 }
  0x54   :  { %1874 = vmatpush3.bf16.msra.mxu1 %v2105_v27  ;;  %1947 = vmatpush3.bf16.msra.mxu0 %v2112_v30 }
  0x55   :  { %1875 = vmatprep.subr.bf16.mxu1 %v2113_v31  ;;  %1948 = vmatprep.subr.bf16.mxu0 %v2159_v7 }
  0x58   :  { %1876 = vmatpush3.bf16.msra.mxu1 %v2114_v32  ;;  %1949 = vmatpush3.bf16.msra.mxu0 %v2120_v35 }
  0x59   :  { %1877 = vmatprep.subr.bf16.mxu1 %v2122_v36  ;;  %1950 = vmatprep.subr.bf16.mxu0 %v2159_v7 }
  0x5a   :  { %1116 = vmatmul.mubr.bf16.gmra.mrb[24].mxu1 %v2099_v28  ;;  %1204 = vmatmul.mubr.bf16.gmra.mrb[28].mxu0 %v2102_v29 }
  0x5b   :  { %1123 = vmatprep.mubr.bf16.mxu1 %v2106_v33  ;;  %1211 = vmatprep.mubr.bf16.mxu0 %v2109_v34 }
  0x5c   :  { %1878 = vmatpush3.bf16.msra.mxu1 %v2123_v39  ;;  %1951 = vmatpush3.bf16.msra.mxu0 %v2126_v41 }
  0x5d   :  { %1879 = vmatprep.subr.bf16.mxu1 %v2128_v42  ;;  %1952 = vmatprep.subr.bf16.mxu0 %v2159_v7 }
  0x60   :  { %1880 = vmatpush3.bf16.msra.mxu1 %v2130_v44  ;;  %1953 = vmatpush3.bf16.msra.mxu0 %v2134_v45 }
  0x62   :  { %1124 = vmatmul.mubr.bf16.gmra.mrb[28].mxu1 %v2108_v37  ;;  %1212 = vmatmul.mubr.bf16.gmra.mrb[32].mxu0 %v2111_v38 }
  0x63   :  { %1131 = vmatprep.mubr.bf16.mxu1 %v2115_v40  ;;  %1219 = vmatprep.mubr.bf16.mxu0 %v2118_v43 }
  0x6a   :  { %1132 = vmatmul.mubr.bf16.gmra.mrb[32].mxu1 %v2117_v48  ;;  %1220 = vmatmul.mubr.bf16.gmra.mrb[36].mxu0 %v2121_v49 }
  0x6b   :  { %1139 = vmatprep.mubr.bf16.mxu1 %v1552_v50  ;;  %1227 = vmatprep.mubr.bf16.mxu0 %v1554_v51 }
  0x72   :  { %1140 = vmatmul.mubr.bf16.gmra.mrb[36].mxu1 %v1551_v52  ;;  %1228 = vmatmul.mubr.bf16.gmra.mrb[40].mxu0 %v1553_v53 }
  0x73   :  { %1267 = vmatprep.mubr.bf16.mxu1 %v2133_v54  ;;  %1954 = vmatprep.mubr.msk.bf16.mxu0 %vm2160_vm0, %v2159_v7 }
  0x7a   :  { %1268 = vmatmul.mubr.bf16.vlgmr.msra.gmra.mrb[40].mxu1 %v2131_v55  ;;  %1955 = vmatmul.mubr.bf16.vlgmr.msra.gmra.mrb[44].mxu0 %v2135_v56  ;;  %v2613_v55 = vld [vmem:[%s2697_s2] ss:$0 sm:$0xff] }
  0x7b   :  { %1275 = vmatprep.mubr.bf16.mxu1 %v2136_v57  ;;  %1958 = vmatprep.mubr.msk.bf16.mxu0 %vm2160_vm0, %v2159_v7 }
  0x82   :  { %1276 = vmatmul.mubr.bf16.gmra.mrb[44].mxu1 %v2138_v58  ;;  %1959 = vmatmul.mubr.bf16.gmra.mrb[48].mxu0 %v2139_v59 }
  0x83   :  { %1283 = vmatprep.mubr.bf16.mxu1 %v2140_v60  ;;  %1962 = vmatprep.mubr.msk.bf16.mxu0 %vm2160_vm0, %v2159_v7 }
  0x8a   :  { %1284 = vmatmul.mubr.bf16.gmra.mrb[48].mxu1 %v2142_v61  ;;  %1963 = vmatmul.mubr.bf16.gmra.mrb[52].mxu0 %v2143_v62 }
  0x8b   :  { %1291 = vmatprep.mubr.bf16.mxu1 %v2144_v63  ;;  %1966 = vmatprep.mubr.msk.bf16.mxu0 %vm2160_vm0, %v2159_v7 }
  0x92   :  { %1292 = vmatmul.mubr.bf16.gmra.mrb[52].mxu1 %v2146_v0  ;;  %1967 = vmatmul.mubr.bf16.gmra.mrb[56].mxu0 %v2147_v1 }
  0x93   :  { %1299 = vmatprep.mubr.bf16.mxu1 %v2148_v2  ;;  %1970 = vmatprep.mubr.msk.bf16.mxu0 %vm2160_vm0, %v2159_v7 }
  0x9a   :  { %1300 = vmatmul.mubr.bf16.gmra.mrb[56].mxu1 %v2150_v3  ;;  %1971 = vmatmul.mubr.bf16.gmra.mrb[60].mxu0 %v2151_v4 }
  0x9b   :  { %1307 = vmatprep.mubr.bf16.mxu1 %v2152_v5  ;;  %1974 = vmatprep.mubr.msk.bf16.mxu0 %vm2160_vm0, %v2159_v7 }
  0xa2   :  { %1308 = vmatmul.mubr.bf16.gmra.mrb[60].mxu1 %v2154_v8  ;;  %1975 = vmatmul.mubr.bf16.gmra.mrb[64].mxu0 %v2155_v9 }
  0xa3   :  { %1315 = vmatprep.mubr.bf16.mxu1 %v1556_v10  ;;  %1978 = vmatprep.mubr.msk.bf16.mxu0 %vm2160_vm0, %v2159_v7 }
  0xaa   :  { %1316 = vmatmul.mubr.bf16.gmra.mrb[64].mxu1 %v1555_v11  ;;  %1979 = vmatmul.mubr.bf16.gmra.mrb[68].mxu0 %v2158_v12 }
  0xf5   :  { %v1731_v13 = vpop.f32.mrb[0].mxu1  ;;  %v1707_v14 = vpop.f32.mrb[0].mxu0 }
  0xf6   :  { %v1732_v15 = vpop.f32.mrb[1].mxu1  ;;  %v1708_v16 = vpop.f32.mrb[1].mxu0 }
  0xf7   :  { %v2596_v17 = vadd.f32 %v1732_v15, %v1731_v13  ;;  %v1734_v18 = vpop.f32.mrb[2].mxu1  ;;  %v1709_v19 = vadd.f32 %v1708_v16, %v1707_v14  ;;  %v1710_v20 = vpop.f32.mrb[2].mxu0 }
  0xf8   :  { %v1735_v21 = vpop.f32.mrb[3].mxu1  ;;  %v1711_v22 = vpop.f32.mrb[3].mxu0 }
  0xf9   :  { %v2598_v23 = vadd.f32 %v1735_v21, %v1734_v18  ;;  %v1712_v7 = vadd.f32 %v1711_v22, %v1710_v20  ;;  %v1006_v58 = vadd.f32 %v1709_v19, %v2613_v55 }
  0xfb   :  { %v1009_v1 = vadd.f32 %v1712_v7, %v2613_v55 }
  0xfd   :  { %v1713_v24 = vpop.f32.mrb[4].mxu0  ;;  %v1737_v25 = vpop.f32.mrb[4].mxu1 }
  0xfe   :  { %v1714_v26 = vpop.f32.mrb[5].mxu0  ;;  %v1738_v27 = vpop.f32.mrb[5].mxu1 }
  0xff   :  { %v1715_v28 = vadd.f32 %v1714_v26, %v1713_v24  ;;  %v1716_v29 = vpop.f32.mrb[6].mxu0  ;;  %v2600_v30 = vadd.f32 %v1738_v27, %v1737_v25  ;;  %v1740_v31 = vpop.f32.mrb[6].mxu1 }
 0x100   :  { %v1717_v32 = vpop.f32.mrb[7].mxu0  ;;  %v1741_v33 = vpop.f32.mrb[7].mxu1 }
 0x101   :  { %v1718_v34 = vadd.f32 %v1717_v32, %v1716_v29  ;;  %v2602_v35 = vadd.f32 %v1741_v33, %v1740_v31  ;;  %v1014_v13 = vadd.f32 %v1715_v28, %v2613_v55 }
 0x103   :  { %v1017_v21 = vadd.f32 %v1718_v34, %v2613_v55 }
 0x105   :  { %v1719_v36 = vpop.f32.mrb[8].mxu0  ;;  %v1743_v37 = vpop.f32.mrb[8].mxu1 }
 0x106   :  { %v1720_v38 = vpop.f32.mrb[9].mxu0  ;;  %v1744_v39 = vpop.f32.mrb[9].mxu1 }
 0x107   :  { %v1721_v40 = vadd.f32 %v1720_v38, %v1719_v36  ;;  %v1722_v41 = vpop.f32.mrb[10].mxu0  ;;  %v2604_v42 = vadd.f32 %v1744_v39, %v1743_v37  ;;  %v1746_v43 = vpop.f32.mrb[10].mxu1 }
 0x108   :  { %v1723_v44 = vpop.f32.mrb[11].mxu0  ;;  %v1747_v45 = vpop.f32.mrb[11].mxu1 }
 0x109   :  { %v1724_v46 = vadd.f32 %v1723_v44, %v1722_v41  ;;  %v1022_v33 = vadd.f32 %v1721_v40, %v2613_v55 }
 0x10b   :  { %v1025_v43 = vadd.f32 %v1724_v46, %v2613_v55 }
 0x10d   :  { %v1725_v47 = vpop.f32.mrb[12].mxu0 }
 0x10e   :  { %v1726_v48 = vpop.f32.mrb[13].mxu0 }
 0x10f   :  { %v2606_v49 = vadd.f32 %v1726_v48, %v1725_v47  ;;  %v1728_v50 = vpop.f32.mrb[14].mxu0 }
 0x110   :  { %v1729_v51 = vpop.f32.mrb[15].mxu0 }
 0x111   :  { %v2608_v52 = vadd.f32 %v1729_v51, %v1728_v50 }
 0x115   :  { %v1765_v53 = vpop.f32.mrb[12].mxu1  ;;  %v1823_v54 = vpop.f32.mrb[16].mxu0 }
 0x116   :  { %v1766_v56 = vpop.f32.mrb[13].mxu1  ;;  %v1824_v57 = vpop.f32.mrb[17].mxu0 }
 0x117   :  { %v1767_v59 = vadd.f32 %v1766_v56, %v1765_v53  ;;  %v1768_v60 = vpop.f32.mrb[14].mxu1  ;;  %v1825_v61 = vadd.f32 %v1824_v57, %v1823_v54  ;;  %v1826_v62 = vpop.f32.mrb[18].mxu0  ;;  %v1030_v57 = vadd.f32 %v2606_v49, %v2613_v55 }
 0x118   :  { %v1769_v63 = vpop.f32.mrb[15].mxu1  ;;  %v1827_v0 = vpop.f32.mrb[19].mxu0 }
 0x119   :  { %v1094_v2 = vadd.f32 %v1767_v59, %v1006_v58  ;;  %v1770_v3 = vadd.f32 %v1769_v63, %v1768_v60  ;;  %v1828_v4 = vadd.f32 %v1827_v0, %v1826_v62  ;;  %v1033_v63 = vadd.f32 %v2608_v52, %v2613_v55 }
 0x11b   :  { %v1097_v5 = vadd.f32 %v1770_v3, %v1009_v1  ;;  %v2617_v6 = vadd.f32 %v1825_v61, %v1094_v2 }
 0x11d   :  { %v2619_v8 = vadd.f32 %v1828_v4, %v1097_v5  ;;  %v1771_v9 = vpop.f32.mrb[16].mxu1  ;;  %v1829_v10 = vpop.f32.mrb[20].mxu0 }
 0x11e   :  { %v1772_v11 = vpop.f32.mrb[17].mxu1  ;;  %v1830_v12 = vpop.f32.mrb[21].mxu0 }
 0x11f   :  { %v1773_v14 = vadd.f32 %v1772_v11, %v1771_v9  ;;  %v1774_v15 = vpop.f32.mrb[18].mxu1  ;;  %v1831_v16 = vadd.f32 %v1830_v12, %v1829_v10  ;;  %v1832_v18 = vpop.f32.mrb[22].mxu0  ;;  %v1038_v12 = vadd.f32 %v2596_v17, %v2613_v55 }
 0x120   :  { %v1775_v19 = vpop.f32.mrb[19].mxu1  ;;  %v1833_v20 = vpop.f32.mrb[23].mxu0 }
 0x121   :  { %v1102_v22 = vadd.f32 %v1773_v14, %v1014_v13  ;;  %v1776_v7 = vadd.f32 %v1775_v19, %v1774_v15  ;;  %v1834_v24 = vadd.f32 %v1833_v20, %v1832_v18  ;;  %v1041_v19 = vadd.f32 %v2598_v23, %v2613_v55 }
 0x123   :  { %v1105_v25 = vadd.f32 %v1776_v7, %v1017_v21  ;;  %v2623_v26 = vadd.f32 %v1831_v16, %v1102_v22 }
 0x125   :  { %v2625_v27 = vadd.f32 %v1834_v24, %v1105_v25  ;;  %v1777_v29 = vpop.f32.mrb[20].mxu1  ;;  %v1835_v31 = vpop.f32.mrb[24].mxu0 }
 0x126   :  { %v1778_v32 = vpop.f32.mrb[21].mxu1  ;;  %v1836_v28 = vpop.f32.mrb[25].mxu0 }
 0x127   :  { %v1779_v36 = vadd.f32 %v1778_v32, %v1777_v29  ;;  %v1780_v37 = vpop.f32.mrb[22].mxu1  ;;  %v1837_v38 = vadd.f32 %v1836_v28, %v1835_v31  ;;  %v1838_v39 = vpop.f32.mrb[26].mxu0  ;;  %v1046_v28 = vadd.f32 %v2600_v30, %v2613_v55 }
 0x128   :  { %v1781_v41 = vpop.f32.mrb[23].mxu1  ;;  %v1839_v34 = vpop.f32.mrb[27].mxu0 }
 0x129   :  { %v1110_v44 = vadd.f32 %v1779_v36, %v1022_v33  ;;  %v1782_v45 = vadd.f32 %v1781_v41, %v1780_v37  ;;  %v1840_v47 = vadd.f32 %v1839_v34, %v1838_v39  ;;  %v1049_v41 = vadd.f32 %v2602_v35, %v2613_v55 }
 0x12b   :  { %v1113_v48 = vadd.f32 %v1782_v45, %v1025_v43  ;;  %v2629_v50 = vadd.f32 %v1837_v38, %v1110_v44 }
 0x12d   :  { %v2631_v51 = vadd.f32 %v1840_v47, %v1113_v48  ;;  %v1783_v53 = vpop.f32.mrb[24].mxu1  ;;  %v1841_v54 = vpop.f32.mrb[28].mxu0 }
 0x12e   :  { %v1784_v56 = vpop.f32.mrb[25].mxu1  ;;  %v1842_v40 = vpop.f32.mrb[29].mxu0 }
 0x12f   :  { %v1785_v58 = vadd.f32 %v1784_v56, %v1783_v53  ;;  %v1786_v59 = vpop.f32.mrb[26].mxu1  ;;  %v1843_v60 = vadd.f32 %v1842_v40, %v1841_v54  ;;  %v1844_v61 = vpop.f32.mrb[30].mxu0  ;;  %v1054_v40 = vadd.f32 %v2604_v42, %v2613_v55 }
 0x130   :  { %v1787_v46 = vpop.f32.mrb[27].mxu1  ;;  %v1845_v62 = vpop.f32.mrb[31].mxu0 }
 0x131   :  { %v1118_v0 = vadd.f32 %v1785_v58, %v1030_v57  ;;  %v1788_v1 = vadd.f32 %v1787_v46, %v1786_v59  ;;  %v1846_v2 = vadd.f32 %v1845_v62, %v1844_v61 }
 0x133   :  { %v1121_v3 = vadd.f32 %v1788_v1, %v1033_v63  ;;  %v2637_v4 = vadd.f32 %v1843_v60, %v1118_v0 }
 0x135   :  { %v2639_v5 = vadd.f32 %v1846_v2, %v1121_v3  ;;  %v1789_v9 = vpop.f32.mrb[28].mxu1  ;;  %v1847_v10 = vpop.f32.mrb[32].mxu0 }
 0x136   :  { %v1790_v49 = vpop.f32.mrb[29].mxu1  ;;  %v1848_v11 = vpop.f32.mrb[33].mxu0 }
 0x137   :  { %v1791_v13 = vadd.f32 %v1790_v49, %v1789_v9  ;;  %v1792_v14 = vpop.f32.mrb[30].mxu1  ;;  %v1849_v15 = vadd.f32 %v1848_v11, %v1847_v10  ;;  %v1850_v16 = vpop.f32.mrb[34].mxu0 }
 0x138   :  { %v1793_v52 = vpop.f32.mrb[31].mxu1  ;;  %v1851_v18 = vpop.f32.mrb[35].mxu0 }
 0x139   :  { %v1126_v20 = vadd.f32 %v1791_v13, %v1038_v12  ;;  %v1794_v21 = vadd.f32 %v1793_v52, %v1792_v14  ;;  %v1852_v22 = vadd.f32 %v1851_v18, %v1850_v16 }
 0x13b   :  { %v1129_v7 = vadd.f32 %v1794_v21, %v1041_v19  ;;  %v2645_v24 = vadd.f32 %v1849_v15, %v1126_v20 }
 0x13d   :  { %v2647_v25 = vadd.f32 %v1852_v22, %v1129_v7  ;;  %v1795_v29 = vpop.f32.mrb[32].mxu1  ;;  %v1853_v31 = vpop.f32.mrb[36].mxu0 }
 0x13e   :  { %v1796_v17 = vpop.f32.mrb[33].mxu1  ;;  %v1854_v32 = vpop.f32.mrb[37].mxu0 }
 0x13f   :  { %v1797_v33 = vadd.f32 %v1796_v17, %v1795_v29  ;;  %v1798_v36 = vpop.f32.mrb[34].mxu1  ;;  %v1855_v37 = vadd.f32 %v1854_v32, %v1853_v31  ;;  %v1856_v38 = vpop.f32.mrb[38].mxu0 }
 0x140   :  { %v1799_v23 = vpop.f32.mrb[35].mxu1  ;;  %v1857_v39 = vpop.f32.mrb[39].mxu0 }
 0x141   :  { %v1134_v34 = vadd.f32 %v1797_v33, %v1046_v28  ;;  %v1800_v43 = vadd.f32 %v1799_v23, %v1798_v36  ;;  %v1858_v44 = vadd.f32 %v1857_v39, %v1856_v38 }
 0x143   :  { %v1137_v45 = vadd.f32 %v1800_v43, %v1049_v41  ;;  %v2653_v47 = vadd.f32 %v1855_v37, %v1134_v34 }
 0x145   :  { %v2655_v48 = vadd.f32 %v1858_v44, %v1137_v45  ;;  %v1801_v53 = vpop.f32.mrb[36].mxu1  ;;  %v1859_v54 = vpop.f32.mrb[40].mxu0 }
 0x146   :  { %v1802_v30 = vpop.f32.mrb[37].mxu1  ;;  %v1860_v56 = vpop.f32.mrb[41].mxu0 }
 0x147   :  { %v1803_v57 = vadd.f32 %v1802_v30, %v1801_v53  ;;  %v1804_v58 = vpop.f32.mrb[38].mxu1  ;;  %v1861_v59 = vadd.f32 %v1860_v56, %v1859_v54  ;;  %v1862_v60 = vpop.f32.mrb[42].mxu0 }
 0x148   :  { %v1805_v35 = vpop.f32.mrb[39].mxu1  ;;  %v1863_v61 = vpop.f32.mrb[43].mxu0 }
 0x149   :  { %v1142_v46 = vadd.f32 %v1803_v57, %v1054_v40 }
 0x14b   :  { %v2659_v62 = vadd.f32 %v1861_v59, %v1142_v46 }
 0x14d   :  { %v1881_v63 = vpop.f32.mrb[40].mxu1  ;;  %v1357_v0 = vpop.f32.mrb[44].mxu0 }
 0x14e   :  { %v1882_v1 = vpop.f32.mrb[41].mxu1  ;;  %v1956_v2 = vpop.f32.mrb[45].mxu0 }
 0x14f   :  { %v1883_v3 = vadd.f32 %v1882_v1, %v1881_v63  ;;  %v1884_v9 = vpop.f32.mrb[42].mxu1  ;;  %v1360_v10 = vpop.f32.mrb[46].mxu0 }
 0x150   :  { %v1885_v49 = vpop.f32.mrb[43].mxu1  ;;  %v1957_v11 = vpop.f32.mrb[47].mxu0 }
 0x151   :  { %v1886_v12 = vadd.f32 %v1885_v49, %v1884_v9  ;;  %v1270_v42 = vadd.f32 %v1883_v3, %v2617_v6 }
 0x153   :  { %v1358_v55 = vadd.f32 %v1357_v0, %v1270_v42  ;;  %v1273_v13 = vadd.f32 %v1886_v12, %v2619_v8 }
 0x155   :  { %v1361_v14 = vadd.f32 %v1360_v10, %v1273_v13  ;;  %v1887_v15 = vpop.f32.mrb[44].mxu1  ;;  %v1365_v16 = vpop.f32.mrb[48].mxu0  ;;  %v1411_v19 = vmax.f32 %v1358_v55, 0.0 }
 0x156   :  { %v1888_v52 = vpop.f32.mrb[45].mxu1  ;;  %v1960_v18 = vpop.f32.mrb[49].mxu0 }
 0x157   :  { %v1412_v20 = vmax.f32 %v1361_v14, 0.0  ;;  %v1889_v21 = vadd.f32 %v1888_v52, %v1887_v15  ;;  %v1890_v22 = vpop.f32.mrb[46].mxu1  ;;  %v1368_v7 = vpop.f32.mrb[50].mxu0 }
 0x158   :  { %v1891_v29 = vpop.f32.mrb[47].mxu1  ;;  %v1961_v31 = vpop.f32.mrb[51].mxu0 }
 0x159   :  { %v1659_v17 = vpack.c.bf16 %v1412_v20, %v1411_v19  ;;  %v1892_v32 = vadd.f32 %v1891_v29, %v1890_v22  ;;  %v1278_v28 = vadd.f32 %v1889_v21, %v2623_v26 }
 0x15b   :  { %1660 = vst [vmem:[%s2698_s3] sm:$0xff] %v1659_v17   ;;  %v1366_v6 = vadd.f32 %v1365_v16, %v1278_v28  ;;  %v1281_v8 = vadd.f32 %v1892_v32, %v2625_v27 }
 0x15d   :  { %v1369_v33 = vadd.f32 %v1368_v7, %v1281_v8  ;;  %v1893_v36 = vpop.f32.mrb[48].mxu1  ;;  %v1373_v37 = vpop.f32.mrb[52].mxu0  ;;  %v1413_v39 = vmax.f32 %v1366_v6, 0.0 }
 0x15e   :  { %v1894_v38 = vpop.f32.mrb[49].mxu1  ;;  %v1964_v23 = vpop.f32.mrb[53].mxu0 }
 0x15f   :  { %v1414_v41 = vmax.f32 %v1369_v33, 0.0  ;;  %v1895_v34 = vadd.f32 %v1894_v38, %v1893_v36  ;;  %v1896_v43 = vpop.f32.mrb[50].mxu1  ;;  %v1376_v44 = vpop.f32.mrb[54].mxu0 }
 0x160   :  { %v1897_v45 = vpop.f32.mrb[51].mxu1  ;;  %v1965_v53 = vpop.f32.mrb[55].mxu0 }
 0x161   :  { %v1664_v26 = vpack.c.bf16 %v1414_v41, %v1413_v39  ;;  %v1898_v54 = vadd.f32 %v1897_v45, %v1896_v43  ;;  %v1286_v30 = vadd.f32 %v1895_v34, %v2629_v50 }
 0x163   :  { %1686 = vst [vmem:[%s2698_s3 + $0x8] sm:$0xff] %v1664_v26   ;;  %v1374_v27 = vadd.f32 %v1373_v37, %v1286_v30  ;;  %v1289_v56 = vadd.f32 %v1898_v54, %v2631_v51 }
 0x165   :  { %v1377_v40 = vadd.f32 %v1376_v44, %v1289_v56  ;;  %v1899_v57 = vpop.f32.mrb[52].mxu1  ;;  %v1381_v58 = vpop.f32.mrb[56].mxu0  ;;  %v1415_v35 = vmax.f32 %v1374_v27, 0.0 }
 0x166   :  { %v1900_v59 = vpop.f32.mrb[53].mxu1  ;;  %v1968_v60 = vpop.f32.mrb[57].mxu0 }
 0x167   :  { %v1416_v61 = vmax.f32 %v1377_v40, 0.0  ;;  %v1901_v46 = vadd.f32 %v1900_v59, %v1899_v57  ;;  %v1902_v63 = vpop.f32.mrb[54].mxu1  ;;  %v1384_v0 = vpop.f32.mrb[58].mxu0 }
 0x168   :  { %v1903_v1 = vpop.f32.mrb[55].mxu1  ;;  %v1969_v2 = vpop.f32.mrb[59].mxu0 }
 0x169   :  { %v1669_v50 = vpack.c.bf16 %v1416_v61, %v1415_v35  ;;  %v1904_v3 = vadd.f32 %v1903_v1, %v1902_v63  ;;  %v1294_v9 = vadd.f32 %v1901_v46, %v2637_v4 }
 0x16b   :  { %1687 = vst [vmem:[%s2698_s3 + $0x10] sm:$0xff] %v1669_v50   ;;  %v1382_v51 = vadd.f32 %v1381_v58, %v1294_v9  ;;  %v1297_v10 = vadd.f32 %v1904_v3, %v2639_v5 }
 0x16d   :  { %v1385_v49 = vadd.f32 %v1384_v0, %v1297_v10  ;;  %v1905_v11 = vpop.f32.mrb[56].mxu1  ;;  %v1389_v12 = vpop.f32.mrb[60].mxu0  ;;  %v1417_v13 = vmax.f32 %v1382_v51, 0.0 }
 0x16e   :  { %v1906_v42 = vpop.f32.mrb[57].mxu1  ;;  %v1972_v55 = vpop.f32.mrb[61].mxu0 }
 0x16f   :  { %v1418_v14 = vmax.f32 %v1385_v49, 0.0  ;;  %v1907_v15 = vadd.f32 %v1906_v42, %v1905_v11  ;;  %v1908_v16 = vpop.f32.mrb[58].mxu1  ;;  %v1392_v52 = vpop.f32.mrb[62].mxu0 }
 0x170   :  { %v1909_v18 = vpop.f32.mrb[59].mxu1  ;;  %v1973_v19 = vpop.f32.mrb[63].mxu0 }
 0x171   :  { %v1674_v4 = vpack.c.bf16 %v1418_v14, %v1417_v13  ;;  %v1910_v20 = vadd.f32 %v1909_v18, %v1908_v16  ;;  %v1302_v21 = vadd.f32 %v1907_v15, %v2645_v24 }
 0x173   :  { %1688 = vst [vmem:[%s2698_s3 + $0x18] sm:$0xff] %v1674_v4   ;;  %v1390_v5 = vadd.f32 %v1389_v12, %v1302_v21  ;;  %v1305_v22 = vadd.f32 %v1910_v20, %v2647_v25 }
 0x175   :  { %v1393_v7 = vadd.f32 %v1392_v52, %v1305_v22  ;;  %v1911_v29 = vpop.f32.mrb[60].mxu1  ;;  %v1397_v31 = vpop.f32.mrb[64].mxu0  ;;  %v1419_v28 = vmax.f32 %v1390_v5, 0.0 }
 0x176   :  { %v1912_v17 = vpop.f32.mrb[61].mxu1  ;;  %v1976_v32 = vpop.f32.mrb[65].mxu0 }
 0x177   :  { %v1420_v6 = vmax.f32 %v1393_v7, 0.0  ;;  %v1913_v8 = vadd.f32 %v1912_v17, %v1911_v29  ;;  %v1914_v33 = vpop.f32.mrb[62].mxu1  ;;  %v1400_v36 = vpop.f32.mrb[66].mxu0 }
 0x178   :  { %v1915_v37 = vpop.f32.mrb[63].mxu1  ;;  %v1977_v38 = vpop.f32.mrb[67].mxu0 }
 0x179   :  { %v1679_v24 = vpack.c.bf16 %v1420_v6, %v1419_v28  ;;  %v1916_v23 = vadd.f32 %v1915_v37, %v1914_v33  ;;  %v1310_v39 = vadd.f32 %v1913_v8, %v2653_v47 }
 0x17b   :  { %1689 = vst [vmem:[%s2698_s3 + $0x20] sm:$0xff] %v1679_v24   ;;  %v1398_v25 = vadd.f32 %v1397_v31, %v1310_v39  ;;  %v1313_v41 = vadd.f32 %v1916_v23, %v2655_v48 }
 0x17d   :  { %v1401_v34 = vadd.f32 %v1400_v36, %v1313_v41  ;;  %v1917_v43 = vpop.f32.mrb[64].mxu1  ;;  %v1405_v44 = vpop.f32.mrb[68].mxu0  ;;  %v1421_v26 = vmax.f32 %v1398_v25, 0.0 }
 0x17e   :  { %v1918_v45 = vpop.f32.mrb[65].mxu1  ;;  %v1980_v53 = vpop.f32.mrb[69].mxu0 }
 0x17f   :  { %v1422_v54 = vmax.f32 %v1401_v34, 0.0  ;;  %v1919_v30 = vadd.f32 %v1918_v45, %v1917_v43  ;;  %v1920_v27 = vpop.f32.mrb[66].mxu1  ;;  %v1408_v56 = vpop.f32.mrb[70].mxu0 }
 0x180   :  { %v1921_v40 = vpop.f32.mrb[67].mxu1  ;;  %v1981_v57 = vpop.f32.mrb[71].mxu0 }
 0x181   :  { %v1684_v47 = vpack.c.bf16 %v1422_v54, %v1421_v26  ;;  %v1318_v58 = vadd.f32 %v1919_v30, %v2659_v62 }
 0x183   :  { %1690 = vst [vmem:[%s2698_s3 + $0x28] sm:$0xff] %v1684_v47   ;;  %v1406_v48 = vadd.f32 %v1405_v44, %v1318_v58 }
 0x185   :  { %v1423_v59 = vmax.f32 %v1406_v48, 0.0 }
 0x187   :  { %v1655_v60 = vpack.c.bf16 %v1423_v59, %v1423_v59 }
 0x189   :  { %1489 = vst [vmem:[%s2698_s3 + $0x30] sm:$0x1] %v1655_v60 }

// kernel: dqn_forward.7
= control target key start
LH: loop header
LB: loop body
LE: loop exit
PB: predicated region body
PF: predicated region fallthrough
CT: control target
= control target key end

     0   :  { %v1599_v36 = vlaneseq  ;;  %v16504_v37 = vmov 1966171168   ;;  %s21636_s0 = inlined_call_operand.vmem [shape: bf16[2,6272], index: 0, kind: input, shape index: {}]   ;;  %s21637_s1 = inlined_call_operand.vmem [shape: bf16[6272,512], index: 1, kind: input, shape index: {}]   ;;  %s21638_s2 = inlined_call_operand.vmem [shape: f32[1,512], index: 2, kind: input, shape index: {}]   ;;  %s21639_s3 = inlined_call_operand.vmem [shape: bf16[512,128], index: 3, kind: input, shape index: {}]   ;;  %s21640_s4 = inlined_call_operand.vmem [shape: f32[1,128], index: 4, kind: input, shape index: {}]   ;;  %s21641_s5 = inlined_call_operand.hbm [shape: f32[2,128], index: 5, kind: output, shape index: {}]  }
   0x1   :  { %v14084_v0 = vld [vmem:[%s21637_s1 + $0x4] ss:$16 sps:$4 sm:$0xff]   ;;  %v14086_v1 = vld [vmem:[%s21637_s1 + $0xc] ss:$16 sps:$4 sm:$0xff]   ;;  %v14088_v2 = vld [vmem:[%s21637_s1] ss:$16 sps:$4 sm:$0xff]   ;;  %v1628_v38 = vunpack.c.l.s4 %v16504_v37 }
   0x2   :  { %9823 = vmatprep.subr.bf16.mxu0 %v14084_v0  ;;  %v14089_v3 = vld [vmem:[%s21637_s1 + $0x8] ss:$16 sps:$4 sm:$0xff]   ;;  %10848 = vmatprep.subr.bf16.mxu1 %v14086_v1  ;;  %v14090_v4 = vld [vmem:[%s21637_s1 + $0x24] ss:$16 sps:$4 sm:$0xff]   ;;  %v14092_v5 = vld [vmem:[%s21637_s1 + $0x2c] ss:$16 sps:$4 sm:$0xff]  }
   0x3   :  { %9824 = vmatpush1.bf16.msra.mxu0 %v14088_v2  ;;  %10849 = vmatpush1.bf16.msra.mxu1 %v14089_v3  ;;  %v14094_v6 = vld [vmem:[%s21637_s1 + $0x20] ss:$16 sps:$4 sm:$0xff]   ;;  %v14095_v7 = vld [vmem:[%s21637_s1 + $0x28] ss:$16 sps:$4 sm:$0xff]   ;;  %v14096_v8 = vld [vmem:[%s21637_s1 + $0x44] ss:$16 sps:$4 sm:$0xff]   ;;  %v1629_v43 = vunpack.c.0.s8 %v1628_v38 }
   0x4   :  { %9825 = vmatprep.subr.bf16.mxu0 %v14090_v4  ;;  %10850 = vmatprep.subr.bf16.mxu1 %v14092_v5  ;;  %v14098_v9 = vld [vmem:[%s21637_s1 + $0x4c] ss:$16 sps:$4 sm:$0xff]   ;;  %v14100_v10 = vld [vmem:[%s21637_s1 + $0x40] ss:$16 sps:$4 sm:$0xff]   ;;  %v14101_v11 = vld [vmem:[%s21637_s1 + $0x48] ss:$16 sps:$4 sm:$0xff]  }
   0x5   :  { %v14102_v12 = vld [vmem:[%s21637_s1 + $0x64] ss:$16 sps:$4 sm:$0xff]   ;;  %v14104_v13 = vld [vmem:[%s21637_s1 + $0x6c] ss:$16 sps:$4 sm:$0xff]   ;;  %v14106_v14 = vld [vmem:[%s21637_s1 + $0x60] ss:$16 sps:$4 sm:$0xff]  }
   0x6   :  { %v14107_v15 = vld [vmem:[%s21637_s1 + $0x68] ss:$16 sps:$4 sm:$0xff]   ;;  %v14108_v16 = vld [vmem:[%s21637_s1 + $0x84] ss:$16 sps:$4 sm:$0xff]   ;;  %v14110_v17 = vld [vmem:[%s21637_s1 + $0x8c] ss:$16 sps:$4 sm:$0xff]  }
   0x7   :  { %9826 = vmatpush1.bf16.msra.mxu0 %v14094_v6  ;;  %10851 = vmatpush1.bf16.msra.mxu1 %v14095_v7  ;;  %v14112_v18 = vld [vmem:[%s21637_s1 + $0x80] ss:$16 sps:$4 sm:$0xff]   ;;  %v14113_v19 = vld [vmem:[%s21637_s1 + $0x88] ss:$16 sps:$4 sm:$0xff]   ;;  %v14114_v20 = vld [vmem:[%s21637_s1 + $0xa4] ss:$16 sps:$4 sm:$0xff]  }
   0x8   :  { %9827 = vmatprep.subr.bf16.mxu0 %v14096_v8  ;;  %10852 = vmatprep.subr.bf16.mxu1 %v14098_v9  ;;  %v14116_v21 = vld [vmem:[%s21637_s1 + $0xac] ss:$16 sps:$4 sm:$0xff]   ;;  %v14118_v22 = vld [vmem:[%s21637_s1 + $0xa0] ss:$16 sps:$4 sm:$0xff]   ;;  %v14119_v23 = vld [vmem:[%s21637_s1 + $0xa8] ss:$16 sps:$4 sm:$0xff]  }
   0x9   :  { %v14120_v24 = vld [vmem:[%s21637_s1 + $0xc4] ss:$16 sps:$4 sm:$0xff]   ;;  %v14122_v25 = vld [vmem:[%s21637_s1 + $0xcc] ss:$16 sps:$4 sm:$0xff]   ;;  %v14124_v26 = vld [vmem:[%s21637_s1 + $0xc0] ss:$16 sps:$4 sm:$0xff]  }
   0xa   :  { %v14125_v27 = vld [vmem:[%s21637_s1 + $0xc8] ss:$16 sps:$4 sm:$0xff]   ;;  %v14126_v28 = vld [vmem:[%s21637_s1 + $0xe4] ss:$16 sps:$4 sm:$0xff]   ;;  %v14128_v29 = vld [vmem:[%s21637_s1 + $0xec] ss:$16 sps:$4 sm:$0xff]  }
   0xb   :  { %9828 = vmatpush1.bf16.msra.mxu0 %v14100_v10  ;;  %10853 = vmatpush1.bf16.msra.mxu1 %v14101_v11  ;;  %v14130_v30 = vld [vmem:[%s21637_s1 + $0xe0] ss:$16 sps:$4 sm:$0xff]   ;;  %v14131_v31 = vld [vmem:[%s21637_s1 + $0xe8] ss:$16 sps:$4 sm:$0xff]   ;;  %v14132_v32 = vld [vmem:[%s21637_s1 + $0x104] ss:$16 sps:$4 sm:$0xff]  }
   0xc   :  { %9829 = vmatprep.subr.bf16.mxu0 %v14102_v12  ;;  %10854 = vmatprep.subr.bf16.mxu1 %v14104_v13  ;;  %v14134_v33 = vld [vmem:[%s21637_s1 + $0x10c] ss:$16 sps:$4 sm:$0xff]   ;;  %v14136_v34 = vld [vmem:[%s21637_s1 + $0x100] ss:$16 sps:$4 sm:$0xff]   ;;  %v14137_v35 = vld [vmem:[%s21637_s1 + $0x108] ss:$16 sps:$4 sm:$0xff]  }
   0xd   :  { %v14138_v39 = vld [vmem:[%s21637_s1 + $0x124] ss:$16 sps:$4 sm:$0xff]   ;;  %v14140_v40 = vld [vmem:[%s21637_s1 + $0x12c] ss:$16 sps:$4 sm:$0xff]   ;;  %v14142_v41 = vld [vmem:[%s21637_s1 + $0x120] ss:$16 sps:$4 sm:$0xff]  }
   0xe   :  { %v16654_v42 = vshrl.u32 %v1599_v36, 7  ;;  %v14143_v44 = vld [vmem:[%s21637_s1 + $0x128] ss:$16 sps:$4 sm:$0xff]   ;;  %v14144_v45 = vld [vmem:[%s21637_s1 + $0x144] ss:$16 sps:$4 sm:$0xff]  }
   0xf   :  { %9830 = vmatpush1.bf16.msra.mxu0 %v14106_v14  ;;  %10855 = vmatpush1.bf16.msra.mxu1 %v14107_v15  ;;  %v14146_v46 = vld [vmem:[%s21637_s1 + $0x14c] ss:$16 sps:$4 sm:$0xff]   ;;  %v14148_v47 = vld [vmem:[%s21637_s1 + $0x140] ss:$16 sps:$4 sm:$0xff]   ;;  %v14149_v48 = vld [vmem:[%s21637_s1 + $0x148] ss:$16 sps:$4 sm:$0xff]  }
  0x10   :  { %9831 = vmatprep.subr.bf16.mxu0 %v14108_v16  ;;  %10856 = vmatprep.subr.bf16.mxu1 %v14110_v17  ;;  %v16672_v49 = vsub.s32 %v1629_v43, %v16654_v42  ;;  %v14150_v50 = vld [vmem:[%s21637_s1 + $0x164] ss:$16 sps:$4 sm:$0xff]   ;;  %v14152_v51 = vld [vmem:[%s21637_s1 + $0x16c] ss:$16 sps:$4 sm:$0xff]   ;;  %v14154_v53 = vld [vmem:[%s21637_s1 + $0x160] ss:$16 sps:$4 sm:$0xff]  }
  0x11   :  { %v16683_v52 = vld [vmem:[%s21636_s0] sm:$0xff]  ;;  %v14155_v55 = vld [vmem:[%s21637_s1 + $0x168] ss:$16 sps:$4 sm:$0xff]   ;;  %v14158_v57 = vld [vmem:[%s21637_s1 + $0x18c] ss:$16 sps:$4 sm:$0xff]  }
  0x12   :  { %v1633_v54 = vrot.slane %v16683_v52, %v16672_v49  ;;  %v14156_v56 = vld [vmem:[%s21637_s1 + $0x184] ss:$16 sps:$4 sm:$0xff]   ;;  %v14160_v59 = vld [vmem:[%s21637_s1 + $0x180] ss:$16 sps:$4 sm:$0xff]   ;;  %v14161_v61 = vld [vmem:[%s21637_s1 + $0x188] ss:$16 sps:$4 sm:$0xff]  }
  0x13   :  { %9832 = vmatpush1.bf16.msra.mxu0 %v14112_v18  ;;  %10857 = vmatpush1.bf16.msra.mxu1 %v14113_v19  ;;  %v14162_v62 = vld [vmem:[%s21637_s1 + $0x1a4] ss:$16 sps:$4 sm:$0xff]   ;;  %v14164_v63 = vld [vmem:[%s21637_s1 + $0x1ac] ss:$16 sps:$4 sm:$0xff]   ;;  %v14166_v0 = vld [vmem:[%s21637_s1 + $0x1a0] ss:$16 sps:$4 sm:$0xff]  }
  0x14   :  { %9833 = vmatprep.subr.bf16.mxu0 %v14114_v20  ;;  %10858 = vmatprep.subr.bf16.mxu1 %v14116_v21  ;;  %v1641_v58 = vcombine.high %v1633_v54, %v1633_v54  ;;  %v14167_v1 = vld [vmem:[%s21637_s1 + $0x1a8] ss:$16 sps:$4 sm:$0xff]   ;;  %v14168_v2 = vld [vmem:[%s21637_s1 + $0x1c4] ss:$16 sps:$4 sm:$0xff]   ;;  %v14170_v3 = vld [vmem:[%s21637_s1 + $0x1cc] ss:$16 sps:$4 sm:$0xff]   ;;  %v16752_v13 = vrot.slane %v1633_v54, %v16672_v49 }
  0x15   :  { %v14172_v4 = vld [vmem:[%s21637_s1 + $0x1c0] ss:$16 sps:$4 sm:$0xff]   ;;  %v14173_v5 = vld [vmem:[%s21637_s1 + $0x1c8] ss:$16 sps:$4 sm:$0xff]   ;;  %v14174_v6 = vld [vmem:[%s21637_s1 + $0x1e4] ss:$16 sps:$4 sm:$0xff]  }
  0x16   :  { %v1663_v60 = vrot.slane %v1641_v58, %v16672_v49  ;;  %v14176_v7 = vld [vmem:[%s21637_s1 + $0x1ec] ss:$16 sps:$4 sm:$0xff]   ;;  %v14178_v8 = vld [vmem:[%s21637_s1 + $0x1e0] ss:$16 sps:$4 sm:$0xff]   ;;  %v14179_v9 = vld [vmem:[%s21637_s1 + $0x1e8] ss:$16 sps:$4 sm:$0xff]  }
  0x17   :  { %9834 = vmatpush1.bf16.msra.mxu0 %v14118_v22  ;;  %10859 = vmatpush1.bf16.msra.mxu1 %v14119_v23  ;;  %v14182_v10 = vld [vmem:[%s21637_s1 + $0x204] ss:$16 sps:$4 sm:$0xff]   ;;  %v14185_v11 = vld [vmem:[%s21637_s1 + $0x20c] ss:$16 sps:$4 sm:$0xff]   ;;  %v14180_v12 = vld [vmem:[%s21637_s1 + $0x200] ss:$16 sps:$4 sm:$0xff]  }
  0x18   :  { %9835 = vmatprep.subr.bf16.mxu0 %v14120_v24  ;;  %10860 = vmatprep.subr.bf16.mxu1 %v14122_v25  ;;  %v14183_v14 = vld [vmem:[%s21637_s1 + $0x208] ss:$16 sps:$4 sm:$0xff]   ;;  %v14188_v15 = vld [vmem:[%s21637_s1 + $0x224] ss:$16 sps:$4 sm:$0xff]   ;;  %v14191_v16 = vld [vmem:[%s21637_s1 + $0x22c] ss:$16 sps:$4 sm:$0xff]   ;;  %v1673_v17 = vcombine.high %v1663_v60, %v1663_v60 }
  0x19   :  { %9855 = vmatprep.mubr.bf16.mxu0 %v1663_v60  ;;  %10880 = vmatprep.mubr.bf16.mxu1 %v1663_v60  ;;  %v14186_v18 = vld [vmem:[%s21637_s1 + $0x220] ss:$16 sps:$4 sm:$0xff]   ;;  %v14189_v19 = vld [vmem:[%s21637_s1 + $0x228] ss:$16 sps:$4 sm:$0xff]   ;;  %v14194_v20 = vld [vmem:[%s21637_s1 + $0x244] ss:$16 sps:$4 sm:$0xff]  }
  0x1a   :  { %v14197_v21 = vld [vmem:[%s21637_s1 + $0x24c] ss:$16 sps:$4 sm:$0xff]   ;;  %v14192_v22 = vld [vmem:[%s21637_s1 + $0x240] ss:$16 sps:$4 sm:$0xff]   ;;  %v14195_v23 = vld [vmem:[%s21637_s1 + $0x248] ss:$16 sps:$4 sm:$0xff]  }
  0x1b   :  { %9836 = vmatpush1.bf16.msra.mxu0 %v14124_v26  ;;  %10861 = vmatpush1.bf16.msra.mxu1 %v14125_v27  ;;  %v14200_v24 = vld [vmem:[%s21637_s1 + $0x264] ss:$16 sps:$4 sm:$0xff]   ;;  %v14203_v25 = vld [vmem:[%s21637_s1 + $0x26c] ss:$16 sps:$4 sm:$0xff]   ;;  %v14198_v26 = vld [vmem:[%s21637_s1 + $0x260] ss:$16 sps:$4 sm:$0xff]  }
  0x1c   :  { %9837 = vmatprep.subr.bf16.mxu0 %v14126_v28  ;;  %10862 = vmatprep.subr.bf16.mxu1 %v14128_v29  ;;  %v14201_v27 = vld [vmem:[%s21637_s1 + $0x268] ss:$16 sps:$4 sm:$0xff]   ;;  %v14206_v28 = vld [vmem:[%s21637_s1 + $0x284] ss:$16 sps:$4 sm:$0xff]   ;;  %v14209_v29 = vld [vmem:[%s21637_s1 + $0x28c] ss:$16 sps:$4 sm:$0xff]  }
  0x1d   :  { %v14218_v36 = vld [vmem:[%s21637_s1 + $0x2c4] ss:$16 sps:$4 sm:$0xff]   ;;  %v14221_v37 = vld [vmem:[%s21637_s1 + $0x2cc] ss:$16 sps:$4 sm:$0xff]   ;;  %v14216_v38 = vld [vmem:[%s21637_s1 + $0x2c0] ss:$16 sps:$4 sm:$0xff]  }
  0x1e   :  { %v14222_v43 = vld [vmem:[%s21637_s1 + $0x2e0] ss:$16 sps:$4 sm:$0xff]   ;;  %v14237_v54 = vld [vmem:[%s21637_s1 + $0x328] ss:$16 sps:$4 sm:$0xff]   ;;  %v14251_v60 = vld [vmem:[%s21637_s1 + $0x36c] ss:$16 sps:$4 sm:$0xff]  }
  0x1f   :  { %9838 = vmatpush1.bf16.msra.mxu0 %v14130_v30  ;;  %10863 = vmatpush1.bf16.msra.mxu1 %v14131_v31  ;;  %v14204_v30 = vld [vmem:[%s21637_s1 + $0x280] ss:$16 sps:$4 sm:$0xff]   ;;  %v14207_v31 = vld [vmem:[%s21637_s1 + $0x288] ss:$16 sps:$4 sm:$0xff]  }
  0x20   :  { %9839 = vmatprep.subr.bf16.mxu0 %v14132_v32  ;;  %10864 = vmatprep.subr.bf16.mxu1 %v14134_v33  ;;  %v14212_v32 = vld [vmem:[%s21637_s1 + $0x2a4] ss:$16 sps:$4 sm:$0xff]   ;;  %v14215_v33 = vld [vmem:[%s21637_s1 + $0x2ac] ss:$16 sps:$4 sm:$0xff]   ;;  %v14243_v58 = vld [vmem:[%s21637_s1 + $0x348] ss:$16 sps:$4 sm:$0xff]  }
  0x23   :  { %9840 = vmatpush1.bf16.msra.mxu0 %v14136_v34  ;;  %10865 = vmatpush1.bf16.msra.mxu1 %v14137_v35  ;;  %v14210_v34 = vld [vmem:[%s21637_s1 + $0x2a0] ss:$16 sps:$4 sm:$0xff]   ;;  %v14213_v35 = vld [vmem:[%s21637_s1 + $0x2a8] ss:$16 sps:$4 sm:$0xff]  }
  0x24   :  { %9841 = vmatprep.subr.bf16.mxu0 %v14138_v39  ;;  %10866 = vmatprep.subr.bf16.mxu1 %v14140_v40  ;;  %v14219_v39 = vld [vmem:[%s21637_s1 + $0x2c8] ss:$16 sps:$4 sm:$0xff]   ;;  %v14224_v40 = vld [vmem:[%s21637_s1 + $0x2e4] ss:$16 sps:$4 sm:$0xff]  }
  0x27   :  { %9842 = vmatpush1.bf16.msra.mxu0 %v14142_v41  ;;  %10867 = vmatpush1.bf16.msra.mxu1 %v14143_v44  ;;  %v14227_v41 = vld [vmem:[%s21637_s1 + $0x2ec] ss:$16 sps:$4 sm:$0xff]   ;;  %v14225_v44 = vld [vmem:[%s21637_s1 + $0x2e8] ss:$16 sps:$4 sm:$0xff]  }
  0x28   :  { %9843 = vmatprep.subr.bf16.mxu0 %v14144_v45  ;;  %10868 = vmatprep.subr.bf16.mxu1 %v14146_v46  ;;  %v14230_v45 = vld [vmem:[%s21637_s1 + $0x304] ss:$16 sps:$4 sm:$0xff]   ;;  %v14233_v46 = vld [vmem:[%s21637_s1 + $0x30c] ss:$16 sps:$4 sm:$0xff]  }
  0x2b   :  { %9844 = vmatpush1.bf16.msra.mxu0 %v14148_v47  ;;  %10869 = vmatpush1.bf16.msra.mxu1 %v14149_v48  ;;  %v14228_v47 = vld [vmem:[%s21637_s1 + $0x300] ss:$16 sps:$4 sm:$0xff]   ;;  %v14231_v48 = vld [vmem:[%s21637_s1 + $0x308] ss:$16 sps:$4 sm:$0xff]  }
  0x2c   :  { %9845 = vmatprep.subr.bf16.mxu0 %v14150_v50  ;;  %10870 = vmatprep.subr.bf16.mxu1 %v14152_v51  ;;  %v14236_v50 = vld [vmem:[%s21637_s1 + $0x324] ss:$16 sps:$4 sm:$0xff]   ;;  %v14239_v51 = vld [vmem:[%s21637_s1 + $0x32c] ss:$16 sps:$4 sm:$0xff]  }
  0x2f   :  { %9846 = vmatpush1.bf16.msra.mxu0 %v14154_v53  ;;  %10871 = vmatpush1.bf16.msra.mxu1 %v14155_v55  ;;  %v14234_v53 = vld [vmem:[%s21637_s1 + $0x320] ss:$16 sps:$4 sm:$0xff]   ;;  %v14242_v55 = vld [vmem:[%s21637_s1 + $0x344] ss:$16 sps:$4 sm:$0xff]  }
  0x30   :  { %9847 = vmatprep.subr.bf16.mxu0 %v14156_v56  ;;  %10872 = vmatprep.subr.bf16.mxu1 %v14158_v57  ;;  %v14245_v56 = vld [vmem:[%s21637_s1 + $0x34c] ss:$16 sps:$4 sm:$0xff]   ;;  %v14240_v57 = vld [vmem:[%s21637_s1 + $0x340] ss:$16 sps:$4 sm:$0xff]  }
  0x33   :  { %9848 = vmatpush1.bf16.msra.mxu0 %v14160_v59  ;;  %10873 = vmatpush1.bf16.msra.mxu1 %v14161_v61  ;;  %v14248_v59 = vld [vmem:[%s21637_s1 + $0x364] ss:$16 sps:$4 sm:$0xff]   ;;  %v14246_v61 = vld [vmem:[%s21637_s1 + $0x360] ss:$16 sps:$4 sm:$0xff]  }
  0x34   :  { %9849 = vmatprep.subr.bf16.mxu0 %v14162_v62  ;;  %10874 = vmatprep.subr.bf16.mxu1 %v14164_v63  ;;  %v14249_v62 = vld [vmem:[%s21637_s1 + $0x368] ss:$16 sps:$4 sm:$0xff]   ;;  %v14254_v63 = vld [vmem:[%s21637_s1 + $0x384] ss:$16 sps:$4 sm:$0xff]  }
  0x37   :  { %9850 = vmatpush1.bf16.msra.mxu0 %v14166_v0  ;;  %10875 = vmatpush1.bf16.msra.mxu1 %v14167_v1  ;;  %v14257_v0 = vld [vmem:[%s21637_s1 + $0x38c] ss:$16 sps:$4 sm:$0xff]   ;;  %v14252_v1 = vld [vmem:[%s21637_s1 + $0x380] ss:$16 sps:$4 sm:$0xff]  }
  0x38   :  { %9851 = vmatprep.subr.bf16.mxu0 %v14168_v2  ;;  %10876 = vmatprep.subr.bf16.mxu1 %v14170_v3  ;;  %v14255_v2 = vld [vmem:[%s21637_s1 + $0x388] ss:$16 sps:$4 sm:$0xff]   ;;  %v14260_v3 = vld [vmem:[%s21637_s1 + $0x3a4] ss:$16 sps:$4 sm:$0xff]  }
  0x3b   :  { %9852 = vmatpush1.bf16.msra.mxu0 %v14172_v4  ;;  %10877 = vmatpush1.bf16.msra.mxu1 %v14173_v5  ;;  %v14263_v4 = vld [vmem:[%s21637_s1 + $0x3ac] ss:$16 sps:$4 sm:$0xff]   ;;  %v14258_v5 = vld [vmem:[%s21637_s1 + $0x3a0] ss:$16 sps:$4 sm:$0xff]  }
  0x3c   :  { %9853 = vmatprep.subr.bf16.mxu0 %v14174_v6  ;;  %10878 = vmatprep.subr.bf16.mxu1 %v14176_v7  ;;  %v14261_v6 = vld [vmem:[%s21637_s1 + $0x3a8] ss:$16 sps:$4 sm:$0xff]   ;;  %v14266_v7 = vld [vmem:[%s21637_s1 + $0x3c4] ss:$16 sps:$4 sm:$0xff]  }
  0x3f   :  { %9854 = vmatpush1.bf16.msra.mxu0 %v14178_v8  ;;  %10879 = vmatpush1.bf16.msra.mxu1 %v14179_v9  ;;  %v14269_v8 = vld [vmem:[%s21637_s1 + $0x3cc] ss:$16 sps:$4 sm:$0xff]   ;;  %v1626_v9 = vcombine.high %v16683_v52, %v16683_v52 }
  0x40   :  { %9864 = vmatprep.subr.bf16.mxu0 %v14182_v10  ;;  %10889 = vmatprep.subr.bf16.mxu1 %v14185_v11  ;;  %v14264_v10 = vld [vmem:[%s21637_s1 + $0x3c0] ss:$16 sps:$4 sm:$0xff]   ;;  %v14267_v11 = vld [vmem:[%s21637_s1 + $0x3c8] ss:$16 sps:$4 sm:$0xff]   ;;  %v14275_v52 = vld [vmem:[%s21637_s1 + $0x3ec] ss:$16 sps:$4 sm:$0xff]  }
  0x42   :  { %9856 = vmatmul.mubr.bf16.vlgmr.msra.gmra.mrb[0].mxu0 %v16752_v13  ;;  %10881 = vmatmul.mubr.bf16.vlgmr.msra.gmra.mrb[0].mxu1 %v16752_v13 }
  0x43   :  { %9865 = vmatpush1.bf16.msra.mxu0 %v14180_v12  ;;  %10890 = vmatpush1.bf16.msra.mxu1 %v14183_v14  ;;  %v14272_v12 = vld [vmem:[%s21637_s1 + $0x3e4] ss:$16 sps:$4 sm:$0xff]   ;;  %v16936_v14 = vrot.slane %v1626_v9, %v16672_v49  ;;  %v14351_v9 = vld [vmem:[%s21637_s1 + $0x588] ss:$16 sps:$4 sm:$0xff]  }
  0x44   :  { %9866 = vmatprep.subr.bf16.mxu0 %v14188_v15  ;;  %10891 = vmatprep.subr.bf16.mxu1 %v14191_v16  ;;  %v14270_v15 = vld [vmem:[%s21637_s1 + $0x3e0] ss:$16 sps:$4 sm:$0xff]   ;;  %v14273_v16 = vld [vmem:[%s21637_s1 + $0x3e8] ss:$16 sps:$4 sm:$0xff]  }
  0x45   :  { %9896 = vmatprep.mubr.bf16.mxu0 %v1673_v17  ;;  %10921 = vmatprep.mubr.bf16.mxu1 %v1673_v17  ;;  %v14278_v17 = vld [vmem:[%s21637_s1 + $0x404] ss:$16 sps:$4 sm:$0xff]  }
  0x47   :  { %9867 = vmatpush1.bf16.msra.mxu0 %v14186_v18  ;;  %10892 = vmatpush1.bf16.msra.mxu1 %v14189_v19  ;;  %v14281_v18 = vld [vmem:[%s21637_s1 + $0x40c] ss:$16 sps:$4 sm:$0xff]   ;;  %v1642_v19 = vcombine.high %v16936_v14, %v16936_v14 }
  0x48   :  { %9868 = vmatprep.subr.bf16.mxu0 %v14194_v20  ;;  %10893 = vmatprep.subr.bf16.mxu1 %v14197_v21  ;;  %v14276_v20 = vld [vmem:[%s21637_s1 + $0x400] ss:$16 sps:$4 sm:$0xff]   ;;  %v1671_v21 = vcombine.high %v16752_v13, %v16752_v13 }
  0x49   :  { %v14282_v13 = vld [vmem:[%s21637_s1 + $0x420] ss:$16 sps:$4 sm:$0xff]  }
  0x4b   :  { %9869 = vmatpush1.bf16.msra.mxu0 %v14192_v22  ;;  %10894 = vmatpush1.bf16.msra.mxu1 %v14195_v23  ;;  %v14279_v22 = vld [vmem:[%s21637_s1 + $0x408] ss:$16 sps:$4 sm:$0xff]   ;;  %v14284_v23 = vld [vmem:[%s21637_s1 + $0x424] ss:$16 sps:$4 sm:$0xff]  }
  0x4c   :  { %9870 = vmatprep.subr.bf16.mxu0 %v14200_v24  ;;  %10895 = vmatprep.subr.bf16.mxu1 %v14203_v25  ;;  %v14287_v24 = vld [vmem:[%s21637_s1 + $0x42c] ss:$16 sps:$4 sm:$0xff]   ;;  %v16967_v25 = vrot.slane %v1642_v19, %v16672_v49  ;;  %v14368_v19 = vld [vmem:[%s21637_s1 + $0x5e4] ss:$16 sps:$4 sm:$0xff]  }
  0x4f   :  { %9871 = vmatpush1.bf16.msra.mxu0 %v14198_v26  ;;  %10896 = vmatpush1.bf16.msra.mxu1 %v14201_v27  ;;  %v14285_v26 = vld [vmem:[%s21637_s1 + $0x428] ss:$16 sps:$4 sm:$0xff]   ;;  %v14290_v27 = vld [vmem:[%s21637_s1 + $0x444] ss:$16 sps:$4 sm:$0xff]  }
  0x50   :  { %9872 = vmatprep.subr.bf16.mxu0 %v14206_v28  ;;  %10897 = vmatprep.subr.bf16.mxu1 %v14209_v29  ;;  %v14293_v28 = vld [vmem:[%s21637_s1 + $0x44c] ss:$16 sps:$4 sm:$0xff]   ;;  %v14288_v29 = vld [vmem:[%s21637_s1 + $0x440] ss:$16 sps:$4 sm:$0xff]  }
  0x53   :  { %9873 = vmatpush1.bf16.msra.mxu0 %v14204_v30  ;;  %10898 = vmatpush1.bf16.msra.mxu1 %v14207_v31  ;;  %v14291_v30 = vld [vmem:[%s21637_s1 + $0x448] ss:$16 sps:$4 sm:$0xff]   ;;  %v14296_v31 = vld [vmem:[%s21637_s1 + $0x464] ss:$16 sps:$4 sm:$0xff]  }
  0x54   :  { %9874 = vmatprep.subr.bf16.mxu0 %v14212_v32  ;;  %10899 = vmatprep.subr.bf16.mxu1 %v14215_v33  ;;  %v14299_v32 = vld [vmem:[%s21637_s1 + $0x46c] ss:$16 sps:$4 sm:$0xff]   ;;  %v14294_v33 = vld [vmem:[%s21637_s1 + $0x460] ss:$16 sps:$4 sm:$0xff]  }
  0x57   :  { %9875 = vmatpush1.bf16.msra.mxu0 %v14210_v34  ;;  %10900 = vmatpush1.bf16.msra.mxu1 %v14213_v35  ;;  %v14297_v34 = vld [vmem:[%s21637_s1 + $0x468] ss:$16 sps:$4 sm:$0xff]   ;;  %v14302_v35 = vld [vmem:[%s21637_s1 + $0x484] ss:$16 sps:$4 sm:$0xff]  }
  0x58   :  { %9876 = vmatprep.subr.bf16.mxu0 %v14218_v36  ;;  %10901 = vmatprep.subr.bf16.mxu1 %v14221_v37  ;;  %v14305_v36 = vld [vmem:[%s21637_s1 + $0x48c] ss:$16 sps:$4 sm:$0xff]   ;;  %v14300_v37 = vld [vmem:[%s21637_s1 + $0x480] ss:$16 sps:$4 sm:$0xff]  }
  0x5b   :  { %9877 = vmatpush1.bf16.msra.mxu0 %v14216_v38  ;;  %10902 = vmatpush1.bf16.msra.mxu1 %v14219_v39  ;;  %v14303_v38 = vld [vmem:[%s21637_s1 + $0x488] ss:$16 sps:$4 sm:$0xff]   ;;  %v14308_v39 = vld [vmem:[%s21637_s1 + $0x4a4] ss:$16 sps:$4 sm:$0xff]  }
  0x5c   :  { %9878 = vmatprep.subr.bf16.mxu0 %v14224_v40  ;;  %10903 = vmatprep.subr.bf16.mxu1 %v14227_v41  ;;  %v14311_v40 = vld [vmem:[%s21637_s1 + $0x4ac] ss:$16 sps:$4 sm:$0xff]   ;;  %v14306_v41 = vld [vmem:[%s21637_s1 + $0x4a0] ss:$16 sps:$4 sm:$0xff]  }
  0x5f   :  { %9879 = vmatpush1.bf16.msra.mxu0 %v14222_v43  ;;  %10904 = vmatpush1.bf16.msra.mxu1 %v14225_v44  ;;  %v14309_v43 = vld [vmem:[%s21637_s1 + $0x4a8] ss:$16 sps:$4 sm:$0xff]   ;;  %v14314_v44 = vld [vmem:[%s21637_s1 + $0x4c4] ss:$16 sps:$4 sm:$0xff]  }
  0x60   :  { %9880 = vmatprep.subr.bf16.mxu0 %v14230_v45  ;;  %10905 = vmatprep.subr.bf16.mxu1 %v14233_v46  ;;  %v14317_v45 = vld [vmem:[%s21637_s1 + $0x4cc] ss:$16 sps:$4 sm:$0xff]   ;;  %v14312_v46 = vld [vmem:[%s21637_s1 + $0x4c0] ss:$16 sps:$4 sm:$0xff]  }
  0x63   :  { %9881 = vmatpush1.bf16.msra.mxu0 %v14228_v47  ;;  %10906 = vmatpush1.bf16.msra.mxu1 %v14231_v48  ;;  %v14315_v47 = vld [vmem:[%s21637_s1 + $0x4c8] ss:$16 sps:$4 sm:$0xff]   ;;  %v14320_v48 = vld [vmem:[%s21637_s1 + $0x4e4] ss:$16 sps:$4 sm:$0xff]  }
  0x64   :  { %9882 = vmatprep.subr.bf16.mxu0 %v14236_v50  ;;  %10907 = vmatprep.subr.bf16.mxu1 %v14239_v51  ;;  %v14323_v50 = vld [vmem:[%s21637_s1 + $0x4ec] ss:$16 sps:$4 sm:$0xff]   ;;  %v14318_v51 = vld [vmem:[%s21637_s1 + $0x4e0] ss:$16 sps:$4 sm:$0xff]  }
  0x67   :  { %9883 = vmatpush1.bf16.msra.mxu0 %v14234_v53  ;;  %10908 = vmatpush1.bf16.msra.mxu1 %v14237_v54  ;;  %v14321_v53 = vld [vmem:[%s21637_s1 + $0x4e8] ss:$16 sps:$4 sm:$0xff]   ;;  %v14326_v54 = vld [vmem:[%s21637_s1 + $0x504] ss:$16 sps:$4 sm:$0xff]  }
  0x68   :  { %9884 = vmatprep.subr.bf16.mxu0 %v14242_v55  ;;  %10909 = vmatprep.subr.bf16.mxu1 %v14245_v56  ;;  %v14329_v55 = vld [vmem:[%s21637_s1 + $0x50c] ss:$16 sps:$4 sm:$0xff]   ;;  %v14324_v56 = vld [vmem:[%s21637_s1 + $0x500] ss:$16 sps:$4 sm:$0xff]  }
  0x6b   :  { %9885 = vmatpush1.bf16.msra.mxu0 %v14240_v57  ;;  %10910 = vmatpush1.bf16.msra.mxu1 %v14243_v58  ;;  %v14327_v57 = vld [vmem:[%s21637_s1 + $0x508] ss:$16 sps:$4 sm:$0xff]   ;;  %v14332_v58 = vld [vmem:[%s21637_s1 + $0x524] ss:$16 sps:$4 sm:$0xff]  }
  0x6c   :  { %9886 = vmatprep.subr.bf16.mxu0 %v14248_v59  ;;  %10911 = vmatprep.subr.bf16.mxu1 %v14251_v60  ;;  %v14335_v59 = vld [vmem:[%s21637_s1 + $0x52c] ss:$16 sps:$4 sm:$0xff]   ;;  %v14330_v60 = vld [vmem:[%s21637_s1 + $0x520] ss:$16 sps:$4 sm:$0xff]  }
  0x6f   :  { %9887 = vmatpush1.bf16.msra.mxu0 %v14246_v61  ;;  %10912 = vmatpush1.bf16.msra.mxu1 %v14249_v62  ;;  %v14333_v61 = vld [vmem:[%s21637_s1 + $0x528] ss:$16 sps:$4 sm:$0xff]   ;;  %v14338_v62 = vld [vmem:[%s21637_s1 + $0x544] ss:$16 sps:$4 sm:$0xff]  }
  0x70   :  { %9888 = vmatprep.subr.bf16.mxu0 %v14254_v63  ;;  %10913 = vmatprep.subr.bf16.mxu1 %v14257_v0  ;;  %v14341_v63 = vld [vmem:[%s21637_s1 + $0x54c] ss:$16 sps:$4 sm:$0xff]   ;;  %v14336_v0 = vld [vmem:[%s21637_s1 + $0x540] ss:$16 sps:$4 sm:$0xff]  }
  0x73   :  { %9889 = vmatpush1.bf16.msra.mxu0 %v14252_v1  ;;  %10914 = vmatpush1.bf16.msra.mxu1 %v14255_v2  ;;  %v14339_v1 = vld [vmem:[%s21637_s1 + $0x548] ss:$16 sps:$4 sm:$0xff]   ;;  %v14344_v2 = vld [vmem:[%s21637_s1 + $0x564] ss:$16 sps:$4 sm:$0xff]  }
  0x74   :  { %9890 = vmatprep.subr.bf16.mxu0 %v14260_v3  ;;  %10915 = vmatprep.subr.bf16.mxu1 %v14263_v4  ;;  %v14347_v3 = vld [vmem:[%s21637_s1 + $0x56c] ss:$16 sps:$4 sm:$0xff]   ;;  %v14342_v4 = vld [vmem:[%s21637_s1 + $0x560] ss:$16 sps:$4 sm:$0xff]  }
  0x77   :  { %9891 = vmatpush1.bf16.msra.mxu0 %v14258_v5  ;;  %10916 = vmatpush1.bf16.msra.mxu1 %v14261_v6  ;;  %v14345_v5 = vld [vmem:[%s21637_s1 + $0x568] ss:$16 sps:$4 sm:$0xff]   ;;  %v14350_v6 = vld [vmem:[%s21637_s1 + $0x584] ss:$16 sps:$4 sm:$0xff]  }
  0x78   :  { %9892 = vmatprep.subr.bf16.mxu0 %v14266_v7  ;;  %10917 = vmatprep.subr.bf16.mxu1 %v14269_v8  ;;  %v14353_v7 = vld [vmem:[%s21637_s1 + $0x58c] ss:$16 sps:$4 sm:$0xff]   ;;  %v14348_v8 = vld [vmem:[%s21637_s1 + $0x580] ss:$16 sps:$4 sm:$0xff]  }
  0x7b   :  { %9893 = vmatpush1.bf16.msra.mxu0 %v14264_v10  ;;  %10918 = vmatpush1.bf16.msra.mxu1 %v14267_v11  ;;  %v14356_v10 = vld [vmem:[%s21637_s1 + $0x5a4] ss:$16 sps:$4 sm:$0xff]   ;;  %v14359_v11 = vld [vmem:[%s21637_s1 + $0x5ac] ss:$16 sps:$4 sm:$0xff]  }
  0x7c   :  { %9894 = vmatprep.subr.bf16.mxu0 %v14272_v12  ;;  %10919 = vmatprep.subr.bf16.mxu1 %v14275_v52  ;;  %v14354_v12 = vld [vmem:[%s21637_s1 + $0x5a0] ss:$16 sps:$4 sm:$0xff]   ;;  %v14357_v52 = vld [vmem:[%s21637_s1 + $0x5a8] ss:$16 sps:$4 sm:$0xff]  }
  0x7f   :  { %9895 = vmatpush1.bf16.msra.mxu0 %v14270_v15  ;;  %10920 = vmatpush1.bf16.msra.mxu1 %v14273_v16  ;;  %v14362_v15 = vld [vmem:[%s21637_s1 + $0x5c4] ss:$16 sps:$4 sm:$0xff]   ;;  %v14365_v16 = vld [vmem:[%s21637_s1 + $0x5cc] ss:$16 sps:$4 sm:$0xff]  }
  0x80   :  { %9905 = vmatprep.subr.bf16.mxu0 %v14278_v17  ;;  %10930 = vmatprep.subr.bf16.mxu1 %v14281_v18  ;;  %v14360_v17 = vld [vmem:[%s21637_s1 + $0x5c0] ss:$16 sps:$4 sm:$0xff]   ;;  %v14363_v18 = vld [vmem:[%s21637_s1 + $0x5c8] ss:$16 sps:$4 sm:$0xff]  }
  0x82   :  { %9897 = vmatmul.mubr.bf16.vlgmr.msra.gmra.mrb[0].mxu0 %v1671_v21  ;;  %10922 = vmatmul.mubr.bf16.vlgmr.msra.gmra.mrb[0].mxu1 %v1671_v21  ;;  %v14366_v21 = vld [vmem:[%s21637_s1 + $0x5e0] ss:$16 sps:$4 sm:$0xff]  }
  0x83   :  { %9906 = vmatpush1.bf16.msra.mxu0 %v14276_v20  ;;  %10931 = vmatpush1.bf16.msra.mxu1 %v14279_v22  ;;  %v14371_v20 = vld [vmem:[%s21637_s1 + $0x5ec] ss:$16 sps:$4 sm:$0xff]   ;;  %v14369_v22 = vld [vmem:[%s21637_s1 + $0x5e8] ss:$16 sps:$4 sm:$0xff]  }
  0x84   :  { %9907 = vmatprep.subr.bf16.mxu0 %v14284_v23  ;;  %10932 = vmatprep.subr.bf16.mxu1 %v14287_v24  ;;  %v14375_v23 = vld [vmem:[%s21637_s1 + $0x604] ss:$16 sps:$4 sm:$0xff]   ;;  %v14378_v24 = vld [vmem:[%s21637_s1 + $0x60c] ss:$16 sps:$4 sm:$0xff]  }
  0x85   :  { %9937 = vmatprep.mubr.bf16.mxu0 %v16967_v25  ;;  %10962 = vmatprep.mubr.bf16.mxu1 %v16967_v25 }
  0x87   :  { %9908 = vmatpush1.bf16.msra.mxu0 %v14282_v13  ;;  %10933 = vmatpush1.bf16.msra.mxu1 %v14285_v26  ;;  %v14373_v13 = vld [vmem:[%s21637_s1 + $0x600] ss:$16 sps:$4 sm:$0xff]   ;;  %v17156_v26 = vrot.slane %v16936_v14, %v16672_v49  ;;  %v1674_v14 = vcombine.high %v16967_v25, %v16967_v25  ;;  %v14387_v25 = vld [vmem:[%s21637_s1 + $0x644] ss:$16 sps:$4 sm:$0xff]  }
  0x88   :  { %9909 = vmatprep.subr.bf16.mxu0 %v14290_v27  ;;  %10934 = vmatprep.subr.bf16.mxu1 %v14293_v28  ;;  %v14376_v27 = vld [vmem:[%s21637_s1 + $0x608] ss:$16 sps:$4 sm:$0xff]   ;;  %v14381_v28 = vld [vmem:[%s21637_s1 + $0x624] ss:$16 sps:$4 sm:$0xff]  }
  0x8b   :  { %9910 = vmatpush1.bf16.msra.mxu0 %v14288_v29  ;;  %10935 = vmatpush1.bf16.msra.mxu1 %v14291_v30  ;;  %v14384_v29 = vld [vmem:[%s21637_s1 + $0x62c] ss:$16 sps:$4 sm:$0xff]   ;;  %v14379_v30 = vld [vmem:[%s21637_s1 + $0x620] ss:$16 sps:$4 sm:$0xff]  }
  0x8c   :  { %9911 = vmatprep.subr.bf16.mxu0 %v14296_v31  ;;  %10936 = vmatprep.subr.bf16.mxu1 %v14299_v32  ;;  %v14382_v31 = vld [vmem:[%s21637_s1 + $0x628] ss:$16 sps:$4 sm:$0xff]   ;;  %v14390_v32 = vld [vmem:[%s21637_s1 + $0x64c] ss:$16 sps:$4 sm:$0xff]  }
  0x8f   :  { %9912 = vmatpush1.bf16.msra.mxu0 %v14294_v33  ;;  %10937 = vmatpush1.bf16.msra.mxu1 %v14297_v34  ;;  %v14385_v33 = vld [vmem:[%s21637_s1 + $0x640] ss:$16 sps:$4 sm:$0xff]   ;;  %v14388_v34 = vld [vmem:[%s21637_s1 + $0x648] ss:$16 sps:$4 sm:$0xff]  }
  0x90   :  { %9913 = vmatprep.subr.bf16.mxu0 %v14302_v35  ;;  %10938 = vmatprep.subr.bf16.mxu1 %v14305_v36  ;;  %v14393_v35 = vld [vmem:[%s21637_s1 + $0x664] ss:$16 sps:$4 sm:$0xff]   ;;  %v14396_v36 = vld [vmem:[%s21637_s1 + $0x66c] ss:$16 sps:$4 sm:$0xff]  }
  0x93   :  { %9914 = vmatpush1.bf16.msra.mxu0 %v14300_v37  ;;  %10939 = vmatpush1.bf16.msra.mxu1 %v14303_v38  ;;  %v14391_v37 = vld [vmem:[%s21637_s1 + $0x660] ss:$16 sps:$4 sm:$0xff]   ;;  %v14394_v38 = vld [vmem:[%s21637_s1 + $0x668] ss:$16 sps:$4 sm:$0xff]  }
  0x94   :  { %9915 = vmatprep.subr.bf16.mxu0 %v14308_v39  ;;  %10940 = vmatprep.subr.bf16.mxu1 %v14311_v40  ;;  %v14399_v39 = vld [vmem:[%s21637_s1 + $0x684] ss:$16 sps:$4 sm:$0xff]   ;;  %v14402_v40 = vld [vmem:[%s21637_s1 + $0x68c] ss:$16 sps:$4 sm:$0xff]  }
  0x97   :  { %9916 = vmatpush1.bf16.msra.mxu0 %v14306_v41  ;;  %10941 = vmatpush1.bf16.msra.mxu1 %v14309_v43  ;;  %v14397_v41 = vld [vmem:[%s21637_s1 + $0x680] ss:$16 sps:$4 sm:$0xff]   ;;  %v14400_v43 = vld [vmem:[%s21637_s1 + $0x688] ss:$16 sps:$4 sm:$0xff]  }
  0x98   :  { %9917 = vmatprep.subr.bf16.mxu0 %v14314_v44  ;;  %10942 = vmatprep.subr.bf16.mxu1 %v14317_v45  ;;  %v14405_v44 = vld [vmem:[%s21637_s1 + $0x6a4] ss:$16 sps:$4 sm:$0xff]   ;;  %v14408_v45 = vld [vmem:[%s21637_s1 + $0x6ac] ss:$16 sps:$4 sm:$0xff]  }
  0x9b   :  { %9918 = vmatpush1.bf16.msra.mxu0 %v14312_v46  ;;  %10943 = vmatpush1.bf16.msra.mxu1 %v14315_v47  ;;  %v14403_v46 = vld [vmem:[%s21637_s1 + $0x6a0] ss:$16 sps:$4 sm:$0xff]   ;;  %v14406_v47 = vld [vmem:[%s21637_s1 + $0x6a8] ss:$16 sps:$4 sm:$0xff]  }
  0x9c   :  { %9919 = vmatprep.subr.bf16.mxu0 %v14320_v48  ;;  %10944 = vmatprep.subr.bf16.mxu1 %v14323_v50  ;;  %v14411_v48 = vld [vmem:[%s21637_s1 + $0x6c4] ss:$16 sps:$4 sm:$0xff]   ;;  %v14414_v50 = vld [vmem:[%s21637_s1 + $0x6cc] ss:$16 sps:$4 sm:$0xff]  }
  0x9f   :  { %9920 = vmatpush1.bf16.msra.mxu0 %v14318_v51  ;;  %10945 = vmatpush1.bf16.msra.mxu1 %v14321_v53  ;;  %v14409_v51 = vld [vmem:[%s21637_s1 + $0x6c0] ss:$16 sps:$4 sm:$0xff]   ;;  %v14412_v53 = vld [vmem:[%s21637_s1 + $0x6c8] ss:$16 sps:$4 sm:$0xff]  }
  0xa0   :  { %9921 = vmatprep.subr.bf16.mxu0 %v14326_v54  ;;  %10946 = vmatprep.subr.bf16.mxu1 %v14329_v55  ;;  %v14417_v54 = vld [vmem:[%s21637_s1 + $0x6e4] ss:$16 sps:$4 sm:$0xff]   ;;  %v14420_v55 = vld [vmem:[%s21637_s1 + $0x6ec] ss:$16 sps:$4 sm:$0xff]  }
  0xa3   :  { %9922 = vmatpush1.bf16.msra.mxu0 %v14324_v56  ;;  %10947 = vmatpush1.bf16.msra.mxu1 %v14327_v57  ;;  %v14415_v56 = vld [vmem:[%s21637_s1 + $0x6e0] ss:$16 sps:$4 sm:$0xff]   ;;  %v14418_v57 = vld [vmem:[%s21637_s1 + $0x6e8] ss:$16 sps:$4 sm:$0xff]  }
  0xa4   :  { %9923 = vmatprep.subr.bf16.mxu0 %v14332_v58  ;;  %10948 = vmatprep.subr.bf16.mxu1 %v14335_v59  ;;  %v14423_v58 = vld [vmem:[%s21637_s1 + $0x704] ss:$16 sps:$4 sm:$0xff]   ;;  %v14426_v59 = vld [vmem:[%s21637_s1 + $0x70c] ss:$16 sps:$4 sm:$0xff]  }
  0xa7   :  { %9924 = vmatpush1.bf16.msra.mxu0 %v14330_v60  ;;  %10949 = vmatpush1.bf16.msra.mxu1 %v14333_v61  ;;  %v14421_v60 = vld [vmem:[%s21637_s1 + $0x700] ss:$16 sps:$4 sm:$0xff]   ;;  %v14424_v61 = vld [vmem:[%s21637_s1 + $0x708] ss:$16 sps:$4 sm:$0xff]  }
  0xa8   :  { %9925 = vmatprep.subr.bf16.mxu0 %v14338_v62  ;;  %10950 = vmatprep.subr.bf16.mxu1 %v14341_v63  ;;  %v14429_v62 = vld [vmem:[%s21637_s1 + $0x724] ss:$16 sps:$4 sm:$0xff]   ;;  %v14432_v63 = vld [vmem:[%s21637_s1 + $0x72c] ss:$16 sps:$4 sm:$0xff]  }
  0xab   :  { %9926 = vmatpush1.bf16.msra.mxu0 %v14336_v0  ;;  %10951 = vmatpush1.bf16.msra.mxu1 %v14339_v1  ;;  %v14427_v0 = vld [vmem:[%s21637_s1 + $0x720] ss:$16 sps:$4 sm:$0xff]   ;;  %v14430_v1 = vld [vmem:[%s21637_s1 + $0x728] ss:$16 sps:$4 sm:$0xff]  }
  0xac   :  { %9927 = vmatprep.subr.bf16.mxu0 %v14344_v2  ;;  %10952 = vmatprep.subr.bf16.mxu1 %v14347_v3  ;;  %v14435_v2 = vld [vmem:[%s21637_s1 + $0x744] ss:$16 sps:$4 sm:$0xff]   ;;  %v14438_v3 = vld [vmem:[%s21637_s1 + $0x74c] ss:$16 sps:$4 sm:$0xff]  }
  0xaf   :  { %9928 = vmatpush1.bf16.msra.mxu0 %v14342_v4  ;;  %10953 = vmatpush1.bf16.msra.mxu1 %v14345_v5  ;;  %v14433_v4 = vld [vmem:[%s21637_s1 + $0x740] ss:$16 sps:$4 sm:$0xff]   ;;  %v14436_v5 = vld [vmem:[%s21637_s1 + $0x748] ss:$16 sps:$4 sm:$0xff]  }
  0xb0   :  { %9929 = vmatprep.subr.bf16.mxu0 %v14350_v6  ;;  %10954 = vmatprep.subr.bf16.mxu1 %v14353_v7  ;;  %v14441_v6 = vld [vmem:[%s21637_s1 + $0x764] ss:$16 sps:$4 sm:$0xff]   ;;  %v14444_v7 = vld [vmem:[%s21637_s1 + $0x76c] ss:$16 sps:$4 sm:$0xff]  }
  0xb3   :  { %9930 = vmatpush1.bf16.msra.mxu0 %v14348_v8  ;;  %10955 = vmatpush1.bf16.msra.mxu1 %v14351_v9  ;;  %v14439_v8 = vld [vmem:[%s21637_s1 + $0x760] ss:$16 sps:$4 sm:$0xff]   ;;  %v14442_v9 = vld [vmem:[%s21637_s1 + $0x768] ss:$16 sps:$4 sm:$0xff]  }
  0xb4   :  { %9931 = vmatprep.subr.bf16.mxu0 %v14356_v10  ;;  %10956 = vmatprep.subr.bf16.mxu1 %v14359_v11  ;;  %v14447_v10 = vld [vmem:[%s21637_s1 + $0x784] ss:$16 sps:$4 sm:$0xff]   ;;  %v14450_v11 = vld [vmem:[%s21637_s1 + $0x78c] ss:$16 sps:$4 sm:$0xff]  }
  0xb7   :  { %9932 = vmatpush1.bf16.msra.mxu0 %v14354_v12  ;;  %10957 = vmatpush1.bf16.msra.mxu1 %v14357_v52  ;;  %v14445_v12 = vld [vmem:[%s21637_s1 + $0x780] ss:$16 sps:$4 sm:$0xff]   ;;  %v14448_v52 = vld [vmem:[%s21637_s1 + $0x788] ss:$16 sps:$4 sm:$0xff]  }
  0xb8   :  { %9933 = vmatprep.subr.bf16.mxu0 %v14362_v15  ;;  %10958 = vmatprep.subr.bf16.mxu1 %v14365_v16  ;;  %v14453_v15 = vld [vmem:[%s21637_s1 + $0x7a4] ss:$16 sps:$4 sm:$0xff]   ;;  %v14456_v16 = vld [vmem:[%s21637_s1 + $0x7ac] ss:$16 sps:$4 sm:$0xff]  }
  0xbb   :  { %9934 = vmatpush1.bf16.msra.mxu0 %v14360_v17  ;;  %10959 = vmatpush1.bf16.msra.mxu1 %v14363_v18  ;;  %v14451_v17 = vld [vmem:[%s21637_s1 + $0x7a0] ss:$16 sps:$4 sm:$0xff]   ;;  %v14454_v18 = vld [vmem:[%s21637_s1 + $0x7a8] ss:$16 sps:$4 sm:$0xff]  }
  0xbc   :  { %9935 = vmatprep.subr.bf16.mxu0 %v14368_v19  ;;  %10960 = vmatprep.subr.bf16.mxu1 %v14371_v20  ;;  %v14459_v19 = vld [vmem:[%s21637_s1 + $0x7c4] ss:$16 sps:$4 sm:$0xff]   ;;  %v14462_v20 = vld [vmem:[%s21637_s1 + $0x7cc] ss:$16 sps:$4 sm:$0xff]  }
  0xbf   :  { %9936 = vmatpush1.bf16.msra.mxu0 %v14366_v21  ;;  %10961 = vmatpush1.bf16.msra.mxu1 %v14369_v22  ;;  %v17330_v21 = vld.sshfl [vmem:[%s21636_s0 + $0x8] sm:$0xff pattern:$0x75316420]  ;;  %v14457_v22 = vld [vmem:[%s21637_s1 + $0x7c0] ss:$16 sps:$4 sm:$0xff]  }
  0xc0   :  { %9946 = vmatprep.subr.bf16.mxu0 %v14375_v23  ;;  %10971 = vmatprep.subr.bf16.mxu1 %v14378_v24  ;;  %v14460_v23 = vld [vmem:[%s21637_s1 + $0x7c8] ss:$16 sps:$4 sm:$0xff]   ;;  %v14465_v24 = vld [vmem:[%s21637_s1 + $0x7e4] ss:$16 sps:$4 sm:$0xff]  }
  0xc2   :  { %9938 = vmatmul.mubr.bf16.vlgmr.msra.gmra.mrb[0].mxu0 %v17156_v26  ;;  %10963 = vmatmul.mubr.bf16.vlgmr.msra.gmra.mrb[0].mxu1 %v17156_v26 }
  0xc3   :  { %9947 = vmatpush1.bf16.msra.mxu0 %v14373_v13  ;;  %10972 = vmatpush1.bf16.msra.mxu1 %v14376_v27  ;;  %v14468_v13 = vld [vmem:[%s21637_s1 + $0x7ec] ss:$16 sps:$4 sm:$0xff]   ;;  %v14463_v27 = vld [vmem:[%s21637_s1 + $0x7e0] ss:$16 sps:$4 sm:$0xff]  }
  0xc4   :  { %9948 = vmatprep.subr.bf16.mxu0 %v14381_v28  ;;  %10973 = vmatprep.subr.bf16.mxu1 %v14384_v29  ;;  %v14466_v28 = vld [vmem:[%s21637_s1 + $0x7e8] ss:$16 sps:$4 sm:$0xff]   ;;  %v14471_v29 = vld [vmem:[%s21637_s1 + $0x804] ss:$16 sps:$4 sm:$0xff]  }
  0xc5   :  { %9978 = vmatprep.mubr.bf16.mxu0 %v1674_v14  ;;  %11003 = vmatprep.mubr.bf16.mxu1 %v1674_v14  ;;  %v14474_v14 = vld [vmem:[%s21637_s1 + $0x80c] ss:$16 sps:$4 sm:$0xff]  }
  0xc7   :  { %9949 = vmatpush1.bf16.msra.mxu0 %v14379_v30  ;;  %10974 = vmatpush1.bf16.msra.mxu1 %v14382_v31  ;;  %v1690_v30 = vcombine.high %v17330_v21, %v17330_v21  ;;  %v1672_v31 = vcombine.high %v17156_v26, %v17156_v26  ;;  %v14480_v26 = vld [vmem:[%s21637_s1 + $0x82c] ss:$16 sps:$4 sm:$0xff]  }
  0xc8   :  { %9950 = vmatprep.subr.bf16.mxu0 %v14387_v25  ;;  %10975 = vmatprep.subr.bf16.mxu1 %v14390_v32  ;;  %v14469_v25 = vld [vmem:[%s21637_s1 + $0x800] ss:$16 sps:$4 sm:$0xff]   ;;  %v14472_v32 = vld [vmem:[%s21637_s1 + $0x808] ss:$16 sps:$4 sm:$0xff]  }
  0xcb   :  { %9951 = vmatpush1.bf16.msra.mxu0 %v14385_v33  ;;  %10976 = vmatpush1.bf16.msra.mxu1 %v14388_v34  ;;  %v14477_v33 = vld [vmem:[%s21637_s1 + $0x824] ss:$16 sps:$4 sm:$0xff]   ;;  %v17373_v34 = vrot.slane %v1690_v30, %v16672_v49 }
  0xcc   :  { %9952 = vmatprep.subr.bf16.mxu0 %v14393_v35  ;;  %10977 = vmatprep.subr.bf16.mxu1 %v14396_v36  ;;  %v14475_v35 = vld [vmem:[%s21637_s1 + $0x820] ss:$16 sps:$4 sm:$0xff]   ;;  %v14478_v36 = vld [vmem:[%s21637_s1 + $0x828] ss:$16 sps:$4 sm:$0xff]   ;;  %v14561_v30 = vld [vmem:[%s21637_s1 + $0x9e4] ss:$16 sps:$4 sm:$0xff]  }
  0xcf   :  { %9953 = vmatpush1.bf16.msra.mxu0 %v14391_v37  ;;  %10978 = vmatpush1.bf16.msra.mxu1 %v14394_v38  ;;  %v14483_v37 = vld [vmem:[%s21637_s1 + $0x844] ss:$16 sps:$4 sm:$0xff]   ;;  %v14486_v38 = vld [vmem:[%s21637_s1 + $0x84c] ss:$16 sps:$4 sm:$0xff]  }
  0xd0   :  { %9954 = vmatprep.subr.bf16.mxu0 %v14399_v39  ;;  %10979 = vmatprep.subr.bf16.mxu1 %v14402_v40  ;;  %v14481_v39 = vld [vmem:[%s21637_s1 + $0x840] ss:$16 sps:$4 sm:$0xff]   ;;  %v14484_v40 = vld [vmem:[%s21637_s1 + $0x848] ss:$16 sps:$4 sm:$0xff]  }
  0xd3   :  { %9955 = vmatpush1.bf16.msra.mxu0 %v14397_v41  ;;  %10980 = vmatpush1.bf16.msra.mxu1 %v14400_v43  ;;  %v14489_v41 = vld [vmem:[%s21637_s1 + $0x864] ss:$16 sps:$4 sm:$0xff]   ;;  %v14492_v43 = vld [vmem:[%s21637_s1 + $0x86c] ss:$16 sps:$4 sm:$0xff]  }
  0xd4   :  { %9956 = vmatprep.subr.bf16.mxu0 %v14405_v44  ;;  %10981 = vmatprep.subr.bf16.mxu1 %v14408_v45  ;;  %v14487_v44 = vld [vmem:[%s21637_s1 + $0x860] ss:$16 sps:$4 sm:$0xff]   ;;  %v14490_v45 = vld [vmem:[%s21637_s1 + $0x868] ss:$16 sps:$4 sm:$0xff]  }
  0xd7   :  { %9957 = vmatpush1.bf16.msra.mxu0 %v14403_v46  ;;  %10982 = vmatpush1.bf16.msra.mxu1 %v14406_v47  ;;  %v14495_v46 = vld [vmem:[%s21637_s1 + $0x884] ss:$16 sps:$4 sm:$0xff]   ;;  %v14498_v47 = vld [vmem:[%s21637_s1 + $0x88c] ss:$16 sps:$4 sm:$0xff]  }
  0xd8   :  { %9958 = vmatprep.subr.bf16.mxu0 %v14411_v48  ;;  %10983 = vmatprep.subr.bf16.mxu1 %v14414_v50  ;;  %v14493_v48 = vld [vmem:[%s21637_s1 + $0x880] ss:$16 sps:$4 sm:$0xff]   ;;  %v14496_v50 = vld [vmem:[%s21637_s1 + $0x888] ss:$16 sps:$4 sm:$0xff]  }
  0xdb   :  { %9959 = vmatpush1.bf16.msra.mxu0 %v14409_v51  ;;  %10984 = vmatpush1.bf16.msra.mxu1 %v14412_v53  ;;  %v14501_v51 = vld [vmem:[%s21637_s1 + $0x8a4] ss:$16 sps:$4 sm:$0xff]   ;;  %v14504_v53 = vld [vmem:[%s21637_s1 + $0x8ac] ss:$16 sps:$4 sm:$0xff]  }
  0xdc   :  { %9960 = vmatprep.subr.bf16.mxu0 %v14417_v54  ;;  %10985 = vmatprep.subr.bf16.mxu1 %v14420_v55  ;;  %v14499_v54 = vld [vmem:[%s21637_s1 + $0x8a0] ss:$16 sps:$4 sm:$0xff]   ;;  %v14502_v55 = vld [vmem:[%s21637_s1 + $0x8a8] ss:$16 sps:$4 sm:$0xff]  }
  0xdf   :  { %9961 = vmatpush1.bf16.msra.mxu0 %v14415_v56  ;;  %10986 = vmatpush1.bf16.msra.mxu1 %v14418_v57  ;;  %v14507_v56 = vld [vmem:[%s21637_s1 + $0x8c4] ss:$16 sps:$4 sm:$0xff]   ;;  %v14510_v57 = vld [vmem:[%s21637_s1 + $0x8cc] ss:$16 sps:$4 sm:$0xff]  }
  0xe0   :  { %9962 = vmatprep.subr.bf16.mxu0 %v14423_v58  ;;  %10987 = vmatprep.subr.bf16.mxu1 %v14426_v59  ;;  %v14505_v58 = vld [vmem:[%s21637_s1 + $0x8c0] ss:$16 sps:$4 sm:$0xff]   ;;  %v14508_v59 = vld [vmem:[%s21637_s1 + $0x8c8] ss:$16 sps:$4 sm:$0xff]  }
  0xe3   :  { %9963 = vmatpush1.bf16.msra.mxu0 %v14421_v60  ;;  %10988 = vmatpush1.bf16.msra.mxu1 %v14424_v61  ;;  %v14513_v60 = vld [vmem:[%s21637_s1 + $0x8e4] ss:$16 sps:$4 sm:$0xff]   ;;  %v14516_v61 = vld [vmem:[%s21637_s1 + $0x8ec] ss:$16 sps:$4 sm:$0xff]  }
  0xe4   :  { %9964 = vmatprep.subr.bf16.mxu0 %v14429_v62  ;;  %10989 = vmatprep.subr.bf16.mxu1 %v14432_v63  ;;  %v14511_v62 = vld [vmem:[%s21637_s1 + $0x8e0] ss:$16 sps:$4 sm:$0xff]   ;;  %v14514_v63 = vld [vmem:[%s21637_s1 + $0x8e8] ss:$16 sps:$4 sm:$0xff]  }
  0xe7   :  { %9965 = vmatpush1.bf16.msra.mxu0 %v14427_v0  ;;  %10990 = vmatpush1.bf16.msra.mxu1 %v14430_v1  ;;  %v14519_v0 = vld [vmem:[%s21637_s1 + $0x904] ss:$16 sps:$4 sm:$0xff]   ;;  %v14522_v1 = vld [vmem:[%s21637_s1 + $0x90c] ss:$16 sps:$4 sm:$0xff]  }
  0xe8   :  { %9966 = vmatprep.subr.bf16.mxu0 %v14435_v2  ;;  %10991 = vmatprep.subr.bf16.mxu1 %v14438_v3  ;;  %v14517_v2 = vld [vmem:[%s21637_s1 + $0x900] ss:$16 sps:$4 sm:$0xff]   ;;  %v14520_v3 = vld [vmem:[%s21637_s1 + $0x908] ss:$16 sps:$4 sm:$0xff]  }
  0xeb   :  { %9967 = vmatpush1.bf16.msra.mxu0 %v14433_v4  ;;  %10992 = vmatpush1.bf16.msra.mxu1 %v14436_v5  ;;  %v14525_v4 = vld [vmem:[%s21637_s1 + $0x924] ss:$16 sps:$4 sm:$0xff]   ;;  %v14528_v5 = vld [vmem:[%s21637_s1 + $0x92c] ss:$16 sps:$4 sm:$0xff]  }
  0xec   :  { %9968 = vmatprep.subr.bf16.mxu0 %v14441_v6  ;;  %10993 = vmatprep.subr.bf16.mxu1 %v14444_v7  ;;  %v14523_v6 = vld [vmem:[%s21637_s1 + $0x920] ss:$16 sps:$4 sm:$0xff]   ;;  %v14526_v7 = vld [vmem:[%s21637_s1 + $0x928] ss:$16 sps:$4 sm:$0xff]  }
  0xef   :  { %9969 = vmatpush1.bf16.msra.mxu0 %v14439_v8  ;;  %10994 = vmatpush1.bf16.msra.mxu1 %v14442_v9  ;;  %v14531_v8 = vld [vmem:[%s21637_s1 + $0x944] ss:$16 sps:$4 sm:$0xff]   ;;  %v14534_v9 = vld [vmem:[%s21637_s1 + $0x94c] ss:$16 sps:$4 sm:$0xff]  }
  0xf0   :  { %9970 = vmatprep.subr.bf16.mxu0 %v14447_v10  ;;  %10995 = vmatprep.subr.bf16.mxu1 %v14450_v11  ;;  %v14529_v10 = vld [vmem:[%s21637_s1 + $0x940] ss:$16 sps:$4 sm:$0xff]   ;;  %v14532_v11 = vld [vmem:[%s21637_s1 + $0x948] ss:$16 sps:$4 sm:$0xff]  }
  0xf3   :  { %9971 = vmatpush1.bf16.msra.mxu0 %v14445_v12  ;;  %10996 = vmatpush1.bf16.msra.mxu1 %v14448_v52  ;;  %v14537_v12 = vld [vmem:[%s21637_s1 + $0x964] ss:$16 sps:$4 sm:$0xff]   ;;  %v14540_v52 = vld [vmem:[%s21637_s1 + $0x96c] ss:$16 sps:$4 sm:$0xff]  }
  0xf4   :  { %9972 = vmatprep.subr.bf16.mxu0 %v14453_v15  ;;  %10997 = vmatprep.subr.bf16.mxu1 %v14456_v16  ;;  %v14535_v15 = vld [vmem:[%s21637_s1 + $0x960] ss:$16 sps:$4 sm:$0xff]   ;;  %v14538_v16 = vld [vmem:[%s21637_s1 + $0x968] ss:$16 sps:$4 sm:$0xff]  }
  0xf7   :  { %9973 = vmatpush1.bf16.msra.mxu0 %v14451_v17  ;;  %10998 = vmatpush1.bf16.msra.mxu1 %v14454_v18  ;;  %v14543_v17 = vld [vmem:[%s21637_s1 + $0x984] ss:$16 sps:$4 sm:$0xff]   ;;  %v14546_v18 = vld [vmem:[%s21637_s1 + $0x98c] ss:$16 sps:$4 sm:$0xff]  }
  0xf8   :  { %9974 = vmatprep.subr.bf16.mxu0 %v14459_v19  ;;  %10999 = vmatprep.subr.bf16.mxu1 %v14462_v20  ;;  %v14541_v19 = vld [vmem:[%s21637_s1 + $0x980] ss:$16 sps:$4 sm:$0xff]   ;;  %v14544_v20 = vld [vmem:[%s21637_s1 + $0x988] ss:$16 sps:$4 sm:$0xff]  }
  0xfb   :  { %9975 = vmatpush1.bf16.msra.mxu0 %v14457_v22  ;;  %11000 = vmatpush1.bf16.msra.mxu1 %v14460_v23  ;;  %v14549_v22 = vld [vmem:[%s21637_s1 + $0x9a4] ss:$16 sps:$4 sm:$0xff]   ;;  %v14552_v23 = vld [vmem:[%s21637_s1 + $0x9ac] ss:$16 sps:$4 sm:$0xff]  }
  0xfc   :  { %9976 = vmatprep.subr.bf16.mxu0 %v14465_v24  ;;  %11001 = vmatprep.subr.bf16.mxu1 %v14468_v13  ;;  %v14547_v24 = vld [vmem:[%s21637_s1 + $0x9a0] ss:$16 sps:$4 sm:$0xff]   ;;  %v14550_v13 = vld [vmem:[%s21637_s1 + $0x9a8] ss:$16 sps:$4 sm:$0xff]  }
  0xff   :  { %9977 = vmatpush1.bf16.msra.mxu0 %v14463_v27  ;;  %11002 = vmatpush1.bf16.msra.mxu1 %v14466_v28  ;;  %v14555_v27 = vld [vmem:[%s21637_s1 + $0x9c4] ss:$16 sps:$4 sm:$0xff]   ;;  %v14558_v28 = vld [vmem:[%s21637_s1 + $0x9cc] ss:$16 sps:$4 sm:$0xff]  }
 0x100   :  { %9987 = vmatprep.subr.bf16.mxu0 %v14471_v29  ;;  %11012 = vmatprep.subr.bf16.mxu1 %v14474_v14  ;;  %v14553_v29 = vld [vmem:[%s21637_s1 + $0x9c0] ss:$16 sps:$4 sm:$0xff]   ;;  %v14556_v14 = vld [vmem:[%s21637_s1 + $0x9c8] ss:$16 sps:$4 sm:$0xff]  }
 0x102   :  { %9979 = vmatmul.mubr.bf16.vlgmr.msra.gmra.mrb[0].mxu0 %v1672_v31  ;;  %11004 = vmatmul.mubr.bf16.vlgmr.msra.gmra.mrb[0].mxu1 %v1672_v31  ;;  %v14564_v31 = vld [vmem:[%s21637_s1 + $0x9ec] ss:$16 sps:$4 sm:$0xff]  }
 0x103   :  { %9988 = vmatpush1.bf16.msra.mxu0 %v14469_v25  ;;  %11013 = vmatpush1.bf16.msra.mxu1 %v14472_v32  ;;  %v14559_v25 = vld [vmem:[%s21637_s1 + $0x9e0] ss:$16 sps:$4 sm:$0xff]   ;;  %v14562_v32 = vld [vmem:[%s21637_s1 + $0x9e8] ss:$16 sps:$4 sm:$0xff]  }
 0x104   :  { %9989 = vmatprep.subr.bf16.mxu0 %v14477_v33  ;;  %11014 = vmatprep.subr.bf16.mxu1 %v14480_v26  ;;  %v14567_v33 = vld [vmem:[%s21637_s1 + $0xa04] ss:$16 sps:$4 sm:$0xff]   ;;  %v14570_v26 = vld [vmem:[%s21637_s1 + $0xa0c] ss:$16 sps:$4 sm:$0xff]  }
 0x105   :  { %10019 = vmatprep.mubr.bf16.mxu0 %v17373_v34  ;;  %11044 = vmatprep.mubr.bf16.mxu1 %v17373_v34 }
 0x107   :  { %9990 = vmatpush1.bf16.msra.mxu0 %v14475_v35  ;;  %11015 = vmatpush1.bf16.msra.mxu1 %v14478_v36  ;;  %v17559_v35 = vrot.slane %v17330_v21, %v16672_v49  ;;  %v14565_v36 = vld [vmem:[%s21637_s1 + $0xa00] ss:$16 sps:$4 sm:$0xff]   ;;  %v14576_v21 = vld [vmem:[%s21637_s1 + $0xa2c] ss:$16 sps:$4 sm:$0xff]  }
 0x108   :  { %9991 = vmatprep.subr.bf16.mxu0 %v14483_v37  ;;  %11016 = vmatprep.subr.bf16.mxu1 %v14486_v38  ;;  %v14568_v37 = vld [vmem:[%s21637_s1 + $0xa08] ss:$16 sps:$4 sm:$0xff]   ;;  %v14573_v38 = vld [vmem:[%s21637_s1 + $0xa24] ss:$16 sps:$4 sm:$0xff]  }
 0x10b   :  { %9992 = vmatpush1.bf16.msra.mxu0 %v14481_v39  ;;  %11017 = vmatpush1.bf16.msra.mxu1 %v14484_v40  ;;  %v1722_v39 = vcombine.high %v17373_v34, %v17373_v34  ;;  %v14571_v40 = vld [vmem:[%s21637_s1 + $0xa20] ss:$16 sps:$4 sm:$0xff]   ;;  %v14579_v34 = vld [vmem:[%s21637_s1 + $0xa44] ss:$16 sps:$4 sm:$0xff]  }
 0x10c   :  { %9993 = vmatprep.subr.bf16.mxu0 %v14489_v41  ;;  %11018 = vmatprep.subr.bf16.mxu1 %v14492_v43  ;;  %v14574_v41 = vld [vmem:[%s21637_s1 + $0xa28] ss:$16 sps:$4 sm:$0xff]   ;;  %v14582_v43 = vld [vmem:[%s21637_s1 + $0xa4c] ss:$16 sps:$4 sm:$0xff]  }
 0x10f   :  { %9994 = vmatpush1.bf16.msra.mxu0 %v14487_v44  ;;  %11019 = vmatpush1.bf16.msra.mxu1 %v14490_v45  ;;  %v14577_v44 = vld [vmem:[%s21637_s1 + $0xa40] ss:$16 sps:$4 sm:$0xff]   ;;  %v14580_v45 = vld [vmem:[%s21637_s1 + $0xa48] ss:$16 sps:$4 sm:$0xff]  }
 0x110   :  { %9995 = vmatprep.subr.bf16.mxu0 %v14495_v46  ;;  %11020 = vmatprep.subr.bf16.mxu1 %v14498_v47  ;;  %v14585_v46 = vld [vmem:[%s21637_s1 + $0xa64] ss:$16 sps:$4 sm:$0xff]   ;;  %v14588_v47 = vld [vmem:[%s21637_s1 + $0xa6c] ss:$16 sps:$4 sm:$0xff]  }
 0x113   :  { %9996 = vmatpush1.bf16.msra.mxu0 %v14493_v48  ;;  %11021 = vmatpush1.bf16.msra.mxu1 %v14496_v50  ;;  %v14583_v48 = vld [vmem:[%s21637_s1 + $0xa60] ss:$16 sps:$4 sm:$0xff]   ;;  %v14586_v50 = vld [vmem:[%s21637_s1 + $0xa68] ss:$16 sps:$4 sm:$0xff]  }
 0x114   :  { %9997 = vmatprep.subr.bf16.mxu0 %v14501_v51  ;;  %11022 = vmatprep.subr.bf16.mxu1 %v14504_v53  ;;  %v14591_v51 = vld [vmem:[%s21637_s1 + $0xa84] ss:$16 sps:$4 sm:$0xff]   ;;  %v14594_v53 = vld [vmem:[%s21637_s1 + $0xa8c] ss:$16 sps:$4 sm:$0xff]  }
 0x117   :  { %9998 = vmatpush1.bf16.msra.mxu0 %v14499_v54  ;;  %11023 = vmatpush1.bf16.msra.mxu1 %v14502_v55  ;;  %v14589_v54 = vld [vmem:[%s21637_s1 + $0xa80] ss:$16 sps:$4 sm:$0xff]   ;;  %v14592_v55 = vld [vmem:[%s21637_s1 + $0xa88] ss:$16 sps:$4 sm:$0xff]  }
 0x118   :  { %9999 = vmatprep.subr.bf16.mxu0 %v14507_v56  ;;  %11024 = vmatprep.subr.bf16.mxu1 %v14510_v57  ;;  %v14597_v56 = vld [vmem:[%s21637_s1 + $0xaa4] ss:$16 sps:$4 sm:$0xff]   ;;  %v14600_v57 = vld [vmem:[%s21637_s1 + $0xaac] ss:$16 sps:$4 sm:$0xff]  }
 0x11b   :  { %10000 = vmatpush1.bf16.msra.mxu0 %v14505_v58  ;;  %11025 = vmatpush1.bf16.msra.mxu1 %v14508_v59  ;;  %v14595_v58 = vld [vmem:[%s21637_s1 + $0xaa0] ss:$16 sps:$4 sm:$0xff]   ;;  %v14598_v59 = vld [vmem:[%s21637_s1 + $0xaa8] ss:$16 sps:$4 sm:$0xff]  }
 0x11c   :  { %10001 = vmatprep.subr.bf16.mxu0 %v14513_v60  ;;  %11026 = vmatprep.subr.bf16.mxu1 %v14516_v61  ;;  %v14603_v60 = vld [vmem:[%s21637_s1 + $0xac4] ss:$16 sps:$4 sm:$0xff]   ;;  %v14606_v61 = vld [vmem:[%s21637_s1 + $0xacc] ss:$16 sps:$4 sm:$0xff]  }
 0x11f   :  { %10002 = vmatpush1.bf16.msra.mxu0 %v14511_v62  ;;  %11027 = vmatpush1.bf16.msra.mxu1 %v14514_v63  ;;  %v14601_v62 = vld [vmem:[%s21637_s1 + $0xac0] ss:$16 sps:$4 sm:$0xff]   ;;  %v14604_v63 = vld [vmem:[%s21637_s1 + $0xac8] ss:$16 sps:$4 sm:$0xff]  }
 0x120   :  { %10003 = vmatprep.subr.bf16.mxu0 %v14519_v0  ;;  %11028 = vmatprep.subr.bf16.mxu1 %v14522_v1  ;;  %v14609_v0 = vld [vmem:[%s21637_s1 + $0xae4] ss:$16 sps:$4 sm:$0xff]   ;;  %v14612_v1 = vld [vmem:[%s21637_s1 + $0xaec] ss:$16 sps:$4 sm:$0xff]  }
 0x123   :  { %10004 = vmatpush1.bf16.msra.mxu0 %v14517_v2  ;;  %11029 = vmatpush1.bf16.msra.mxu1 %v14520_v3  ;;  %v14607_v2 = vld [vmem:[%s21637_s1 + $0xae0] ss:$16 sps:$4 sm:$0xff]   ;;  %v14610_v3 = vld [vmem:[%s21637_s1 + $0xae8] ss:$16 sps:$4 sm:$0xff]  }
 0x124   :  { %10005 = vmatprep.subr.bf16.mxu0 %v14525_v4  ;;  %11030 = vmatprep.subr.bf16.mxu1 %v14528_v5  ;;  %v14615_v4 = vld [vmem:[%s21637_s1 + $0xb04] ss:$16 sps:$4 sm:$0xff]   ;;  %v14618_v5 = vld [vmem:[%s21637_s1 + $0xb0c] ss:$16 sps:$4 sm:$0xff]  }
 0x127   :  { %10006 = vmatpush1.bf16.msra.mxu0 %v14523_v6  ;;  %11031 = vmatpush1.bf16.msra.mxu1 %v14526_v7  ;;  %v14613_v6 = vld [vmem:[%s21637_s1 + $0xb00] ss:$16 sps:$4 sm:$0xff]   ;;  %v14616_v7 = vld [vmem:[%s21637_s1 + $0xb08] ss:$16 sps:$4 sm:$0xff]  }
 0x128   :  { %10007 = vmatprep.subr.bf16.mxu0 %v14531_v8  ;;  %11032 = vmatprep.subr.bf16.mxu1 %v14534_v9  ;;  %v14621_v8 = vld [vmem:[%s21637_s1 + $0xb24] ss:$16 sps:$4 sm:$0xff]   ;;  %v14624_v9 = vld [vmem:[%s21637_s1 + $0xb2c] ss:$16 sps:$4 sm:$0xff]  }
 0x12b   :  { %10008 = vmatpush1.bf16.msra.mxu0 %v14529_v10  ;;  %11033 = vmatpush1.bf16.msra.mxu1 %v14532_v11  ;;  %v14619_v10 = vld [vmem:[%s21637_s1 + $0xb20] ss:$16 sps:$4 sm:$0xff]   ;;  %v14622_v11 = vld [vmem:[%s21637_s1 + $0xb28] ss:$16 sps:$4 sm:$0xff]  }
 0x12c   :  { %10009 = vmatprep.subr.bf16.mxu0 %v14537_v12  ;;  %11034 = vmatprep.subr.bf16.mxu1 %v14540_v52  ;;  %v14627_v12 = vld [vmem:[%s21637_s1 + $0xb44] ss:$16 sps:$4 sm:$0xff]   ;;  %v14630_v52 = vld [vmem:[%s21637_s1 + $0xb4c] ss:$16 sps:$4 sm:$0xff]  }
 0x12f   :  { %10010 = vmatpush1.bf16.msra.mxu0 %v14535_v15  ;;  %11035 = vmatpush1.bf16.msra.mxu1 %v14538_v16  ;;  %v14625_v15 = vld [vmem:[%s21637_s1 + $0xb40] ss:$16 sps:$4 sm:$0xff]   ;;  %v14628_v16 = vld [vmem:[%s21637_s1 + $0xb48] ss:$16 sps:$4 sm:$0xff]  }
 0x130   :  { %10011 = vmatprep.subr.bf16.mxu0 %v14543_v17  ;;  %11036 = vmatprep.subr.bf16.mxu1 %v14546_v18  ;;  %v14633_v17 = vld [vmem:[%s21637_s1 + $0xb64] ss:$16 sps:$4 sm:$0xff]   ;;  %v14636_v18 = vld [vmem:[%s21637_s1 + $0xb6c] ss:$16 sps:$4 sm:$0xff]  }
 0x133   :  { %10012 = vmatpush1.bf16.msra.mxu0 %v14541_v19  ;;  %11037 = vmatpush1.bf16.msra.mxu1 %v14544_v20  ;;  %v14631_v19 = vld [vmem:[%s21637_s1 + $0xb60] ss:$16 sps:$4 sm:$0xff]   ;;  %v14634_v20 = vld [vmem:[%s21637_s1 + $0xb68] ss:$16 sps:$4 sm:$0xff]  }
 0x134   :  { %10013 = vmatprep.subr.bf16.mxu0 %v14549_v22  ;;  %11038 = vmatprep.subr.bf16.mxu1 %v14552_v23  ;;  %v14639_v22 = vld [vmem:[%s21637_s1 + $0xb84] ss:$16 sps:$4 sm:$0xff]   ;;  %v14642_v23 = vld [vmem:[%s21637_s1 + $0xb8c] ss:$16 sps:$4 sm:$0xff]  }
 0x137   :  { %10014 = vmatpush1.bf16.msra.mxu0 %v14547_v24  ;;  %11039 = vmatpush1.bf16.msra.mxu1 %v14550_v13  ;;  %v14637_v24 = vld [vmem:[%s21637_s1 + $0xb80] ss:$16 sps:$4 sm:$0xff]   ;;  %v14640_v13 = vld [vmem:[%s21637_s1 + $0xb88] ss:$16 sps:$4 sm:$0xff]  }
 0x138   :  { %10015 = vmatprep.subr.bf16.mxu0 %v14555_v27  ;;  %11040 = vmatprep.subr.bf16.mxu1 %v14558_v28  ;;  %v14645_v27 = vld [vmem:[%s21637_s1 + $0xba4] ss:$16 sps:$4 sm:$0xff]   ;;  %v14648_v28 = vld [vmem:[%s21637_s1 + $0xbac] ss:$16 sps:$4 sm:$0xff]  }
 0x13b   :  { %10016 = vmatpush1.bf16.msra.mxu0 %v14553_v29  ;;  %11041 = vmatpush1.bf16.msra.mxu1 %v14556_v14  ;;  %v14643_v29 = vld [vmem:[%s21637_s1 + $0xba0] ss:$16 sps:$4 sm:$0xff]   ;;  %v14646_v14 = vld [vmem:[%s21637_s1 + $0xba8] ss:$16 sps:$4 sm:$0xff]  }
 0x13c   :  { %10017 = vmatprep.subr.bf16.mxu0 %v14561_v30  ;;  %11042 = vmatprep.subr.bf16.mxu1 %v14564_v31  ;;  %v14651_v30 = vld [vmem:[%s21637_s1 + $0xbc4] ss:$16 sps:$4 sm:$0xff]   ;;  %v14654_v31 = vld [vmem:[%s21637_s1 + $0xbcc] ss:$16 sps:$4 sm:$0xff]  }
 0x13f   :  { %10018 = vmatpush1.bf16.msra.mxu0 %v14559_v25  ;;  %11043 = vmatpush1.bf16.msra.mxu1 %v14562_v32  ;;  %v16474_v25 = vld [vmem:[%s21636_s0 + $0x8] sm:$0xff] }
 0x140   :  { %10028 = vmatprep.subr.bf16.mxu0 %v14567_v33  ;;  %11053 = vmatprep.subr.bf16.mxu1 %v14570_v26  ;;  %v1675_v32 = vcombine.high %v16474_v25, %v16474_v25  ;;  %v14649_v33 = vld [vmem:[%s21637_s1 + $0xbc0] ss:$16 sps:$4 sm:$0xff]   ;;  %v14652_v26 = vld [vmem:[%s21637_s1 + $0xbc8] ss:$16 sps:$4 sm:$0xff]  }
 0x141   :  { %v14733_v25 = vld [vmem:[%s21637_s1 + $0xd80] ss:$16 sps:$4 sm:$0xff]  }
 0x142   :  { %10020 = vmatmul.mubr.bf16.vlgmr.msra.gmra.mrb[0].mxu0 %v17559_v35  ;;  %11045 = vmatmul.mubr.bf16.vlgmr.msra.gmra.mrb[0].mxu1 %v17559_v35 }
 0x143   :  { %10029 = vmatpush1.bf16.msra.mxu0 %v14565_v36  ;;  %11054 = vmatpush1.bf16.msra.mxu1 %v14568_v37  ;;  %v14657_v36 = vld [vmem:[%s21637_s1 + $0xbe4] ss:$16 sps:$4 sm:$0xff]   ;;  %v14660_v37 = vld [vmem:[%s21637_s1 + $0xbec] ss:$16 sps:$4 sm:$0xff]  }
 0x144   :  { %10030 = vmatprep.subr.bf16.mxu0 %v14573_v38  ;;  %11055 = vmatprep.subr.bf16.mxu1 %v14576_v21  ;;  %v17749_v38 = vrot.slane %v1675_v32, %v16672_v49  ;;  %v14655_v21 = vld [vmem:[%s21637_s1 + $0xbe0] ss:$16 sps:$4 sm:$0xff]   ;;  %v14736_v32 = vld [vmem:[%s21637_s1 + $0xd88] ss:$16 sps:$4 sm:$0xff]  }
 0x145   :  { %10060 = vmatprep.mubr.bf16.mxu0 %v1722_v39  ;;  %11085 = vmatprep.mubr.bf16.mxu1 %v1722_v39  ;;  %v14658_v39 = vld [vmem:[%s21637_s1 + $0xbe8] ss:$16 sps:$4 sm:$0xff]  }
 0x147   :  { %10031 = vmatpush1.bf16.msra.mxu0 %v14571_v40  ;;  %11056 = vmatpush1.bf16.msra.mxu1 %v14574_v41  ;;  %v14663_v40 = vld [vmem:[%s21637_s1 + $0xc04] ss:$16 sps:$4 sm:$0xff]   ;;  %v14666_v41 = vld [vmem:[%s21637_s1 + $0xc0c] ss:$16 sps:$4 sm:$0xff]  }
 0x148   :  { %10032 = vmatprep.subr.bf16.mxu0 %v14579_v34  ;;  %11057 = vmatprep.subr.bf16.mxu1 %v14582_v43  ;;  %v1691_v34 = vcombine.high %v17749_v38, %v17749_v38  ;;  %v1720_v43 = vcombine.high %v17559_v35, %v17559_v35  ;;  %v14672_v35 = vld [vmem:[%s21637_s1 + $0xc2c] ss:$16 sps:$4 sm:$0xff]  }
 0x14b   :  { %10033 = vmatpush1.bf16.msra.mxu0 %v14577_v44  ;;  %11058 = vmatpush1.bf16.msra.mxu1 %v14580_v45  ;;  %v14661_v44 = vld [vmem:[%s21637_s1 + $0xc00] ss:$16 sps:$4 sm:$0xff]   ;;  %v14664_v45 = vld [vmem:[%s21637_s1 + $0xc08] ss:$16 sps:$4 sm:$0xff]  }
 0x14c   :  { %10034 = vmatprep.subr.bf16.mxu0 %v14585_v46  ;;  %11059 = vmatprep.subr.bf16.mxu1 %v14588_v47  ;;  %v14669_v46 = vld [vmem:[%s21637_s1 + $0xc24] ss:$16 sps:$4 sm:$0xff]   ;;  %v17780_v47 = vrot.slane %v1691_v34, %v16672_v49 }
 0x14d   :  { %v14753_v34 = vld [vmem:[%s21637_s1 + $0xde4] ss:$16 sps:$4 sm:$0xff]  }
 0x14f   :  { %10035 = vmatpush1.bf16.msra.mxu0 %v14583_v48  ;;  %11060 = vmatpush1.bf16.msra.mxu1 %v14586_v50  ;;  %v14667_v48 = vld [vmem:[%s21637_s1 + $0xc20] ss:$16 sps:$4 sm:$0xff]   ;;  %v14670_v50 = vld [vmem:[%s21637_s1 + $0xc28] ss:$16 sps:$4 sm:$0xff]  }
 0x150   :  { %10036 = vmatprep.subr.bf16.mxu0 %v14591_v51  ;;  %11061 = vmatprep.subr.bf16.mxu1 %v14594_v53  ;;  %v14675_v51 = vld [vmem:[%s21637_s1 + $0xc44] ss:$16 sps:$4 sm:$0xff]   ;;  %v14678_v53 = vld [vmem:[%s21637_s1 + $0xc4c] ss:$16 sps:$4 sm:$0xff]  }
 0x153   :  { %10037 = vmatpush1.bf16.msra.mxu0 %v14589_v54  ;;  %11062 = vmatpush1.bf16.msra.mxu1 %v14592_v55  ;;  %v14673_v54 = vld [vmem:[%s21637_s1 + $0xc40] ss:$16 sps:$4 sm:$0xff]   ;;  %v14676_v55 = vld [vmem:[%s21637_s1 + $0xc48] ss:$16 sps:$4 sm:$0xff]  }
 0x154   :  { %10038 = vmatprep.subr.bf16.mxu0 %v14597_v56  ;;  %11063 = vmatprep.subr.bf16.mxu1 %v14600_v57  ;;  %v14681_v56 = vld [vmem:[%s21637_s1 + $0xc64] ss:$16 sps:$4 sm:$0xff]   ;;  %v14684_v57 = vld [vmem:[%s21637_s1 + $0xc6c] ss:$16 sps:$4 sm:$0xff]  }
 0x157   :  { %10039 = vmatpush1.bf16.msra.mxu0 %v14595_v58  ;;  %11064 = vmatpush1.bf16.msra.mxu1 %v14598_v59  ;;  %v14679_v58 = vld [vmem:[%s21637_s1 + $0xc60] ss:$16 sps:$4 sm:$0xff]   ;;  %v14682_v59 = vld [vmem:[%s21637_s1 + $0xc68] ss:$16 sps:$4 sm:$0xff]  }
 0x158   :  { %10040 = vmatprep.subr.bf16.mxu0 %v14603_v60  ;;  %11065 = vmatprep.subr.bf16.mxu1 %v14606_v61  ;;  %v14687_v60 = vld [vmem:[%s21637_s1 + $0xc84] ss:$16 sps:$4 sm:$0xff]   ;;  %v14690_v61 = vld [vmem:[%s21637_s1 + $0xc8c] ss:$16 sps:$4 sm:$0xff]  }
 0x15b   :  { %10041 = vmatpush1.bf16.msra.mxu0 %v14601_v62  ;;  %11066 = vmatpush1.bf16.msra.mxu1 %v14604_v63  ;;  %v14685_v62 = vld [vmem:[%s21637_s1 + $0xc80] ss:$16 sps:$4 sm:$0xff]   ;;  %v14688_v63 = vld [vmem:[%s21637_s1 + $0xc88] ss:$16 sps:$4 sm:$0xff]  }
 0x15c   :  { %10042 = vmatprep.subr.bf16.mxu0 %v14609_v0  ;;  %11067 = vmatprep.subr.bf16.mxu1 %v14612_v1  ;;  %v14693_v0 = vld [vmem:[%s21637_s1 + $0xca4] ss:$16 sps:$4 sm:$0xff]   ;;  %v14696_v1 = vld [vmem:[%s21637_s1 + $0xcac] ss:$16 sps:$4 sm:$0xff]  }
 0x15f   :  { %10043 = vmatpush1.bf16.msra.mxu0 %v14607_v2  ;;  %11068 = vmatpush1.bf16.msra.mxu1 %v14610_v3  ;;  %v14691_v2 = vld [vmem:[%s21637_s1 + $0xca0] ss:$16 sps:$4 sm:$0xff]   ;;  %v14694_v3 = vld [vmem:[%s21637_s1 + $0xca8] ss:$16 sps:$4 sm:$0xff]  }
 0x160   :  { %10044 = vmatprep.subr.bf16.mxu0 %v14615_v4  ;;  %11069 = vmatprep.subr.bf16.mxu1 %v14618_v5  ;;  %v14699_v4 = vld [vmem:[%s21637_s1 + $0xcc4] ss:$16 sps:$4 sm:$0xff]   ;;  %v14702_v5 = vld [vmem:[%s21637_s1 + $0xccc] ss:$16 sps:$4 sm:$0xff]  }
 0x163   :  { %10045 = vmatpush1.bf16.msra.mxu0 %v14613_v6  ;;  %11070 = vmatpush1.bf16.msra.mxu1 %v14616_v7  ;;  %v14697_v6 = vld [vmem:[%s21637_s1 + $0xcc0] ss:$16 sps:$4 sm:$0xff]   ;;  %v14700_v7 = vld [vmem:[%s21637_s1 + $0xcc8] ss:$16 sps:$4 sm:$0xff]  }
 0x164   :  { %10046 = vmatprep.subr.bf16.mxu0 %v14621_v8  ;;  %11071 = vmatprep.subr.bf16.mxu1 %v14624_v9  ;;  %v14705_v8 = vld [vmem:[%s21637_s1 + $0xce4] ss:$16 sps:$4 sm:$0xff]   ;;  %v14708_v9 = vld [vmem:[%s21637_s1 + $0xcec] ss:$16 sps:$4 sm:$0xff]  }
 0x167   :  { %10047 = vmatpush1.bf16.msra.mxu0 %v14619_v10  ;;  %11072 = vmatpush1.bf16.msra.mxu1 %v14622_v11  ;;  %v14703_v10 = vld [vmem:[%s21637_s1 + $0xce0] ss:$16 sps:$4 sm:$0xff]   ;;  %v14706_v11 = vld [vmem:[%s21637_s1 + $0xce8] ss:$16 sps:$4 sm:$0xff]  }
 0x168   :  { %10048 = vmatprep.subr.bf16.mxu0 %v14627_v12  ;;  %11073 = vmatprep.subr.bf16.mxu1 %v14630_v52  ;;  %v14711_v12 = vld [vmem:[%s21637_s1 + $0xd04] ss:$16 sps:$4 sm:$0xff]   ;;  %v14714_v52 = vld [vmem:[%s21637_s1 + $0xd0c] ss:$16 sps:$4 sm:$0xff]  }
 0x16b   :  { %10049 = vmatpush1.bf16.msra.mxu0 %v14625_v15  ;;  %11074 = vmatpush1.bf16.msra.mxu1 %v14628_v16  ;;  %v14709_v15 = vld [vmem:[%s21637_s1 + $0xd00] ss:$16 sps:$4 sm:$0xff]   ;;  %v14712_v16 = vld [vmem:[%s21637_s1 + $0xd08] ss:$16 sps:$4 sm:$0xff]  }
 0x16c   :  { %10050 = vmatprep.subr.bf16.mxu0 %v14633_v17  ;;  %11075 = vmatprep.subr.bf16.mxu1 %v14636_v18  ;;  %v14717_v17 = vld [vmem:[%s21637_s1 + $0xd24] ss:$16 sps:$4 sm:$0xff]   ;;  %v14720_v18 = vld [vmem:[%s21637_s1 + $0xd2c] ss:$16 sps:$4 sm:$0xff]  }
 0x16f   :  { %10051 = vmatpush1.bf16.msra.mxu0 %v14631_v19  ;;  %11076 = vmatpush1.bf16.msra.mxu1 %v14634_v20  ;;  %v14715_v19 = vld [vmem:[%s21637_s1 + $0xd20] ss:$16 sps:$4 sm:$0xff]   ;;  %v14718_v20 = vld [vmem:[%s21637_s1 + $0xd28] ss:$16 sps:$4 sm:$0xff]  }
 0x170   :  { %10052 = vmatprep.subr.bf16.mxu0 %v14639_v22  ;;  %11077 = vmatprep.subr.bf16.mxu1 %v14642_v23  ;;  %v14723_v22 = vld [vmem:[%s21637_s1 + $0xd44] ss:$16 sps:$4 sm:$0xff]   ;;  %v14726_v23 = vld [vmem:[%s21637_s1 + $0xd4c] ss:$16 sps:$4 sm:$0xff]  }
 0x173   :  { %10053 = vmatpush1.bf16.msra.mxu0 %v14637_v24  ;;  %11078 = vmatpush1.bf16.msra.mxu1 %v14640_v13  ;;  %v14721_v24 = vld [vmem:[%s21637_s1 + $0xd40] ss:$16 sps:$4 sm:$0xff]   ;;  %v14724_v13 = vld [vmem:[%s21637_s1 + $0xd48] ss:$16 sps:$4 sm:$0xff]  }
 0x174   :  { %10054 = vmatprep.subr.bf16.mxu0 %v14645_v27  ;;  %11079 = vmatprep.subr.bf16.mxu1 %v14648_v28  ;;  %v14729_v27 = vld [vmem:[%s21637_s1 + $0xd64] ss:$16 sps:$4 sm:$0xff]   ;;  %v14732_v28 = vld [vmem:[%s21637_s1 + $0xd6c] ss:$16 sps:$4 sm:$0xff]  }
 0x177   :  { %10055 = vmatpush1.bf16.msra.mxu0 %v14643_v29  ;;  %11080 = vmatpush1.bf16.msra.mxu1 %v14646_v14  ;;  %v14727_v29 = vld [vmem:[%s21637_s1 + $0xd60] ss:$16 sps:$4 sm:$0xff]   ;;  %v14730_v14 = vld [vmem:[%s21637_s1 + $0xd68] ss:$16 sps:$4 sm:$0xff]  }
 0x178   :  { %10056 = vmatprep.subr.bf16.mxu0 %v14651_v30  ;;  %11081 = vmatprep.subr.bf16.mxu1 %v14654_v31  ;;  %v14735_v30 = vld [vmem:[%s21637_s1 + $0xd84] ss:$16 sps:$4 sm:$0xff]   ;;  %v14738_v31 = vld [vmem:[%s21637_s1 + $0xd8c] ss:$16 sps:$4 sm:$0xff]  }
 0x17b   :  { %10057 = vmatpush1.bf16.msra.mxu0 %v14649_v33  ;;  %11082 = vmatpush1.bf16.msra.mxu1 %v14652_v26  ;;  %v14741_v33 = vld [vmem:[%s21637_s1 + $0xda4] ss:$16 sps:$4 sm:$0xff]   ;;  %v14744_v26 = vld [vmem:[%s21637_s1 + $0xdac] ss:$16 sps:$4 sm:$0xff]  }
 0x17c   :  { %10058 = vmatprep.subr.bf16.mxu0 %v14657_v36  ;;  %11083 = vmatprep.subr.bf16.mxu1 %v14660_v37  ;;  %v14739_v36 = vld [vmem:[%s21637_s1 + $0xda0] ss:$16 sps:$4 sm:$0xff]   ;;  %v14742_v37 = vld [vmem:[%s21637_s1 + $0xda8] ss:$16 sps:$4 sm:$0xff]  }
 0x17f   :  { %10059 = vmatpush1.bf16.msra.mxu0 %v14655_v21  ;;  %11084 = vmatpush1.bf16.msra.mxu1 %v14658_v39  ;;  %v14747_v21 = vld [vmem:[%s21637_s1 + $0xdc4] ss:$16 sps:$4 sm:$0xff]   ;;  %v14750_v39 = vld [vmem:[%s21637_s1 + $0xdcc] ss:$16 sps:$4 sm:$0xff]  }
 0x180   :  { %10069 = vmatprep.subr.bf16.mxu0 %v14663_v40  ;;  %11094 = vmatprep.subr.bf16.mxu1 %v14666_v41  ;;  %v14745_v40 = vld [vmem:[%s21637_s1 + $0xdc0] ss:$16 sps:$4 sm:$0xff]   ;;  %v14748_v41 = vld [vmem:[%s21637_s1 + $0xdc8] ss:$16 sps:$4 sm:$0xff]  }
 0x182   :  { %10061 = vmatmul.mubr.bf16.vlgmr.msra.gmra.mrb[0].mxu0 %v1720_v43  ;;  %11086 = vmatmul.mubr.bf16.vlgmr.msra.gmra.mrb[0].mxu1 %v1720_v43  ;;  %v14756_v43 = vld [vmem:[%s21637_s1 + $0xdec] ss:$16 sps:$4 sm:$0xff]  }
 0x183   :  { %10070 = vmatpush1.bf16.msra.mxu0 %v14661_v44  ;;  %11095 = vmatpush1.bf16.msra.mxu1 %v14664_v45  ;;  %v14751_v44 = vld [vmem:[%s21637_s1 + $0xde0] ss:$16 sps:$4 sm:$0xff]   ;;  %v14754_v45 = vld [vmem:[%s21637_s1 + $0xde8] ss:$16 sps:$4 sm:$0xff]  }
 0x184   :  { %10071 = vmatprep.subr.bf16.mxu0 %v14669_v46  ;;  %11096 = vmatprep.subr.bf16.mxu1 %v14672_v35  ;;  %v14760_v46 = vld [vmem:[%s21637_s1 + $0xe04] ss:$16 sps:$4 sm:$0xff]   ;;  %v14763_v35 = vld [vmem:[%s21637_s1 + $0xe0c] ss:$16 sps:$4 sm:$0xff]  }
 0x185   :  { %10101 = vmatprep.mubr.bf16.mxu0 %v17780_v47  ;;  %11126 = vmatprep.mubr.bf16.mxu1 %v17780_v47 }
 0x187   :  { %10072 = vmatpush1.bf16.msra.mxu0 %v14667_v48  ;;  %11097 = vmatpush1.bf16.msra.mxu1 %v14670_v50  ;;  %v17966_v48 = vrot.slane %v17749_v38, %v16672_v49  ;;  %v14758_v50 = vld [vmem:[%s21637_s1 + $0xe00] ss:$16 sps:$4 sm:$0xff]   ;;  %v14769_v38 = vld [vmem:[%s21637_s1 + $0xe2c] ss:$16 sps:$4 sm:$0xff]  }
 0x188   :  { %10073 = vmatprep.subr.bf16.mxu0 %v14675_v51  ;;  %11098 = vmatprep.subr.bf16.mxu1 %v14678_v53  ;;  %v14761_v51 = vld [vmem:[%s21637_s1 + $0xe08] ss:$16 sps:$4 sm:$0xff]   ;;  %v14766_v53 = vld [vmem:[%s21637_s1 + $0xe24] ss:$16 sps:$4 sm:$0xff]  }
 0x18b   :  { %10074 = vmatpush1.bf16.msra.mxu0 %v14673_v54  ;;  %11099 = vmatpush1.bf16.msra.mxu1 %v14676_v55  ;;  %v1723_v54 = vcombine.high %v17780_v47, %v17780_v47  ;;  %v14764_v55 = vld [vmem:[%s21637_s1 + $0xe20] ss:$16 sps:$4 sm:$0xff]   ;;  %v14772_v47 = vld [vmem:[%s21637_s1 + $0xe44] ss:$16 sps:$4 sm:$0xff]  }
 0x18c   :  { %10075 = vmatprep.subr.bf16.mxu0 %v14681_v56  ;;  %11100 = vmatprep.subr.bf16.mxu1 %v14684_v57  ;;  %v14767_v56 = vld [vmem:[%s21637_s1 + $0xe28] ss:$16 sps:$4 sm:$0xff]   ;;  %v14775_v57 = vld [vmem:[%s21637_s1 + $0xe4c] ss:$16 sps:$4 sm:$0xff]  }
 0x18f   :  { %10076 = vmatpush1.bf16.msra.mxu0 %v14679_v58  ;;  %11101 = vmatpush1.bf16.msra.mxu1 %v14682_v59  ;;  %v14770_v58 = vld [vmem:[%s21637_s1 + $0xe40] ss:$16 sps:$4 sm:$0xff]   ;;  %v14773_v59 = vld [vmem:[%s21637_s1 + $0xe48] ss:$16 sps:$4 sm:$0xff]  }
 0x190   :  { %10077 = vmatprep.subr.bf16.mxu0 %v14687_v60  ;;  %11102 = vmatprep.subr.bf16.mxu1 %v14690_v61  ;;  %v14778_v60 = vld [vmem:[%s21637_s1 + $0xe64] ss:$16 sps:$4 sm:$0xff]   ;;  %v14781_v61 = vld [vmem:[%s21637_s1 + $0xe6c] ss:$16 sps:$4 sm:$0xff]  }
 0x193   :  { %10078 = vmatpush1.bf16.msra.mxu0 %v14685_v62  ;;  %11103 = vmatpush1.bf16.msra.mxu1 %v14688_v63  ;;  %v14776_v62 = vld [vmem:[%s21637_s1 + $0xe60] ss:$16 sps:$4 sm:$0xff]   ;;  %v14779_v63 = vld [vmem:[%s21637_s1 + $0xe68] ss:$16 sps:$4 sm:$0xff]  }
 0x194   :  { %10079 = vmatprep.subr.bf16.mxu0 %v14693_v0  ;;  %11104 = vmatprep.subr.bf16.mxu1 %v14696_v1  ;;  %v14784_v0 = vld [vmem:[%s21637_s1 + $0xe84] ss:$16 sps:$4 sm:$0xff]   ;;  %v14787_v1 = vld [vmem:[%s21637_s1 + $0xe8c] ss:$16 sps:$4 sm:$0xff]  }
 0x197   :  { %10080 = vmatpush1.bf16.msra.mxu0 %v14691_v2  ;;  %11105 = vmatpush1.bf16.msra.mxu1 %v14694_v3  ;;  %v14782_v2 = vld [vmem:[%s21637_s1 + $0xe80] ss:$16 sps:$4 sm:$0xff]   ;;  %v14785_v3 = vld [vmem:[%s21637_s1 + $0xe88] ss:$16 sps:$4 sm:$0xff]  }
 0x198   :  { %10081 = vmatprep.subr.bf16.mxu0 %v14699_v4  ;;  %11106 = vmatprep.subr.bf16.mxu1 %v14702_v5  ;;  %v14790_v4 = vld [vmem:[%s21637_s1 + $0xea4] ss:$16 sps:$4 sm:$0xff]   ;;  %v14793_v5 = vld [vmem:[%s21637_s1 + $0xeac] ss:$16 sps:$4 sm:$0xff]  }
 0x19b   :  { %10082 = vmatpush1.bf16.msra.mxu0 %v14697_v6  ;;  %11107 = vmatpush1.bf16.msra.mxu1 %v14700_v7  ;;  %v14788_v6 = vld [vmem:[%s21637_s1 + $0xea0] ss:$16 sps:$4 sm:$0xff]   ;;  %v14791_v7 = vld [vmem:[%s21637_s1 + $0xea8] ss:$16 sps:$4 sm:$0xff]  }
 0x19c   :  { %10083 = vmatprep.subr.bf16.mxu0 %v14705_v8  ;;  %11108 = vmatprep.subr.bf16.mxu1 %v14708_v9  ;;  %v14796_v8 = vld [vmem:[%s21637_s1 + $0xec4] ss:$16 sps:$4 sm:$0xff]   ;;  %v14799_v9 = vld [vmem:[%s21637_s1 + $0xecc] ss:$16 sps:$4 sm:$0xff]  }
 0x19f   :  { %10084 = vmatpush1.bf16.msra.mxu0 %v14703_v10  ;;  %11109 = vmatpush1.bf16.msra.mxu1 %v14706_v11  ;;  %v14794_v10 = vld [vmem:[%s21637_s1 + $0xec0] ss:$16 sps:$4 sm:$0xff]   ;;  %v14797_v11 = vld [vmem:[%s21637_s1 + $0xec8] ss:$16 sps:$4 sm:$0xff]  }
 0x1a0   :  { %10085 = vmatprep.subr.bf16.mxu0 %v14711_v12  ;;  %11110 = vmatprep.subr.bf16.mxu1 %v14714_v52  ;;  %v14802_v12 = vld [vmem:[%s21637_s1 + $0xee4] ss:$16 sps:$4 sm:$0xff]   ;;  %v14805_v52 = vld [vmem:[%s21637_s1 + $0xeec] ss:$16 sps:$4 sm:$0xff]  }
 0x1a3   :  { %10086 = vmatpush1.bf16.msra.mxu0 %v14709_v15  ;;  %11111 = vmatpush1.bf16.msra.mxu1 %v14712_v16  ;;  %v14800_v15 = vld [vmem:[%s21637_s1 + $0xee0] ss:$16 sps:$4 sm:$0xff]   ;;  %v14803_v16 = vld [vmem:[%s21637_s1 + $0xee8] ss:$16 sps:$4 sm:$0xff]  }
 0x1a4   :  { %10087 = vmatprep.subr.bf16.mxu0 %v14717_v17  ;;  %11112 = vmatprep.subr.bf16.mxu1 %v14720_v18  ;;  %v14808_v17 = vld [vmem:[%s21637_s1 + $0xf04] ss:$16 sps:$4 sm:$0xff]   ;;  %v14811_v18 = vld [vmem:[%s21637_s1 + $0xf0c] ss:$16 sps:$4 sm:$0xff]  }
 0x1a7   :  { %10088 = vmatpush1.bf16.msra.mxu0 %v14715_v19  ;;  %11113 = vmatpush1.bf16.msra.mxu1 %v14718_v20  ;;  %v14806_v19 = vld [vmem:[%s21637_s1 + $0xf00] ss:$16 sps:$4 sm:$0xff]   ;;  %v14809_v20 = vld [vmem:[%s21637_s1 + $0xf08] ss:$16 sps:$4 sm:$0xff]  }
 0x1a8   :  { %10089 = vmatprep.subr.bf16.mxu0 %v14723_v22  ;;  %11114 = vmatprep.subr.bf16.mxu1 %v14726_v23  ;;  %v14814_v22 = vld [vmem:[%s21637_s1 + $0xf24] ss:$16 sps:$4 sm:$0xff]   ;;  %v14817_v23 = vld [vmem:[%s21637_s1 + $0xf2c] ss:$16 sps:$4 sm:$0xff]  }
 0x1ab   :  { %10090 = vmatpush1.bf16.msra.mxu0 %v14721_v24  ;;  %11115 = vmatpush1.bf16.msra.mxu1 %v14724_v13  ;;  %v14812_v24 = vld [vmem:[%s21637_s1 + $0xf20] ss:$16 sps:$4 sm:$0xff]   ;;  %v14815_v13 = vld [vmem:[%s21637_s1 + $0xf28] ss:$16 sps:$4 sm:$0xff]  }
 0x1ac   :  { %10091 = vmatprep.subr.bf16.mxu0 %v14729_v27  ;;  %11116 = vmatprep.subr.bf16.mxu1 %v14732_v28  ;;  %v14820_v27 = vld [vmem:[%s21637_s1 + $0xf44] ss:$16 sps:$4 sm:$0xff]   ;;  %v14823_v28 = vld [vmem:[%s21637_s1 + $0xf4c] ss:$16 sps:$4 sm:$0xff]  }
 0x1af   :  { %10092 = vmatpush1.bf16.msra.mxu0 %v14727_v29  ;;  %11117 = vmatpush1.bf16.msra.mxu1 %v14730_v14  ;;  %v14818_v29 = vld [vmem:[%s21637_s1 + $0xf40] ss:$16 sps:$4 sm:$0xff]   ;;  %v14821_v14 = vld [vmem:[%s21637_s1 + $0xf48] ss:$16 sps:$4 sm:$0xff]  }
 0x1b0   :  { %10093 = vmatprep.subr.bf16.mxu0 %v14735_v30  ;;  %11118 = vmatprep.subr.bf16.mxu1 %v14738_v31  ;;  %v14826_v30 = vld [vmem:[%s21637_s1 + $0xf64] ss:$16 sps:$4 sm:$0xff]   ;;  %v14829_v31 = vld [vmem:[%s21637_s1 + $0xf6c] ss:$16 sps:$4 sm:$0xff]  }
 0x1b3   :  { %10094 = vmatpush1.bf16.msra.mxu0 %v14733_v25  ;;  %11119 = vmatpush1.bf16.msra.mxu1 %v14736_v32  ;;  %v14824_v25 = vld [vmem:[%s21637_s1 + $0xf60] ss:$16 sps:$4 sm:$0xff]   ;;  %v14827_v32 = vld [vmem:[%s21637_s1 + $0xf68] ss:$16 sps:$4 sm:$0xff]  }
 0x1b4   :  { %10095 = vmatprep.subr.bf16.mxu0 %v14741_v33  ;;  %11120 = vmatprep.subr.bf16.mxu1 %v14744_v26  ;;  %v14832_v33 = vld [vmem:[%s21637_s1 + $0xf84] ss:$16 sps:$4 sm:$0xff]   ;;  %v14835_v26 = vld [vmem:[%s21637_s1 + $0xf8c] ss:$16 sps:$4 sm:$0xff]  }
 0x1b7   :  { %10096 = vmatpush1.bf16.msra.mxu0 %v14739_v36  ;;  %11121 = vmatpush1.bf16.msra.mxu1 %v14742_v37  ;;  %v14830_v36 = vld [vmem:[%s21637_s1 + $0xf80] ss:$16 sps:$4 sm:$0xff]   ;;  %v14833_v37 = vld [vmem:[%s21637_s1 + $0xf88] ss:$16 sps:$4 sm:$0xff]  }
 0x1b8   :  { %10097 = vmatprep.subr.bf16.mxu0 %v14747_v21  ;;  %11122 = vmatprep.subr.bf16.mxu1 %v14750_v39  ;;  %v14838_v21 = vld [vmem:[%s21637_s1 + $0xfa4] ss:$16 sps:$4 sm:$0xff]   ;;  %v14841_v39 = vld [vmem:[%s21637_s1 + $0xfac] ss:$16 sps:$4 sm:$0xff]  }
 0x1bb   :  { %10098 = vmatpush1.bf16.msra.mxu0 %v14745_v40  ;;  %11123 = vmatpush1.bf16.msra.mxu1 %v14748_v41  ;;  %v14836_v40 = vld [vmem:[%s21637_s1 + $0xfa0] ss:$16 sps:$4 sm:$0xff]   ;;  %v14839_v41 = vld [vmem:[%s21637_s1 + $0xfa8] ss:$16 sps:$4 sm:$0xff]  }
 0x1bc   :  { %10099 = vmatprep.subr.bf16.mxu0 %v14753_v34  ;;  %11124 = vmatprep.subr.bf16.mxu1 %v14756_v43  ;;  %v14844_v34 = vld [vmem:[%s21637_s1 + $0xfc4] ss:$16 sps:$4 sm:$0xff]   ;;  %v14847_v43 = vld [vmem:[%s21637_s1 + $0xfcc] ss:$16 sps:$4 sm:$0xff]  }
 0x1bf   :  { %10100 = vmatpush1.bf16.msra.mxu0 %v14751_v44  ;;  %11125 = vmatpush1.bf16.msra.mxu1 %v14754_v45  ;;  %v18143_v44 = vld.sshfl [vmem:[%s21636_s0 + $0x10] sm:$0xff pattern:$0x75316420] }
 0x1c0   :  { %10110 = vmatprep.subr.bf16.mxu0 %v14760_v46  ;;  %11135 = vmatprep.subr.bf16.mxu1 %v14763_v35  ;;  %v14842_v45 = vld [vmem:[%s21637_s1 + $0xfc0] ss:$16 sps:$4 sm:$0xff]   ;;  %v14845_v46 = vld [vmem:[%s21637_s1 + $0xfc8] ss:$16 sps:$4 sm:$0xff]   ;;  %v14850_v35 = vld [vmem:[%s21637_s1 + $0xfe4] ss:$16 sps:$4 sm:$0xff]  }
 0x1c2   :  { %10102 = vmatmul.mubr.bf16.vlgmr.msra.gmra.mrb[0].mxu0 %v17966_v48  ;;  %11127 = vmatmul.mubr.bf16.vlgmr.msra.gmra.mrb[0].mxu1 %v17966_v48 }
 0x1c3   :  { %10111 = vmatpush1.bf16.msra.mxu0 %v14758_v50  ;;  %11136 = vmatpush1.bf16.msra.mxu1 %v14761_v51  ;;  %v14853_v50 = vld [vmem:[%s21637_s1 + $0xfec] ss:$16 sps:$4 sm:$0xff]   ;;  %v14848_v51 = vld [vmem:[%s21637_s1 + $0xfe0] ss:$16 sps:$4 sm:$0xff]  }
 0x1c4   :  { %10112 = vmatprep.subr.bf16.mxu0 %v14766_v53  ;;  %11137 = vmatprep.subr.bf16.mxu1 %v14769_v38  ;;  %v14851_v53 = vld [vmem:[%s21637_s1 + $0xfe8] ss:$16 sps:$4 sm:$0xff]   ;;  %v14856_v38 = vld [vmem:[%s21637_s1 + $0x1004] ss:$16 sps:$4 sm:$0xff]  }
 0x1c5   :  { %10142 = vmatprep.mubr.bf16.mxu0 %v1723_v54  ;;  %11167 = vmatprep.mubr.bf16.mxu1 %v1723_v54  ;;  %v14859_v54 = vld [vmem:[%s21637_s1 + $0x100c] ss:$16 sps:$4 sm:$0xff]  }
 0x1c7   :  { %10113 = vmatpush1.bf16.msra.mxu0 %v14764_v55  ;;  %11138 = vmatpush1.bf16.msra.mxu1 %v14767_v56  ;;  %v1739_v55 = vcombine.high %v18143_v44, %v18143_v44  ;;  %v1721_v56 = vcombine.high %v17966_v48, %v17966_v48  ;;  %v14865_v48 = vld [vmem:[%s21637_s1 + $0x102c] ss:$16 sps:$4 sm:$0xff]  }
 0x1c8   :  { %10114 = vmatprep.subr.bf16.mxu0 %v14772_v47  ;;  %11139 = vmatprep.subr.bf16.mxu1 %v14775_v57  ;;  %v14854_v47 = vld [vmem:[%s21637_s1 + $0x1000] ss:$16 sps:$4 sm:$0xff]   ;;  %v14857_v57 = vld [vmem:[%s21637_s1 + $0x1008] ss:$16 sps:$4 sm:$0xff]  }
 0x1cb   :  { %10115 = vmatpush1.bf16.msra.mxu0 %v14770_v58  ;;  %11140 = vmatpush1.bf16.msra.mxu1 %v14773_v59  ;;  %v14862_v58 = vld [vmem:[%s21637_s1 + $0x1024] ss:$16 sps:$4 sm:$0xff]   ;;  %v18186_v59 = vrot.slane %v1739_v55, %v16672_v49 }
 0x1cc   :  { %10116 = vmatprep.subr.bf16.mxu0 %v14778_v60  ;;  %11141 = vmatprep.subr.bf16.mxu1 %v14781_v61  ;;  %v14860_v60 = vld [vmem:[%s21637_s1 + $0x1020] ss:$16 sps:$4 sm:$0xff]   ;;  %v14863_v61 = vld [vmem:[%s21637_s1 + $0x1028] ss:$16 sps:$4 sm:$0xff]   ;;  %v14946_v55 = vld [vmem:[%s21637_s1 + $0x11e4] ss:$16 sps:$4 sm:$0xff]  }
 0x1cf   :  { %10117 = vmatpush1.bf16.msra.mxu0 %v14776_v62  ;;  %11142 = vmatpush1.bf16.msra.mxu1 %v14779_v63  ;;  %v14868_v62 = vld [vmem:[%s21637_s1 + $0x1044] ss:$16 sps:$4 sm:$0xff]   ;;  %v14871_v63 = vld [vmem:[%s21637_s1 + $0x104c] ss:$16 sps:$4 sm:$0xff]  }
 0x1d0   :  { %10118 = vmatprep.subr.bf16.mxu0 %v14784_v0  ;;  %11143 = vmatprep.subr.bf16.mxu1 %v14787_v1  ;;  %v14866_v0 = vld [vmem:[%s21637_s1 + $0x1040] ss:$16 sps:$4 sm:$0xff]   ;;  %v14869_v1 = vld [vmem:[%s21637_s1 + $0x1048] ss:$16 sps:$4 sm:$0xff]  }
 0x1d3   :  { %10119 = vmatpush1.bf16.msra.mxu0 %v14782_v2  ;;  %11144 = vmatpush1.bf16.msra.mxu1 %v14785_v3  ;;  %v14874_v2 = vld [vmem:[%s21637_s1 + $0x1064] ss:$16 sps:$4 sm:$0xff]   ;;  %v14877_v3 = vld [vmem:[%s21637_s1 + $0x106c] ss:$16 sps:$4 sm:$0xff]  }
 0x1d4   :  { %10120 = vmatprep.subr.bf16.mxu0 %v14790_v4  ;;  %11145 = vmatprep.subr.bf16.mxu1 %v14793_v5  ;;  %v14872_v4 = vld [vmem:[%s21637_s1 + $0x1060] ss:$16 sps:$4 sm:$0xff]   ;;  %v14875_v5 = vld [vmem:[%s21637_s1 + $0x1068] ss:$16 sps:$4 sm:$0xff]  }
 0x1d7   :  { %10121 = vmatpush1.bf16.msra.mxu0 %v14788_v6  ;;  %11146 = vmatpush1.bf16.msra.mxu1 %v14791_v7  ;;  %v14880_v6 = vld [vmem:[%s21637_s1 + $0x1084] ss:$16 sps:$4 sm:$0xff]   ;;  %v14883_v7 = vld [vmem:[%s21637_s1 + $0x108c] ss:$16 sps:$4 sm:$0xff]  }
 0x1d8   :  { %10122 = vmatprep.subr.bf16.mxu0 %v14796_v8  ;;  %11147 = vmatprep.subr.bf16.mxu1 %v14799_v9  ;;  %v14878_v8 = vld [vmem:[%s21637_s1 + $0x1080] ss:$16 sps:$4 sm:$0xff]   ;;  %v14881_v9 = vld [vmem:[%s21637_s1 + $0x1088] ss:$16 sps:$4 sm:$0xff]  }
 0x1db   :  { %10123 = vmatpush1.bf16.msra.mxu0 %v14794_v10  ;;  %11148 = vmatpush1.bf16.msra.mxu1 %v14797_v11  ;;  %v14886_v10 = vld [vmem:[%s21637_s1 + $0x10a4] ss:$16 sps:$4 sm:$0xff]   ;;  %v14889_v11 = vld [vmem:[%s21637_s1 + $0x10ac] ss:$16 sps:$4 sm:$0xff]  }
 0x1dc   :  { %10124 = vmatprep.subr.bf16.mxu0 %v14802_v12  ;;  %11149 = vmatprep.subr.bf16.mxu1 %v14805_v52  ;;  %v14884_v12 = vld [vmem:[%s21637_s1 + $0x10a0] ss:$16 sps:$4 sm:$0xff]   ;;  %v14887_v52 = vld [vmem:[%s21637_s1 + $0x10a8] ss:$16 sps:$4 sm:$0xff]  }
 0x1df   :  { %10125 = vmatpush1.bf16.msra.mxu0 %v14800_v15  ;;  %11150 = vmatpush1.bf16.msra.mxu1 %v14803_v16  ;;  %v14892_v15 = vld [vmem:[%s21637_s1 + $0x10c4] ss:$16 sps:$4 sm:$0xff]   ;;  %v14895_v16 = vld [vmem:[%s21637_s1 + $0x10cc] ss:$16 sps:$4 sm:$0xff]  }
 0x1e0   :  { %10126 = vmatprep.subr.bf16.mxu0 %v14808_v17  ;;  %11151 = vmatprep.subr.bf16.mxu1 %v14811_v18  ;;  %v14890_v17 = vld [vmem:[%s21637_s1 + $0x10c0] ss:$16 sps:$4 sm:$0xff]   ;;  %v14893_v18 = vld [vmem:[%s21637_s1 + $0x10c8] ss:$16 sps:$4 sm:$0xff]  }
 0x1e3   :  { %10127 = vmatpush1.bf16.msra.mxu0 %v14806_v19  ;;  %11152 = vmatpush1.bf16.msra.mxu1 %v14809_v20  ;;  %v14898_v19 = vld [vmem:[%s21637_s1 + $0x10e4] ss:$16 sps:$4 sm:$0xff]   ;;  %v14901_v20 = vld [vmem:[%s21637_s1 + $0x10ec] ss:$16 sps:$4 sm:$0xff]  }
 0x1e4   :  { %10128 = vmatprep.subr.bf16.mxu0 %v14814_v22  ;;  %11153 = vmatprep.subr.bf16.mxu1 %v14817_v23  ;;  %v14896_v22 = vld [vmem:[%s21637_s1 + $0x10e0] ss:$16 sps:$4 sm:$0xff]   ;;  %v14899_v23 = vld [vmem:[%s21637_s1 + $0x10e8] ss:$16 sps:$4 sm:$0xff]  }
 0x1e7   :  { %10129 = vmatpush1.bf16.msra.mxu0 %v14812_v24  ;;  %11154 = vmatpush1.bf16.msra.mxu1 %v14815_v13  ;;  %v14904_v24 = vld [vmem:[%s21637_s1 + $0x1104] ss:$16 sps:$4 sm:$0xff]   ;;  %v14907_v13 = vld [vmem:[%s21637_s1 + $0x110c] ss:$16 sps:$4 sm:$0xff]  }
 0x1e8   :  { %10130 = vmatprep.subr.bf16.mxu0 %v14820_v27  ;;  %11155 = vmatprep.subr.bf16.mxu1 %v14823_v28  ;;  %v14902_v27 = vld [vmem:[%s21637_s1 + $0x1100] ss:$16 sps:$4 sm:$0xff]   ;;  %v14905_v28 = vld [vmem:[%s21637_s1 + $0x1108] ss:$16 sps:$4 sm:$0xff]  }
 0x1eb   :  { %10131 = vmatpush1.bf16.msra.mxu0 %v14818_v29  ;;  %11156 = vmatpush1.bf16.msra.mxu1 %v14821_v14  ;;  %v14910_v29 = vld [vmem:[%s21637_s1 + $0x1124] ss:$16 sps:$4 sm:$0xff]   ;;  %v14913_v14 = vld [vmem:[%s21637_s1 + $0x112c] ss:$16 sps:$4 sm:$0xff]  }
 0x1ec   :  { %10132 = vmatprep.subr.bf16.mxu0 %v14826_v30  ;;  %11157 = vmatprep.subr.bf16.mxu1 %v14829_v31  ;;  %v14908_v30 = vld [vmem:[%s21637_s1 + $0x1120] ss:$16 sps:$4 sm:$0xff]   ;;  %v14911_v31 = vld [vmem:[%s21637_s1 + $0x1128] ss:$16 sps:$4 sm:$0xff]  }
 0x1ef   :  { %10133 = vmatpush1.bf16.msra.mxu0 %v14824_v25  ;;  %11158 = vmatpush1.bf16.msra.mxu1 %v14827_v32  ;;  %v14916_v25 = vld [vmem:[%s21637_s1 + $0x1144] ss:$16 sps:$4 sm:$0xff]   ;;  %v14919_v32 = vld [vmem:[%s21637_s1 + $0x114c] ss:$16 sps:$4 sm:$0xff]  }
 0x1f0   :  { %10134 = vmatprep.subr.bf16.mxu0 %v14832_v33  ;;  %11159 = vmatprep.subr.bf16.mxu1 %v14835_v26  ;;  %v14914_v33 = vld [vmem:[%s21637_s1 + $0x1140] ss:$16 sps:$4 sm:$0xff]   ;;  %v14917_v26 = vld [vmem:[%s21637_s1 + $0x1148] ss:$16 sps:$4 sm:$0xff]  }
 0x1f3   :  { %10135 = vmatpush1.bf16.msra.mxu0 %v14830_v36  ;;  %11160 = vmatpush1.bf16.msra.mxu1 %v14833_v37  ;;  %v14922_v36 = vld [vmem:[%s21637_s1 + $0x1164] ss:$16 sps:$4 sm:$0xff]   ;;  %v14925_v37 = vld [vmem:[%s21637_s1 + $0x116c] ss:$16 sps:$4 sm:$0xff]  }
 0x1f4   :  { %10136 = vmatprep.subr.bf16.mxu0 %v14838_v21  ;;  %11161 = vmatprep.subr.bf16.mxu1 %v14841_v39  ;;  %v14920_v21 = vld [vmem:[%s21637_s1 + $0x1160] ss:$16 sps:$4 sm:$0xff]   ;;  %v14923_v39 = vld [vmem:[%s21637_s1 + $0x1168] ss:$16 sps:$4 sm:$0xff]  }
 0x1f7   :  { %10137 = vmatpush1.bf16.msra.mxu0 %v14836_v40  ;;  %11162 = vmatpush1.bf16.msra.mxu1 %v14839_v41  ;;  %v14928_v40 = vld [vmem:[%s21637_s1 + $0x1184] ss:$16 sps:$4 sm:$0xff]   ;;  %v14931_v41 = vld [vmem:[%s21637_s1 + $0x118c] ss:$16 sps:$4 sm:$0xff]  }
 0x1f8   :  { %10138 = vmatprep.subr.bf16.mxu0 %v14844_v34  ;;  %11163 = vmatprep.subr.bf16.mxu1 %v14847_v43  ;;  %v14926_v34 = vld [vmem:[%s21637_s1 + $0x1180] ss:$16 sps:$4 sm:$0xff]   ;;  %v14929_v43 = vld [vmem:[%s21637_s1 + $0x1188] ss:$16 sps:$4 sm:$0xff]  }
 0x1fb   :  { %10139 = vmatpush1.bf16.msra.mxu0 %v14842_v45  ;;  %11164 = vmatpush1.bf16.msra.mxu1 %v14845_v46  ;;  %v14934_v45 = vld [vmem:[%s21637_s1 + $0x11a4] ss:$16 sps:$4 sm:$0xff]   ;;  %v14937_v46 = vld [vmem:[%s21637_s1 + $0x11ac] ss:$16 sps:$4 sm:$0xff]  }
 0x1fc   :  { %10140 = vmatprep.subr.bf16.mxu0 %v14850_v35  ;;  %11165 = vmatprep.subr.bf16.mxu1 %v14853_v50  ;;  %v14932_v35 = vld [vmem:[%s21637_s1 + $0x11a0] ss:$16 sps:$4 sm:$0xff]   ;;  %v14935_v50 = vld [vmem:[%s21637_s1 + $0x11a8] ss:$16 sps:$4 sm:$0xff]  }
 0x1ff   :  { %10141 = vmatpush1.bf16.msra.mxu0 %v14848_v51  ;;  %11166 = vmatpush1.bf16.msra.mxu1 %v14851_v53  ;;  %v14940_v51 = vld [vmem:[%s21637_s1 + $0x11c4] ss:$16 sps:$4 sm:$0xff]   ;;  %v14943_v53 = vld [vmem:[%s21637_s1 + $0x11cc] ss:$16 sps:$4 sm:$0xff]  }
 0x200   :  { %10151 = vmatprep.subr.bf16.mxu0 %v14856_v38  ;;  %11176 = vmatprep.subr.bf16.mxu1 %v14859_v54  ;;  %v14938_v38 = vld [vmem:[%s21637_s1 + $0x11c0] ss:$16 sps:$4 sm:$0xff]   ;;  %v14941_v54 = vld [vmem:[%s21637_s1 + $0x11c8] ss:$16 sps:$4 sm:$0xff]  }
 0x202   :  { %10143 = vmatmul.mubr.bf16.vlgmr.msra.gmra.mrb[0].mxu0 %v1721_v56  ;;  %11168 = vmatmul.mubr.bf16.vlgmr.msra.gmra.mrb[0].mxu1 %v1721_v56  ;;  %v14949_v56 = vld [vmem:[%s21637_s1 + $0x11ec] ss:$16 sps:$4 sm:$0xff]  }
 0x203   :  { %10152 = vmatpush1.bf16.msra.mxu0 %v14854_v47  ;;  %11177 = vmatpush1.bf16.msra.mxu1 %v14857_v57  ;;  %v14944_v47 = vld [vmem:[%s21637_s1 + $0x11e0] ss:$16 sps:$4 sm:$0xff]   ;;  %v14947_v57 = vld [vmem:[%s21637_s1 + $0x11e8] ss:$16 sps:$4 sm:$0xff]  }
 0x204   :  { %10153 = vmatprep.subr.bf16.mxu0 %v14862_v58  ;;  %11178 = vmatprep.subr.bf16.mxu1 %v14865_v48  ;;  %v14952_v58 = vld [vmem:[%s21637_s1 + $0x1204] ss:$16 sps:$4 sm:$0xff]   ;;  %v14955_v48 = vld [vmem:[%s21637_s1 + $0x120c] ss:$16 sps:$4 sm:$0xff]  }
 0x205   :  { %10183 = vmatprep.mubr.bf16.mxu0 %v18186_v59  ;;  %11208 = vmatprep.mubr.bf16.mxu1 %v18186_v59 }
 0x207   :  { %10154 = vmatpush1.bf16.msra.mxu0 %v14860_v60  ;;  %11179 = vmatpush1.bf16.msra.mxu1 %v14863_v61  ;;  %v18372_v60 = vrot.slane %v18143_v44, %v16672_v49  ;;  %v14950_v61 = vld [vmem:[%s21637_s1 + $0x1200] ss:$16 sps:$4 sm:$0xff]   ;;  %v14961_v44 = vld [vmem:[%s21637_s1 + $0x122c] ss:$16 sps:$4 sm:$0xff]  }
 0x208   :  { %10155 = vmatprep.subr.bf16.mxu0 %v14868_v62  ;;  %11180 = vmatprep.subr.bf16.mxu1 %v14871_v63  ;;  %v14953_v62 = vld [vmem:[%s21637_s1 + $0x1208] ss:$16 sps:$4 sm:$0xff]   ;;  %v14958_v63 = vld [vmem:[%s21637_s1 + $0x1224] ss:$16 sps:$4 sm:$0xff]  }
 0x20b   :  { %10156 = vmatpush1.bf16.msra.mxu0 %v14866_v0  ;;  %11181 = vmatpush1.bf16.msra.mxu1 %v14869_v1  ;;  %v1771_v0 = vcombine.high %v18186_v59, %v18186_v59  ;;  %v14956_v1 = vld [vmem:[%s21637_s1 + $0x1220] ss:$16 sps:$4 sm:$0xff]   ;;  %v14964_v59 = vld [vmem:[%s21637_s1 + $0x1244] ss:$16 sps:$4 sm:$0xff]  }
 0x20c   :  { %10157 = vmatprep.subr.bf16.mxu0 %v14874_v2  ;;  %11182 = vmatprep.subr.bf16.mxu1 %v14877_v3  ;;  %v14959_v2 = vld [vmem:[%s21637_s1 + $0x1228] ss:$16 sps:$4 sm:$0xff]   ;;  %v14967_v3 = vld [vmem:[%s21637_s1 + $0x124c] ss:$16 sps:$4 sm:$0xff]  }
 0x20f   :  { %10158 = vmatpush1.bf16.msra.mxu0 %v14872_v4  ;;  %11183 = vmatpush1.bf16.msra.mxu1 %v14875_v5  ;;  %v14962_v4 = vld [vmem:[%s21637_s1 + $0x1240] ss:$16 sps:$4 sm:$0xff]   ;;  %v14965_v5 = vld [vmem:[%s21637_s1 + $0x1248] ss:$16 sps:$4 sm:$0xff]  }
 0x210   :  { %10159 = vmatprep.subr.bf16.mxu0 %v14880_v6  ;;  %11184 = vmatprep.subr.bf16.mxu1 %v14883_v7  ;;  %v14970_v6 = vld [vmem:[%s21637_s1 + $0x1264] ss:$16 sps:$4 sm:$0xff]   ;;  %v14973_v7 = vld [vmem:[%s21637_s1 + $0x126c] ss:$16 sps:$4 sm:$0xff]  }
 0x213   :  { %10160 = vmatpush1.bf16.msra.mxu0 %v14878_v8  ;;  %11185 = vmatpush1.bf16.msra.mxu1 %v14881_v9  ;;  %v14968_v8 = vld [vmem:[%s21637_s1 + $0x1260] ss:$16 sps:$4 sm:$0xff]   ;;  %v14971_v9 = vld [vmem:[%s21637_s1 + $0x1268] ss:$16 sps:$4 sm:$0xff]  }
 0x214   :  { %10161 = vmatprep.subr.bf16.mxu0 %v14886_v10  ;;  %11186 = vmatprep.subr.bf16.mxu1 %v14889_v11  ;;  %v14976_v10 = vld [vmem:[%s21637_s1 + $0x1284] ss:$16 sps:$4 sm:$0xff]   ;;  %v14979_v11 = vld [vmem:[%s21637_s1 + $0x128c] ss:$16 sps:$4 sm:$0xff]  }
 0x217   :  { %10162 = vmatpush1.bf16.msra.mxu0 %v14884_v12  ;;  %11187 = vmatpush1.bf16.msra.mxu1 %v14887_v52  ;;  %v14974_v12 = vld [vmem:[%s21637_s1 + $0x1280] ss:$16 sps:$4 sm:$0xff]   ;;  %v14977_v52 = vld [vmem:[%s21637_s1 + $0x1288] ss:$16 sps:$4 sm:$0xff]  }
 0x218   :  { %10163 = vmatprep.subr.bf16.mxu0 %v14892_v15  ;;  %11188 = vmatprep.subr.bf16.mxu1 %v14895_v16  ;;  %v14982_v15 = vld [vmem:[%s21637_s1 + $0x12a4] ss:$16 sps:$4 sm:$0xff]   ;;  %v14985_v16 = vld [vmem:[%s21637_s1 + $0x12ac] ss:$16 sps:$4 sm:$0xff]  }
 0x21b   :  { %10164 = vmatpush1.bf16.msra.mxu0 %v14890_v17  ;;  %11189 = vmatpush1.bf16.msra.mxu1 %v14893_v18  ;;  %v14980_v17 = vld [vmem:[%s21637_s1 + $0x12a0] ss:$16 sps:$4 sm:$0xff]   ;;  %v14983_v18 = vld [vmem:[%s21637_s1 + $0x12a8] ss:$16 sps:$4 sm:$0xff]  }
 0x21c   :  { %10165 = vmatprep.subr.bf16.mxu0 %v14898_v19  ;;  %11190 = vmatprep.subr.bf16.mxu1 %v14901_v20  ;;  %v14988_v19 = vld [vmem:[%s21637_s1 + $0x12c4] ss:$16 sps:$4 sm:$0xff]   ;;  %v14991_v20 = vld [vmem:[%s21637_s1 + $0x12cc] ss:$16 sps:$4 sm:$0xff]  }
 0x21f   :  { %10166 = vmatpush1.bf16.msra.mxu0 %v14896_v22  ;;  %11191 = vmatpush1.bf16.msra.mxu1 %v14899_v23  ;;  %v14986_v22 = vld [vmem:[%s21637_s1 + $0x12c0] ss:$16 sps:$4 sm:$0xff]   ;;  %v14989_v23 = vld [vmem:[%s21637_s1 + $0x12c8] ss:$16 sps:$4 sm:$0xff]  }
 0x220   :  { %10167 = vmatprep.subr.bf16.mxu0 %v14904_v24  ;;  %11192 = vmatprep.subr.bf16.mxu1 %v14907_v13  ;;  %v14994_v24 = vld [vmem:[%s21637_s1 + $0x12e4] ss:$16 sps:$4 sm:$0xff]   ;;  %v14997_v13 = vld [vmem:[%s21637_s1 + $0x12ec] ss:$16 sps:$4 sm:$0xff]  }
 0x223   :  { %10168 = vmatpush1.bf16.msra.mxu0 %v14902_v27  ;;  %11193 = vmatpush1.bf16.msra.mxu1 %v14905_v28  ;;  %v14992_v27 = vld [vmem:[%s21637_s1 + $0x12e0] ss:$16 sps:$4 sm:$0xff]   ;;  %v14995_v28 = vld [vmem:[%s21637_s1 + $0x12e8] ss:$16 sps:$4 sm:$0xff]  }
 0x224   :  { %10169 = vmatprep.subr.bf16.mxu0 %v14910_v29  ;;  %11194 = vmatprep.subr.bf16.mxu1 %v14913_v14  ;;  %v15000_v29 = vld [vmem:[%s21637_s1 + $0x1304] ss:$16 sps:$4 sm:$0xff]   ;;  %v15003_v14 = vld [vmem:[%s21637_s1 + $0x130c] ss:$16 sps:$4 sm:$0xff]  }
 0x227   :  { %10170 = vmatpush1.bf16.msra.mxu0 %v14908_v30  ;;  %11195 = vmatpush1.bf16.msra.mxu1 %v14911_v31  ;;  %v14998_v30 = vld [vmem:[%s21637_s1 + $0x1300] ss:$16 sps:$4 sm:$0xff]   ;;  %v15001_v31 = vld [vmem:[%s21637_s1 + $0x1308] ss:$16 sps:$4 sm:$0xff]  }
 0x228   :  { %10171 = vmatprep.subr.bf16.mxu0 %v14916_v25  ;;  %11196 = vmatprep.subr.bf16.mxu1 %v14919_v32  ;;  %v15006_v25 = vld [vmem:[%s21637_s1 + $0x1324] ss:$16 sps:$4 sm:$0xff]   ;;  %v15009_v32 = vld [vmem:[%s21637_s1 + $0x132c] ss:$16 sps:$4 sm:$0xff]  }
 0x22b   :  { %10172 = vmatpush1.bf16.msra.mxu0 %v14914_v33  ;;  %11197 = vmatpush1.bf16.msra.mxu1 %v14917_v26  ;;  %v15004_v33 = vld [vmem:[%s21637_s1 + $0x1320] ss:$16 sps:$4 sm:$0xff]   ;;  %v15007_v26 = vld [vmem:[%s21637_s1 + $0x1328] ss:$16 sps:$4 sm:$0xff]  }
 0x22c   :  { %10173 = vmatprep.subr.bf16.mxu0 %v14922_v36  ;;  %11198 = vmatprep.subr.bf16.mxu1 %v14925_v37  ;;  %v15012_v36 = vld [vmem:[%s21637_s1 + $0x1344] ss:$16 sps:$4 sm:$0xff]   ;;  %v15015_v37 = vld [vmem:[%s21637_s1 + $0x134c] ss:$16 sps:$4 sm:$0xff]  }
 0x22f   :  { %10174 = vmatpush1.bf16.msra.mxu0 %v14920_v21  ;;  %11199 = vmatpush1.bf16.msra.mxu1 %v14923_v39  ;;  %v15010_v21 = vld [vmem:[%s21637_s1 + $0x1340] ss:$16 sps:$4 sm:$0xff]   ;;  %v15013_v39 = vld [vmem:[%s21637_s1 + $0x1348] ss:$16 sps:$4 sm:$0xff]  }
 0x230   :  { %10175 = vmatprep.subr.bf16.mxu0 %v14928_v40  ;;  %11200 = vmatprep.subr.bf16.mxu1 %v14931_v41  ;;  %v15018_v40 = vld [vmem:[%s21637_s1 + $0x1364] ss:$16 sps:$4 sm:$0xff]   ;;  %v15021_v41 = vld [vmem:[%s21637_s1 + $0x136c] ss:$16 sps:$4 sm:$0xff]  }
 0x233   :  { %10176 = vmatpush1.bf16.msra.mxu0 %v14926_v34  ;;  %11201 = vmatpush1.bf16.msra.mxu1 %v14929_v43  ;;  %v15016_v34 = vld [vmem:[%s21637_s1 + $0x1360] ss:$16 sps:$4 sm:$0xff]   ;;  %v15019_v43 = vld [vmem:[%s21637_s1 + $0x1368] ss:$16 sps:$4 sm:$0xff]  }
 0x234   :  { %10177 = vmatprep.subr.bf16.mxu0 %v14934_v45  ;;  %11202 = vmatprep.subr.bf16.mxu1 %v14937_v46  ;;  %v15024_v45 = vld [vmem:[%s21637_s1 + $0x1384] ss:$16 sps:$4 sm:$0xff]   ;;  %v15027_v46 = vld [vmem:[%s21637_s1 + $0x138c] ss:$16 sps:$4 sm:$0xff]  }
 0x237   :  { %10178 = vmatpush1.bf16.msra.mxu0 %v14932_v35  ;;  %11203 = vmatpush1.bf16.msra.mxu1 %v14935_v50  ;;  %v15022_v35 = vld [vmem:[%s21637_s1 + $0x1380] ss:$16 sps:$4 sm:$0xff]   ;;  %v15025_v50 = vld [vmem:[%s21637_s1 + $0x1388] ss:$16 sps:$4 sm:$0xff]  }
 0x238   :  { %10179 = vmatprep.subr.bf16.mxu0 %v14940_v51  ;;  %11204 = vmatprep.subr.bf16.mxu1 %v14943_v53  ;;  %v15030_v51 = vld [vmem:[%s21637_s1 + $0x13a4] ss:$16 sps:$4 sm:$0xff]   ;;  %v15033_v53 = vld [vmem:[%s21637_s1 + $0x13ac] ss:$16 sps:$4 sm:$0xff]  }
 0x23b   :  { %10180 = vmatpush1.bf16.msra.mxu0 %v14938_v38  ;;  %11205 = vmatpush1.bf16.msra.mxu1 %v14941_v54  ;;  %v15028_v38 = vld [vmem:[%s21637_s1 + $0x13a0] ss:$16 sps:$4 sm:$0xff]   ;;  %v15031_v54 = vld [vmem:[%s21637_s1 + $0x13a8] ss:$16 sps:$4 sm:$0xff]  }
 0x23c   :  { %10181 = vmatprep.subr.bf16.mxu0 %v14946_v55  ;;  %11206 = vmatprep.subr.bf16.mxu1 %v14949_v56  ;;  %v15036_v55 = vld [vmem:[%s21637_s1 + $0x13c4] ss:$16 sps:$4 sm:$0xff]   ;;  %v15039_v56 = vld [vmem:[%s21637_s1 + $0x13cc] ss:$16 sps:$4 sm:$0xff]  }
 0x23f   :  { %10182 = vmatpush1.bf16.msra.mxu0 %v14944_v47  ;;  %11207 = vmatpush1.bf16.msra.mxu1 %v14947_v57  ;;  %v16475_v47 = vld [vmem:[%s21636_s0 + $0x10] sm:$0xff] }
 0x240   :  { %10192 = vmatprep.subr.bf16.mxu0 %v14952_v58  ;;  %11217 = vmatprep.subr.bf16.mxu1 %v14955_v48  ;;  %v1724_v57 = vcombine.high %v16475_v47, %v16475_v47  ;;  %v15034_v58 = vld [vmem:[%s21637_s1 + $0x13c0] ss:$16 sps:$4 sm:$0xff]   ;;  %v15037_v48 = vld [vmem:[%s21637_s1 + $0x13c8] ss:$16 sps:$4 sm:$0xff]  }
 0x241   :  { %v15118_v47 = vld [vmem:[%s21637_s1 + $0x1580] ss:$16 sps:$4 sm:$0xff]  }
 0x242   :  { %10184 = vmatmul.mubr.bf16.vlgmr.msra.gmra.mrb[0].mxu0 %v18372_v60  ;;  %11209 = vmatmul.mubr.bf16.vlgmr.msra.gmra.mrb[0].mxu1 %v18372_v60 }
 0x243   :  { %10193 = vmatpush1.bf16.msra.mxu0 %v14950_v61  ;;  %11218 = vmatpush1.bf16.msra.mxu1 %v14953_v62  ;;  %v15042_v61 = vld [vmem:[%s21637_s1 + $0x13e4] ss:$16 sps:$4 sm:$0xff]   ;;  %v15045_v62 = vld [vmem:[%s21637_s1 + $0x13ec] ss:$16 sps:$4 sm:$0xff]  }
 0x244   :  { %10194 = vmatprep.subr.bf16.mxu0 %v14958_v63  ;;  %11219 = vmatprep.subr.bf16.mxu1 %v14961_v44  ;;  %v18562_v63 = vrot.slane %v1724_v57, %v16672_v49  ;;  %v15040_v44 = vld [vmem:[%s21637_s1 + $0x13e0] ss:$16 sps:$4 sm:$0xff]   ;;  %v15121_v57 = vld [vmem:[%s21637_s1 + $0x1588] ss:$16 sps:$4 sm:$0xff]  }
 0x245   :  { %10224 = vmatprep.mubr.bf16.mxu0 %v1771_v0  ;;  %11249 = vmatprep.mubr.bf16.mxu1 %v1771_v0  ;;  %v15043_v0 = vld [vmem:[%s21637_s1 + $0x13e8] ss:$16 sps:$4 sm:$0xff]  }
 0x247   :  { %10195 = vmatpush1.bf16.msra.mxu0 %v14956_v1  ;;  %11220 = vmatpush1.bf16.msra.mxu1 %v14959_v2  ;;  %v15048_v1 = vld [vmem:[%s21637_s1 + $0x1404] ss:$16 sps:$4 sm:$0xff]   ;;  %v15051_v2 = vld [vmem:[%s21637_s1 + $0x140c] ss:$16 sps:$4 sm:$0xff]  }
 0x248   :  { %10196 = vmatprep.subr.bf16.mxu0 %v14964_v59  ;;  %11221 = vmatprep.subr.bf16.mxu1 %v14967_v3  ;;  %v1740_v59 = vcombine.high %v18562_v63, %v18562_v63  ;;  %v1769_v3 = vcombine.high %v18372_v60, %v18372_v60  ;;  %v15057_v60 = vld [vmem:[%s21637_s1 + $0x142c] ss:$16 sps:$4 sm:$0xff]  }
 0x24b   :  { %10197 = vmatpush1.bf16.msra.mxu0 %v14962_v4  ;;  %11222 = vmatpush1.bf16.msra.mxu1 %v14965_v5  ;;  %v15046_v4 = vld [vmem:[%s21637_s1 + $0x1400] ss:$16 sps:$4 sm:$0xff]   ;;  %v15049_v5 = vld [vmem:[%s21637_s1 + $0x1408] ss:$16 sps:$4 sm:$0xff]  }
 0x24c   :  { %10198 = vmatprep.subr.bf16.mxu0 %v14970_v6  ;;  %11223 = vmatprep.subr.bf16.mxu1 %v14973_v7  ;;  %v15054_v6 = vld [vmem:[%s21637_s1 + $0x1424] ss:$16 sps:$4 sm:$0xff]   ;;  %v18593_v7 = vrot.slane %v1740_v59, %v16672_v49 }
 0x24d   :  { %v15138_v59 = vld [vmem:[%s21637_s1 + $0x15e4] ss:$16 sps:$4 sm:$0xff]  }
 0x24f   :  { %10199 = vmatpush1.bf16.msra.mxu0 %v14968_v8  ;;  %11224 = vmatpush1.bf16.msra.mxu1 %v14971_v9  ;;  %v15052_v8 = vld [vmem:[%s21637_s1 + $0x1420] ss:$16 sps:$4 sm:$0xff]   ;;  %v15055_v9 = vld [vmem:[%s21637_s1 + $0x1428] ss:$16 sps:$4 sm:$0xff]  }
 0x250   :  { %10200 = vmatprep.subr.bf16.mxu0 %v14976_v10  ;;  %11225 = vmatprep.subr.bf16.mxu1 %v14979_v11  ;;  %v15060_v10 = vld [vmem:[%s21637_s1 + $0x1444] ss:$16 sps:$4 sm:$0xff]   ;;  %v15063_v11 = vld [vmem:[%s21637_s1 + $0x144c] ss:$16 sps:$4 sm:$0xff]  }
 0x253   :  { %10201 = vmatpush1.bf16.msra.mxu0 %v14974_v12  ;;  %11226 = vmatpush1.bf16.msra.mxu1 %v14977_v52  ;;  %v15058_v12 = vld [vmem:[%s21637_s1 + $0x1440] ss:$16 sps:$4 sm:$0xff]   ;;  %v15061_v52 = vld [vmem:[%s21637_s1 + $0x1448] ss:$16 sps:$4 sm:$0xff]  }
 0x254   :  { %10202 = vmatprep.subr.bf16.mxu0 %v14982_v15  ;;  %11227 = vmatprep.subr.bf16.mxu1 %v14985_v16  ;;  %v15066_v15 = vld [vmem:[%s21637_s1 + $0x1464] ss:$16 sps:$4 sm:$0xff]   ;;  %v15069_v16 = vld [vmem:[%s21637_s1 + $0x146c] ss:$16 sps:$4 sm:$0xff]  }
 0x257   :  { %10203 = vmatpush1.bf16.msra.mxu0 %v14980_v17  ;;  %11228 = vmatpush1.bf16.msra.mxu1 %v14983_v18  ;;  %v15064_v17 = vld [vmem:[%s21637_s1 + $0x1460] ss:$16 sps:$4 sm:$0xff]   ;;  %v15067_v18 = vld [vmem:[%s21637_s1 + $0x1468] ss:$16 sps:$4 sm:$0xff]  }
 0x258   :  { %10204 = vmatprep.subr.bf16.mxu0 %v14988_v19  ;;  %11229 = vmatprep.subr.bf16.mxu1 %v14991_v20  ;;  %v15072_v19 = vld [vmem:[%s21637_s1 + $0x1484] ss:$16 sps:$4 sm:$0xff]   ;;  %v15075_v20 = vld [vmem:[%s21637_s1 + $0x148c] ss:$16 sps:$4 sm:$0xff]  }
 0x25b   :  { %10205 = vmatpush1.bf16.msra.mxu0 %v14986_v22  ;;  %11230 = vmatpush1.bf16.msra.mxu1 %v14989_v23  ;;  %v15070_v22 = vld [vmem:[%s21637_s1 + $0x1480] ss:$16 sps:$4 sm:$0xff]   ;;  %v15073_v23 = vld [vmem:[%s21637_s1 + $0x1488] ss:$16 sps:$4 sm:$0xff]  }
 0x25c   :  { %10206 = vmatprep.subr.bf16.mxu0 %v14994_v24  ;;  %11231 = vmatprep.subr.bf16.mxu1 %v14997_v13  ;;  %v15078_v24 = vld [vmem:[%s21637_s1 + $0x14a4] ss:$16 sps:$4 sm:$0xff]   ;;  %v15081_v13 = vld [vmem:[%s21637_s1 + $0x14ac] ss:$16 sps:$4 sm:$0xff]  }
 0x25f   :  { %10207 = vmatpush1.bf16.msra.mxu0 %v14992_v27  ;;  %11232 = vmatpush1.bf16.msra.mxu1 %v14995_v28  ;;  %v15076_v27 = vld [vmem:[%s21637_s1 + $0x14a0] ss:$16 sps:$4 sm:$0xff]   ;;  %v15079_v28 = vld [vmem:[%s21637_s1 + $0x14a8] ss:$16 sps:$4 sm:$0xff]  }
 0x260   :  { %10208 = vmatprep.subr.bf16.mxu0 %v15000_v29  ;;  %11233 = vmatprep.subr.bf16.mxu1 %v15003_v14  ;;  %v15084_v29 = vld [vmem:[%s21637_s1 + $0x14c4] ss:$16 sps:$4 sm:$0xff]   ;;  %v15087_v14 = vld [vmem:[%s21637_s1 + $0x14cc] ss:$16 sps:$4 sm:$0xff]  }
 0x263   :  { %10209 = vmatpush1.bf16.msra.mxu0 %v14998_v30  ;;  %11234 = vmatpush1.bf16.msra.mxu1 %v15001_v31  ;;  %v15082_v30 = vld [vmem:[%s21637_s1 + $0x14c0] ss:$16 sps:$4 sm:$0xff]   ;;  %v15085_v31 = vld [vmem:[%s21637_s1 + $0x14c8] ss:$16 sps:$4 sm:$0xff]  }
 0x264   :  { %10210 = vmatprep.subr.bf16.mxu0 %v15006_v25  ;;  %11235 = vmatprep.subr.bf16.mxu1 %v15009_v32  ;;  %v15090_v25 = vld [vmem:[%s21637_s1 + $0x14e4] ss:$16 sps:$4 sm:$0xff]   ;;  %v15093_v32 = vld [vmem:[%s21637_s1 + $0x14ec] ss:$16 sps:$4 sm:$0xff]  }
 0x267   :  { %10211 = vmatpush1.bf16.msra.mxu0 %v15004_v33  ;;  %11236 = vmatpush1.bf16.msra.mxu1 %v15007_v26  ;;  %v15088_v33 = vld [vmem:[%s21637_s1 + $0x14e0] ss:$16 sps:$4 sm:$0xff]   ;;  %v15091_v26 = vld [vmem:[%s21637_s1 + $0x14e8] ss:$16 sps:$4 sm:$0xff]  }
 0x268   :  { %10212 = vmatprep.subr.bf16.mxu0 %v15012_v36  ;;  %11237 = vmatprep.subr.bf16.mxu1 %v15015_v37  ;;  %v15096_v36 = vld [vmem:[%s21637_s1 + $0x1504] ss:$16 sps:$4 sm:$0xff]   ;;  %v15099_v37 = vld [vmem:[%s21637_s1 + $0x150c] ss:$16 sps:$4 sm:$0xff]  }
 0x26b   :  { %10213 = vmatpush1.bf16.msra.mxu0 %v15010_v21  ;;  %11238 = vmatpush1.bf16.msra.mxu1 %v15013_v39  ;;  %v15094_v21 = vld [vmem:[%s21637_s1 + $0x1500] ss:$16 sps:$4 sm:$0xff]   ;;  %v15097_v39 = vld [vmem:[%s21637_s1 + $0x1508] ss:$16 sps:$4 sm:$0xff]  }
 0x26c   :  { %10214 = vmatprep.subr.bf16.mxu0 %v15018_v40  ;;  %11239 = vmatprep.subr.bf16.mxu1 %v15021_v41  ;;  %v15102_v40 = vld [vmem:[%s21637_s1 + $0x1524] ss:$16 sps:$4 sm:$0xff]   ;;  %v15105_v41 = vld [vmem:[%s21637_s1 + $0x152c] ss:$16 sps:$4 sm:$0xff]  }
 0x26f   :  { %10215 = vmatpush1.bf16.msra.mxu0 %v15016_v34  ;;  %11240 = vmatpush1.bf16.msra.mxu1 %v15019_v43  ;;  %v15100_v34 = vld [vmem:[%s21637_s1 + $0x1520] ss:$16 sps:$4 sm:$0xff]   ;;  %v15103_v43 = vld [vmem:[%s21637_s1 + $0x1528] ss:$16 sps:$4 sm:$0xff]  }
 0x270   :  { %10216 = vmatprep.subr.bf16.mxu0 %v15024_v45  ;;  %11241 = vmatprep.subr.bf16.mxu1 %v15027_v46  ;;  %v15108_v45 = vld [vmem:[%s21637_s1 + $0x1544] ss:$16 sps:$4 sm:$0xff]   ;;  %v15111_v46 = vld [vmem:[%s21637_s1 + $0x154c] ss:$16 sps:$4 sm:$0xff]  }
 0x273   :  { %10217 = vmatpush1.bf16.msra.mxu0 %v15022_v35  ;;  %11242 = vmatpush1.bf16.msra.mxu1 %v15025_v50  ;;  %v15106_v35 = vld [vmem:[%s21637_s1 + $0x1540] ss:$16 sps:$4 sm:$0xff]   ;;  %v15109_v50 = vld [vmem:[%s21637_s1 + $0x1548] ss:$16 sps:$4 sm:$0xff]  }
 0x274   :  { %10218 = vmatprep.subr.bf16.mxu0 %v15030_v51  ;;  %11243 = vmatprep.subr.bf16.mxu1 %v15033_v53  ;;  %v15114_v51 = vld [vmem:[%s21637_s1 + $0x1564] ss:$16 sps:$4 sm:$0xff]   ;;  %v15117_v53 = vld [vmem:[%s21637_s1 + $0x156c] ss:$16 sps:$4 sm:$0xff]  }
 0x277   :  { %10219 = vmatpush1.bf16.msra.mxu0 %v15028_v38  ;;  %11244 = vmatpush1.bf16.msra.mxu1 %v15031_v54  ;;  %v15112_v38 = vld [vmem:[%s21637_s1 + $0x1560] ss:$16 sps:$4 sm:$0xff]   ;;  %v15115_v54 = vld [vmem:[%s21637_s1 + $0x1568] ss:$16 sps:$4 sm:$0xff]  }
 0x278   :  { %10220 = vmatprep.subr.bf16.mxu0 %v15036_v55  ;;  %11245 = vmatprep.subr.bf16.mxu1 %v15039_v56  ;;  %v15120_v55 = vld [vmem:[%s21637_s1 + $0x1584] ss:$16 sps:$4 sm:$0xff]   ;;  %v15123_v56 = vld [vmem:[%s21637_s1 + $0x158c] ss:$16 sps:$4 sm:$0xff]  }
 0x27b   :  { %10221 = vmatpush1.bf16.msra.mxu0 %v15034_v58  ;;  %11246 = vmatpush1.bf16.msra.mxu1 %v15037_v48  ;;  %v15126_v58 = vld [vmem:[%s21637_s1 + $0x15a4] ss:$16 sps:$4 sm:$0xff]   ;;  %v15129_v48 = vld [vmem:[%s21637_s1 + $0x15ac] ss:$16 sps:$4 sm:$0xff]  }
 0x27c   :  { %10222 = vmatprep.subr.bf16.mxu0 %v15042_v61  ;;  %11247 = vmatprep.subr.bf16.mxu1 %v15045_v62  ;;  %v15124_v61 = vld [vmem:[%s21637_s1 + $0x15a0] ss:$16 sps:$4 sm:$0xff]   ;;  %v15127_v62 = vld [vmem:[%s21637_s1 + $0x15a8] ss:$16 sps:$4 sm:$0xff]  }
 0x27f   :  { %10223 = vmatpush1.bf16.msra.mxu0 %v15040_v44  ;;  %11248 = vmatpush1.bf16.msra.mxu1 %v15043_v0  ;;  %v15132_v44 = vld [vmem:[%s21637_s1 + $0x15c4] ss:$16 sps:$4 sm:$0xff]   ;;  %v15135_v0 = vld [vmem:[%s21637_s1 + $0x15cc] ss:$16 sps:$4 sm:$0xff]  }
 0x280   :  { %10233 = vmatprep.subr.bf16.mxu0 %v15048_v1  ;;  %11258 = vmatprep.subr.bf16.mxu1 %v15051_v2  ;;  %v15130_v1 = vld [vmem:[%s21637_s1 + $0x15c0] ss:$16 sps:$4 sm:$0xff]   ;;  %v15133_v2 = vld [vmem:[%s21637_s1 + $0x15c8] ss:$16 sps:$4 sm:$0xff]  }
 0x282   :  { %10225 = vmatmul.mubr.bf16.vlgmr.msra.gmra.mrb[0].mxu0 %v1769_v3  ;;  %11250 = vmatmul.mubr.bf16.vlgmr.msra.gmra.mrb[0].mxu1 %v1769_v3  ;;  %v15141_v3 = vld [vmem:[%s21637_s1 + $0x15ec] ss:$16 sps:$4 sm:$0xff]  }
 0x283   :  { %10234 = vmatpush1.bf16.msra.mxu0 %v15046_v4  ;;  %11259 = vmatpush1.bf16.msra.mxu1 %v15049_v5  ;;  %v15136_v4 = vld [vmem:[%s21637_s1 + $0x15e0] ss:$16 sps:$4 sm:$0xff]   ;;  %v15139_v5 = vld [vmem:[%s21637_s1 + $0x15e8] ss:$16 sps:$4 sm:$0xff]  }
 0x284   :  { %10235 = vmatprep.subr.bf16.mxu0 %v15054_v6  ;;  %11260 = vmatprep.subr.bf16.mxu1 %v15057_v60  ;;  %v15145_v6 = vld [vmem:[%s21637_s1 + $0x1604] ss:$16 sps:$4 sm:$0xff]   ;;  %v15148_v60 = vld [vmem:[%s21637_s1 + $0x160c] ss:$16 sps:$4 sm:$0xff]  }
 0x285   :  { %10265 = vmatprep.mubr.bf16.mxu0 %v18593_v7  ;;  %11290 = vmatprep.mubr.bf16.mxu1 %v18593_v7 }
 0x287   :  { %10236 = vmatpush1.bf16.msra.mxu0 %v15052_v8  ;;  %11261 = vmatpush1.bf16.msra.mxu1 %v15055_v9  ;;  %v18779_v8 = vrot.slane %v18562_v63, %v16672_v49  ;;  %v15143_v9 = vld [vmem:[%s21637_s1 + $0x1600] ss:$16 sps:$4 sm:$0xff]   ;;  %v15154_v63 = vld [vmem:[%s21637_s1 + $0x162c] ss:$16 sps:$4 sm:$0xff]  }
 0x288   :  { %10237 = vmatprep.subr.bf16.mxu0 %v15060_v10  ;;  %11262 = vmatprep.subr.bf16.mxu1 %v15063_v11  ;;  %v15146_v10 = vld [vmem:[%s21637_s1 + $0x1608] ss:$16 sps:$4 sm:$0xff]   ;;  %v15151_v11 = vld [vmem:[%s21637_s1 + $0x1624] ss:$16 sps:$4 sm:$0xff]  }
 0x28b   :  { %10238 = vmatpush1.bf16.msra.mxu0 %v15058_v12  ;;  %11263 = vmatpush1.bf16.msra.mxu1 %v15061_v52  ;;  %v1772_v12 = vcombine.high %v18593_v7, %v18593_v7  ;;  %v15149_v52 = vld [vmem:[%s21637_s1 + $0x1620] ss:$16 sps:$4 sm:$0xff]   ;;  %v15157_v7 = vld [vmem:[%s21637_s1 + $0x1644] ss:$16 sps:$4 sm:$0xff]  }
 0x28c   :  { %10239 = vmatprep.subr.bf16.mxu0 %v15066_v15  ;;  %11264 = vmatprep.subr.bf16.mxu1 %v15069_v16  ;;  %v15152_v15 = vld [vmem:[%s21637_s1 + $0x1628] ss:$16 sps:$4 sm:$0xff]   ;;  %v15160_v16 = vld [vmem:[%s21637_s1 + $0x164c] ss:$16 sps:$4 sm:$0xff]  }
 0x28f   :  { %10240 = vmatpush1.bf16.msra.mxu0 %v15064_v17  ;;  %11265 = vmatpush1.bf16.msra.mxu1 %v15067_v18  ;;  %v15155_v17 = vld [vmem:[%s21637_s1 + $0x1640] ss:$16 sps:$4 sm:$0xff]   ;;  %v15158_v18 = vld [vmem:[%s21637_s1 + $0x1648] ss:$16 sps:$4 sm:$0xff]  }
 0x290   :  { %10241 = vmatprep.subr.bf16.mxu0 %v15072_v19  ;;  %11266 = vmatprep.subr.bf16.mxu1 %v15075_v20  ;;  %v15163_v19 = vld [vmem:[%s21637_s1 + $0x1664] ss:$16 sps:$4 sm:$0xff]   ;;  %v15166_v20 = vld [vmem:[%s21637_s1 + $0x166c] ss:$16 sps:$4 sm:$0xff]  }
 0x293   :  { %10242 = vmatpush1.bf16.msra.mxu0 %v15070_v22  ;;  %11267 = vmatpush1.bf16.msra.mxu1 %v15073_v23  ;;  %v15161_v22 = vld [vmem:[%s21637_s1 + $0x1660] ss:$16 sps:$4 sm:$0xff]   ;;  %v15164_v23 = vld [vmem:[%s21637_s1 + $0x1668] ss:$16 sps:$4 sm:$0xff]  }
 0x294   :  { %10243 = vmatprep.subr.bf16.mxu0 %v15078_v24  ;;  %11268 = vmatprep.subr.bf16.mxu1 %v15081_v13  ;;  %v15169_v24 = vld [vmem:[%s21637_s1 + $0x1684] ss:$16 sps:$4 sm:$0xff]   ;;  %v15172_v13 = vld [vmem:[%s21637_s1 + $0x168c] ss:$16 sps:$4 sm:$0xff]  }
 0x297   :  { %10244 = vmatpush1.bf16.msra.mxu0 %v15076_v27  ;;  %11269 = vmatpush1.bf16.msra.mxu1 %v15079_v28  ;;  %v15167_v27 = vld [vmem:[%s21637_s1 + $0x1680] ss:$16 sps:$4 sm:$0xff]   ;;  %v15170_v28 = vld [vmem:[%s21637_s1 + $0x1688] ss:$16 sps:$4 sm:$0xff]  }
 0x298   :  { %10245 = vmatprep.subr.bf16.mxu0 %v15084_v29  ;;  %11270 = vmatprep.subr.bf16.mxu1 %v15087_v14  ;;  %v15175_v29 = vld [vmem:[%s21637_s1 + $0x16a4] ss:$16 sps:$4 sm:$0xff]   ;;  %v15178_v14 = vld [vmem:[%s21637_s1 + $0x16ac] ss:$16 sps:$4 sm:$0xff]  }
 0x29b   :  { %10246 = vmatpush1.bf16.msra.mxu0 %v15082_v30  ;;  %11271 = vmatpush1.bf16.msra.mxu1 %v15085_v31  ;;  %v15173_v30 = vld [vmem:[%s21637_s1 + $0x16a0] ss:$16 sps:$4 sm:$0xff]   ;;  %v15176_v31 = vld [vmem:[%s21637_s1 + $0x16a8] ss:$16 sps:$4 sm:$0xff]  }
 0x29c   :  { %10247 = vmatprep.subr.bf16.mxu0 %v15090_v25  ;;  %11272 = vmatprep.subr.bf16.mxu1 %v15093_v32  ;;  %v15181_v25 = vld [vmem:[%s21637_s1 + $0x16c4] ss:$16 sps:$4 sm:$0xff]   ;;  %v15184_v32 = vld [vmem:[%s21637_s1 + $0x16cc] ss:$16 sps:$4 sm:$0xff]  }
 0x29f   :  { %10248 = vmatpush1.bf16.msra.mxu0 %v15088_v33  ;;  %11273 = vmatpush1.bf16.msra.mxu1 %v15091_v26  ;;  %v15179_v33 = vld [vmem:[%s21637_s1 + $0x16c0] ss:$16 sps:$4 sm:$0xff]   ;;  %v15182_v26 = vld [vmem:[%s21637_s1 + $0x16c8] ss:$16 sps:$4 sm:$0xff]  }
 0x2a0   :  { %10249 = vmatprep.subr.bf16.mxu0 %v15096_v36  ;;  %11274 = vmatprep.subr.bf16.mxu1 %v15099_v37  ;;  %v15187_v36 = vld [vmem:[%s21637_s1 + $0x16e4] ss:$16 sps:$4 sm:$0xff]   ;;  %v15190_v37 = vld [vmem:[%s21637_s1 + $0x16ec] ss:$16 sps:$4 sm:$0xff]  }
 0x2a3   :  { %10250 = vmatpush1.bf16.msra.mxu0 %v15094_v21  ;;  %11275 = vmatpush1.bf16.msra.mxu1 %v15097_v39  ;;  %v15185_v21 = vld [vmem:[%s21637_s1 + $0x16e0] ss:$16 sps:$4 sm:$0xff]   ;;  %v15188_v39 = vld [vmem:[%s21637_s1 + $0x16e8] ss:$16 sps:$4 sm:$0xff]  }
 0x2a4   :  { %10251 = vmatprep.subr.bf16.mxu0 %v15102_v40  ;;  %11276 = vmatprep.subr.bf16.mxu1 %v15105_v41  ;;  %v15193_v40 = vld [vmem:[%s21637_s1 + $0x1704] ss:$16 sps:$4 sm:$0xff]   ;;  %v15196_v41 = vld [vmem:[%s21637_s1 + $0x170c] ss:$16 sps:$4 sm:$0xff]  }
 0x2a7   :  { %10252 = vmatpush1.bf16.msra.mxu0 %v15100_v34  ;;  %11277 = vmatpush1.bf16.msra.mxu1 %v15103_v43  ;;  %v15191_v34 = vld [vmem:[%s21637_s1 + $0x1700] ss:$16 sps:$4 sm:$0xff]   ;;  %v15194_v43 = vld [vmem:[%s21637_s1 + $0x1708] ss:$16 sps:$4 sm:$0xff]  }
 0x2a8   :  { %10253 = vmatprep.subr.bf16.mxu0 %v15108_v45  ;;  %11278 = vmatprep.subr.bf16.mxu1 %v15111_v46  ;;  %v15199_v45 = vld [vmem:[%s21637_s1 + $0x1724] ss:$16 sps:$4 sm:$0xff]   ;;  %v15202_v46 = vld [vmem:[%s21637_s1 + $0x172c] ss:$16 sps:$4 sm:$0xff]  }
 0x2ab   :  { %10254 = vmatpush1.bf16.msra.mxu0 %v15106_v35  ;;  %11279 = vmatpush1.bf16.msra.mxu1 %v15109_v50  ;;  %v15197_v35 = vld [vmem:[%s21637_s1 + $0x1720] ss:$16 sps:$4 sm:$0xff]   ;;  %v15200_v50 = vld [vmem:[%s21637_s1 + $0x1728] ss:$16 sps:$4 sm:$0xff]  }
 0x2ac   :  { %10255 = vmatprep.subr.bf16.mxu0 %v15114_v51  ;;  %11280 = vmatprep.subr.bf16.mxu1 %v15117_v53  ;;  %v15205_v51 = vld [vmem:[%s21637_s1 + $0x1744] ss:$16 sps:$4 sm:$0xff]   ;;  %v15208_v53 = vld [vmem:[%s21637_s1 + $0x174c] ss:$16 sps:$4 sm:$0xff]  }
 0x2af   :  { %10256 = vmatpush1.bf16.msra.mxu0 %v15112_v38  ;;  %11281 = vmatpush1.bf16.msra.mxu1 %v15115_v54  ;;  %v15203_v38 = vld [vmem:[%s21637_s1 + $0x1740] ss:$16 sps:$4 sm:$0xff]   ;;  %v15206_v54 = vld [vmem:[%s21637_s1 + $0x1748] ss:$16 sps:$4 sm:$0xff]  }
 0x2b0   :  { %10257 = vmatprep.subr.bf16.mxu0 %v15120_v55  ;;  %11282 = vmatprep.subr.bf16.mxu1 %v15123_v56  ;;  %v15211_v55 = vld [vmem:[%s21637_s1 + $0x1764] ss:$16 sps:$4 sm:$0xff]   ;;  %v15214_v56 = vld [vmem:[%s21637_s1 + $0x176c] ss:$16 sps:$4 sm:$0xff]  }
 0x2b3   :  { %10258 = vmatpush1.bf16.msra.mxu0 %v15118_v47  ;;  %11283 = vmatpush1.bf16.msra.mxu1 %v15121_v57  ;;  %v15209_v47 = vld [vmem:[%s21637_s1 + $0x1760] ss:$16 sps:$4 sm:$0xff]   ;;  %v15212_v57 = vld [vmem:[%s21637_s1 + $0x1768] ss:$16 sps:$4 sm:$0xff]  }
 0x2b4   :  { %10259 = vmatprep.subr.bf16.mxu0 %v15126_v58  ;;  %11284 = vmatprep.subr.bf16.mxu1 %v15129_v48  ;;  %v15217_v58 = vld [vmem:[%s21637_s1 + $0x1784] ss:$16 sps:$4 sm:$0xff]   ;;  %v15220_v48 = vld [vmem:[%s21637_s1 + $0x178c] ss:$16 sps:$4 sm:$0xff]  }
 0x2b7   :  { %10260 = vmatpush1.bf16.msra.mxu0 %v15124_v61  ;;  %11285 = vmatpush1.bf16.msra.mxu1 %v15127_v62  ;;  %v15215_v61 = vld [vmem:[%s21637_s1 + $0x1780] ss:$16 sps:$4 sm:$0xff]   ;;  %v15218_v62 = vld [vmem:[%s21637_s1 + $0x1788] ss:$16 sps:$4 sm:$0xff]  }
 0x2b8   :  { %10261 = vmatprep.subr.bf16.mxu0 %v15132_v44  ;;  %11286 = vmatprep.subr.bf16.mxu1 %v15135_v0  ;;  %v15223_v44 = vld [vmem:[%s21637_s1 + $0x17a4] ss:$16 sps:$4 sm:$0xff]   ;;  %v15226_v0 = vld [vmem:[%s21637_s1 + $0x17ac] ss:$16 sps:$4 sm:$0xff]  }
 0x2bb   :  { %10262 = vmatpush1.bf16.msra.mxu0 %v15130_v1  ;;  %11287 = vmatpush1.bf16.msra.mxu1 %v15133_v2  ;;  %v15221_v1 = vld [vmem:[%s21637_s1 + $0x17a0] ss:$16 sps:$4 sm:$0xff]   ;;  %v15224_v2 = vld [vmem:[%s21637_s1 + $0x17a8] ss:$16 sps:$4 sm:$0xff]  }
 0x2bc   :  { %10263 = vmatprep.subr.bf16.mxu0 %v15138_v59  ;;  %11288 = vmatprep.subr.bf16.mxu1 %v15141_v3  ;;  %v15229_v59 = vld [vmem:[%s21637_s1 + $0x17c4] ss:$16 sps:$4 sm:$0xff]   ;;  %v15232_v3 = vld [vmem:[%s21637_s1 + $0x17cc] ss:$16 sps:$4 sm:$0xff]  }
 0x2bf   :  { %10264 = vmatpush1.bf16.msra.mxu0 %v15136_v4  ;;  %11289 = vmatpush1.bf16.msra.mxu1 %v15139_v5  ;;  %v18956_v4 = vld.sshfl [vmem:[%s21636_s0 + $0x18] sm:$0xff pattern:$0x75316420]  ;;  %v15227_v5 = vld [vmem:[%s21637_s1 + $0x17c0] ss:$16 sps:$4 sm:$0xff]  }
 0x2c0   :  { %10274 = vmatprep.subr.bf16.mxu0 %v15145_v6  ;;  %11299 = vmatprep.subr.bf16.mxu1 %v15148_v60  ;;  %v15230_v6 = vld [vmem:[%s21637_s1 + $0x17c8] ss:$16 sps:$4 sm:$0xff]   ;;  %v15235_v60 = vld [vmem:[%s21637_s1 + $0x17e4] ss:$16 sps:$4 sm:$0xff]  }
 0x2c2   :  { %10266 = vmatmul.mubr.bf16.vlgmr.msra.gmra.mrb[0].mxu0 %v18779_v8  ;;  %11291 = vmatmul.mubr.bf16.vlgmr.msra.gmra.mrb[0].mxu1 %v18779_v8 }
 0x2c3   :  { %10275 = vmatpush1.bf16.msra.mxu0 %v15143_v9  ;;  %11300 = vmatpush1.bf16.msra.mxu1 %v15146_v10  ;;  %v15238_v9 = vld [vmem:[%s21637_s1 + $0x17ec] ss:$16 sps:$4 sm:$0xff]   ;;  %v15233_v10 = vld [vmem:[%s21637_s1 + $0x17e0] ss:$16 sps:$4 sm:$0xff]  }
 0x2c4   :  { %10276 = vmatprep.subr.bf16.mxu0 %v15151_v11  ;;  %11301 = vmatprep.subr.bf16.mxu1 %v15154_v63  ;;  %v15236_v11 = vld [vmem:[%s21637_s1 + $0x17e8] ss:$16 sps:$4 sm:$0xff]   ;;  %v15241_v63 = vld [vmem:[%s21637_s1 + $0x1804] ss:$16 sps:$4 sm:$0xff]  }
 0x2c5   :  { %10306 = vmatprep.mubr.bf16.mxu0 %v1772_v12  ;;  %11331 = vmatprep.mubr.bf16.mxu1 %v1772_v12  ;;  %v15244_v12 = vld [vmem:[%s21637_s1 + $0x180c] ss:$16 sps:$4 sm:$0xff]  }
 0x2c7   :  { %10277 = vmatpush1.bf16.msra.mxu0 %v15149_v52  ;;  %11302 = vmatpush1.bf16.msra.mxu1 %v15152_v15  ;;  %v1788_v52 = vcombine.high %v18956_v4, %v18956_v4  ;;  %v1770_v15 = vcombine.high %v18779_v8, %v18779_v8  ;;  %v15250_v8 = vld [vmem:[%s21637_s1 + $0x182c] ss:$16 sps:$4 sm:$0xff]  }
 0x2c8   :  { %10278 = vmatprep.subr.bf16.mxu0 %v15157_v7  ;;  %11303 = vmatprep.subr.bf16.mxu1 %v15160_v16  ;;  %v15239_v7 = vld [vmem:[%s21637_s1 + $0x1800] ss:$16 sps:$4 sm:$0xff]   ;;  %v15242_v16 = vld [vmem:[%s21637_s1 + $0x1808] ss:$16 sps:$4 sm:$0xff]  }
 0x2cb   :  { %10279 = vmatpush1.bf16.msra.mxu0 %v15155_v17  ;;  %11304 = vmatpush1.bf16.msra.mxu1 %v15158_v18  ;;  %v15247_v17 = vld [vmem:[%s21637_s1 + $0x1824] ss:$16 sps:$4 sm:$0xff]   ;;  %v18999_v18 = vrot.slane %v1788_v52, %v16672_v49 }
 0x2cc   :  { %10280 = vmatprep.subr.bf16.mxu0 %v15163_v19  ;;  %11305 = vmatprep.subr.bf16.mxu1 %v15166_v20  ;;  %v15245_v19 = vld [vmem:[%s21637_s1 + $0x1820] ss:$16 sps:$4 sm:$0xff]   ;;  %v15248_v20 = vld [vmem:[%s21637_s1 + $0x1828] ss:$16 sps:$4 sm:$0xff]   ;;  %v15331_v52 = vld [vmem:[%s21637_s1 + $0x19e4] ss:$16 sps:$4 sm:$0xff]  }
 0x2cf   :  { %10281 = vmatpush1.bf16.msra.mxu0 %v15161_v22  ;;  %11306 = vmatpush1.bf16.msra.mxu1 %v15164_v23  ;;  %v15253_v22 = vld [vmem:[%s21637_s1 + $0x1844] ss:$16 sps:$4 sm:$0xff]   ;;  %v15256_v23 = vld [vmem:[%s21637_s1 + $0x184c] ss:$16 sps:$4 sm:$0xff]  }
 0x2d0   :  { %10282 = vmatprep.subr.bf16.mxu0 %v15169_v24  ;;  %11307 = vmatprep.subr.bf16.mxu1 %v15172_v13  ;;  %v15251_v24 = vld [vmem:[%s21637_s1 + $0x1840] ss:$16 sps:$4 sm:$0xff]   ;;  %v15254_v13 = vld [vmem:[%s21637_s1 + $0x1848] ss:$16 sps:$4 sm:$0xff]  }
 0x2d3   :  { %10283 = vmatpush1.bf16.msra.mxu0 %v15167_v27  ;;  %11308 = vmatpush1.bf16.msra.mxu1 %v15170_v28  ;;  %v15259_v27 = vld [vmem:[%s21637_s1 + $0x1864] ss:$16 sps:$4 sm:$0xff]   ;;  %v15262_v28 = vld [vmem:[%s21637_s1 + $0x186c] ss:$16 sps:$4 sm:$0xff]  }
 0x2d4   :  { %10284 = vmatprep.subr.bf16.mxu0 %v15175_v29  ;;  %11309 = vmatprep.subr.bf16.mxu1 %v15178_v14  ;;  %v15257_v29 = vld [vmem:[%s21637_s1 + $0x1860] ss:$16 sps:$4 sm:$0xff]   ;;  %v15260_v14 = vld [vmem:[%s21637_s1 + $0x1868] ss:$16 sps:$4 sm:$0xff]  }
 0x2d7   :  { %10285 = vmatpush1.bf16.msra.mxu0 %v15173_v30  ;;  %11310 = vmatpush1.bf16.msra.mxu1 %v15176_v31  ;;  %v15265_v30 = vld [vmem:[%s21637_s1 + $0x1884] ss:$16 sps:$4 sm:$0xff]   ;;  %v15268_v31 = vld [vmem:[%s21637_s1 + $0x188c] ss:$16 sps:$4 sm:$0xff]  }
 0x2d8   :  { %10286 = vmatprep.subr.bf16.mxu0 %v15181_v25  ;;  %11311 = vmatprep.subr.bf16.mxu1 %v15184_v32  ;;  %v15263_v25 = vld [vmem:[%s21637_s1 + $0x1880] ss:$16 sps:$4 sm:$0xff]   ;;  %v15266_v32 = vld [vmem:[%s21637_s1 + $0x1888] ss:$16 sps:$4 sm:$0xff]  }
 0x2db   :  { %10287 = vmatpush1.bf16.msra.mxu0 %v15179_v33  ;;  %11312 = vmatpush1.bf16.msra.mxu1 %v15182_v26  ;;  %v15271_v33 = vld [vmem:[%s21637_s1 + $0x18a4] ss:$16 sps:$4 sm:$0xff]   ;;  %v15274_v26 = vld [vmem:[%s21637_s1 + $0x18ac] ss:$16 sps:$4 sm:$0xff]  }
 0x2dc   :  { %10288 = vmatprep.subr.bf16.mxu0 %v15187_v36  ;;  %11313 = vmatprep.subr.bf16.mxu1 %v15190_v37  ;;  %v15269_v36 = vld [vmem:[%s21637_s1 + $0x18a0] ss:$16 sps:$4 sm:$0xff]   ;;  %v15272_v37 = vld [vmem:[%s21637_s1 + $0x18a8] ss:$16 sps:$4 sm:$0xff]  }
 0x2df   :  { %10289 = vmatpush1.bf16.msra.mxu0 %v15185_v21  ;;  %11314 = vmatpush1.bf16.msra.mxu1 %v15188_v39  ;;  %v15277_v21 = vld [vmem:[%s21637_s1 + $0x18c4] ss:$16 sps:$4 sm:$0xff]   ;;  %v15280_v39 = vld [vmem:[%s21637_s1 + $0x18cc] ss:$16 sps:$4 sm:$0xff]  }
 0x2e0   :  { %10290 = vmatprep.subr.bf16.mxu0 %v15193_v40  ;;  %11315 = vmatprep.subr.bf16.mxu1 %v15196_v41  ;;  %v15275_v40 = vld [vmem:[%s21637_s1 + $0x18c0] ss:$16 sps:$4 sm:$0xff]   ;;  %v15278_v41 = vld [vmem:[%s21637_s1 + $0x18c8] ss:$16 sps:$4 sm:$0xff]  }
 0x2e3   :  { %10291 = vmatpush1.bf16.msra.mxu0 %v15191_v34  ;;  %11316 = vmatpush1.bf16.msra.mxu1 %v15194_v43  ;;  %v15283_v34 = vld [vmem:[%s21637_s1 + $0x18e4] ss:$16 sps:$4 sm:$0xff]   ;;  %v15286_v43 = vld [vmem:[%s21637_s1 + $0x18ec] ss:$16 sps:$4 sm:$0xff]  }
 0x2e4   :  { %10292 = vmatprep.subr.bf16.mxu0 %v15199_v45  ;;  %11317 = vmatprep.subr.bf16.mxu1 %v15202_v46  ;;  %v15281_v45 = vld [vmem:[%s21637_s1 + $0x18e0] ss:$16 sps:$4 sm:$0xff]   ;;  %v15284_v46 = vld [vmem:[%s21637_s1 + $0x18e8] ss:$16 sps:$4 sm:$0xff]  }
 0x2e7   :  { %10293 = vmatpush1.bf16.msra.mxu0 %v15197_v35  ;;  %11318 = vmatpush1.bf16.msra.mxu1 %v15200_v50  ;;  %v15289_v35 = vld [vmem:[%s21637_s1 + $0x1904] ss:$16 sps:$4 sm:$0xff]   ;;  %v15292_v50 = vld [vmem:[%s21637_s1 + $0x190c] ss:$16 sps:$4 sm:$0xff]  }
 0x2e8   :  { %10294 = vmatprep.subr.bf16.mxu0 %v15205_v51  ;;  %11319 = vmatprep.subr.bf16.mxu1 %v15208_v53  ;;  %v15287_v51 = vld [vmem:[%s21637_s1 + $0x1900] ss:$16 sps:$4 sm:$0xff]   ;;  %v15290_v53 = vld [vmem:[%s21637_s1 + $0x1908] ss:$16 sps:$4 sm:$0xff]  }
 0x2eb   :  { %10295 = vmatpush1.bf16.msra.mxu0 %v15203_v38  ;;  %11320 = vmatpush1.bf16.msra.mxu1 %v15206_v54  ;;  %v15295_v38 = vld [vmem:[%s21637_s1 + $0x1924] ss:$16 sps:$4 sm:$0xff]   ;;  %v15298_v54 = vld [vmem:[%s21637_s1 + $0x192c] ss:$16 sps:$4 sm:$0xff]  }
 0x2ec   :  { %10296 = vmatprep.subr.bf16.mxu0 %v15211_v55  ;;  %11321 = vmatprep.subr.bf16.mxu1 %v15214_v56  ;;  %v15293_v55 = vld [vmem:[%s21637_s1 + $0x1920] ss:$16 sps:$4 sm:$0xff]   ;;  %v15296_v56 = vld [vmem:[%s21637_s1 + $0x1928] ss:$16 sps:$4 sm:$0xff]  }
 0x2ef   :  { %10297 = vmatpush1.bf16.msra.mxu0 %v15209_v47  ;;  %11322 = vmatpush1.bf16.msra.mxu1 %v15212_v57  ;;  %v15301_v47 = vld [vmem:[%s21637_s1 + $0x1944] ss:$16 sps:$4 sm:$0xff]   ;;  %v15304_v57 = vld [vmem:[%s21637_s1 + $0x194c] ss:$16 sps:$4 sm:$0xff]  }
 0x2f0   :  { %10298 = vmatprep.subr.bf16.mxu0 %v15217_v58  ;;  %11323 = vmatprep.subr.bf16.mxu1 %v15220_v48  ;;  %v15299_v58 = vld [vmem:[%s21637_s1 + $0x1940] ss:$16 sps:$4 sm:$0xff]   ;;  %v15302_v48 = vld [vmem:[%s21637_s1 + $0x1948] ss:$16 sps:$4 sm:$0xff]  }
 0x2f3   :  { %10299 = vmatpush1.bf16.msra.mxu0 %v15215_v61  ;;  %11324 = vmatpush1.bf16.msra.mxu1 %v15218_v62  ;;  %v15307_v61 = vld [vmem:[%s21637_s1 + $0x1964] ss:$16 sps:$4 sm:$0xff]   ;;  %v15310_v62 = vld [vmem:[%s21637_s1 + $0x196c] ss:$16 sps:$4 sm:$0xff]  }
 0x2f4   :  { %10300 = vmatprep.subr.bf16.mxu0 %v15223_v44  ;;  %11325 = vmatprep.subr.bf16.mxu1 %v15226_v0  ;;  %v15305_v44 = vld [vmem:[%s21637_s1 + $0x1960] ss:$16 sps:$4 sm:$0xff]   ;;  %v15308_v0 = vld [vmem:[%s21637_s1 + $0x1968] ss:$16 sps:$4 sm:$0xff]  }
 0x2f7   :  { %10301 = vmatpush1.bf16.msra.mxu0 %v15221_v1  ;;  %11326 = vmatpush1.bf16.msra.mxu1 %v15224_v2  ;;  %v15313_v1 = vld [vmem:[%s21637_s1 + $0x1984] ss:$16 sps:$4 sm:$0xff]   ;;  %v15316_v2 = vld [vmem:[%s21637_s1 + $0x198c] ss:$16 sps:$4 sm:$0xff]  }
 0x2f8   :  { %10302 = vmatprep.subr.bf16.mxu0 %v15229_v59  ;;  %11327 = vmatprep.subr.bf16.mxu1 %v15232_v3  ;;  %v15311_v59 = vld [vmem:[%s21637_s1 + $0x1980] ss:$16 sps:$4 sm:$0xff]   ;;  %v15314_v3 = vld [vmem:[%s21637_s1 + $0x1988] ss:$16 sps:$4 sm:$0xff]  }
 0x2fb   :  { %10303 = vmatpush1.bf16.msra.mxu0 %v15227_v5  ;;  %11328 = vmatpush1.bf16.msra.mxu1 %v15230_v6  ;;  %v15319_v5 = vld [vmem:[%s21637_s1 + $0x19a4] ss:$16 sps:$4 sm:$0xff]   ;;  %v15322_v6 = vld [vmem:[%s21637_s1 + $0x19ac] ss:$16 sps:$4 sm:$0xff]  }
 0x2fc   :  { %10304 = vmatprep.subr.bf16.mxu0 %v15235_v60  ;;  %11329 = vmatprep.subr.bf16.mxu1 %v15238_v9  ;;  %v15317_v60 = vld [vmem:[%s21637_s1 + $0x19a0] ss:$16 sps:$4 sm:$0xff]   ;;  %v15320_v9 = vld [vmem:[%s21637_s1 + $0x19a8] ss:$16 sps:$4 sm:$0xff]  }
 0x2ff   :  { %10305 = vmatpush1.bf16.msra.mxu0 %v15233_v10  ;;  %11330 = vmatpush1.bf16.msra.mxu1 %v15236_v11  ;;  %v15325_v10 = vld [vmem:[%s21637_s1 + $0x19c4] ss:$16 sps:$4 sm:$0xff]   ;;  %v15328_v11 = vld [vmem:[%s21637_s1 + $0x19cc] ss:$16 sps:$4 sm:$0xff]  }
 0x300   :  { %10315 = vmatprep.subr.bf16.mxu0 %v15241_v63  ;;  %11340 = vmatprep.subr.bf16.mxu1 %v15244_v12  ;;  %v15323_v63 = vld [vmem:[%s21637_s1 + $0x19c0] ss:$16 sps:$4 sm:$0xff]   ;;  %v15326_v12 = vld [vmem:[%s21637_s1 + $0x19c8] ss:$16 sps:$4 sm:$0xff]  }
 0x302   :  { %10307 = vmatmul.mubr.bf16.vlgmr.msra.gmra.mrb[0].mxu0 %v1770_v15  ;;  %11332 = vmatmul.mubr.bf16.vlgmr.msra.gmra.mrb[0].mxu1 %v1770_v15  ;;  %v15334_v15 = vld [vmem:[%s21637_s1 + $0x19ec] ss:$16 sps:$4 sm:$0xff]  }
 0x303   :  { %10316 = vmatpush1.bf16.msra.mxu0 %v15239_v7  ;;  %11341 = vmatpush1.bf16.msra.mxu1 %v15242_v16  ;;  %v15329_v7 = vld [vmem:[%s21637_s1 + $0x19e0] ss:$16 sps:$4 sm:$0xff]   ;;  %v15332_v16 = vld [vmem:[%s21637_s1 + $0x19e8] ss:$16 sps:$4 sm:$0xff]  }
 0x304   :  { %10317 = vmatprep.subr.bf16.mxu0 %v15247_v17  ;;  %11342 = vmatprep.subr.bf16.mxu1 %v15250_v8  ;;  %v15337_v17 = vld [vmem:[%s21637_s1 + $0x1a04] ss:$16 sps:$4 sm:$0xff]   ;;  %v15340_v8 = vld [vmem:[%s21637_s1 + $0x1a0c] ss:$16 sps:$4 sm:$0xff]  }
 0x305   :  { %10347 = vmatprep.mubr.bf16.mxu0 %v18999_v18  ;;  %11372 = vmatprep.mubr.bf16.mxu1 %v18999_v18 }
 0x307   :  { %10318 = vmatpush1.bf16.msra.mxu0 %v15245_v19  ;;  %11343 = vmatpush1.bf16.msra.mxu1 %v15248_v20  ;;  %v19185_v19 = vrot.slane %v18956_v4, %v16672_v49  ;;  %v15335_v20 = vld [vmem:[%s21637_s1 + $0x1a00] ss:$16 sps:$4 sm:$0xff]   ;;  %v15346_v4 = vld [vmem:[%s21637_s1 + $0x1a2c] ss:$16 sps:$4 sm:$0xff]  }
 0x308   :  { %10319 = vmatprep.subr.bf16.mxu0 %v15253_v22  ;;  %11344 = vmatprep.subr.bf16.mxu1 %v15256_v23  ;;  %v15338_v22 = vld [vmem:[%s21637_s1 + $0x1a08] ss:$16 sps:$4 sm:$0xff]   ;;  %v15343_v23 = vld [vmem:[%s21637_s1 + $0x1a24] ss:$16 sps:$4 sm:$0xff]  }
 0x30b   :  { %10320 = vmatpush1.bf16.msra.mxu0 %v15251_v24  ;;  %11345 = vmatpush1.bf16.msra.mxu1 %v15254_v13  ;;  %v1820_v24 = vcombine.high %v18999_v18, %v18999_v18  ;;  %v15341_v13 = vld [vmem:[%s21637_s1 + $0x1a20] ss:$16 sps:$4 sm:$0xff]   ;;  %v15349_v18 = vld [vmem:[%s21637_s1 + $0x1a44] ss:$16 sps:$4 sm:$0xff]  }
 0x30c   :  { %10321 = vmatprep.subr.bf16.mxu0 %v15259_v27  ;;  %11346 = vmatprep.subr.bf16.mxu1 %v15262_v28  ;;  %v15344_v27 = vld [vmem:[%s21637_s1 + $0x1a28] ss:$16 sps:$4 sm:$0xff]   ;;  %v15352_v28 = vld [vmem:[%s21637_s1 + $0x1a4c] ss:$16 sps:$4 sm:$0xff]  }
 0x30f   :  { %10322 = vmatpush1.bf16.msra.mxu0 %v15257_v29  ;;  %11347 = vmatpush1.bf16.msra.mxu1 %v15260_v14  ;;  %v15347_v29 = vld [vmem:[%s21637_s1 + $0x1a40] ss:$16 sps:$4 sm:$0xff]   ;;  %v15350_v14 = vld [vmem:[%s21637_s1 + $0x1a48] ss:$16 sps:$4 sm:$0xff]  }
 0x310   :  { %10323 = vmatprep.subr.bf16.mxu0 %v15265_v30  ;;  %11348 = vmatprep.subr.bf16.mxu1 %v15268_v31  ;;  %v15355_v30 = vld [vmem:[%s21637_s1 + $0x1a64] ss:$16 sps:$4 sm:$0xff]   ;;  %v15358_v31 = vld [vmem:[%s21637_s1 + $0x1a6c] ss:$16 sps:$4 sm:$0xff]  }
 0x313   :  { %10324 = vmatpush1.bf16.msra.mxu0 %v15263_v25  ;;  %11349 = vmatpush1.bf16.msra.mxu1 %v15266_v32  ;;  %v15353_v25 = vld [vmem:[%s21637_s1 + $0x1a60] ss:$16 sps:$4 sm:$0xff]   ;;  %v15356_v32 = vld [vmem:[%s21637_s1 + $0x1a68] ss:$16 sps:$4 sm:$0xff]  }
 0x314   :  { %10325 = vmatprep.subr.bf16.mxu0 %v15271_v33  ;;  %11350 = vmatprep.subr.bf16.mxu1 %v15274_v26  ;;  %v15361_v33 = vld [vmem:[%s21637_s1 + $0x1a84] ss:$16 sps:$4 sm:$0xff]   ;;  %v15364_v26 = vld [vmem:[%s21637_s1 + $0x1a8c] ss:$16 sps:$4 sm:$0xff]  }
 0x317   :  { %10326 = vmatpush1.bf16.msra.mxu0 %v15269_v36  ;;  %11351 = vmatpush1.bf16.msra.mxu1 %v15272_v37  ;;  %v15359_v36 = vld [vmem:[%s21637_s1 + $0x1a80] ss:$16 sps:$4 sm:$0xff]   ;;  %v15362_v37 = vld [vmem:[%s21637_s1 + $0x1a88] ss:$16 sps:$4 sm:$0xff]  }
 0x318   :  { %10327 = vmatprep.subr.bf16.mxu0 %v15277_v21  ;;  %11352 = vmatprep.subr.bf16.mxu1 %v15280_v39  ;;  %v15367_v21 = vld [vmem:[%s21637_s1 + $0x1aa4] ss:$16 sps:$4 sm:$0xff]   ;;  %v15370_v39 = vld [vmem:[%s21637_s1 + $0x1aac] ss:$16 sps:$4 sm:$0xff]  }
 0x31b   :  { %10328 = vmatpush1.bf16.msra.mxu0 %v15275_v40  ;;  %11353 = vmatpush1.bf16.msra.mxu1 %v15278_v41  ;;  %v15365_v40 = vld [vmem:[%s21637_s1 + $0x1aa0] ss:$16 sps:$4 sm:$0xff]   ;;  %v15368_v41 = vld [vmem:[%s21637_s1 + $0x1aa8] ss:$16 sps:$4 sm:$0xff]  }
 0x31c   :  { %10329 = vmatprep.subr.bf16.mxu0 %v15283_v34  ;;  %11354 = vmatprep.subr.bf16.mxu1 %v15286_v43  ;;  %v15373_v34 = vld [vmem:[%s21637_s1 + $0x1ac4] ss:$16 sps:$4 sm:$0xff]   ;;  %v15376_v43 = vld [vmem:[%s21637_s1 + $0x1acc] ss:$16 sps:$4 sm:$0xff]  }
 0x31f   :  { %10330 = vmatpush1.bf16.msra.mxu0 %v15281_v45  ;;  %11355 = vmatpush1.bf16.msra.mxu1 %v15284_v46  ;;  %v15371_v45 = vld [vmem:[%s21637_s1 + $0x1ac0] ss:$16 sps:$4 sm:$0xff]   ;;  %v15374_v46 = vld [vmem:[%s21637_s1 + $0x1ac8] ss:$16 sps:$4 sm:$0xff]  }
 0x320   :  { %10331 = vmatprep.subr.bf16.mxu0 %v15289_v35  ;;  %11356 = vmatprep.subr.bf16.mxu1 %v15292_v50  ;;  %v15379_v35 = vld [vmem:[%s21637_s1 + $0x1ae4] ss:$16 sps:$4 sm:$0xff]   ;;  %v15382_v50 = vld [vmem:[%s21637_s1 + $0x1aec] ss:$16 sps:$4 sm:$0xff]  }
 0x323   :  { %10332 = vmatpush1.bf16.msra.mxu0 %v15287_v51  ;;  %11357 = vmatpush1.bf16.msra.mxu1 %v15290_v53  ;;  %v15377_v51 = vld [vmem:[%s21637_s1 + $0x1ae0] ss:$16 sps:$4 sm:$0xff]   ;;  %v15380_v53 = vld [vmem:[%s21637_s1 + $0x1ae8] ss:$16 sps:$4 sm:$0xff]  }
 0x324   :  { %10333 = vmatprep.subr.bf16.mxu0 %v15295_v38  ;;  %11358 = vmatprep.subr.bf16.mxu1 %v15298_v54  ;;  %v15385_v38 = vld [vmem:[%s21637_s1 + $0x1b04] ss:$16 sps:$4 sm:$0xff]   ;;  %v15388_v54 = vld [vmem:[%s21637_s1 + $0x1b0c] ss:$16 sps:$4 sm:$0xff]  }
 0x327   :  { %10334 = vmatpush1.bf16.msra.mxu0 %v15293_v55  ;;  %11359 = vmatpush1.bf16.msra.mxu1 %v15296_v56  ;;  %v15383_v55 = vld [vmem:[%s21637_s1 + $0x1b00] ss:$16 sps:$4 sm:$0xff]   ;;  %v15386_v56 = vld [vmem:[%s21637_s1 + $0x1b08] ss:$16 sps:$4 sm:$0xff]  }
 0x328   :  { %10335 = vmatprep.subr.bf16.mxu0 %v15301_v47  ;;  %11360 = vmatprep.subr.bf16.mxu1 %v15304_v57  ;;  %v15391_v47 = vld [vmem:[%s21637_s1 + $0x1b24] ss:$16 sps:$4 sm:$0xff]   ;;  %v15394_v57 = vld [vmem:[%s21637_s1 + $0x1b2c] ss:$16 sps:$4 sm:$0xff]  }
 0x32b   :  { %10336 = vmatpush1.bf16.msra.mxu0 %v15299_v58  ;;  %11361 = vmatpush1.bf16.msra.mxu1 %v15302_v48  ;;  %v15389_v58 = vld [vmem:[%s21637_s1 + $0x1b20] ss:$16 sps:$4 sm:$0xff]   ;;  %v15392_v48 = vld [vmem:[%s21637_s1 + $0x1b28] ss:$16 sps:$4 sm:$0xff]  }
 0x32c   :  { %10337 = vmatprep.subr.bf16.mxu0 %v15307_v61  ;;  %11362 = vmatprep.subr.bf16.mxu1 %v15310_v62  ;;  %v15397_v61 = vld [vmem:[%s21637_s1 + $0x1b44] ss:$16 sps:$4 sm:$0xff]   ;;  %v15400_v62 = vld [vmem:[%s21637_s1 + $0x1b4c] ss:$16 sps:$4 sm:$0xff]  }
 0x32f   :  { %10338 = vmatpush1.bf16.msra.mxu0 %v15305_v44  ;;  %11363 = vmatpush1.bf16.msra.mxu1 %v15308_v0  ;;  %v15395_v44 = vld [vmem:[%s21637_s1 + $0x1b40] ss:$16 sps:$4 sm:$0xff]   ;;  %v15398_v0 = vld [vmem:[%s21637_s1 + $0x1b48] ss:$16 sps:$4 sm:$0xff]  }
 0x330   :  { %10339 = vmatprep.subr.bf16.mxu0 %v15313_v1  ;;  %11364 = vmatprep.subr.bf16.mxu1 %v15316_v2  ;;  %v15403_v1 = vld [vmem:[%s21637_s1 + $0x1b64] ss:$16 sps:$4 sm:$0xff]   ;;  %v15406_v2 = vld [vmem:[%s21637_s1 + $0x1b6c] ss:$16 sps:$4 sm:$0xff]  }
 0x333   :  { %10340 = vmatpush1.bf16.msra.mxu0 %v15311_v59  ;;  %11365 = vmatpush1.bf16.msra.mxu1 %v15314_v3  ;;  %v15401_v59 = vld [vmem:[%s21637_s1 + $0x1b60] ss:$16 sps:$4 sm:$0xff]   ;;  %v15404_v3 = vld [vmem:[%s21637_s1 + $0x1b68] ss:$16 sps:$4 sm:$0xff]  }
 0x334   :  { %10341 = vmatprep.subr.bf16.mxu0 %v15319_v5  ;;  %11366 = vmatprep.subr.bf16.mxu1 %v15322_v6  ;;  %v15409_v5 = vld [vmem:[%s21637_s1 + $0x1b84] ss:$16 sps:$4 sm:$0xff]   ;;  %v15412_v6 = vld [vmem:[%s21637_s1 + $0x1b8c] ss:$16 sps:$4 sm:$0xff]  }
 0x337   :  { %10342 = vmatpush1.bf16.msra.mxu0 %v15317_v60  ;;  %11367 = vmatpush1.bf16.msra.mxu1 %v15320_v9  ;;  %v15407_v60 = vld [vmem:[%s21637_s1 + $0x1b80] ss:$16 sps:$4 sm:$0xff]   ;;  %v15410_v9 = vld [vmem:[%s21637_s1 + $0x1b88] ss:$16 sps:$4 sm:$0xff]  }
 0x338   :  { %10343 = vmatprep.subr.bf16.mxu0 %v15325_v10  ;;  %11368 = vmatprep.subr.bf16.mxu1 %v15328_v11  ;;  %v15415_v10 = vld [vmem:[%s21637_s1 + $0x1ba4] ss:$16 sps:$4 sm:$0xff]   ;;  %v15418_v11 = vld [vmem:[%s21637_s1 + $0x1bac] ss:$16 sps:$4 sm:$0xff]  }
 0x33b   :  { %10344 = vmatpush1.bf16.msra.mxu0 %v15323_v63  ;;  %11369 = vmatpush1.bf16.msra.mxu1 %v15326_v12 }
 0x33c   :  { %10345 = vmatprep.subr.bf16.mxu0 %v15331_v52  ;;  %11370 = vmatprep.subr.bf16.mxu1 %v15334_v15 }
 0x33f   :  { %10346 = vmatpush1.bf16.msra.mxu0 %v15329_v7  ;;  %11371 = vmatpush1.bf16.msra.mxu1 %v15332_v16 }
 0x340   :  { %10356 = vmatprep.subr.bf16.mxu0 %v15337_v17  ;;  %11381 = vmatprep.subr.bf16.mxu1 %v15340_v8 }
 0x342   :  { %10348 = vmatmul.mubr.bf16.vlgmr.msra.gmra.mrb[0].mxu0 %v19185_v19  ;;  %11373 = vmatmul.mubr.bf16.vlgmr.msra.gmra.mrb[0].mxu1 %v19185_v19 }
 0x343   :  { %10357 = vmatpush1.bf16.msra.mxu0 %v15335_v20  ;;  %11382 = vmatpush1.bf16.msra.mxu1 %v15338_v22 }
 0x344   :  { %10358 = vmatprep.subr.bf16.mxu0 %v15343_v23  ;;  %11383 = vmatprep.subr.bf16.mxu1 %v15346_v4 }
 0x345   :  { %10388 = vmatprep.mubr.bf16.mxu0 %v1820_v24  ;;  %11413 = vmatprep.mubr.bf16.mxu1 %v1820_v24 }
 0x347   :  { %10359 = vmatpush1.bf16.msra.mxu0 %v15341_v13  ;;  %11384 = vmatpush1.bf16.msra.mxu1 %v15344_v27 }
 0x348   :  { %10360 = vmatprep.subr.bf16.mxu0 %v15349_v18  ;;  %11385 = vmatprep.subr.bf16.mxu1 %v15352_v28 }
 0x34b   :  { %10361 = vmatpush1.bf16.msra.mxu0 %v15347_v29  ;;  %11386 = vmatpush1.bf16.msra.mxu1 %v15350_v14 }
 0x34c   :  { %10362 = vmatprep.subr.bf16.mxu0 %v15355_v30  ;;  %11387 = vmatprep.subr.bf16.mxu1 %v15358_v31 }
 0x34f   :  { %10363 = vmatpush1.bf16.msra.mxu0 %v15353_v25  ;;  %11388 = vmatpush1.bf16.msra.mxu1 %v15356_v32 }
 0x350   :  { %10364 = vmatprep.subr.bf16.mxu0 %v15361_v33  ;;  %11389 = vmatprep.subr.bf16.mxu1 %v15364_v26 }
 0x353   :  { %10365 = vmatpush1.bf16.msra.mxu0 %v15359_v36  ;;  %11390 = vmatpush1.bf16.msra.mxu1 %v15362_v37 }
 0x354   :  { %10366 = vmatprep.subr.bf16.mxu0 %v15367_v21  ;;  %11391 = vmatprep.subr.bf16.mxu1 %v15370_v39 }
 0x357   :  { %10367 = vmatpush1.bf16.msra.mxu0 %v15365_v40  ;;  %11392 = vmatpush1.bf16.msra.mxu1 %v15368_v41 }
 0x358   :  { %10368 = vmatprep.subr.bf16.mxu0 %v15373_v34  ;;  %11393 = vmatprep.subr.bf16.mxu1 %v15376_v43 }
 0x35b   :  { %10369 = vmatpush1.bf16.msra.mxu0 %v15371_v45  ;;  %11394 = vmatpush1.bf16.msra.mxu1 %v15374_v46 }
 0x35c   :  { %10370 = vmatprep.subr.bf16.mxu0 %v15379_v35  ;;  %11395 = vmatprep.subr.bf16.mxu1 %v15382_v50 }
 0x35f   :  { %10371 = vmatpush1.bf16.msra.mxu0 %v15377_v51  ;;  %11396 = vmatpush1.bf16.msra.mxu1 %v15380_v53 }
 0x360   :  { %10372 = vmatprep.subr.bf16.mxu0 %v15385_v38  ;;  %11397 = vmatprep.subr.bf16.mxu1 %v15388_v54 }
 0x363   :  { %10373 = vmatpush1.bf16.msra.mxu0 %v15383_v55  ;;  %11398 = vmatpush1.bf16.msra.mxu1 %v15386_v56 }
 0x364   :  { %10374 = vmatprep.subr.bf16.mxu0 %v15391_v47  ;;  %11399 = vmatprep.subr.bf16.mxu1 %v15394_v57 }
 0x367   :  { %10375 = vmatpush1.bf16.msra.mxu0 %v15389_v58  ;;  %11400 = vmatpush1.bf16.msra.mxu1 %v15392_v48 }
 0x368   :  { %10376 = vmatprep.subr.bf16.mxu0 %v15397_v61  ;;  %11401 = vmatprep.subr.bf16.mxu1 %v15400_v62 }
 0x36b   :  { %10377 = vmatpush1.bf16.msra.mxu0 %v15395_v44  ;;  %11402 = vmatpush1.bf16.msra.mxu1 %v15398_v0 }
 0x36c   :  { %10378 = vmatprep.subr.bf16.mxu0 %v15403_v1  ;;  %11403 = vmatprep.subr.bf16.mxu1 %v15406_v2 }
 0x36f   :  { %10379 = vmatpush1.bf16.msra.mxu0 %v15401_v59  ;;  %11404 = vmatpush1.bf16.msra.mxu1 %v15404_v3 }
 0x370   :  { %10380 = vmatprep.subr.bf16.mxu0 %v15409_v5  ;;  %11405 = vmatprep.subr.bf16.mxu1 %v15412_v6 }
 0x371   :  { %10 = vsyncpa [#allocation3], 0  ;;  %v15413_v63 = vld [vmem:[%s21637_s1 + $0x1ba0] ss:$16 sps:$4 sm:$0xff]   ;;  %v15416_v12 = vld [vmem:[%s21637_s1 + $0x1ba8] ss:$16 sps:$4 sm:$0xff]   ;;  %v1818_v28 = vcombine.high %v19185_v19, %v19185_v19 }
 0x372   :  { %v15421_v52 = vld [vmem:[%s21637_s1 + $0x1bc4] ss:$16 sps:$4 sm:$0xff]   ;;  %v15424_v15 = vld [vmem:[%s21637_s1 + $0x1bcc] ss:$16 sps:$4 sm:$0xff]   ;;  %v15419_v17 = vld [vmem:[%s21637_s1 + $0x1bc0] ss:$16 sps:$4 sm:$0xff]  }
 0x373   :  { %10381 = vmatpush1.bf16.msra.mxu0 %v15407_v60  ;;  %11406 = vmatpush1.bf16.msra.mxu1 %v15410_v9  ;;  %v16476_v7 = vld [vmem:[%s21636_s0 + $0x18] sm:$0xff]  ;;  %v15427_v20 = vld [vmem:[%s21637_s1 + $0x1be4] ss:$16 sps:$4 sm:$0xff]   ;;  %v15425_v4 = vld [vmem:[%s21637_s1 + $0x1be0] ss:$16 sps:$4 sm:$0xff]   ;;  %s16506_s9 = smov [#allocation2]  }
 0x374   :  { %10382 = vmatprep.subr.bf16.mxu0 %v15415_v10  ;;  %11407 = vmatprep.subr.bf16.mxu1 %v15418_v11  ;;  %v1773_v16 = vcombine.high %v16476_v7, %v16476_v7  ;;  %v15422_v8 = vld [vmem:[%s21637_s1 + $0x1bc8] ss:$16 sps:$4 sm:$0xff]   ;;  %v15430_v22 = vld [vmem:[%s21637_s1 + $0x1bec] ss:$16 sps:$4 sm:$0xff]   ;;  %v15433_v13 = vld [vmem:[%s21637_s1 + $0x1c04] ss:$16 sps:$4 sm:$0xff]  }
 0x375   :  { %v15428_v24 = vld [vmem:[%s21637_s1 + $0x1be8] ss:$16 sps:$4 sm:$0xff]   ;;  %v15436_v27 = vld [vmem:[%s21637_s1 + $0x1c0c] ss:$16 sps:$4 sm:$0xff]   ;;  %v15431_v29 = vld [vmem:[%s21637_s1 + $0x1c00] ss:$16 sps:$4 sm:$0xff]  }
 0x376   :  { %v19375_v23 = vrot.slane %v1773_v16, %v16672_v49  ;;  %v15434_v14 = vld [vmem:[%s21637_s1 + $0x1c08] ss:$16 sps:$4 sm:$0xff]   ;;  %v15439_v30 = vld [vmem:[%s21637_s1 + $0x1c24] ss:$16 sps:$4 sm:$0xff]   ;;  %v15442_v19 = vld [vmem:[%s21637_s1 + $0x1c2c] ss:$16 sps:$4 sm:$0xff]  }
 0x377   :  { %10383 = vmatpush1.bf16.msra.mxu0 %v15413_v63  ;;  %11408 = vmatpush1.bf16.msra.mxu1 %v15416_v12  ;;  %v15437_v25 = vld [vmem:[%s21637_s1 + $0x1c20] ss:$16 sps:$4 sm:$0xff]   ;;  %v15440_v32 = vld [vmem:[%s21637_s1 + $0x1c28] ss:$16 sps:$4 sm:$0xff]   ;;  %v15445_v33 = vld [vmem:[%s21637_s1 + $0x1c44] ss:$16 sps:$4 sm:$0xff]  }
 0x378   :  { %10384 = vmatprep.subr.bf16.mxu0 %v15421_v52  ;;  %11409 = vmatprep.subr.bf16.mxu1 %v15424_v15  ;;  %v1789_v18 = vcombine.high %v19375_v23, %v19375_v23  ;;  %v15448_v26 = vld [vmem:[%s21637_s1 + $0x1c4c] ss:$16 sps:$4 sm:$0xff]   ;;  %v15443_v36 = vld [vmem:[%s21637_s1 + $0x1c40] ss:$16 sps:$4 sm:$0xff]   ;;  %v15446_v37 = vld [vmem:[%s21637_s1 + $0x1c48] ss:$16 sps:$4 sm:$0xff]  }
 0x379   :  { %v15451_v21 = vld [vmem:[%s21637_s1 + $0x1c64] ss:$16 sps:$4 sm:$0xff]   ;;  %v15454_v39 = vld [vmem:[%s21637_s1 + $0x1c6c] ss:$16 sps:$4 sm:$0xff]   ;;  %v15449_v40 = vld [vmem:[%s21637_s1 + $0x1c60] ss:$16 sps:$4 sm:$0xff]  }
 0x37a   :  { %v19406_v31 = vrot.slane %v1789_v18, %v16672_v49  ;;  %v15452_v41 = vld [vmem:[%s21637_s1 + $0x1c68] ss:$16 sps:$4 sm:$0xff]   ;;  %v15457_v34 = vld [vmem:[%s21637_s1 + $0x1c84] ss:$16 sps:$4 sm:$0xff]   ;;  %v15460_v43 = vld [vmem:[%s21637_s1 + $0x1c8c] ss:$16 sps:$4 sm:$0xff]  }
 0x37b   :  { %10385 = vmatpush1.bf16.msra.mxu0 %v15419_v17  ;;  %11410 = vmatpush1.bf16.msra.mxu1 %v15422_v8  ;;  %v15455_v45 = vld [vmem:[%s21637_s1 + $0x1c80] ss:$16 sps:$4 sm:$0xff]   ;;  %v15458_v46 = vld [vmem:[%s21637_s1 + $0x1c88] ss:$16 sps:$4 sm:$0xff]   ;;  %v15463_v35 = vld [vmem:[%s21637_s1 + $0x1ca4] ss:$16 sps:$4 sm:$0xff]  }
 0x37c   :  { %10386 = vmatprep.subr.bf16.mxu0 %v15427_v20  ;;  %11411 = vmatprep.subr.bf16.mxu1 %v15430_v22  ;;  %v15466_v50 = vld [vmem:[%s21637_s1 + $0x1cac] ss:$16 sps:$4 sm:$0xff]   ;;  %v15461_v51 = vld [vmem:[%s21637_s1 + $0x1ca0] ss:$16 sps:$4 sm:$0xff]   ;;  %v15464_v53 = vld [vmem:[%s21637_s1 + $0x1ca8] ss:$16 sps:$4 sm:$0xff]  }
 0x37d   :  { %v15469_v38 = vld [vmem:[%s21637_s1 + $0x1cc4] ss:$16 sps:$4 sm:$0xff]   ;;  %v15472_v54 = vld [vmem:[%s21637_s1 + $0x1ccc] ss:$16 sps:$4 sm:$0xff]   ;;  %v15467_v55 = vld [vmem:[%s21637_s1 + $0x1cc0] ss:$16 sps:$4 sm:$0xff]  }
 0x37e   :  { %v15470_v56 = vld [vmem:[%s21637_s1 + $0x1cc8] ss:$16 sps:$4 sm:$0xff]   ;;  %v15475_v47 = vld [vmem:[%s21637_s1 + $0x1ce4] ss:$16 sps:$4 sm:$0xff]   ;;  %v15478_v57 = vld [vmem:[%s21637_s1 + $0x1cec] ss:$16 sps:$4 sm:$0xff]  }
 0x37f   :  { %10387 = vmatpush1.bf16.msra.mxu0 %v15425_v4  ;;  %11412 = vmatpush1.bf16.msra.mxu1 %v15428_v24  ;;  %v15473_v58 = vld [vmem:[%s21637_s1 + $0x1ce0] ss:$16 sps:$4 sm:$0xff]   ;;  %v15476_v48 = vld [vmem:[%s21637_s1 + $0x1ce8] ss:$16 sps:$4 sm:$0xff]   ;;  %v15481_v61 = vld [vmem:[%s21637_s1 + $0x1d04] ss:$16 sps:$4 sm:$0xff]  }
 0x380   :  { %10397 = vmatprep.subr.bf16.mxu0 %v15433_v13  ;;  %11422 = vmatprep.subr.bf16.mxu1 %v15436_v27  ;;  %v15484_v62 = vld [vmem:[%s21637_s1 + $0x1d0c] ss:$16 sps:$4 sm:$0xff]   ;;  %v15479_v44 = vld [vmem:[%s21637_s1 + $0x1d00] ss:$16 sps:$4 sm:$0xff]   ;;  %v15482_v0 = vld [vmem:[%s21637_s1 + $0x1d08] ss:$16 sps:$4 sm:$0xff]  }
 0x381   :  { %v15487_v1 = vld [vmem:[%s21637_s1 + $0x1d24] ss:$16 sps:$4 sm:$0xff]   ;;  %v15490_v2 = vld [vmem:[%s21637_s1 + $0x1d2c] ss:$16 sps:$4 sm:$0xff]   ;;  %v15485_v59 = vld [vmem:[%s21637_s1 + $0x1d20] ss:$16 sps:$4 sm:$0xff]  }
 0x382   :  { %10389 = vmatmul.mubr.bf16.vlgmr.msra.gmra.mrb[0].mxu0 %v1818_v28  ;;  %11414 = vmatmul.mubr.bf16.vlgmr.msra.gmra.mrb[0].mxu1 %v1818_v28  ;;  %v15488_v3 = vld [vmem:[%s21637_s1 + $0x1d28] ss:$16 sps:$4 sm:$0xff]   ;;  %v15493_v5 = vld [vmem:[%s21637_s1 + $0x1d44] ss:$16 sps:$4 sm:$0xff]   ;;  %v15496_v6 = vld [vmem:[%s21637_s1 + $0x1d4c] ss:$16 sps:$4 sm:$0xff]  }
 0x383   :  { %10398 = vmatpush1.bf16.msra.mxu0 %v15431_v29  ;;  %11423 = vmatpush1.bf16.msra.mxu1 %v15434_v14  ;;  %v15491_v60 = vld [vmem:[%s21637_s1 + $0x1d40] ss:$16 sps:$4 sm:$0xff]   ;;  %v15494_v9 = vld [vmem:[%s21637_s1 + $0x1d48] ss:$16 sps:$4 sm:$0xff]   ;;  %v15499_v10 = vld [vmem:[%s21637_s1 + $0x1d64] ss:$16 sps:$4 sm:$0xff]  }
 0x384   :  { %10399 = vmatprep.subr.bf16.mxu0 %v15439_v30  ;;  %11424 = vmatprep.subr.bf16.mxu1 %v15442_v19  ;;  %v15502_v11 = vld [vmem:[%s21637_s1 + $0x1d6c] ss:$16 sps:$4 sm:$0xff]   ;;  %v15497_v63 = vld [vmem:[%s21637_s1 + $0x1d60] ss:$16 sps:$4 sm:$0xff]   ;;  %v15500_v12 = vld [vmem:[%s21637_s1 + $0x1d68] ss:$16 sps:$4 sm:$0xff]  }
 0x385   :  { %10429 = vmatprep.mubr.bf16.mxu0 %v19406_v31  ;;  %11454 = vmatprep.mubr.bf16.mxu1 %v19406_v31  ;;  %v15505_v52 = vld [vmem:[%s21637_s1 + $0x1d84] ss:$16 sps:$4 sm:$0xff]   ;;  %v15508_v15 = vld [vmem:[%s21637_s1 + $0x1d8c] ss:$16 sps:$4 sm:$0xff]   ;;  %v15503_v7 = vld [vmem:[%s21637_s1 + $0x1d80] ss:$16 sps:$4 sm:$0xff]  }
 0x386   :  { %v15506_v16 = vld [vmem:[%s21637_s1 + $0x1d88] ss:$16 sps:$4 sm:$0xff]   ;;  %v15511_v17 = vld [vmem:[%s21637_s1 + $0x1da4] ss:$16 sps:$4 sm:$0xff]   ;;  %v15514_v8 = vld [vmem:[%s21637_s1 + $0x1dac] ss:$16 sps:$4 sm:$0xff]  }
 0x387   :  { %10400 = vmatpush1.bf16.msra.mxu0 %v15437_v25  ;;  %11425 = vmatpush1.bf16.msra.mxu1 %v15440_v32  ;;  %v15509_v20 = vld [vmem:[%s21637_s1 + $0x1da0] ss:$16 sps:$4 sm:$0xff]   ;;  %v15512_v22 = vld [vmem:[%s21637_s1 + $0x1da8] ss:$16 sps:$4 sm:$0xff]   ;;  %v15517_v4 = vld [vmem:[%s21637_s1 + $0x1dc4] ss:$16 sps:$4 sm:$0xff]   ;;  %v19592_v25 = vrot.slane %v19375_v23, %v16672_v49 }
 0x388   :  { %10401 = vmatprep.subr.bf16.mxu0 %v15445_v33  ;;  %11426 = vmatprep.subr.bf16.mxu1 %v15448_v26  ;;  %v15520_v24 = vld [vmem:[%s21637_s1 + $0x1dcc] ss:$16 sps:$4 sm:$0xff]   ;;  %v15515_v13 = vld [vmem:[%s21637_s1 + $0x1dc0] ss:$16 sps:$4 sm:$0xff]   ;;  %v15518_v27 = vld [vmem:[%s21637_s1 + $0x1dc8] ss:$16 sps:$4 sm:$0xff]  }
 0x389   :  { %v15523_v18 = vld [vmem:[%s21637_s1 + $0x1de4] ss:$16 sps:$4 sm:$0xff]   ;;  %v15526_v28 = vld [vmem:[%s21637_s1 + $0x1dec] ss:$16 sps:$4 sm:$0xff]   ;;  %v15521_v29 = vld [vmem:[%s21637_s1 + $0x1de0] ss:$16 sps:$4 sm:$0xff]  }
 0x38a   :  { %v15524_v14 = vld [vmem:[%s21637_s1 + $0x1de8] ss:$16 sps:$4 sm:$0xff]   ;;  %v15530_v30 = vld [vmem:[%s21637_s1 + $0x1e04] ss:$16 sps:$4 sm:$0xff]   ;;  %v15533_v19 = vld [vmem:[%s21637_s1 + $0x1e0c] ss:$16 sps:$4 sm:$0xff]  }
 0x38b   :  { %10402 = vmatpush1.bf16.msra.mxu0 %v15443_v36  ;;  %11427 = vmatpush1.bf16.msra.mxu1 %v15446_v37  ;;  %v15528_v32 = vld [vmem:[%s21637_s1 + $0x1e00] ss:$16 sps:$4 sm:$0xff]   ;;  %v15531_v33 = vld [vmem:[%s21637_s1 + $0x1e08] ss:$16 sps:$4 sm:$0xff]   ;;  %v15536_v26 = vld [vmem:[%s21637_s1 + $0x1e24] ss:$16 sps:$4 sm:$0xff]   ;;  %v1821_v36 = vcombine.high %v19406_v31, %v19406_v31 }
 0x38c   :  { %10403 = vmatprep.subr.bf16.mxu0 %v15451_v21  ;;  %11428 = vmatprep.subr.bf16.mxu1 %v15454_v39  ;;  %v15539_v23 = vld [vmem:[%s21637_s1 + $0x1e2c] ss:$16 sps:$4 sm:$0xff]   ;;  %v15534_v37 = vld [vmem:[%s21637_s1 + $0x1e20] ss:$16 sps:$4 sm:$0xff]   ;;  %v15537_v21 = vld [vmem:[%s21637_s1 + $0x1e28] ss:$16 sps:$4 sm:$0xff]  }
 0x38d   :  { %v15542_v31 = vld [vmem:[%s21637_s1 + $0x1e44] ss:$16 sps:$4 sm:$0xff]   ;;  %v15545_v39 = vld [vmem:[%s21637_s1 + $0x1e4c] ss:$16 sps:$4 sm:$0xff]   ;;  %s12231_s10 = sshll.u32 %s16506_s9, 4  ;;  %s12232_s10 = int_to_ptr.vmem [resolvable:$true] %s12231_s10 }
 0x38e   :  { %s16480_s11 = scalar_lea.vmem %s12232_s10, 32  ;;  %p16485_p1 = scmp.lt.s32.totalorder %s12232_s10, %s12232_s10 }
 0x38f   :  { %10404 = vmatpush1.bf16.msra.mxu0 %v15449_v40  ;;  %11429 = vmatpush1.bf16.msra.mxu1 %v15452_v41  ;;  %v15540_v40 = vld [vmem:[%s21637_s1 + $0x1e40] ss:$16 sps:$4 sm:$0xff]   ;;  %v15543_v41 = vld [vmem:[%s21637_s1 + $0x1e48] ss:$16 sps:$4 sm:$0xff]   ;;  %p16481_p0 = scmp.ne.s32.totalorder %s12232_s10, %s16480_s11  ;;  %p16486_p2 = scmp.lt.s32.totalorder %s16480_s11, %s16480_s11 }
 0x390   :  { %10405 = vmatprep.subr.bf16.mxu0 %v15457_v34  ;;  %11430 = vmatprep.subr.bf16.mxu1 %v15460_v43  ;;  %v15548_v34 = vld [vmem:[%s21637_s1 + $0x1e64] ss:$16 sps:$4 sm:$0xff]   ;;  %v15551_v43 = vld [vmem:[%s21637_s1 + $0x1e6c] ss:$16 sps:$4 sm:$0xff]  }
 0x391   :  { %p16487_p3 = por %p16486_p2, %p16485_p1 }
 0x393   :  { %10406 = vmatpush1.bf16.msra.mxu0 %v15455_v45  ;;  %11431 = vmatpush1.bf16.msra.mxu1 %v15458_v46  ;;  %v15546_v45 = vld [vmem:[%s21637_s1 + $0x1e60] ss:$16 sps:$4 sm:$0xff]   ;;  %v15549_v46 = vld [vmem:[%s21637_s1 + $0x1e68] ss:$16 sps:$4 sm:$0xff]   ;;  %p16488_p4 = pnand %p16487_p3, %p16481_p0 }
 0x394   :  { %10407 = vmatprep.subr.bf16.mxu0 %v15463_v35  ;;  %11432 = vmatprep.subr.bf16.mxu1 %v15466_v50  ;;  %v15554_v35 = vld [vmem:[%s21637_s1 + $0x1e84] ss:$16 sps:$4 sm:$0xff]   ;;  %v15557_v50 = vld [vmem:[%s21637_s1 + $0x1e8c] ss:$16 sps:$4 sm:$0xff]  }
 0x397   :  { %10408 = vmatpush1.bf16.msra.mxu0 %v15461_v51  ;;  %11433 = vmatpush1.bf16.msra.mxu1 %v15464_v53  ;;  %v15552_v51 = vld [vmem:[%s21637_s1 + $0x1e80] ss:$16 sps:$4 sm:$0xff]   ;;  %v15555_v53 = vld [vmem:[%s21637_s1 + $0x1e88] ss:$16 sps:$4 sm:$0xff]  }
 0x398   :  { %10409 = vmatprep.subr.bf16.mxu0 %v15469_v38  ;;  %11434 = vmatprep.subr.bf16.mxu1 %v15472_v54  ;;  %v15560_v38 = vld [vmem:[%s21637_s1 + $0x1ea4] ss:$16 sps:$4 sm:$0xff]   ;;  %v15563_v54 = vld [vmem:[%s21637_s1 + $0x1eac] ss:$16 sps:$4 sm:$0xff]  }
 0x39b   :  { %10410 = vmatpush1.bf16.msra.mxu0 %v15467_v55  ;;  %11435 = vmatpush1.bf16.msra.mxu1 %v15470_v56  ;;  %v15558_v55 = vld [vmem:[%s21637_s1 + $0x1ea0] ss:$16 sps:$4 sm:$0xff]   ;;  %v15561_v56 = vld [vmem:[%s21637_s1 + $0x1ea8] ss:$16 sps:$4 sm:$0xff]  }
 0x39c   :  { %10411 = vmatprep.subr.bf16.mxu0 %v15475_v47  ;;  %11436 = vmatprep.subr.bf16.mxu1 %v15478_v57  ;;  %v15566_v47 = vld [vmem:[%s21637_s1 + $0x1ec4] ss:$16 sps:$4 sm:$0xff]   ;;  %v15569_v57 = vld [vmem:[%s21637_s1 + $0x1ecc] ss:$16 sps:$4 sm:$0xff]  }
 0x39f   :  { %10412 = vmatpush1.bf16.msra.mxu0 %v15473_v58  ;;  %11437 = vmatpush1.bf16.msra.mxu1 %v15476_v48  ;;  %v15564_v58 = vld [vmem:[%s21637_s1 + $0x1ec0] ss:$16 sps:$4 sm:$0xff]   ;;  %v15567_v48 = vld [vmem:[%s21637_s1 + $0x1ec8] ss:$16 sps:$4 sm:$0xff]  }
 0x3a0   :  { %10413 = vmatprep.subr.bf16.mxu0 %v15481_v61  ;;  %11438 = vmatprep.subr.bf16.mxu1 %v15484_v62  ;;  %v15572_v61 = vld [vmem:[%s21637_s1 + $0x1ee4] ss:$16 sps:$4 sm:$0xff]   ;;  %v15575_v62 = vld [vmem:[%s21637_s1 + $0x1eec] ss:$16 sps:$4 sm:$0xff]  }
 0x3a3   :  { %10414 = vmatpush1.bf16.msra.mxu0 %v15479_v44  ;;  %11439 = vmatpush1.bf16.msra.mxu1 %v15482_v0  ;;  %v15570_v44 = vld [vmem:[%s21637_s1 + $0x1ee0] ss:$16 sps:$4 sm:$0xff]   ;;  %v15573_v0 = vld [vmem:[%s21637_s1 + $0x1ee8] ss:$16 sps:$4 sm:$0xff]  }
 0x3a4   :  { %10415 = vmatprep.subr.bf16.mxu0 %v15487_v1  ;;  %11440 = vmatprep.subr.bf16.mxu1 %v15490_v2  ;;  %v15578_v1 = vld [vmem:[%s21637_s1 + $0x1f04] ss:$16 sps:$4 sm:$0xff]   ;;  %v15581_v2 = vld [vmem:[%s21637_s1 + $0x1f0c] ss:$16 sps:$4 sm:$0xff]  }
 0x3a7   :  { %10416 = vmatpush1.bf16.msra.mxu0 %v15485_v59  ;;  %11441 = vmatpush1.bf16.msra.mxu1 %v15488_v3  ;;  %v15576_v59 = vld [vmem:[%s21637_s1 + $0x1f00] ss:$16 sps:$4 sm:$0xff]   ;;  %v15579_v3 = vld [vmem:[%s21637_s1 + $0x1f08] ss:$16 sps:$4 sm:$0xff]  }
 0x3a8   :  { %10417 = vmatprep.subr.bf16.mxu0 %v15493_v5  ;;  %11442 = vmatprep.subr.bf16.mxu1 %v15496_v6  ;;  %v15584_v5 = vld [vmem:[%s21637_s1 + $0x1f24] ss:$16 sps:$4 sm:$0xff]   ;;  %v15587_v6 = vld [vmem:[%s21637_s1 + $0x1f2c] ss:$16 sps:$4 sm:$0xff]  }
 0x3ab   :  { %10418 = vmatpush1.bf16.msra.mxu0 %v15491_v60  ;;  %11443 = vmatpush1.bf16.msra.mxu1 %v15494_v9  ;;  %v15582_v60 = vld [vmem:[%s21637_s1 + $0x1f20] ss:$16 sps:$4 sm:$0xff]   ;;  %v15585_v9 = vld [vmem:[%s21637_s1 + $0x1f28] ss:$16 sps:$4 sm:$0xff]  }
 0x3ac   :  { %10419 = vmatprep.subr.bf16.mxu0 %v15499_v10  ;;  %11444 = vmatprep.subr.bf16.mxu1 %v15502_v11  ;;  %v15590_v10 = vld [vmem:[%s21637_s1 + $0x1f44] ss:$16 sps:$4 sm:$0xff]   ;;  %v15593_v11 = vld [vmem:[%s21637_s1 + $0x1f4c] ss:$16 sps:$4 sm:$0xff]  }
 0x3af   :  { %10420 = vmatpush1.bf16.msra.mxu0 %v15497_v63  ;;  %11445 = vmatpush1.bf16.msra.mxu1 %v15500_v12  ;;  %v15588_v63 = vld [vmem:[%s21637_s1 + $0x1f40] ss:$16 sps:$4 sm:$0xff]   ;;  %v15591_v12 = vld [vmem:[%s21637_s1 + $0x1f48] ss:$16 sps:$4 sm:$0xff]  }
 0x3b0   :  { %10421 = vmatprep.subr.bf16.mxu0 %v15505_v52  ;;  %11446 = vmatprep.subr.bf16.mxu1 %v15508_v15  ;;  %v15596_v52 = vld [vmem:[%s21637_s1 + $0x1f64] ss:$16 sps:$4 sm:$0xff]   ;;  %v15599_v15 = vld [vmem:[%s21637_s1 + $0x1f6c] ss:$16 sps:$4 sm:$0xff]  }
 0x3b3   :  { %10422 = vmatpush1.bf16.msra.mxu0 %v15503_v7  ;;  %11447 = vmatpush1.bf16.msra.mxu1 %v15506_v16  ;;  %v15594_v7 = vld [vmem:[%s21637_s1 + $0x1f60] ss:$16 sps:$4 sm:$0xff]   ;;  %v15597_v16 = vld [vmem:[%s21637_s1 + $0x1f68] ss:$16 sps:$4 sm:$0xff]  }
 0x3b4   :  { %10423 = vmatprep.subr.bf16.mxu0 %v15511_v17  ;;  %11448 = vmatprep.subr.bf16.mxu1 %v15514_v8  ;;  %v15602_v17 = vld [vmem:[%s21637_s1 + $0x1f84] ss:$16 sps:$4 sm:$0xff]   ;;  %v15605_v8 = vld [vmem:[%s21637_s1 + $0x1f8c] ss:$16 sps:$4 sm:$0xff]  }
 0x3b7   :  { %10424 = vmatpush1.bf16.msra.mxu0 %v15509_v20  ;;  %11449 = vmatpush1.bf16.msra.mxu1 %v15512_v22  ;;  %v15600_v20 = vld [vmem:[%s21637_s1 + $0x1f80] ss:$16 sps:$4 sm:$0xff]   ;;  %v15603_v22 = vld [vmem:[%s21637_s1 + $0x1f88] ss:$16 sps:$4 sm:$0xff]  }
 0x3b8   :  { %10425 = vmatprep.subr.bf16.mxu0 %v15517_v4  ;;  %11450 = vmatprep.subr.bf16.mxu1 %v15520_v24  ;;  %v15608_v4 = vld [vmem:[%s21637_s1 + $0x1fa4] ss:$16 sps:$4 sm:$0xff]   ;;  %v15611_v24 = vld [vmem:[%s21637_s1 + $0x1fac] ss:$16 sps:$4 sm:$0xff]  }
 0x3bb   :  { %10426 = vmatpush1.bf16.msra.mxu0 %v15515_v13  ;;  %11451 = vmatpush1.bf16.msra.mxu1 %v15518_v27  ;;  %v15606_v13 = vld [vmem:[%s21637_s1 + $0x1fa0] ss:$16 sps:$4 sm:$0xff]   ;;  %v15609_v27 = vld [vmem:[%s21637_s1 + $0x1fa8] ss:$16 sps:$4 sm:$0xff]  }
 0x3bc   :  { %10427 = vmatprep.subr.bf16.mxu0 %v15523_v18  ;;  %11452 = vmatprep.subr.bf16.mxu1 %v15526_v28  ;;  %v15614_v18 = vld [vmem:[%s21637_s1 + $0x1fc4] ss:$16 sps:$4 sm:$0xff]   ;;  %v15617_v28 = vld [vmem:[%s21637_s1 + $0x1fcc] ss:$16 sps:$4 sm:$0xff]  }
 0x3bf   :  { %10428 = vmatpush1.bf16.msra.mxu0 %v15521_v29  ;;  %11453 = vmatpush1.bf16.msra.mxu1 %v15524_v14  ;;  %v19769_v29 = vld [vmem:[%s21636_s0 + $0x20] sm:$0xff] }
 0x3c0   :  { %10438 = vmatprep.subr.bf16.mxu0 %v15530_v30  ;;  %11463 = vmatprep.subr.bf16.mxu1 %v15533_v19  ;;  %v15612_v14 = vld [vmem:[%s21637_s1 + $0x1fc0] ss:$16 sps:$4 sm:$0xff]   ;;  %v15615_v30 = vld [vmem:[%s21637_s1 + $0x1fc8] ss:$16 sps:$4 sm:$0xff]   ;;  %v15620_v19 = vld [vmem:[%s21637_s1 + $0x1fe4] ss:$16 sps:$4 sm:$0xff]  }
 0x3c2   :  { %10430 = vmatmul.mubr.bf16.vlgmr.msra.gmra.mrb[0].mxu0 %v19592_v25  ;;  %11455 = vmatmul.mubr.bf16.vlgmr.msra.gmra.mrb[0].mxu1 %v19592_v25 }
 0x3c3   :  { %10439 = vmatpush1.bf16.msra.mxu0 %v15528_v32  ;;  %11464 = vmatpush1.bf16.msra.mxu1 %v15531_v33  ;;  %v15623_v32 = vld [vmem:[%s21637_s1 + $0x1fec] ss:$16 sps:$4 sm:$0xff]   ;;  %v19785_v33 = vrot.slane %v19769_v29, %v16672_v49 }
 0x3c4   :  { %10440 = vmatprep.subr.bf16.mxu0 %v15536_v26  ;;  %11465 = vmatprep.subr.bf16.mxu1 %v15539_v23  ;;  %v15618_v26 = vld [vmem:[%s21637_s1 + $0x1fe0] ss:$16 sps:$4 sm:$0xff]   ;;  %v15621_v23 = vld [vmem:[%s21637_s1 + $0x1fe8] ss:$16 sps:$4 sm:$0xff]  }
 0x3c5   :  { %10470 = vmatprep.mubr.bf16.mxu0 %v1821_v36  ;;  %11495 = vmatprep.mubr.bf16.mxu1 %v1821_v36  ;;  %v15626_v36 = vld [vmem:[%s21637_s1 + $0x2004] ss:$16 sps:$4 sm:$0xff]  }
 0x3c7   :  { %10441 = vmatpush1.bf16.msra.mxu0 %v15534_v37  ;;  %11466 = vmatpush1.bf16.msra.mxu1 %v15537_v21  ;;  %v15629_v37 = vld [vmem:[%s21637_s1 + $0x200c] ss:$16 sps:$4 sm:$0xff]   ;;  %v1837_v21 = vcombine.high %v19785_v33, %v19785_v33 }
 0x3c8   :  { %10442 = vmatprep.subr.bf16.mxu0 %v15542_v31  ;;  %11467 = vmatprep.subr.bf16.mxu1 %v15545_v39  ;;  %v1819_v31 = vcombine.high %v19592_v25, %v19592_v25  ;;  %v15624_v39 = vld [vmem:[%s21637_s1 + $0x2000] ss:$16 sps:$4 sm:$0xff]   ;;  %v15635_v25 = vld [vmem:[%s21637_s1 + $0x202c] ss:$16 sps:$4 sm:$0xff]  }
 0x3cb   :  { %10443 = vmatpush1.bf16.msra.mxu0 %v15540_v40  ;;  %11468 = vmatpush1.bf16.msra.mxu1 %v15543_v41  ;;  %v15627_v40 = vld [vmem:[%s21637_s1 + $0x2008] ss:$16 sps:$4 sm:$0xff]   ;;  %v15632_v41 = vld [vmem:[%s21637_s1 + $0x2024] ss:$16 sps:$4 sm:$0xff]  }
 0x3cc   :  { %10444 = vmatprep.subr.bf16.mxu0 %v15548_v34  ;;  %11469 = vmatprep.subr.bf16.mxu1 %v15551_v43  ;;  %v19816_v34 = vrot.slane %v1837_v21, %v16672_v49  ;;  %v15630_v43 = vld [vmem:[%s21637_s1 + $0x2020] ss:$16 sps:$4 sm:$0xff]   ;;  %v15711_v21 = vld [vmem:[%s21637_s1 + $0x21c8] ss:$16 sps:$4 sm:$0xff]  }
 0x3cf   :  { %10445 = vmatpush1.bf16.msra.mxu0 %v15546_v45  ;;  %11470 = vmatpush1.bf16.msra.mxu1 %v15549_v46  ;;  %v15633_v45 = vld [vmem:[%s21637_s1 + $0x2028] ss:$16 sps:$4 sm:$0xff]   ;;  %v15638_v46 = vld [vmem:[%s21637_s1 + $0x2044] ss:$16 sps:$4 sm:$0xff]  }
 0x3d0   :  { %10446 = vmatprep.subr.bf16.mxu0 %v15554_v35  ;;  %11471 = vmatprep.subr.bf16.mxu1 %v15557_v50  ;;  %v15641_v35 = vld [vmem:[%s21637_s1 + $0x204c] ss:$16 sps:$4 sm:$0xff]   ;;  %v15636_v50 = vld [vmem:[%s21637_s1 + $0x2040] ss:$16 sps:$4 sm:$0xff]  }
 0x3d3   :  { %10447 = vmatpush1.bf16.msra.mxu0 %v15552_v51  ;;  %11472 = vmatpush1.bf16.msra.mxu1 %v15555_v53  ;;  %v15639_v51 = vld [vmem:[%s21637_s1 + $0x2048] ss:$16 sps:$4 sm:$0xff]   ;;  %v15644_v53 = vld [vmem:[%s21637_s1 + $0x2064] ss:$16 sps:$4 sm:$0xff]  }
 0x3d4   :  { %10448 = vmatprep.subr.bf16.mxu0 %v15560_v38  ;;  %11473 = vmatprep.subr.bf16.mxu1 %v15563_v54  ;;  %v15647_v38 = vld [vmem:[%s21637_s1 + $0x206c] ss:$16 sps:$4 sm:$0xff]   ;;  %v15642_v54 = vld [vmem:[%s21637_s1 + $0x2060] ss:$16 sps:$4 sm:$0xff]  }
 0x3d7   :  { %10449 = vmatpush1.bf16.msra.mxu0 %v15558_v55  ;;  %11474 = vmatpush1.bf16.msra.mxu1 %v15561_v56  ;;  %v15645_v55 = vld [vmem:[%s21637_s1 + $0x2068] ss:$16 sps:$4 sm:$0xff]   ;;  %v15650_v56 = vld [vmem:[%s21637_s1 + $0x2084] ss:$16 sps:$4 sm:$0xff]  }
 0x3d8   :  { %10450 = vmatprep.subr.bf16.mxu0 %v15566_v47  ;;  %11475 = vmatprep.subr.bf16.mxu1 %v15569_v57  ;;  %v15653_v47 = vld [vmem:[%s21637_s1 + $0x208c] ss:$16 sps:$4 sm:$0xff]   ;;  %v15648_v57 = vld [vmem:[%s21637_s1 + $0x2080] ss:$16 sps:$4 sm:$0xff]  }
 0x3db   :  { %10451 = vmatpush1.bf16.msra.mxu0 %v15564_v58  ;;  %11476 = vmatpush1.bf16.msra.mxu1 %v15567_v48  ;;  %v15651_v58 = vld [vmem:[%s21637_s1 + $0x2088] ss:$16 sps:$4 sm:$0xff]   ;;  %v15656_v48 = vld [vmem:[%s21637_s1 + $0x20a4] ss:$16 sps:$4 sm:$0xff]  }
 0x3dc   :  { %10452 = vmatprep.subr.bf16.mxu0 %v15572_v61  ;;  %11477 = vmatprep.subr.bf16.mxu1 %v15575_v62  ;;  %v15659_v61 = vld [vmem:[%s21637_s1 + $0x20ac] ss:$16 sps:$4 sm:$0xff]   ;;  %v15654_v62 = vld [vmem:[%s21637_s1 + $0x20a0] ss:$16 sps:$4 sm:$0xff]  }
 0x3df   :  { %10453 = vmatpush1.bf16.msra.mxu0 %v15570_v44  ;;  %11478 = vmatpush1.bf16.msra.mxu1 %v15573_v0  ;;  %v15657_v44 = vld [vmem:[%s21637_s1 + $0x20a8] ss:$16 sps:$4 sm:$0xff]   ;;  %v15662_v0 = vld [vmem:[%s21637_s1 + $0x20c4] ss:$16 sps:$4 sm:$0xff]  }
 0x3e0   :  { %10454 = vmatprep.subr.bf16.mxu0 %v15578_v1  ;;  %11479 = vmatprep.subr.bf16.mxu1 %v15581_v2  ;;  %v15665_v1 = vld [vmem:[%s21637_s1 + $0x20cc] ss:$16 sps:$4 sm:$0xff]   ;;  %v15660_v2 = vld [vmem:[%s21637_s1 + $0x20c0] ss:$16 sps:$4 sm:$0xff]  }
 0x3e3   :  { %10455 = vmatpush1.bf16.msra.mxu0 %v15576_v59  ;;  %11480 = vmatpush1.bf16.msra.mxu1 %v15579_v3  ;;  %v15663_v59 = vld [vmem:[%s21637_s1 + $0x20c8] ss:$16 sps:$4 sm:$0xff]   ;;  %v15668_v3 = vld [vmem:[%s21637_s1 + $0x20e4] ss:$16 sps:$4 sm:$0xff]  }
 0x3e4   :  { %10456 = vmatprep.subr.bf16.mxu0 %v15584_v5  ;;  %11481 = vmatprep.subr.bf16.mxu1 %v15587_v6  ;;  %v15671_v5 = vld [vmem:[%s21637_s1 + $0x20ec] ss:$16 sps:$4 sm:$0xff]   ;;  %v15666_v6 = vld [vmem:[%s21637_s1 + $0x20e0] ss:$16 sps:$4 sm:$0xff]  }
 0x3e7   :  { %10457 = vmatpush1.bf16.msra.mxu0 %v15582_v60  ;;  %11482 = vmatpush1.bf16.msra.mxu1 %v15585_v9  ;;  %v15669_v60 = vld [vmem:[%s21637_s1 + $0x20e8] ss:$16 sps:$4 sm:$0xff]   ;;  %v15674_v9 = vld [vmem:[%s21637_s1 + $0x2104] ss:$16 sps:$4 sm:$0xff]  }
 0x3e8   :  { %10458 = vmatprep.subr.bf16.mxu0 %v15590_v10  ;;  %11483 = vmatprep.subr.bf16.mxu1 %v15593_v11  ;;  %v15677_v10 = vld [vmem:[%s21637_s1 + $0x210c] ss:$16 sps:$4 sm:$0xff]   ;;  %v15672_v11 = vld [vmem:[%s21637_s1 + $0x2100] ss:$16 sps:$4 sm:$0xff]  }
 0x3eb   :  { %10459 = vmatpush1.bf16.msra.mxu0 %v15588_v63  ;;  %11484 = vmatpush1.bf16.msra.mxu1 %v15591_v12  ;;  %v15675_v63 = vld [vmem:[%s21637_s1 + $0x2108] ss:$16 sps:$4 sm:$0xff]   ;;  %v15680_v12 = vld [vmem:[%s21637_s1 + $0x2124] ss:$16 sps:$4 sm:$0xff]  }
 0x3ec   :  { %10460 = vmatprep.subr.bf16.mxu0 %v15596_v52  ;;  %11485 = vmatprep.subr.bf16.mxu1 %v15599_v15  ;;  %v15683_v52 = vld [vmem:[%s21637_s1 + $0x212c] ss:$16 sps:$4 sm:$0xff]   ;;  %v15678_v15 = vld [vmem:[%s21637_s1 + $0x2120] ss:$16 sps:$4 sm:$0xff]  }
 0x3ef   :  { %10461 = vmatpush1.bf16.msra.mxu0 %v15594_v7  ;;  %11486 = vmatpush1.bf16.msra.mxu1 %v15597_v16  ;;  %v15681_v7 = vld [vmem:[%s21637_s1 + $0x2128] ss:$16 sps:$4 sm:$0xff]   ;;  %v15686_v16 = vld [vmem:[%s21637_s1 + $0x2144] ss:$16 sps:$4 sm:$0xff]  }
 0x3f0   :  { %10462 = vmatprep.subr.bf16.mxu0 %v15602_v17  ;;  %11487 = vmatprep.subr.bf16.mxu1 %v15605_v8  ;;  %v15689_v17 = vld [vmem:[%s21637_s1 + $0x214c] ss:$16 sps:$4 sm:$0xff]   ;;  %v15684_v8 = vld [vmem:[%s21637_s1 + $0x2140] ss:$16 sps:$4 sm:$0xff]  }
 0x3f3   :  { %10463 = vmatpush1.bf16.msra.mxu0 %v15600_v20  ;;  %11488 = vmatpush1.bf16.msra.mxu1 %v15603_v22  ;;  %v15687_v20 = vld [vmem:[%s21637_s1 + $0x2148] ss:$16 sps:$4 sm:$0xff]   ;;  %v15692_v22 = vld [vmem:[%s21637_s1 + $0x2164] ss:$16 sps:$4 sm:$0xff]  }
 0x3f4   :  { %10464 = vmatprep.subr.bf16.mxu0 %v15608_v4  ;;  %11489 = vmatprep.subr.bf16.mxu1 %v15611_v24  ;;  %v15695_v4 = vld [vmem:[%s21637_s1 + $0x216c] ss:$16 sps:$4 sm:$0xff]   ;;  %v15690_v24 = vld [vmem:[%s21637_s1 + $0x2160] ss:$16 sps:$4 sm:$0xff]  }
 0x3f7   :  { %10465 = vmatpush1.bf16.msra.mxu0 %v15606_v13  ;;  %11490 = vmatpush1.bf16.msra.mxu1 %v15609_v27  ;;  %v15693_v13 = vld [vmem:[%s21637_s1 + $0x2168] ss:$16 sps:$4 sm:$0xff]   ;;  %v15698_v27 = vld [vmem:[%s21637_s1 + $0x2184] ss:$16 sps:$4 sm:$0xff]  }
 0x3f8   :  { %10466 = vmatprep.subr.bf16.mxu0 %v15614_v18  ;;  %11491 = vmatprep.subr.bf16.mxu1 %v15617_v28  ;;  %v15701_v18 = vld [vmem:[%s21637_s1 + $0x218c] ss:$16 sps:$4 sm:$0xff]   ;;  %v15696_v28 = vld [vmem:[%s21637_s1 + $0x2180] ss:$16 sps:$4 sm:$0xff]  }
 0x3fb   :  { %10467 = vmatpush1.bf16.msra.mxu0 %v15612_v14  ;;  %11492 = vmatpush1.bf16.msra.mxu1 %v15615_v30  ;;  %v15699_v14 = vld [vmem:[%s21637_s1 + $0x2188] ss:$16 sps:$4 sm:$0xff]   ;;  %v15704_v30 = vld [vmem:[%s21637_s1 + $0x21a4] ss:$16 sps:$4 sm:$0xff]  }
 0x3fc   :  { %10468 = vmatprep.subr.bf16.mxu0 %v15620_v19  ;;  %11493 = vmatprep.subr.bf16.mxu1 %v15623_v32  ;;  %v15707_v19 = vld [vmem:[%s21637_s1 + $0x21ac] ss:$16 sps:$4 sm:$0xff]   ;;  %v15702_v32 = vld [vmem:[%s21637_s1 + $0x21a0] ss:$16 sps:$4 sm:$0xff]  }
 0x3ff   :  { %10469 = vmatpush1.bf16.msra.mxu0 %v15618_v26  ;;  %11494 = vmatpush1.bf16.msra.mxu1 %v15621_v23  ;;  %v15705_v26 = vld [vmem:[%s21637_s1 + $0x21a8] ss:$16 sps:$4 sm:$0xff]   ;;  %v15710_v23 = vld [vmem:[%s21637_s1 + $0x21c4] ss:$16 sps:$4 sm:$0xff]  }
 0x400   :  { %10479 = vmatprep.subr.bf16.mxu0 %v15626_v36  ;;  %11504 = vmatprep.subr.bf16.mxu1 %v15629_v37  ;;  %v15713_v36 = vld [vmem:[%s21637_s1 + $0x21cc] ss:$16 sps:$4 sm:$0xff]   ;;  %v15708_v37 = vld [vmem:[%s21637_s1 + $0x21c0] ss:$16 sps:$4 sm:$0xff]  }
 0x402   :  { %10471 = vmatmul.mubr.bf16.vlgmr.msra.gmra.mrb[0].mxu0 %v1819_v31  ;;  %11496 = vmatmul.mubr.bf16.vlgmr.msra.gmra.mrb[0].mxu1 %v1819_v31  ;;  %v15716_v31 = vld [vmem:[%s21637_s1 + $0x21e4] ss:$16 sps:$4 sm:$0xff]  }
 0x403   :  { %10480 = vmatpush1.bf16.msra.mxu0 %v15624_v39  ;;  %11505 = vmatpush1.bf16.msra.mxu1 %v15627_v40  ;;  %v15719_v39 = vld [vmem:[%s21637_s1 + $0x21ec] ss:$16 sps:$4 sm:$0xff]   ;;  %v15714_v40 = vld [vmem:[%s21637_s1 + $0x21e0] ss:$16 sps:$4 sm:$0xff]  }
 0x404   :  { %10481 = vmatprep.subr.bf16.mxu0 %v15632_v41  ;;  %11506 = vmatprep.subr.bf16.mxu1 %v15635_v25  ;;  %v15717_v41 = vld [vmem:[%s21637_s1 + $0x21e8] ss:$16 sps:$4 sm:$0xff]   ;;  %v15722_v25 = vld [vmem:[%s21637_s1 + $0x2204] ss:$16 sps:$4 sm:$0xff]  }
 0x405   :  { %10511 = vmatprep.mubr.bf16.mxu0 %v19816_v34  ;;  %11536 = vmatprep.mubr.bf16.mxu1 %v19816_v34 }
 0x407   :  { %10482 = vmatpush1.bf16.msra.mxu0 %v15630_v43  ;;  %11507 = vmatpush1.bf16.msra.mxu1 %v15633_v45  ;;  %v15725_v43 = vld [vmem:[%s21637_s1 + $0x220c] ss:$16 sps:$4 sm:$0xff]   ;;  %v20002_v45 = vrot.slane %v19785_v33, %v16672_v49 }
 0x408   :  { %10483 = vmatprep.subr.bf16.mxu0 %v15638_v46  ;;  %11508 = vmatprep.subr.bf16.mxu1 %v15641_v35  ;;  %v15720_v46 = vld [vmem:[%s21637_s1 + $0x2200] ss:$16 sps:$4 sm:$0xff]   ;;  %v15723_v35 = vld [vmem:[%s21637_s1 + $0x2208] ss:$16 sps:$4 sm:$0xff]   ;;  %v15731_v33 = vld [vmem:[%s21637_s1 + $0x222c] ss:$16 sps:$4 sm:$0xff]  }
 0x40b   :  { %10484 = vmatpush1.bf16.msra.mxu0 %v15636_v50  ;;  %11509 = vmatpush1.bf16.msra.mxu1 %v15639_v51  ;;  %v15728_v50 = vld [vmem:[%s21637_s1 + $0x2224] ss:$16 sps:$4 sm:$0xff]   ;;  %v1869_v51 = vcombine.high %v19816_v34, %v19816_v34 }
 0x40c   :  { %10485 = vmatprep.subr.bf16.mxu0 %v15644_v53  ;;  %11510 = vmatprep.subr.bf16.mxu1 %v15647_v38  ;;  %v15726_v53 = vld [vmem:[%s21637_s1 + $0x2220] ss:$16 sps:$4 sm:$0xff]   ;;  %v15729_v38 = vld [vmem:[%s21637_s1 + $0x2228] ss:$16 sps:$4 sm:$0xff]   ;;  %v15734_v34 = vld [vmem:[%s21637_s1 + $0x2244] ss:$16 sps:$4 sm:$0xff]  }
 0x40f   :  { %10486 = vmatpush1.bf16.msra.mxu0 %v15642_v54  ;;  %11511 = vmatpush1.bf16.msra.mxu1 %v15645_v55  ;;  %v15737_v54 = vld [vmem:[%s21637_s1 + $0x224c] ss:$16 sps:$4 sm:$0xff]   ;;  %v15732_v55 = vld [vmem:[%s21637_s1 + $0x2240] ss:$16 sps:$4 sm:$0xff]  }
 0x410   :  { %10487 = vmatprep.subr.bf16.mxu0 %v15650_v56  ;;  %11512 = vmatprep.subr.bf16.mxu1 %v15653_v47  ;;  %v15735_v56 = vld [vmem:[%s21637_s1 + $0x2248] ss:$16 sps:$4 sm:$0xff]   ;;  %v15740_v47 = vld [vmem:[%s21637_s1 + $0x2264] ss:$16 sps:$4 sm:$0xff]  }
 0x413   :  { %10488 = vmatpush1.bf16.msra.mxu0 %v15648_v57  ;;  %11513 = vmatpush1.bf16.msra.mxu1 %v15651_v58  ;;  %v15743_v57 = vld [vmem:[%s21637_s1 + $0x226c] ss:$16 sps:$4 sm:$0xff]   ;;  %v15738_v58 = vld [vmem:[%s21637_s1 + $0x2260] ss:$16 sps:$4 sm:$0xff]  }
 0x414   :  { %10489 = vmatprep.subr.bf16.mxu0 %v15656_v48  ;;  %11514 = vmatprep.subr.bf16.mxu1 %v15659_v61  ;;  %v15741_v48 = vld [vmem:[%s21637_s1 + $0x2268] ss:$16 sps:$4 sm:$0xff]   ;;  %v15746_v61 = vld [vmem:[%s21637_s1 + $0x2284] ss:$16 sps:$4 sm:$0xff]  }
 0x417   :  { %10490 = vmatpush1.bf16.msra.mxu0 %v15654_v62  ;;  %11515 = vmatpush1.bf16.msra.mxu1 %v15657_v44  ;;  %v15749_v62 = vld [vmem:[%s21637_s1 + $0x228c] ss:$16 sps:$4 sm:$0xff]   ;;  %v15744_v44 = vld [vmem:[%s21637_s1 + $0x2280] ss:$16 sps:$4 sm:$0xff]  }
 0x418   :  { %10491 = vmatprep.subr.bf16.mxu0 %v15662_v0  ;;  %11516 = vmatprep.subr.bf16.mxu1 %v15665_v1  ;;  %v15747_v0 = vld [vmem:[%s21637_s1 + $0x2288] ss:$16 sps:$4 sm:$0xff]   ;;  %v15752_v1 = vld [vmem:[%s21637_s1 + $0x22a4] ss:$16 sps:$4 sm:$0xff]  }
 0x41b   :  { %10492 = vmatpush1.bf16.msra.mxu0 %v15660_v2  ;;  %11517 = vmatpush1.bf16.msra.mxu1 %v15663_v59  ;;  %v15755_v2 = vld [vmem:[%s21637_s1 + $0x22ac] ss:$16 sps:$4 sm:$0xff]   ;;  %v15750_v59 = vld [vmem:[%s21637_s1 + $0x22a0] ss:$16 sps:$4 sm:$0xff]  }
 0x41c   :  { %10493 = vmatprep.subr.bf16.mxu0 %v15668_v3  ;;  %11518 = vmatprep.subr.bf16.mxu1 %v15671_v5  ;;  %v15753_v3 = vld [vmem:[%s21637_s1 + $0x22a8] ss:$16 sps:$4 sm:$0xff]   ;;  %v15758_v5 = vld [vmem:[%s21637_s1 + $0x22c4] ss:$16 sps:$4 sm:$0xff]  }
 0x41f   :  { %10494 = vmatpush1.bf16.msra.mxu0 %v15666_v6  ;;  %11519 = vmatpush1.bf16.msra.mxu1 %v15669_v60  ;;  %v15761_v6 = vld [vmem:[%s21637_s1 + $0x22cc] ss:$16 sps:$4 sm:$0xff]   ;;  %v15756_v60 = vld [vmem:[%s21637_s1 + $0x22c0] ss:$16 sps:$4 sm:$0xff]  }
 0x420   :  { %10495 = vmatprep.subr.bf16.mxu0 %v15674_v9  ;;  %11520 = vmatprep.subr.bf16.mxu1 %v15677_v10  ;;  %v15759_v9 = vld [vmem:[%s21637_s1 + $0x22c8] ss:$16 sps:$4 sm:$0xff]   ;;  %v15764_v10 = vld [vmem:[%s21637_s1 + $0x22e4] ss:$16 sps:$4 sm:$0xff]  }
 0x423   :  { %10496 = vmatpush1.bf16.msra.mxu0 %v15672_v11  ;;  %11521 = vmatpush1.bf16.msra.mxu1 %v15675_v63  ;;  %v15767_v11 = vld [vmem:[%s21637_s1 + $0x22ec] ss:$16 sps:$4 sm:$0xff]   ;;  %v15762_v63 = vld [vmem:[%s21637_s1 + $0x22e0] ss:$16 sps:$4 sm:$0xff]  }
 0x424   :  { %10497 = vmatprep.subr.bf16.mxu0 %v15680_v12  ;;  %11522 = vmatprep.subr.bf16.mxu1 %v15683_v52  ;;  %v15765_v12 = vld [vmem:[%s21637_s1 + $0x22e8] ss:$16 sps:$4 sm:$0xff]   ;;  %v15770_v52 = vld [vmem:[%s21637_s1 + $0x2304] ss:$16 sps:$4 sm:$0xff]  }
 0x427   :  { %10498 = vmatpush1.bf16.msra.mxu0 %v15678_v15  ;;  %11523 = vmatpush1.bf16.msra.mxu1 %v15681_v7  ;;  %v15773_v15 = vld [vmem:[%s21637_s1 + $0x230c] ss:$16 sps:$4 sm:$0xff]   ;;  %v15768_v7 = vld [vmem:[%s21637_s1 + $0x2300] ss:$16 sps:$4 sm:$0xff]  }
 0x428   :  { %10499 = vmatprep.subr.bf16.mxu0 %v15686_v16  ;;  %11524 = vmatprep.subr.bf16.mxu1 %v15689_v17  ;;  %v15771_v16 = vld [vmem:[%s21637_s1 + $0x2308] ss:$16 sps:$4 sm:$0xff]   ;;  %v15776_v17 = vld [vmem:[%s21637_s1 + $0x2324] ss:$16 sps:$4 sm:$0xff]  }
 0x42b   :  { %10500 = vmatpush1.bf16.msra.mxu0 %v15684_v8  ;;  %11525 = vmatpush1.bf16.msra.mxu1 %v15687_v20  ;;  %v15779_v8 = vld [vmem:[%s21637_s1 + $0x232c] ss:$16 sps:$4 sm:$0xff]   ;;  %v15774_v20 = vld [vmem:[%s21637_s1 + $0x2320] ss:$16 sps:$4 sm:$0xff]  }
 0x42c   :  { %10501 = vmatprep.subr.bf16.mxu0 %v15692_v22  ;;  %11526 = vmatprep.subr.bf16.mxu1 %v15695_v4  ;;  %v15777_v22 = vld [vmem:[%s21637_s1 + $0x2328] ss:$16 sps:$4 sm:$0xff]   ;;  %v15782_v4 = vld [vmem:[%s21637_s1 + $0x2344] ss:$16 sps:$4 sm:$0xff]  }
 0x42f   :  { %10502 = vmatpush1.bf16.msra.mxu0 %v15690_v24  ;;  %11527 = vmatpush1.bf16.msra.mxu1 %v15693_v13  ;;  %v15785_v24 = vld [vmem:[%s21637_s1 + $0x234c] ss:$16 sps:$4 sm:$0xff]   ;;  %v15780_v13 = vld [vmem:[%s21637_s1 + $0x2340] ss:$16 sps:$4 sm:$0xff]  }
 0x430   :  { %10503 = vmatprep.subr.bf16.mxu0 %v15698_v27  ;;  %11528 = vmatprep.subr.bf16.mxu1 %v15701_v18  ;;  %v15783_v27 = vld [vmem:[%s21637_s1 + $0x2348] ss:$16 sps:$4 sm:$0xff]   ;;  %v15788_v18 = vld [vmem:[%s21637_s1 + $0x2364] ss:$16 sps:$4 sm:$0xff]  }
 0x433   :  { %10504 = vmatpush1.bf16.msra.mxu0 %v15696_v28  ;;  %11529 = vmatpush1.bf16.msra.mxu1 %v15699_v14  ;;  %v15791_v28 = vld [vmem:[%s21637_s1 + $0x236c] ss:$16 sps:$4 sm:$0xff]   ;;  %v15786_v14 = vld [vmem:[%s21637_s1 + $0x2360] ss:$16 sps:$4 sm:$0xff]  }
 0x434   :  { %10505 = vmatprep.subr.bf16.mxu0 %v15704_v30  ;;  %11530 = vmatprep.subr.bf16.mxu1 %v15707_v19  ;;  %v15789_v30 = vld [vmem:[%s21637_s1 + $0x2368] ss:$16 sps:$4 sm:$0xff]   ;;  %v15794_v19 = vld [vmem:[%s21637_s1 + $0x2384] ss:$16 sps:$4 sm:$0xff]  }
 0x437   :  { %10506 = vmatpush1.bf16.msra.mxu0 %v15702_v32  ;;  %11531 = vmatpush1.bf16.msra.mxu1 %v15705_v26  ;;  %v15797_v32 = vld [vmem:[%s21637_s1 + $0x238c] ss:$16 sps:$4 sm:$0xff]   ;;  %v15792_v26 = vld [vmem:[%s21637_s1 + $0x2380] ss:$16 sps:$4 sm:$0xff]  }
 0x438   :  { %10507 = vmatprep.subr.bf16.mxu0 %v15710_v23  ;;  %11532 = vmatprep.subr.bf16.mxu1 %v15713_v36  ;;  %v15795_v23 = vld [vmem:[%s21637_s1 + $0x2388] ss:$16 sps:$4 sm:$0xff]   ;;  %v15800_v36 = vld [vmem:[%s21637_s1 + $0x23a4] ss:$16 sps:$4 sm:$0xff]  }
 0x43b   :  { %10508 = vmatpush1.bf16.msra.mxu0 %v15708_v37  ;;  %11533 = vmatpush1.bf16.msra.mxu1 %v15711_v21  ;;  %v15803_v37 = vld [vmem:[%s21637_s1 + $0x23ac] ss:$16 sps:$4 sm:$0xff]   ;;  %v15798_v21 = vld [vmem:[%s21637_s1 + $0x23a0] ss:$16 sps:$4 sm:$0xff]  }
 0x43c   :  { %10509 = vmatprep.subr.bf16.mxu0 %v15716_v31  ;;  %11534 = vmatprep.subr.bf16.mxu1 %v15719_v39  ;;  %v15801_v31 = vld [vmem:[%s21637_s1 + $0x23a8] ss:$16 sps:$4 sm:$0xff]   ;;  %v15806_v39 = vld [vmem:[%s21637_s1 + $0x23c4] ss:$16 sps:$4 sm:$0xff]  }
 0x43f   :  { %10510 = vmatpush1.bf16.msra.mxu0 %v15714_v40  ;;  %11535 = vmatpush1.bf16.msra.mxu1 %v15717_v41  ;;  %v15809_v40 = vld [vmem:[%s21637_s1 + $0x23cc] ss:$16 sps:$4 sm:$0xff]   ;;  %v1822_v41 = vcombine.high %v19769_v29, %v19769_v29 }
 0x440   :  { %10520 = vmatprep.subr.bf16.mxu0 %v15722_v25  ;;  %11545 = vmatprep.subr.bf16.mxu1 %v15725_v43  ;;  %v15804_v25 = vld [vmem:[%s21637_s1 + $0x23c0] ss:$16 sps:$4 sm:$0xff]   ;;  %v15807_v43 = vld [vmem:[%s21637_s1 + $0x23c8] ss:$16 sps:$4 sm:$0xff]   ;;  %v15815_v29 = vld [vmem:[%s21637_s1 + $0x23ec] ss:$16 sps:$4 sm:$0xff]  }
 0x442   :  { %10512 = vmatmul.mubr.bf16.vlgmr.msra.gmra.mrb[0].mxu0 %v20002_v45  ;;  %11537 = vmatmul.mubr.bf16.vlgmr.msra.gmra.mrb[0].mxu1 %v20002_v45 }
 0x443   :  { %10521 = vmatpush1.bf16.msra.mxu0 %v15720_v46  ;;  %11546 = vmatpush1.bf16.msra.mxu1 %v15723_v35  ;;  %v15812_v46 = vld [vmem:[%s21637_s1 + $0x23e4] ss:$16 sps:$4 sm:$0xff]   ;;  %v20191_v35 = vrot.slane %v1822_v41, %v16672_v49  ;;  %v15891_v41 = vld [vmem:[%s21637_s1 + $0x2588] ss:$16 sps:$4 sm:$0xff]  }
 0x444   :  { %10522 = vmatprep.subr.bf16.mxu0 %v15728_v50  ;;  %11547 = vmatprep.subr.bf16.mxu1 %v15731_v33  ;;  %v15810_v50 = vld [vmem:[%s21637_s1 + $0x23e0] ss:$16 sps:$4 sm:$0xff]   ;;  %v15813_v33 = vld [vmem:[%s21637_s1 + $0x23e8] ss:$16 sps:$4 sm:$0xff]  }
 0x445   :  { %10552 = vmatprep.mubr.bf16.mxu0 %v1869_v51  ;;  %11577 = vmatprep.mubr.bf16.mxu1 %v1869_v51  ;;  %v15818_v51 = vld [vmem:[%s21637_s1 + $0x2404] ss:$16 sps:$4 sm:$0xff]  }
 0x447   :  { %10523 = vmatpush1.bf16.msra.mxu0 %v15726_v53  ;;  %11548 = vmatpush1.bf16.msra.mxu1 %v15729_v38  ;;  %v15821_v53 = vld [vmem:[%s21637_s1 + $0x240c] ss:$16 sps:$4 sm:$0xff]   ;;  %v1838_v38 = vcombine.high %v20191_v35, %v20191_v35 }
 0x448   :  { %10524 = vmatprep.subr.bf16.mxu0 %v15734_v34  ;;  %11549 = vmatprep.subr.bf16.mxu1 %v15737_v54  ;;  %v1867_v34 = vcombine.high %v20002_v45, %v20002_v45  ;;  %v15816_v54 = vld [vmem:[%s21637_s1 + $0x2400] ss:$16 sps:$4 sm:$0xff]   ;;  %v15827_v45 = vld [vmem:[%s21637_s1 + $0x242c] ss:$16 sps:$4 sm:$0xff]  }
 0x44b   :  { %10525 = vmatpush1.bf16.msra.mxu0 %v15732_v55  ;;  %11550 = vmatpush1.bf16.msra.mxu1 %v15735_v56  ;;  %v15819_v55 = vld [vmem:[%s21637_s1 + $0x2408] ss:$16 sps:$4 sm:$0xff]   ;;  %v15824_v56 = vld [vmem:[%s21637_s1 + $0x2424] ss:$16 sps:$4 sm:$0xff]  }
 0x44c   :  { %10526 = vmatprep.subr.bf16.mxu0 %v15740_v47  ;;  %11551 = vmatprep.subr.bf16.mxu1 %v15743_v57  ;;  %v20222_v47 = vrot.slane %v1838_v38, %v16672_v49  ;;  %v15822_v57 = vld [vmem:[%s21637_s1 + $0x2420] ss:$16 sps:$4 sm:$0xff]   ;;  %v15908_v38 = vld [vmem:[%s21637_s1 + $0x25e4] ss:$16 sps:$4 sm:$0xff]  }
 0x44f   :  { %10527 = vmatpush1.bf16.msra.mxu0 %v15738_v58  ;;  %11552 = vmatpush1.bf16.msra.mxu1 %v15741_v48  ;;  %v15825_v58 = vld [vmem:[%s21637_s1 + $0x2428] ss:$16 sps:$4 sm:$0xff]   ;;  %v15830_v48 = vld [vmem:[%s21637_s1 + $0x2444] ss:$16 sps:$4 sm:$0xff]  }
 0x450   :  { %10528 = vmatprep.subr.bf16.mxu0 %v15746_v61  ;;  %11553 = vmatprep.subr.bf16.mxu1 %v15749_v62  ;;  %v15833_v61 = vld [vmem:[%s21637_s1 + $0x244c] ss:$16 sps:$4 sm:$0xff]   ;;  %v15828_v62 = vld [vmem:[%s21637_s1 + $0x2440] ss:$16 sps:$4 sm:$0xff]  }
 0x453   :  { %10529 = vmatpush1.bf16.msra.mxu0 %v15744_v44  ;;  %11554 = vmatpush1.bf16.msra.mxu1 %v15747_v0  ;;  %v15831_v44 = vld [vmem:[%s21637_s1 + $0x2448] ss:$16 sps:$4 sm:$0xff]   ;;  %v15836_v0 = vld [vmem:[%s21637_s1 + $0x2464] ss:$16 sps:$4 sm:$0xff]  }
 0x454   :  { %10530 = vmatprep.subr.bf16.mxu0 %v15752_v1  ;;  %11555 = vmatprep.subr.bf16.mxu1 %v15755_v2  ;;  %v15839_v1 = vld [vmem:[%s21637_s1 + $0x246c] ss:$16 sps:$4 sm:$0xff]   ;;  %v15834_v2 = vld [vmem:[%s21637_s1 + $0x2460] ss:$16 sps:$4 sm:$0xff]  }
 0x457   :  { %10531 = vmatpush1.bf16.msra.mxu0 %v15750_v59  ;;  %11556 = vmatpush1.bf16.msra.mxu1 %v15753_v3  ;;  %v15837_v59 = vld [vmem:[%s21637_s1 + $0x2468] ss:$16 sps:$4 sm:$0xff]   ;;  %v15842_v3 = vld [vmem:[%s21637_s1 + $0x2484] ss:$16 sps:$4 sm:$0xff]  }
 0x458   :  { %10532 = vmatprep.subr.bf16.mxu0 %v15758_v5  ;;  %11557 = vmatprep.subr.bf16.mxu1 %v15761_v6  ;;  %v15845_v5 = vld [vmem:[%s21637_s1 + $0x248c] ss:$16 sps:$4 sm:$0xff]   ;;  %v15840_v6 = vld [vmem:[%s21637_s1 + $0x2480] ss:$16 sps:$4 sm:$0xff]  }
 0x45b   :  { %10533 = vmatpush1.bf16.msra.mxu0 %v15756_v60  ;;  %11558 = vmatpush1.bf16.msra.mxu1 %v15759_v9  ;;  %v15843_v60 = vld [vmem:[%s21637_s1 + $0x2488] ss:$16 sps:$4 sm:$0xff]   ;;  %v15848_v9 = vld [vmem:[%s21637_s1 + $0x24a4] ss:$16 sps:$4 sm:$0xff]  }
 0x45c   :  { %10534 = vmatprep.subr.bf16.mxu0 %v15764_v10  ;;  %11559 = vmatprep.subr.bf16.mxu1 %v15767_v11  ;;  %v15851_v10 = vld [vmem:[%s21637_s1 + $0x24ac] ss:$16 sps:$4 sm:$0xff]   ;;  %v15846_v11 = vld [vmem:[%s21637_s1 + $0x24a0] ss:$16 sps:$4 sm:$0xff]  }
 0x45f   :  { %10535 = vmatpush1.bf16.msra.mxu0 %v15762_v63  ;;  %11560 = vmatpush1.bf16.msra.mxu1 %v15765_v12  ;;  %v15849_v63 = vld [vmem:[%s21637_s1 + $0x24a8] ss:$16 sps:$4 sm:$0xff]   ;;  %v15854_v12 = vld [vmem:[%s21637_s1 + $0x24c4] ss:$16 sps:$4 sm:$0xff]  }
 0x460   :  { %10536 = vmatprep.subr.bf16.mxu0 %v15770_v52  ;;  %11561 = vmatprep.subr.bf16.mxu1 %v15773_v15  ;;  %v15857_v52 = vld [vmem:[%s21637_s1 + $0x24cc] ss:$16 sps:$4 sm:$0xff]   ;;  %v15852_v15 = vld [vmem:[%s21637_s1 + $0x24c0] ss:$16 sps:$4 sm:$0xff]  }
 0x463   :  { %10537 = vmatpush1.bf16.msra.mxu0 %v15768_v7  ;;  %11562 = vmatpush1.bf16.msra.mxu1 %v15771_v16  ;;  %v15855_v7 = vld [vmem:[%s21637_s1 + $0x24c8] ss:$16 sps:$4 sm:$0xff]   ;;  %v15860_v16 = vld [vmem:[%s21637_s1 + $0x24e4] ss:$16 sps:$4 sm:$0xff]  }
 0x464   :  { %10538 = vmatprep.subr.bf16.mxu0 %v15776_v17  ;;  %11563 = vmatprep.subr.bf16.mxu1 %v15779_v8  ;;  %v15863_v17 = vld [vmem:[%s21637_s1 + $0x24ec] ss:$16 sps:$4 sm:$0xff]   ;;  %v15858_v8 = vld [vmem:[%s21637_s1 + $0x24e0] ss:$16 sps:$4 sm:$0xff]  }
 0x467   :  { %10539 = vmatpush1.bf16.msra.mxu0 %v15774_v20  ;;  %11564 = vmatpush1.bf16.msra.mxu1 %v15777_v22  ;;  %v15861_v20 = vld [vmem:[%s21637_s1 + $0x24e8] ss:$16 sps:$4 sm:$0xff]   ;;  %v15866_v22 = vld [vmem:[%s21637_s1 + $0x2504] ss:$16 sps:$4 sm:$0xff]  }
 0x468   :  { %10540 = vmatprep.subr.bf16.mxu0 %v15782_v4  ;;  %11565 = vmatprep.subr.bf16.mxu1 %v15785_v24  ;;  %v15869_v4 = vld [vmem:[%s21637_s1 + $0x250c] ss:$16 sps:$4 sm:$0xff]   ;;  %v15864_v24 = vld [vmem:[%s21637_s1 + $0x2500] ss:$16 sps:$4 sm:$0xff]  }
 0x46b   :  { %10541 = vmatpush1.bf16.msra.mxu0 %v15780_v13  ;;  %11566 = vmatpush1.bf16.msra.mxu1 %v15783_v27  ;;  %v15867_v13 = vld [vmem:[%s21637_s1 + $0x2508] ss:$16 sps:$4 sm:$0xff]   ;;  %v15872_v27 = vld [vmem:[%s21637_s1 + $0x2524] ss:$16 sps:$4 sm:$0xff]  }
 0x46c   :  { %10542 = vmatprep.subr.bf16.mxu0 %v15788_v18  ;;  %11567 = vmatprep.subr.bf16.mxu1 %v15791_v28  ;;  %v15875_v18 = vld [vmem:[%s21637_s1 + $0x252c] ss:$16 sps:$4 sm:$0xff]   ;;  %v15870_v28 = vld [vmem:[%s21637_s1 + $0x2520] ss:$16 sps:$4 sm:$0xff]  }
 0x46f   :  { %10543 = vmatpush1.bf16.msra.mxu0 %v15786_v14  ;;  %11568 = vmatpush1.bf16.msra.mxu1 %v15789_v30  ;;  %v15873_v14 = vld [vmem:[%s21637_s1 + $0x2528] ss:$16 sps:$4 sm:$0xff]   ;;  %v15878_v30 = vld [vmem:[%s21637_s1 + $0x2544] ss:$16 sps:$4 sm:$0xff]  }
 0x470   :  { %10544 = vmatprep.subr.bf16.mxu0 %v15794_v19  ;;  %11569 = vmatprep.subr.bf16.mxu1 %v15797_v32  ;;  %v15881_v19 = vld [vmem:[%s21637_s1 + $0x254c] ss:$16 sps:$4 sm:$0xff]   ;;  %v15876_v32 = vld [vmem:[%s21637_s1 + $0x2540] ss:$16 sps:$4 sm:$0xff]  }
 0x473   :  { %10545 = vmatpush1.bf16.msra.mxu0 %v15792_v26  ;;  %11570 = vmatpush1.bf16.msra.mxu1 %v15795_v23  ;;  %v15879_v26 = vld [vmem:[%s21637_s1 + $0x2548] ss:$16 sps:$4 sm:$0xff]   ;;  %v15884_v23 = vld [vmem:[%s21637_s1 + $0x2564] ss:$16 sps:$4 sm:$0xff]  }
 0x474   :  { %10546 = vmatprep.subr.bf16.mxu0 %v15800_v36  ;;  %11571 = vmatprep.subr.bf16.mxu1 %v15803_v37  ;;  %v15887_v36 = vld [vmem:[%s21637_s1 + $0x256c] ss:$16 sps:$4 sm:$0xff]   ;;  %v15882_v37 = vld [vmem:[%s21637_s1 + $0x2560] ss:$16 sps:$4 sm:$0xff]  }
 0x477   :  { %10547 = vmatpush1.bf16.msra.mxu0 %v15798_v21  ;;  %11572 = vmatpush1.bf16.msra.mxu1 %v15801_v31  ;;  %v15885_v21 = vld [vmem:[%s21637_s1 + $0x2568] ss:$16 sps:$4 sm:$0xff]   ;;  %v15890_v31 = vld [vmem:[%s21637_s1 + $0x2584] ss:$16 sps:$4 sm:$0xff]  }
 0x478   :  { %10548 = vmatprep.subr.bf16.mxu0 %v15806_v39  ;;  %11573 = vmatprep.subr.bf16.mxu1 %v15809_v40  ;;  %v15893_v39 = vld [vmem:[%s21637_s1 + $0x258c] ss:$16 sps:$4 sm:$0xff]   ;;  %v15888_v40 = vld [vmem:[%s21637_s1 + $0x2580] ss:$16 sps:$4 sm:$0xff]  }
 0x47b   :  { %10549 = vmatpush1.bf16.msra.mxu0 %v15804_v25  ;;  %11574 = vmatpush1.bf16.msra.mxu1 %v15807_v43  ;;  %v15896_v25 = vld [vmem:[%s21637_s1 + $0x25a4] ss:$16 sps:$4 sm:$0xff]   ;;  %v15899_v43 = vld [vmem:[%s21637_s1 + $0x25ac] ss:$16 sps:$4 sm:$0xff]  }
 0x47c   :  { %10550 = vmatprep.subr.bf16.mxu0 %v15812_v46  ;;  %11575 = vmatprep.subr.bf16.mxu1 %v15815_v29  ;;  %v15894_v46 = vld [vmem:[%s21637_s1 + $0x25a0] ss:$16 sps:$4 sm:$0xff]   ;;  %v15897_v29 = vld [vmem:[%s21637_s1 + $0x25a8] ss:$16 sps:$4 sm:$0xff]  }
 0x47f   :  { %10551 = vmatpush1.bf16.msra.mxu0 %v15810_v50  ;;  %11576 = vmatpush1.bf16.msra.mxu1 %v15813_v33  ;;  %v15902_v50 = vld [vmem:[%s21637_s1 + $0x25c4] ss:$16 sps:$4 sm:$0xff]   ;;  %v15905_v33 = vld [vmem:[%s21637_s1 + $0x25cc] ss:$16 sps:$4 sm:$0xff]  }
 0x480   :  { %10561 = vmatprep.subr.bf16.mxu0 %v15818_v51  ;;  %11586 = vmatprep.subr.bf16.mxu1 %v15821_v53  ;;  %v15900_v51 = vld [vmem:[%s21637_s1 + $0x25c0] ss:$16 sps:$4 sm:$0xff]   ;;  %v15903_v53 = vld [vmem:[%s21637_s1 + $0x25c8] ss:$16 sps:$4 sm:$0xff]  }
 0x482   :  { %10553 = vmatmul.mubr.bf16.vlgmr.msra.gmra.mrb[0].mxu0 %v1867_v34  ;;  %11578 = vmatmul.mubr.bf16.vlgmr.msra.gmra.mrb[0].mxu1 %v1867_v34  ;;  %v15911_v34 = vld [vmem:[%s21637_s1 + $0x25ec] ss:$16 sps:$4 sm:$0xff]  }
 0x483   :  { %10562 = vmatpush1.bf16.msra.mxu0 %v15816_v54  ;;  %11587 = vmatpush1.bf16.msra.mxu1 %v15819_v55  ;;  %v15906_v54 = vld [vmem:[%s21637_s1 + $0x25e0] ss:$16 sps:$4 sm:$0xff]   ;;  %v15909_v55 = vld [vmem:[%s21637_s1 + $0x25e8] ss:$16 sps:$4 sm:$0xff]  }
 0x484   :  { %10563 = vmatprep.subr.bf16.mxu0 %v15824_v56  ;;  %11588 = vmatprep.subr.bf16.mxu1 %v15827_v45  ;;  %v15915_v56 = vld [vmem:[%s21637_s1 + $0x2604] ss:$16 sps:$4 sm:$0xff]   ;;  %v15918_v45 = vld [vmem:[%s21637_s1 + $0x260c] ss:$16 sps:$4 sm:$0xff]  }
 0x485   :  { %10593 = vmatprep.mubr.bf16.mxu0 %v20222_v47  ;;  %11618 = vmatprep.mubr.bf16.mxu1 %v20222_v47 }
 0x487   :  { %10564 = vmatpush1.bf16.msra.mxu0 %v15822_v57  ;;  %11589 = vmatpush1.bf16.msra.mxu1 %v15825_v58  ;;  %v20408_v57 = vrot.slane %v20191_v35, %v16672_v49  ;;  %v15913_v58 = vld [vmem:[%s21637_s1 + $0x2600] ss:$16 sps:$4 sm:$0xff]   ;;  %v15924_v35 = vld [vmem:[%s21637_s1 + $0x262c] ss:$16 sps:$4 sm:$0xff]  }
 0x488   :  { %10565 = vmatprep.subr.bf16.mxu0 %v15830_v48  ;;  %11590 = vmatprep.subr.bf16.mxu1 %v15833_v61  ;;  %v15916_v48 = vld [vmem:[%s21637_s1 + $0x2608] ss:$16 sps:$4 sm:$0xff]   ;;  %v15921_v61 = vld [vmem:[%s21637_s1 + $0x2624] ss:$16 sps:$4 sm:$0xff]  }
 0x48b   :  { %10566 = vmatpush1.bf16.msra.mxu0 %v15828_v62  ;;  %11591 = vmatpush1.bf16.msra.mxu1 %v15831_v44  ;;  %v1870_v62 = vcombine.high %v20222_v47, %v20222_v47  ;;  %v15919_v44 = vld [vmem:[%s21637_s1 + $0x2620] ss:$16 sps:$4 sm:$0xff]   ;;  %v15927_v47 = vld [vmem:[%s21637_s1 + $0x2644] ss:$16 sps:$4 sm:$0xff]  }
 0x48c   :  { %10567 = vmatprep.subr.bf16.mxu0 %v15836_v0  ;;  %11592 = vmatprep.subr.bf16.mxu1 %v15839_v1  ;;  %v15922_v0 = vld [vmem:[%s21637_s1 + $0x2628] ss:$16 sps:$4 sm:$0xff]   ;;  %v15930_v1 = vld [vmem:[%s21637_s1 + $0x264c] ss:$16 sps:$4 sm:$0xff]  }
 0x48f   :  { %10568 = vmatpush1.bf16.msra.mxu0 %v15834_v2  ;;  %11593 = vmatpush1.bf16.msra.mxu1 %v15837_v59  ;;  %v15925_v2 = vld [vmem:[%s21637_s1 + $0x2640] ss:$16 sps:$4 sm:$0xff]   ;;  %v15928_v59 = vld [vmem:[%s21637_s1 + $0x2648] ss:$16 sps:$4 sm:$0xff]  }
 0x490   :  { %10569 = vmatprep.subr.bf16.mxu0 %v15842_v3  ;;  %11594 = vmatprep.subr.bf16.mxu1 %v15845_v5  ;;  %v15933_v3 = vld [vmem:[%s21637_s1 + $0x2664] ss:$16 sps:$4 sm:$0xff]   ;;  %v15936_v5 = vld [vmem:[%s21637_s1 + $0x266c] ss:$16 sps:$4 sm:$0xff]  }
 0x493   :  { %10570 = vmatpush1.bf16.msra.mxu0 %v15840_v6  ;;  %11595 = vmatpush1.bf16.msra.mxu1 %v15843_v60  ;;  %v15931_v6 = vld [vmem:[%s21637_s1 + $0x2660] ss:$16 sps:$4 sm:$0xff]   ;;  %v15934_v60 = vld [vmem:[%s21637_s1 + $0x2668] ss:$16 sps:$4 sm:$0xff]  }
 0x494   :  { %10571 = vmatprep.subr.bf16.mxu0 %v15848_v9  ;;  %11596 = vmatprep.subr.bf16.mxu1 %v15851_v10  ;;  %v15939_v9 = vld [vmem:[%s21637_s1 + $0x2684] ss:$16 sps:$4 sm:$0xff]   ;;  %v15942_v10 = vld [vmem:[%s21637_s1 + $0x268c] ss:$16 sps:$4 sm:$0xff]  }
 0x497   :  { %10572 = vmatpush1.bf16.msra.mxu0 %v15846_v11  ;;  %11597 = vmatpush1.bf16.msra.mxu1 %v15849_v63  ;;  %v15937_v11 = vld [vmem:[%s21637_s1 + $0x2680] ss:$16 sps:$4 sm:$0xff]   ;;  %v15940_v63 = vld [vmem:[%s21637_s1 + $0x2688] ss:$16 sps:$4 sm:$0xff]  }
 0x498   :  { %10573 = vmatprep.subr.bf16.mxu0 %v15854_v12  ;;  %11598 = vmatprep.subr.bf16.mxu1 %v15857_v52  ;;  %v15945_v12 = vld [vmem:[%s21637_s1 + $0x26a4] ss:$16 sps:$4 sm:$0xff]   ;;  %v15948_v52 = vld [vmem:[%s21637_s1 + $0x26ac] ss:$16 sps:$4 sm:$0xff]  }
 0x49b   :  { %10574 = vmatpush1.bf16.msra.mxu0 %v15852_v15  ;;  %11599 = vmatpush1.bf16.msra.mxu1 %v15855_v7  ;;  %v15943_v15 = vld [vmem:[%s21637_s1 + $0x26a0] ss:$16 sps:$4 sm:$0xff]   ;;  %v15946_v7 = vld [vmem:[%s21637_s1 + $0x26a8] ss:$16 sps:$4 sm:$0xff]  }
 0x49c   :  { %10575 = vmatprep.subr.bf16.mxu0 %v15860_v16  ;;  %11600 = vmatprep.subr.bf16.mxu1 %v15863_v17  ;;  %v15951_v16 = vld [vmem:[%s21637_s1 + $0x26c4] ss:$16 sps:$4 sm:$0xff]   ;;  %v15954_v17 = vld [vmem:[%s21637_s1 + $0x26cc] ss:$16 sps:$4 sm:$0xff]  }
 0x49f   :  { %10576 = vmatpush1.bf16.msra.mxu0 %v15858_v8  ;;  %11601 = vmatpush1.bf16.msra.mxu1 %v15861_v20  ;;  %v15949_v8 = vld [vmem:[%s21637_s1 + $0x26c0] ss:$16 sps:$4 sm:$0xff]   ;;  %v15952_v20 = vld [vmem:[%s21637_s1 + $0x26c8] ss:$16 sps:$4 sm:$0xff]  }
 0x4a0   :  { %10577 = vmatprep.subr.bf16.mxu0 %v15866_v22  ;;  %11602 = vmatprep.subr.bf16.mxu1 %v15869_v4  ;;  %v15957_v22 = vld [vmem:[%s21637_s1 + $0x26e4] ss:$16 sps:$4 sm:$0xff]   ;;  %v15960_v4 = vld [vmem:[%s21637_s1 + $0x26ec] ss:$16 sps:$4 sm:$0xff]  }
 0x4a3   :  { %10578 = vmatpush1.bf16.msra.mxu0 %v15864_v24  ;;  %11603 = vmatpush1.bf16.msra.mxu1 %v15867_v13  ;;  %v15955_v24 = vld [vmem:[%s21637_s1 + $0x26e0] ss:$16 sps:$4 sm:$0xff]   ;;  %v15958_v13 = vld [vmem:[%s21637_s1 + $0x26e8] ss:$16 sps:$4 sm:$0xff]  }
 0x4a4   :  { %10579 = vmatprep.subr.bf16.mxu0 %v15872_v27  ;;  %11604 = vmatprep.subr.bf16.mxu1 %v15875_v18  ;;  %v15963_v27 = vld [vmem:[%s21637_s1 + $0x2704] ss:$16 sps:$4 sm:$0xff]   ;;  %v15966_v18 = vld [vmem:[%s21637_s1 + $0x270c] ss:$16 sps:$4 sm:$0xff]  }
 0x4a7   :  { %10580 = vmatpush1.bf16.msra.mxu0 %v15870_v28  ;;  %11605 = vmatpush1.bf16.msra.mxu1 %v15873_v14  ;;  %v15961_v28 = vld [vmem:[%s21637_s1 + $0x2700] ss:$16 sps:$4 sm:$0xff]   ;;  %v15964_v14 = vld [vmem:[%s21637_s1 + $0x2708] ss:$16 sps:$4 sm:$0xff]  }
 0x4a8   :  { %10581 = vmatprep.subr.bf16.mxu0 %v15878_v30  ;;  %11606 = vmatprep.subr.bf16.mxu1 %v15881_v19  ;;  %v15969_v30 = vld [vmem:[%s21637_s1 + $0x2724] ss:$16 sps:$4 sm:$0xff]   ;;  %v15972_v19 = vld [vmem:[%s21637_s1 + $0x272c] ss:$16 sps:$4 sm:$0xff]  }
 0x4ab   :  { %10582 = vmatpush1.bf16.msra.mxu0 %v15876_v32  ;;  %11607 = vmatpush1.bf16.msra.mxu1 %v15879_v26  ;;  %v15967_v32 = vld [vmem:[%s21637_s1 + $0x2720] ss:$16 sps:$4 sm:$0xff]   ;;  %v15970_v26 = vld [vmem:[%s21637_s1 + $0x2728] ss:$16 sps:$4 sm:$0xff]  }
 0x4ac   :  { %10583 = vmatprep.subr.bf16.mxu0 %v15884_v23  ;;  %11608 = vmatprep.subr.bf16.mxu1 %v15887_v36  ;;  %v15975_v23 = vld [vmem:[%s21637_s1 + $0x2744] ss:$16 sps:$4 sm:$0xff]   ;;  %v15978_v36 = vld [vmem:[%s21637_s1 + $0x274c] ss:$16 sps:$4 sm:$0xff]  }
 0x4af   :  { %10584 = vmatpush1.bf16.msra.mxu0 %v15882_v37  ;;  %11609 = vmatpush1.bf16.msra.mxu1 %v15885_v21  ;;  %v15973_v37 = vld [vmem:[%s21637_s1 + $0x2740] ss:$16 sps:$4 sm:$0xff]   ;;  %v15976_v21 = vld [vmem:[%s21637_s1 + $0x2748] ss:$16 sps:$4 sm:$0xff]  }
 0x4b0   :  { %10585 = vmatprep.subr.bf16.mxu0 %v15890_v31  ;;  %11610 = vmatprep.subr.bf16.mxu1 %v15893_v39  ;;  %v15981_v31 = vld [vmem:[%s21637_s1 + $0x2764] ss:$16 sps:$4 sm:$0xff]   ;;  %v15984_v39 = vld [vmem:[%s21637_s1 + $0x276c] ss:$16 sps:$4 sm:$0xff]  }
 0x4b3   :  { %10586 = vmatpush1.bf16.msra.mxu0 %v15888_v40  ;;  %11611 = vmatpush1.bf16.msra.mxu1 %v15891_v41  ;;  %v15979_v40 = vld [vmem:[%s21637_s1 + $0x2760] ss:$16 sps:$4 sm:$0xff]   ;;  %v15982_v41 = vld [vmem:[%s21637_s1 + $0x2768] ss:$16 sps:$4 sm:$0xff]  }
 0x4b4   :  { %10587 = vmatprep.subr.bf16.mxu0 %v15896_v25  ;;  %11612 = vmatprep.subr.bf16.mxu1 %v15899_v43  ;;  %v15987_v25 = vld [vmem:[%s21637_s1 + $0x2784] ss:$16 sps:$4 sm:$0xff]   ;;  %v15990_v43 = vld [vmem:[%s21637_s1 + $0x278c] ss:$16 sps:$4 sm:$0xff]  }
 0x4b7   :  { %10588 = vmatpush1.bf16.msra.mxu0 %v15894_v46  ;;  %11613 = vmatpush1.bf16.msra.mxu1 %v15897_v29  ;;  %v15985_v46 = vld [vmem:[%s21637_s1 + $0x2780] ss:$16 sps:$4 sm:$0xff]   ;;  %v15988_v29 = vld [vmem:[%s21637_s1 + $0x2788] ss:$16 sps:$4 sm:$0xff]  }
 0x4b8   :  { %10589 = vmatprep.subr.bf16.mxu0 %v15902_v50  ;;  %11614 = vmatprep.subr.bf16.mxu1 %v15905_v33  ;;  %v15993_v50 = vld [vmem:[%s21637_s1 + $0x27a4] ss:$16 sps:$4 sm:$0xff]   ;;  %v15996_v33 = vld [vmem:[%s21637_s1 + $0x27ac] ss:$16 sps:$4 sm:$0xff]  }
 0x4bb   :  { %10590 = vmatpush1.bf16.msra.mxu0 %v15900_v51  ;;  %11615 = vmatpush1.bf16.msra.mxu1 %v15903_v53  ;;  %v15991_v51 = vld [vmem:[%s21637_s1 + $0x27a0] ss:$16 sps:$4 sm:$0xff]   ;;  %v15994_v53 = vld [vmem:[%s21637_s1 + $0x27a8] ss:$16 sps:$4 sm:$0xff]  }
 0x4bc   :  { %10591 = vmatprep.subr.bf16.mxu0 %v15908_v38  ;;  %11616 = vmatprep.subr.bf16.mxu1 %v15911_v34  ;;  %v15999_v38 = vld [vmem:[%s21637_s1 + $0x27c4] ss:$16 sps:$4 sm:$0xff]   ;;  %v16002_v34 = vld [vmem:[%s21637_s1 + $0x27cc] ss:$16 sps:$4 sm:$0xff]  }
 0x4bf   :  { %10592 = vmatpush1.bf16.msra.mxu0 %v15906_v54  ;;  %11617 = vmatpush1.bf16.msra.mxu1 %v15909_v55  ;;  %v20585_v54 = vld [vmem:[%s21636_s0 + $0x28] sm:$0xff]  ;;  %v15997_v55 = vld [vmem:[%s21637_s1 + $0x27c0] ss:$16 sps:$4 sm:$0xff]  }
 0x4c0   :  { %10602 = vmatprep.subr.bf16.mxu0 %v15915_v56  ;;  %11627 = vmatprep.subr.bf16.mxu1 %v15918_v45  ;;  %v16000_v56 = vld [vmem:[%s21637_s1 + $0x27c8] ss:$16 sps:$4 sm:$0xff]   ;;  %v16005_v45 = vld [vmem:[%s21637_s1 + $0x27e4] ss:$16 sps:$4 sm:$0xff]  }
 0x4c2   :  { %10594 = vmatmul.mubr.bf16.vlgmr.msra.gmra.mrb[0].mxu0 %v20408_v57  ;;  %11619 = vmatmul.mubr.bf16.vlgmr.msra.gmra.mrb[0].mxu1 %v20408_v57 }
 0x4c3   :  { %10603 = vmatpush1.bf16.msra.mxu0 %v15913_v58  ;;  %11628 = vmatpush1.bf16.msra.mxu1 %v15916_v48  ;;  %v16008_v58 = vld [vmem:[%s21637_s1 + $0x27ec] ss:$16 sps:$4 sm:$0xff]   ;;  %v20601_v48 = vrot.slane %v20585_v54, %v16672_v49 }
 0x4c4   :  { %10604 = vmatprep.subr.bf16.mxu0 %v15921_v61  ;;  %11629 = vmatprep.subr.bf16.mxu1 %v15924_v35  ;;  %v16003_v61 = vld [vmem:[%s21637_s1 + $0x27e0] ss:$16 sps:$4 sm:$0xff]   ;;  %v16006_v35 = vld [vmem:[%s21637_s1 + $0x27e8] ss:$16 sps:$4 sm:$0xff]  }
 0x4c5   :  { %10634 = vmatprep.mubr.bf16.mxu0 %v1870_v62  ;;  %11659 = vmatprep.mubr.bf16.mxu1 %v1870_v62  ;;  %v16011_v62 = vld [vmem:[%s21637_s1 + $0x2804] ss:$16 sps:$4 sm:$0xff]  }
 0x4c7   :  { %10605 = vmatpush1.bf16.msra.mxu0 %v15919_v44  ;;  %11630 = vmatpush1.bf16.msra.mxu1 %v15922_v0  ;;  %v16014_v44 = vld [vmem:[%s21637_s1 + $0x280c] ss:$16 sps:$4 sm:$0xff]   ;;  %v1886_v0 = vcombine.high %v20601_v48, %v20601_v48 }
 0x4c8   :  { %10606 = vmatprep.subr.bf16.mxu0 %v15927_v47  ;;  %11631 = vmatprep.subr.bf16.mxu1 %v15930_v1  ;;  %v1868_v47 = vcombine.high %v20408_v57, %v20408_v57  ;;  %v16009_v1 = vld [vmem:[%s21637_s1 + $0x2800] ss:$16 sps:$4 sm:$0xff]   ;;  %v16020_v57 = vld [vmem:[%s21637_s1 + $0x282c] ss:$16 sps:$4 sm:$0xff]  }
 0x4cb   :  { %10607 = vmatpush1.bf16.msra.mxu0 %v15925_v2  ;;  %11632 = vmatpush1.bf16.msra.mxu1 %v15928_v59  ;;  %v16012_v2 = vld [vmem:[%s21637_s1 + $0x2808] ss:$16 sps:$4 sm:$0xff]   ;;  %v16017_v59 = vld [vmem:[%s21637_s1 + $0x2824] ss:$16 sps:$4 sm:$0xff]  }
 0x4cc   :  { %10608 = vmatprep.subr.bf16.mxu0 %v15933_v3  ;;  %11633 = vmatprep.subr.bf16.mxu1 %v15936_v5  ;;  %v20632_v3 = vrot.slane %v1886_v0, %v16672_v49  ;;  %v16015_v5 = vld [vmem:[%s21637_s1 + $0x2820] ss:$16 sps:$4 sm:$0xff]   ;;  %v16096_v0 = vld [vmem:[%s21637_s1 + $0x29c8] ss:$16 sps:$4 sm:$0xff]  }
 0x4cf   :  { %10609 = vmatpush1.bf16.msra.mxu0 %v15931_v6  ;;  %11634 = vmatpush1.bf16.msra.mxu1 %v15934_v60  ;;  %v16018_v6 = vld [vmem:[%s21637_s1 + $0x2828] ss:$16 sps:$4 sm:$0xff]   ;;  %v16023_v60 = vld [vmem:[%s21637_s1 + $0x2844] ss:$16 sps:$4 sm:$0xff]  }
 0x4d0   :  { %10610 = vmatprep.subr.bf16.mxu0 %v15939_v9  ;;  %11635 = vmatprep.subr.bf16.mxu1 %v15942_v10  ;;  %v16026_v9 = vld [vmem:[%s21637_s1 + $0x284c] ss:$16 sps:$4 sm:$0xff]   ;;  %v16021_v10 = vld [vmem:[%s21637_s1 + $0x2840] ss:$16 sps:$4 sm:$0xff]  }
 0x4d3   :  { %10611 = vmatpush1.bf16.msra.mxu0 %v15937_v11  ;;  %11636 = vmatpush1.bf16.msra.mxu1 %v15940_v63  ;;  %v16024_v11 = vld [vmem:[%s21637_s1 + $0x2848] ss:$16 sps:$4 sm:$0xff]   ;;  %v16029_v63 = vld [vmem:[%s21637_s1 + $0x2864] ss:$16 sps:$4 sm:$0xff]  }
 0x4d4   :  { %10612 = vmatprep.subr.bf16.mxu0 %v15945_v12  ;;  %11637 = vmatprep.subr.bf16.mxu1 %v15948_v52  ;;  %v16032_v12 = vld [vmem:[%s21637_s1 + $0x286c] ss:$16 sps:$4 sm:$0xff]   ;;  %v16027_v52 = vld [vmem:[%s21637_s1 + $0x2860] ss:$16 sps:$4 sm:$0xff]  }
 0x4d7   :  { %10613 = vmatpush1.bf16.msra.mxu0 %v15943_v15  ;;  %11638 = vmatpush1.bf16.msra.mxu1 %v15946_v7  ;;  %v16030_v15 = vld [vmem:[%s21637_s1 + $0x2868] ss:$16 sps:$4 sm:$0xff]   ;;  %v16035_v7 = vld [vmem:[%s21637_s1 + $0x2884] ss:$16 sps:$4 sm:$0xff]  }
 0x4d8   :  { %10614 = vmatprep.subr.bf16.mxu0 %v15951_v16  ;;  %11639 = vmatprep.subr.bf16.mxu1 %v15954_v17  ;;  %v16038_v16 = vld [vmem:[%s21637_s1 + $0x288c] ss:$16 sps:$4 sm:$0xff]   ;;  %v16033_v17 = vld [vmem:[%s21637_s1 + $0x2880] ss:$16 sps:$4 sm:$0xff]  }
 0x4db   :  { %10615 = vmatpush1.bf16.msra.mxu0 %v15949_v8  ;;  %11640 = vmatpush1.bf16.msra.mxu1 %v15952_v20  ;;  %v16036_v8 = vld [vmem:[%s21637_s1 + $0x2888] ss:$16 sps:$4 sm:$0xff]   ;;  %v16041_v20 = vld [vmem:[%s21637_s1 + $0x28a4] ss:$16 sps:$4 sm:$0xff]  }
 0x4dc   :  { %10616 = vmatprep.subr.bf16.mxu0 %v15957_v22  ;;  %11641 = vmatprep.subr.bf16.mxu1 %v15960_v4  ;;  %v16044_v22 = vld [vmem:[%s21637_s1 + $0x28ac] ss:$16 sps:$4 sm:$0xff]   ;;  %v16039_v4 = vld [vmem:[%s21637_s1 + $0x28a0] ss:$16 sps:$4 sm:$0xff]  }
 0x4df   :  { %10617 = vmatpush1.bf16.msra.mxu0 %v15955_v24  ;;  %11642 = vmatpush1.bf16.msra.mxu1 %v15958_v13  ;;  %v16042_v24 = vld [vmem:[%s21637_s1 + $0x28a8] ss:$16 sps:$4 sm:$0xff]   ;;  %v16047_v13 = vld [vmem:[%s21637_s1 + $0x28c4] ss:$16 sps:$4 sm:$0xff]  }
 0x4e0   :  { %10618 = vmatprep.subr.bf16.mxu0 %v15963_v27  ;;  %11643 = vmatprep.subr.bf16.mxu1 %v15966_v18  ;;  %v16050_v27 = vld [vmem:[%s21637_s1 + $0x28cc] ss:$16 sps:$4 sm:$0xff]   ;;  %v16045_v18 = vld [vmem:[%s21637_s1 + $0x28c0] ss:$16 sps:$4 sm:$0xff]  }
 0x4e3   :  { %10619 = vmatpush1.bf16.msra.mxu0 %v15961_v28  ;;  %11644 = vmatpush1.bf16.msra.mxu1 %v15964_v14  ;;  %v16048_v28 = vld [vmem:[%s21637_s1 + $0x28c8] ss:$16 sps:$4 sm:$0xff]   ;;  %v16053_v14 = vld [vmem:[%s21637_s1 + $0x28e4] ss:$16 sps:$4 sm:$0xff]  }
 0x4e4   :  { %10620 = vmatprep.subr.bf16.mxu0 %v15969_v30  ;;  %11645 = vmatprep.subr.bf16.mxu1 %v15972_v19  ;;  %v16056_v30 = vld [vmem:[%s21637_s1 + $0x28ec] ss:$16 sps:$4 sm:$0xff]   ;;  %v16051_v19 = vld [vmem:[%s21637_s1 + $0x28e0] ss:$16 sps:$4 sm:$0xff]  }
 0x4e7   :  { %10621 = vmatpush1.bf16.msra.mxu0 %v15967_v32  ;;  %11646 = vmatpush1.bf16.msra.mxu1 %v15970_v26  ;;  %v16054_v32 = vld [vmem:[%s21637_s1 + $0x28e8] ss:$16 sps:$4 sm:$0xff]   ;;  %v16059_v26 = vld [vmem:[%s21637_s1 + $0x2904] ss:$16 sps:$4 sm:$0xff]  }
 0x4e8   :  { %10622 = vmatprep.subr.bf16.mxu0 %v15975_v23  ;;  %11647 = vmatprep.subr.bf16.mxu1 %v15978_v36  ;;  %v16062_v23 = vld [vmem:[%s21637_s1 + $0x290c] ss:$16 sps:$4 sm:$0xff]   ;;  %v16057_v36 = vld [vmem:[%s21637_s1 + $0x2900] ss:$16 sps:$4 sm:$0xff]  }
 0x4eb   :  { %10623 = vmatpush1.bf16.msra.mxu0 %v15973_v37  ;;  %11648 = vmatpush1.bf16.msra.mxu1 %v15976_v21  ;;  %v16060_v37 = vld [vmem:[%s21637_s1 + $0x2908] ss:$16 sps:$4 sm:$0xff]   ;;  %v16065_v21 = vld [vmem:[%s21637_s1 + $0x2924] ss:$16 sps:$4 sm:$0xff]  }
 0x4ec   :  { %10624 = vmatprep.subr.bf16.mxu0 %v15981_v31  ;;  %11649 = vmatprep.subr.bf16.mxu1 %v15984_v39  ;;  %v16068_v31 = vld [vmem:[%s21637_s1 + $0x292c] ss:$16 sps:$4 sm:$0xff]   ;;  %v16063_v39 = vld [vmem:[%s21637_s1 + $0x2920] ss:$16 sps:$4 sm:$0xff]  }
 0x4ef   :  { %10625 = vmatpush1.bf16.msra.mxu0 %v15979_v40  ;;  %11650 = vmatpush1.bf16.msra.mxu1 %v15982_v41  ;;  %v16066_v40 = vld [vmem:[%s21637_s1 + $0x2928] ss:$16 sps:$4 sm:$0xff]   ;;  %v16071_v41 = vld [vmem:[%s21637_s1 + $0x2944] ss:$16 sps:$4 sm:$0xff]  }
 0x4f0   :  { %10626 = vmatprep.subr.bf16.mxu0 %v15987_v25  ;;  %11651 = vmatprep.subr.bf16.mxu1 %v15990_v43  ;;  %v16074_v25 = vld [vmem:[%s21637_s1 + $0x294c] ss:$16 sps:$4 sm:$0xff]   ;;  %v16069_v43 = vld [vmem:[%s21637_s1 + $0x2940] ss:$16 sps:$4 sm:$0xff]  }
 0x4f3   :  { %10627 = vmatpush1.bf16.msra.mxu0 %v15985_v46  ;;  %11652 = vmatpush1.bf16.msra.mxu1 %v15988_v29  ;;  %v16072_v46 = vld [vmem:[%s21637_s1 + $0x2948] ss:$16 sps:$4 sm:$0xff]   ;;  %v16077_v29 = vld [vmem:[%s21637_s1 + $0x2964] ss:$16 sps:$4 sm:$0xff]  }
 0x4f4   :  { %10628 = vmatprep.subr.bf16.mxu0 %v15993_v50  ;;  %11653 = vmatprep.subr.bf16.mxu1 %v15996_v33  ;;  %v16080_v50 = vld [vmem:[%s21637_s1 + $0x296c] ss:$16 sps:$4 sm:$0xff]   ;;  %v16075_v33 = vld [vmem:[%s21637_s1 + $0x2960] ss:$16 sps:$4 sm:$0xff]  }
 0x4f7   :  { %10629 = vmatpush1.bf16.msra.mxu0 %v15991_v51  ;;  %11654 = vmatpush1.bf16.msra.mxu1 %v15994_v53  ;;  %v16078_v51 = vld [vmem:[%s21637_s1 + $0x2968] ss:$16 sps:$4 sm:$0xff]   ;;  %v16083_v53 = vld [vmem:[%s21637_s1 + $0x2984] ss:$16 sps:$4 sm:$0xff]  }
 0x4f8   :  { %10630 = vmatprep.subr.bf16.mxu0 %v15999_v38  ;;  %11655 = vmatprep.subr.bf16.mxu1 %v16002_v34  ;;  %v16086_v38 = vld [vmem:[%s21637_s1 + $0x298c] ss:$16 sps:$4 sm:$0xff]   ;;  %v16081_v34 = vld [vmem:[%s21637_s1 + $0x2980] ss:$16 sps:$4 sm:$0xff]  }
 0x4fb   :  { %10631 = vmatpush1.bf16.msra.mxu0 %v15997_v55  ;;  %11656 = vmatpush1.bf16.msra.mxu1 %v16000_v56  ;;  %v16084_v55 = vld [vmem:[%s21637_s1 + $0x2988] ss:$16 sps:$4 sm:$0xff]   ;;  %v16089_v56 = vld [vmem:[%s21637_s1 + $0x29a4] ss:$16 sps:$4 sm:$0xff]  }
 0x4fc   :  { %10632 = vmatprep.subr.bf16.mxu0 %v16005_v45  ;;  %11657 = vmatprep.subr.bf16.mxu1 %v16008_v58  ;;  %v16092_v45 = vld [vmem:[%s21637_s1 + $0x29ac] ss:$16 sps:$4 sm:$0xff]   ;;  %v16087_v58 = vld [vmem:[%s21637_s1 + $0x29a0] ss:$16 sps:$4 sm:$0xff]  }
 0x4ff   :  { %10633 = vmatpush1.bf16.msra.mxu0 %v16003_v61  ;;  %11658 = vmatpush1.bf16.msra.mxu1 %v16006_v35  ;;  %v16090_v61 = vld [vmem:[%s21637_s1 + $0x29a8] ss:$16 sps:$4 sm:$0xff]   ;;  %v16095_v35 = vld [vmem:[%s21637_s1 + $0x29c4] ss:$16 sps:$4 sm:$0xff]  }
 0x500   :  { %10643 = vmatprep.subr.bf16.mxu0 %v16011_v62  ;;  %11668 = vmatprep.subr.bf16.mxu1 %v16014_v44  ;;  %v16098_v62 = vld [vmem:[%s21637_s1 + $0x29cc] ss:$16 sps:$4 sm:$0xff]   ;;  %v16093_v44 = vld [vmem:[%s21637_s1 + $0x29c0] ss:$16 sps:$4 sm:$0xff]  }
 0x502   :  { %10635 = vmatmul.mubr.bf16.vlgmr.msra.gmra.mrb[0].mxu0 %v1868_v47  ;;  %11660 = vmatmul.mubr.bf16.vlgmr.msra.gmra.mrb[0].mxu1 %v1868_v47  ;;  %v16101_v47 = vld [vmem:[%s21637_s1 + $0x29e4] ss:$16 sps:$4 sm:$0xff]  }
 0x503   :  { %10644 = vmatpush1.bf16.msra.mxu0 %v16009_v1  ;;  %11669 = vmatpush1.bf16.msra.mxu1 %v16012_v2  ;;  %v16104_v1 = vld [vmem:[%s21637_s1 + $0x29ec] ss:$16 sps:$4 sm:$0xff]   ;;  %v16099_v2 = vld [vmem:[%s21637_s1 + $0x29e0] ss:$16 sps:$4 sm:$0xff]  }
 0x504   :  { %10645 = vmatprep.subr.bf16.mxu0 %v16017_v59  ;;  %11670 = vmatprep.subr.bf16.mxu1 %v16020_v57  ;;  %v16102_v59 = vld [vmem:[%s21637_s1 + $0x29e8] ss:$16 sps:$4 sm:$0xff]   ;;  %v16107_v57 = vld [vmem:[%s21637_s1 + $0x2a04] ss:$16 sps:$4 sm:$0xff]  }
 0x505   :  { %10675 = vmatprep.mubr.bf16.mxu0 %v20632_v3  ;;  %11700 = vmatprep.mubr.bf16.mxu1 %v20632_v3 }
 0x507   :  { %10646 = vmatpush1.bf16.msra.mxu0 %v16015_v5  ;;  %11671 = vmatpush1.bf16.msra.mxu1 %v16018_v6  ;;  %v16110_v5 = vld [vmem:[%s21637_s1 + $0x2a0c] ss:$16 sps:$4 sm:$0xff]   ;;  %v20818_v6 = vrot.slane %v20601_v48, %v16672_v49 }
 0x508   :  { %10647 = vmatprep.subr.bf16.mxu0 %v16023_v60  ;;  %11672 = vmatprep.subr.bf16.mxu1 %v16026_v9  ;;  %v16105_v60 = vld [vmem:[%s21637_s1 + $0x2a00] ss:$16 sps:$4 sm:$0xff]   ;;  %v16108_v9 = vld [vmem:[%s21637_s1 + $0x2a08] ss:$16 sps:$4 sm:$0xff]   ;;  %v16116_v48 = vld [vmem:[%s21637_s1 + $0x2a2c] ss:$16 sps:$4 sm:$0xff]  }
 0x50b   :  { %10648 = vmatpush1.bf16.msra.mxu0 %v16021_v10  ;;  %11673 = vmatpush1.bf16.msra.mxu1 %v16024_v11  ;;  %v16113_v10 = vld [vmem:[%s21637_s1 + $0x2a24] ss:$16 sps:$4 sm:$0xff]   ;;  %v1918_v11 = vcombine.high %v20632_v3, %v20632_v3 }
 0x50c   :  { %10649 = vmatprep.subr.bf16.mxu0 %v16029_v63  ;;  %11674 = vmatprep.subr.bf16.mxu1 %v16032_v12  ;;  %v16111_v63 = vld [vmem:[%s21637_s1 + $0x2a20] ss:$16 sps:$4 sm:$0xff]   ;;  %v16114_v12 = vld [vmem:[%s21637_s1 + $0x2a28] ss:$16 sps:$4 sm:$0xff]   ;;  %v16119_v3 = vld [vmem:[%s21637_s1 + $0x2a44] ss:$16 sps:$4 sm:$0xff]  }
 0x50f   :  { %10650 = vmatpush1.bf16.msra.mxu0 %v16027_v52  ;;  %11675 = vmatpush1.bf16.msra.mxu1 %v16030_v15  ;;  %v16122_v52 = vld [vmem:[%s21637_s1 + $0x2a4c] ss:$16 sps:$4 sm:$0xff]   ;;  %v16117_v15 = vld [vmem:[%s21637_s1 + $0x2a40] ss:$16 sps:$4 sm:$0xff]  }
 0x510   :  { %10651 = vmatprep.subr.bf16.mxu0 %v16035_v7  ;;  %11676 = vmatprep.subr.bf16.mxu1 %v16038_v16  ;;  %v16120_v7 = vld [vmem:[%s21637_s1 + $0x2a48] ss:$16 sps:$4 sm:$0xff]   ;;  %v16125_v16 = vld [vmem:[%s21637_s1 + $0x2a64] ss:$16 sps:$4 sm:$0xff]  }
 0x513   :  { %10652 = vmatpush1.bf16.msra.mxu0 %v16033_v17  ;;  %11677 = vmatpush1.bf16.msra.mxu1 %v16036_v8  ;;  %v16128_v17 = vld [vmem:[%s21637_s1 + $0x2a6c] ss:$16 sps:$4 sm:$0xff]   ;;  %v16123_v8 = vld [vmem:[%s21637_s1 + $0x2a60] ss:$16 sps:$4 sm:$0xff]  }
 0x514   :  { %10653 = vmatprep.subr.bf16.mxu0 %v16041_v20  ;;  %11678 = vmatprep.subr.bf16.mxu1 %v16044_v22  ;;  %v16126_v20 = vld [vmem:[%s21637_s1 + $0x2a68] ss:$16 sps:$4 sm:$0xff]   ;;  %v16131_v22 = vld [vmem:[%s21637_s1 + $0x2a84] ss:$16 sps:$4 sm:$0xff]  }
 0x517   :  { %10654 = vmatpush1.bf16.msra.mxu0 %v16039_v4  ;;  %11679 = vmatpush1.bf16.msra.mxu1 %v16042_v24  ;;  %v16134_v4 = vld [vmem:[%s21637_s1 + $0x2a8c] ss:$16 sps:$4 sm:$0xff]   ;;  %v16129_v24 = vld [vmem:[%s21637_s1 + $0x2a80] ss:$16 sps:$4 sm:$0xff]  }
 0x518   :  { %10655 = vmatprep.subr.bf16.mxu0 %v16047_v13  ;;  %11680 = vmatprep.subr.bf16.mxu1 %v16050_v27  ;;  %v16132_v13 = vld [vmem:[%s21637_s1 + $0x2a88] ss:$16 sps:$4 sm:$0xff]   ;;  %v16137_v27 = vld [vmem:[%s21637_s1 + $0x2aa4] ss:$16 sps:$4 sm:$0xff]  }
 0x51b   :  { %10656 = vmatpush1.bf16.msra.mxu0 %v16045_v18  ;;  %11681 = vmatpush1.bf16.msra.mxu1 %v16048_v28  ;;  %v16140_v18 = vld [vmem:[%s21637_s1 + $0x2aac] ss:$16 sps:$4 sm:$0xff]   ;;  %v16135_v28 = vld [vmem:[%s21637_s1 + $0x2aa0] ss:$16 sps:$4 sm:$0xff]  }
 0x51c   :  { %10657 = vmatprep.subr.bf16.mxu0 %v16053_v14  ;;  %11682 = vmatprep.subr.bf16.mxu1 %v16056_v30  ;;  %v16138_v14 = vld [vmem:[%s21637_s1 + $0x2aa8] ss:$16 sps:$4 sm:$0xff]   ;;  %v16143_v30 = vld [vmem:[%s21637_s1 + $0x2ac4] ss:$16 sps:$4 sm:$0xff]  }
 0x51f   :  { %10658 = vmatpush1.bf16.msra.mxu0 %v16051_v19  ;;  %11683 = vmatpush1.bf16.msra.mxu1 %v16054_v32  ;;  %v16146_v19 = vld [vmem:[%s21637_s1 + $0x2acc] ss:$16 sps:$4 sm:$0xff]   ;;  %v16141_v32 = vld [vmem:[%s21637_s1 + $0x2ac0] ss:$16 sps:$4 sm:$0xff]  }
 0x520   :  { %10659 = vmatprep.subr.bf16.mxu0 %v16059_v26  ;;  %11684 = vmatprep.subr.bf16.mxu1 %v16062_v23  ;;  %v16144_v26 = vld [vmem:[%s21637_s1 + $0x2ac8] ss:$16 sps:$4 sm:$0xff]   ;;  %v16149_v23 = vld [vmem:[%s21637_s1 + $0x2ae4] ss:$16 sps:$4 sm:$0xff]  }
 0x523   :  { %10660 = vmatpush1.bf16.msra.mxu0 %v16057_v36  ;;  %11685 = vmatpush1.bf16.msra.mxu1 %v16060_v37  ;;  %v16152_v36 = vld [vmem:[%s21637_s1 + $0x2aec] ss:$16 sps:$4 sm:$0xff]   ;;  %v16147_v37 = vld [vmem:[%s21637_s1 + $0x2ae0] ss:$16 sps:$4 sm:$0xff]  }
 0x524   :  { %10661 = vmatprep.subr.bf16.mxu0 %v16065_v21  ;;  %11686 = vmatprep.subr.bf16.mxu1 %v16068_v31  ;;  %v16150_v21 = vld [vmem:[%s21637_s1 + $0x2ae8] ss:$16 sps:$4 sm:$0xff]   ;;  %v16155_v31 = vld [vmem:[%s21637_s1 + $0x2b04] ss:$16 sps:$4 sm:$0xff]  }
 0x527   :  { %10662 = vmatpush1.bf16.msra.mxu0 %v16063_v39  ;;  %11687 = vmatpush1.bf16.msra.mxu1 %v16066_v40  ;;  %v16158_v39 = vld [vmem:[%s21637_s1 + $0x2b0c] ss:$16 sps:$4 sm:$0xff]   ;;  %v16153_v40 = vld [vmem:[%s21637_s1 + $0x2b00] ss:$16 sps:$4 sm:$0xff]  }
 0x528   :  { %10663 = vmatprep.subr.bf16.mxu0 %v16071_v41  ;;  %11688 = vmatprep.subr.bf16.mxu1 %v16074_v25  ;;  %v16156_v41 = vld [vmem:[%s21637_s1 + $0x2b08] ss:$16 sps:$4 sm:$0xff]   ;;  %v16161_v25 = vld [vmem:[%s21637_s1 + $0x2b24] ss:$16 sps:$4 sm:$0xff]  }
 0x52b   :  { %10664 = vmatpush1.bf16.msra.mxu0 %v16069_v43  ;;  %11689 = vmatpush1.bf16.msra.mxu1 %v16072_v46  ;;  %v16164_v43 = vld [vmem:[%s21637_s1 + $0x2b2c] ss:$16 sps:$4 sm:$0xff]   ;;  %v16159_v46 = vld [vmem:[%s21637_s1 + $0x2b20] ss:$16 sps:$4 sm:$0xff]  }
 0x52c   :  { %10665 = vmatprep.subr.bf16.mxu0 %v16077_v29  ;;  %11690 = vmatprep.subr.bf16.mxu1 %v16080_v50  ;;  %v16162_v29 = vld [vmem:[%s21637_s1 + $0x2b28] ss:$16 sps:$4 sm:$0xff]   ;;  %v16167_v50 = vld [vmem:[%s21637_s1 + $0x2b44] ss:$16 sps:$4 sm:$0xff]  }
 0x52f   :  { %10666 = vmatpush1.bf16.msra.mxu0 %v16075_v33  ;;  %11691 = vmatpush1.bf16.msra.mxu1 %v16078_v51  ;;  %v16170_v33 = vld [vmem:[%s21637_s1 + $0x2b4c] ss:$16 sps:$4 sm:$0xff]   ;;  %v16165_v51 = vld [vmem:[%s21637_s1 + $0x2b40] ss:$16 sps:$4 sm:$0xff]  }
 0x530   :  { %10667 = vmatprep.subr.bf16.mxu0 %v16083_v53  ;;  %11692 = vmatprep.subr.bf16.mxu1 %v16086_v38  ;;  %v16168_v53 = vld [vmem:[%s21637_s1 + $0x2b48] ss:$16 sps:$4 sm:$0xff]   ;;  %v16173_v38 = vld [vmem:[%s21637_s1 + $0x2b64] ss:$16 sps:$4 sm:$0xff]  }
 0x533   :  { %10668 = vmatpush1.bf16.msra.mxu0 %v16081_v34  ;;  %11693 = vmatpush1.bf16.msra.mxu1 %v16084_v55  ;;  %v16176_v34 = vld [vmem:[%s21637_s1 + $0x2b6c] ss:$16 sps:$4 sm:$0xff]   ;;  %v16171_v55 = vld [vmem:[%s21637_s1 + $0x2b60] ss:$16 sps:$4 sm:$0xff]  }
 0x534   :  { %10669 = vmatprep.subr.bf16.mxu0 %v16089_v56  ;;  %11694 = vmatprep.subr.bf16.mxu1 %v16092_v45  ;;  %v16174_v56 = vld [vmem:[%s21637_s1 + $0x2b68] ss:$16 sps:$4 sm:$0xff]   ;;  %v16179_v45 = vld [vmem:[%s21637_s1 + $0x2b84] ss:$16 sps:$4 sm:$0xff]  }
 0x537   :  { %10670 = vmatpush1.bf16.msra.mxu0 %v16087_v58  ;;  %11695 = vmatpush1.bf16.msra.mxu1 %v16090_v61  ;;  %v16182_v58 = vld [vmem:[%s21637_s1 + $0x2b8c] ss:$16 sps:$4 sm:$0xff]   ;;  %v16177_v61 = vld [vmem:[%s21637_s1 + $0x2b80] ss:$16 sps:$4 sm:$0xff]  }
 0x538   :  { %10671 = vmatprep.subr.bf16.mxu0 %v16095_v35  ;;  %11696 = vmatprep.subr.bf16.mxu1 %v16098_v62  ;;  %v16180_v35 = vld [vmem:[%s21637_s1 + $0x2b88] ss:$16 sps:$4 sm:$0xff]   ;;  %v16185_v62 = vld [vmem:[%s21637_s1 + $0x2ba4] ss:$16 sps:$4 sm:$0xff]  }
 0x53b   :  { %10672 = vmatpush1.bf16.msra.mxu0 %v16093_v44  ;;  %11697 = vmatpush1.bf16.msra.mxu1 %v16096_v0  ;;  %v16188_v44 = vld [vmem:[%s21637_s1 + $0x2bac] ss:$16 sps:$4 sm:$0xff]   ;;  %v16183_v0 = vld [vmem:[%s21637_s1 + $0x2ba0] ss:$16 sps:$4 sm:$0xff]  }
 0x53c   :  { %10673 = vmatprep.subr.bf16.mxu0 %v16101_v47  ;;  %11698 = vmatprep.subr.bf16.mxu1 %v16104_v1  ;;  %v16186_v47 = vld [vmem:[%s21637_s1 + $0x2ba8] ss:$16 sps:$4 sm:$0xff]   ;;  %v16191_v1 = vld [vmem:[%s21637_s1 + $0x2bc4] ss:$16 sps:$4 sm:$0xff]  }
 0x53f   :  { %10674 = vmatpush1.bf16.msra.mxu0 %v16099_v2  ;;  %11699 = vmatpush1.bf16.msra.mxu1 %v16102_v59  ;;  %v16194_v2 = vld [vmem:[%s21637_s1 + $0x2bcc] ss:$16 sps:$4 sm:$0xff]   ;;  %v1871_v59 = vcombine.high %v20585_v54, %v20585_v54 }
 0x540   :  { %10684 = vmatprep.subr.bf16.mxu0 %v16107_v57  ;;  %11709 = vmatprep.subr.bf16.mxu1 %v16110_v5  ;;  %v16189_v57 = vld [vmem:[%s21637_s1 + $0x2bc0] ss:$16 sps:$4 sm:$0xff]   ;;  %v16192_v5 = vld [vmem:[%s21637_s1 + $0x2bc8] ss:$16 sps:$4 sm:$0xff]   ;;  %v16200_v54 = vld [vmem:[%s21637_s1 + $0x2bec] ss:$16 sps:$4 sm:$0xff]  }
 0x542   :  { %10676 = vmatmul.mubr.bf16.vlgmr.msra.gmra.mrb[0].mxu0 %v20818_v6  ;;  %11701 = vmatmul.mubr.bf16.vlgmr.msra.gmra.mrb[0].mxu1 %v20818_v6 }
 0x543   :  { %10685 = vmatpush1.bf16.msra.mxu0 %v16105_v60  ;;  %11710 = vmatpush1.bf16.msra.mxu1 %v16108_v9  ;;  %v16197_v60 = vld [vmem:[%s21637_s1 + $0x2be4] ss:$16 sps:$4 sm:$0xff]   ;;  %v21007_v9 = vrot.slane %v1871_v59, %v16672_v49  ;;  %v16276_v59 = vld [vmem:[%s21637_s1 + $0x2d88] ss:$16 sps:$4 sm:$0xff]  }
 0x544   :  { %10686 = vmatprep.subr.bf16.mxu0 %v16113_v10  ;;  %11711 = vmatprep.subr.bf16.mxu1 %v16116_v48  ;;  %v16195_v10 = vld [vmem:[%s21637_s1 + $0x2be0] ss:$16 sps:$4 sm:$0xff]   ;;  %v16198_v48 = vld [vmem:[%s21637_s1 + $0x2be8] ss:$16 sps:$4 sm:$0xff]  }
 0x545   :  { %10716 = vmatprep.mubr.bf16.mxu0 %v1918_v11  ;;  %11741 = vmatprep.mubr.bf16.mxu1 %v1918_v11  ;;  %v16203_v11 = vld [vmem:[%s21637_s1 + $0x2c04] ss:$16 sps:$4 sm:$0xff]  }
 0x547   :  { %10687 = vmatpush1.bf16.msra.mxu0 %v16111_v63  ;;  %11712 = vmatpush1.bf16.msra.mxu1 %v16114_v12  ;;  %v16206_v63 = vld [vmem:[%s21637_s1 + $0x2c0c] ss:$16 sps:$4 sm:$0xff]   ;;  %v1887_v12 = vcombine.high %v21007_v9, %v21007_v9 }
 0x548   :  { %10688 = vmatprep.subr.bf16.mxu0 %v16119_v3  ;;  %11713 = vmatprep.subr.bf16.mxu1 %v16122_v52  ;;  %v1916_v3 = vcombine.high %v20818_v6, %v20818_v6  ;;  %v16201_v52 = vld [vmem:[%s21637_s1 + $0x2c00] ss:$16 sps:$4 sm:$0xff]   ;;  %v16212_v6 = vld [vmem:[%s21637_s1 + $0x2c2c] ss:$16 sps:$4 sm:$0xff]  }
 0x54b   :  { %10689 = vmatpush1.bf16.msra.mxu0 %v16117_v15  ;;  %11714 = vmatpush1.bf16.msra.mxu1 %v16120_v7  ;;  %v16204_v15 = vld [vmem:[%s21637_s1 + $0x2c08] ss:$16 sps:$4 sm:$0xff]   ;;  %v16209_v7 = vld [vmem:[%s21637_s1 + $0x2c24] ss:$16 sps:$4 sm:$0xff]  }
 0x54c   :  { %10690 = vmatprep.subr.bf16.mxu0 %v16125_v16  ;;  %11715 = vmatprep.subr.bf16.mxu1 %v16128_v17  ;;  %v21038_v16 = vrot.slane %v1887_v12, %v16672_v49  ;;  %v16207_v17 = vld [vmem:[%s21637_s1 + $0x2c20] ss:$16 sps:$4 sm:$0xff]   ;;  %v16293_v12 = vld [vmem:[%s21637_s1 + $0x2de4] ss:$16 sps:$4 sm:$0xff]  }
 0x54f   :  { %10691 = vmatpush1.bf16.msra.mxu0 %v16123_v8  ;;  %11716 = vmatpush1.bf16.msra.mxu1 %v16126_v20  ;;  %v16210_v8 = vld [vmem:[%s21637_s1 + $0x2c28] ss:$16 sps:$4 sm:$0xff]   ;;  %v16215_v20 = vld [vmem:[%s21637_s1 + $0x2c44] ss:$16 sps:$4 sm:$0xff]  }
 0x550   :  { %10692 = vmatprep.subr.bf16.mxu0 %v16131_v22  ;;  %11717 = vmatprep.subr.bf16.mxu1 %v16134_v4  ;;  %v16218_v22 = vld [vmem:[%s21637_s1 + $0x2c4c] ss:$16 sps:$4 sm:$0xff]   ;;  %v16213_v4 = vld [vmem:[%s21637_s1 + $0x2c40] ss:$16 sps:$4 sm:$0xff]  }
 0x553   :  { %10693 = vmatpush1.bf16.msra.mxu0 %v16129_v24  ;;  %11718 = vmatpush1.bf16.msra.mxu1 %v16132_v13  ;;  %v16216_v24 = vld [vmem:[%s21637_s1 + $0x2c48] ss:$16 sps:$4 sm:$0xff]   ;;  %v16221_v13 = vld [vmem:[%s21637_s1 + $0x2c64] ss:$16 sps:$4 sm:$0xff]  }
 0x554   :  { %10694 = vmatprep.subr.bf16.mxu0 %v16137_v27  ;;  %11719 = vmatprep.subr.bf16.mxu1 %v16140_v18  ;;  %v16224_v27 = vld [vmem:[%s21637_s1 + $0x2c6c] ss:$16 sps:$4 sm:$0xff]   ;;  %v16219_v18 = vld [vmem:[%s21637_s1 + $0x2c60] ss:$16 sps:$4 sm:$0xff]  }
 0x557   :  { %10695 = vmatpush1.bf16.msra.mxu0 %v16135_v28  ;;  %11720 = vmatpush1.bf16.msra.mxu1 %v16138_v14  ;;  %v16222_v28 = vld [vmem:[%s21637_s1 + $0x2c68] ss:$16 sps:$4 sm:$0xff]   ;;  %v16227_v14 = vld [vmem:[%s21637_s1 + $0x2c84] ss:$16 sps:$4 sm:$0xff]  }
 0x558   :  { %10696 = vmatprep.subr.bf16.mxu0 %v16143_v30  ;;  %11721 = vmatprep.subr.bf16.mxu1 %v16146_v19  ;;  %v16230_v30 = vld [vmem:[%s21637_s1 + $0x2c8c] ss:$16 sps:$4 sm:$0xff]   ;;  %v16225_v19 = vld [vmem:[%s21637_s1 + $0x2c80] ss:$16 sps:$4 sm:$0xff]  }
 0x55b   :  { %10697 = vmatpush1.bf16.msra.mxu0 %v16141_v32  ;;  %11722 = vmatpush1.bf16.msra.mxu1 %v16144_v26  ;;  %v16228_v32 = vld [vmem:[%s21637_s1 + $0x2c88] ss:$16 sps:$4 sm:$0xff]   ;;  %v16233_v26 = vld [vmem:[%s21637_s1 + $0x2ca4] ss:$16 sps:$4 sm:$0xff]  }
 0x55c   :  { %10698 = vmatprep.subr.bf16.mxu0 %v16149_v23  ;;  %11723 = vmatprep.subr.bf16.mxu1 %v16152_v36  ;;  %v16236_v23 = vld [vmem:[%s21637_s1 + $0x2cac] ss:$16 sps:$4 sm:$0xff]   ;;  %v16231_v36 = vld [vmem:[%s21637_s1 + $0x2ca0] ss:$16 sps:$4 sm:$0xff]  }
 0x55f   :  { %10699 = vmatpush1.bf16.msra.mxu0 %v16147_v37  ;;  %11724 = vmatpush1.bf16.msra.mxu1 %v16150_v21  ;;  %v16234_v37 = vld [vmem:[%s21637_s1 + $0x2ca8] ss:$16 sps:$4 sm:$0xff]   ;;  %v16239_v21 = vld [vmem:[%s21637_s1 + $0x2cc4] ss:$16 sps:$4 sm:$0xff]  }
 0x560   :  { %10700 = vmatprep.subr.bf16.mxu0 %v16155_v31  ;;  %11725 = vmatprep.subr.bf16.mxu1 %v16158_v39  ;;  %v16242_v31 = vld [vmem:[%s21637_s1 + $0x2ccc] ss:$16 sps:$4 sm:$0xff]   ;;  %v16237_v39 = vld [vmem:[%s21637_s1 + $0x2cc0] ss:$16 sps:$4 sm:$0xff]  }
 0x563   :  { %10701 = vmatpush1.bf16.msra.mxu0 %v16153_v40  ;;  %11726 = vmatpush1.bf16.msra.mxu1 %v16156_v41  ;;  %v16240_v40 = vld [vmem:[%s21637_s1 + $0x2cc8] ss:$16 sps:$4 sm:$0xff]   ;;  %v16245_v41 = vld [vmem:[%s21637_s1 + $0x2ce4] ss:$16 sps:$4 sm:$0xff]  }
 0x564   :  { %10702 = vmatprep.subr.bf16.mxu0 %v16161_v25  ;;  %11727 = vmatprep.subr.bf16.mxu1 %v16164_v43  ;;  %v16248_v25 = vld [vmem:[%s21637_s1 + $0x2cec] ss:$16 sps:$4 sm:$0xff]   ;;  %v16243_v43 = vld [vmem:[%s21637_s1 + $0x2ce0] ss:$16 sps:$4 sm:$0xff]  }
 0x567   :  { %10703 = vmatpush1.bf16.msra.mxu0 %v16159_v46  ;;  %11728 = vmatpush1.bf16.msra.mxu1 %v16162_v29  ;;  %v16246_v46 = vld [vmem:[%s21637_s1 + $0x2ce8] ss:$16 sps:$4 sm:$0xff]   ;;  %v16251_v29 = vld [vmem:[%s21637_s1 + $0x2d04] ss:$16 sps:$4 sm:$0xff]  }
 0x568   :  { %10704 = vmatprep.subr.bf16.mxu0 %v16167_v50  ;;  %11729 = vmatprep.subr.bf16.mxu1 %v16170_v33  ;;  %v16254_v50 = vld [vmem:[%s21637_s1 + $0x2d0c] ss:$16 sps:$4 sm:$0xff]   ;;  %v16249_v33 = vld [vmem:[%s21637_s1 + $0x2d00] ss:$16 sps:$4 sm:$0xff]  }
 0x56b   :  { %10705 = vmatpush1.bf16.msra.mxu0 %v16165_v51  ;;  %11730 = vmatpush1.bf16.msra.mxu1 %v16168_v53  ;;  %v16252_v51 = vld [vmem:[%s21637_s1 + $0x2d08] ss:$16 sps:$4 sm:$0xff]   ;;  %v16257_v53 = vld [vmem:[%s21637_s1 + $0x2d24] ss:$16 sps:$4 sm:$0xff]  }
 0x56c   :  { %10706 = vmatprep.subr.bf16.mxu0 %v16173_v38  ;;  %11731 = vmatprep.subr.bf16.mxu1 %v16176_v34  ;;  %v16260_v38 = vld [vmem:[%s21637_s1 + $0x2d2c] ss:$16 sps:$4 sm:$0xff]   ;;  %v16255_v34 = vld [vmem:[%s21637_s1 + $0x2d20] ss:$16 sps:$4 sm:$0xff]  }
 0x56f   :  { %10707 = vmatpush1.bf16.msra.mxu0 %v16171_v55  ;;  %11732 = vmatpush1.bf16.msra.mxu1 %v16174_v56  ;;  %v16258_v55 = vld [vmem:[%s21637_s1 + $0x2d28] ss:$16 sps:$4 sm:$0xff]   ;;  %v16263_v56 = vld [vmem:[%s21637_s1 + $0x2d44] ss:$16 sps:$4 sm:$0xff]  }
 0x570   :  { %10708 = vmatprep.subr.bf16.mxu0 %v16179_v45  ;;  %11733 = vmatprep.subr.bf16.mxu1 %v16182_v58  ;;  %v16266_v45 = vld [vmem:[%s21637_s1 + $0x2d4c] ss:$16 sps:$4 sm:$0xff]   ;;  %v16261_v58 = vld [vmem:[%s21637_s1 + $0x2d40] ss:$16 sps:$4 sm:$0xff]  }
 0x573   :  { %10709 = vmatpush1.bf16.msra.mxu0 %v16177_v61  ;;  %11734 = vmatpush1.bf16.msra.mxu1 %v16180_v35  ;;  %v16264_v61 = vld [vmem:[%s21637_s1 + $0x2d48] ss:$16 sps:$4 sm:$0xff]   ;;  %v16269_v35 = vld [vmem:[%s21637_s1 + $0x2d64] ss:$16 sps:$4 sm:$0xff]  }
 0x574   :  { %10710 = vmatprep.subr.bf16.mxu0 %v16185_v62  ;;  %11735 = vmatprep.subr.bf16.mxu1 %v16188_v44  ;;  %v16272_v62 = vld [vmem:[%s21637_s1 + $0x2d6c] ss:$16 sps:$4 sm:$0xff]   ;;  %v16267_v44 = vld [vmem:[%s21637_s1 + $0x2d60] ss:$16 sps:$4 sm:$0xff]  }
 0x577   :  { %10711 = vmatpush1.bf16.msra.mxu0 %v16183_v0  ;;  %11736 = vmatpush1.bf16.msra.mxu1 %v16186_v47  ;;  %v16270_v0 = vld [vmem:[%s21637_s1 + $0x2d68] ss:$16 sps:$4 sm:$0xff]   ;;  %v16275_v47 = vld [vmem:[%s21637_s1 + $0x2d84] ss:$16 sps:$4 sm:$0xff]  }
 0x578   :  { %10712 = vmatprep.subr.bf16.mxu0 %v16191_v1  ;;  %11737 = vmatprep.subr.bf16.mxu1 %v16194_v2  ;;  %v16278_v1 = vld [vmem:[%s21637_s1 + $0x2d8c] ss:$16 sps:$4 sm:$0xff]   ;;  %v16273_v2 = vld [vmem:[%s21637_s1 + $0x2d80] ss:$16 sps:$4 sm:$0xff]  }
 0x57b   :  { %10713 = vmatpush1.bf16.msra.mxu0 %v16189_v57  ;;  %11738 = vmatpush1.bf16.msra.mxu1 %v16192_v5  ;;  %v16281_v57 = vld [vmem:[%s21637_s1 + $0x2da4] ss:$16 sps:$4 sm:$0xff]   ;;  %v16284_v5 = vld [vmem:[%s21637_s1 + $0x2dac] ss:$16 sps:$4 sm:$0xff]  }
 0x57c   :  { %10714 = vmatprep.subr.bf16.mxu0 %v16197_v60  ;;  %11739 = vmatprep.subr.bf16.mxu1 %v16200_v54  ;;  %v16279_v60 = vld [vmem:[%s21637_s1 + $0x2da0] ss:$16 sps:$4 sm:$0xff]   ;;  %v16282_v54 = vld [vmem:[%s21637_s1 + $0x2da8] ss:$16 sps:$4 sm:$0xff]  }
 0x57f   :  { %10715 = vmatpush1.bf16.msra.mxu0 %v16195_v10  ;;  %11740 = vmatpush1.bf16.msra.mxu1 %v16198_v48  ;;  %v16287_v10 = vld [vmem:[%s21637_s1 + $0x2dc4] ss:$16 sps:$4 sm:$0xff]   ;;  %v16290_v48 = vld [vmem:[%s21637_s1 + $0x2dcc] ss:$16 sps:$4 sm:$0xff]  }
 0x580   :  { %10725 = vmatprep.subr.bf16.mxu0 %v16203_v11  ;;  %11750 = vmatprep.subr.bf16.mxu1 %v16206_v63  ;;  %v16285_v11 = vld [vmem:[%s21637_s1 + $0x2dc0] ss:$16 sps:$4 sm:$0xff]   ;;  %v16288_v63 = vld [vmem:[%s21637_s1 + $0x2dc8] ss:$16 sps:$4 sm:$0xff]  }
 0x582   :  { %10717 = vmatmul.mubr.bf16.vlgmr.msra.gmra.mrb[0].mxu0 %v1916_v3  ;;  %11742 = vmatmul.mubr.bf16.vlgmr.msra.gmra.mrb[0].mxu1 %v1916_v3  ;;  %v16296_v3 = vld [vmem:[%s21637_s1 + $0x2dec] ss:$16 sps:$4 sm:$0xff]  }
 0x583   :  { %10726 = vmatpush1.bf16.msra.mxu0 %v16201_v52  ;;  %11751 = vmatpush1.bf16.msra.mxu1 %v16204_v15  ;;  %v16291_v52 = vld [vmem:[%s21637_s1 + $0x2de0] ss:$16 sps:$4 sm:$0xff]   ;;  %v16294_v15 = vld [vmem:[%s21637_s1 + $0x2de8] ss:$16 sps:$4 sm:$0xff]  }
 0x584   :  { %10727 = vmatprep.subr.bf16.mxu0 %v16209_v7  ;;  %11752 = vmatprep.subr.bf16.mxu1 %v16212_v6  ;;  %v16300_v7 = vld [vmem:[%s21637_s1 + $0x2e04] ss:$16 sps:$4 sm:$0xff]   ;;  %v16303_v6 = vld [vmem:[%s21637_s1 + $0x2e0c] ss:$16 sps:$4 sm:$0xff]  }
 0x585   :  { %10757 = vmatprep.mubr.bf16.mxu0 %v21038_v16  ;;  %11782 = vmatprep.mubr.bf16.mxu1 %v21038_v16 }
 0x587   :  { %10728 = vmatpush1.bf16.msra.mxu0 %v16207_v17  ;;  %11753 = vmatpush1.bf16.msra.mxu1 %v16210_v8  ;;  %v21224_v17 = vrot.slane %v21007_v9, %v16672_v49  ;;  %v16298_v8 = vld [vmem:[%s21637_s1 + $0x2e00] ss:$16 sps:$4 sm:$0xff]   ;;  %v16309_v9 = vld [vmem:[%s21637_s1 + $0x2e2c] ss:$16 sps:$4 sm:$0xff]  }
 0x588   :  { %10729 = vmatprep.subr.bf16.mxu0 %v16215_v20  ;;  %11754 = vmatprep.subr.bf16.mxu1 %v16218_v22  ;;  %v16301_v20 = vld [vmem:[%s21637_s1 + $0x2e08] ss:$16 sps:$4 sm:$0xff]   ;;  %v16306_v22 = vld [vmem:[%s21637_s1 + $0x2e24] ss:$16 sps:$4 sm:$0xff]  }
 0x58b   :  { %10730 = vmatpush1.bf16.msra.mxu0 %v16213_v4  ;;  %11755 = vmatpush1.bf16.msra.mxu1 %v16216_v24  ;;  %v1919_v4 = vcombine.high %v21038_v16, %v21038_v16  ;;  %v16304_v24 = vld [vmem:[%s21637_s1 + $0x2e20] ss:$16 sps:$4 sm:$0xff]   ;;  %v16312_v16 = vld [vmem:[%s21637_s1 + $0x2e44] ss:$16 sps:$4 sm:$0xff]  }
 0x58c   :  { %10731 = vmatprep.subr.bf16.mxu0 %v16221_v13  ;;  %11756 = vmatprep.subr.bf16.mxu1 %v16224_v27  ;;  %v16307_v13 = vld [vmem:[%s21637_s1 + $0x2e28] ss:$16 sps:$4 sm:$0xff]   ;;  %v16315_v27 = vld [vmem:[%s21637_s1 + $0x2e4c] ss:$16 sps:$4 sm:$0xff]  }
 0x58f   :  { %10732 = vmatpush1.bf16.msra.mxu0 %v16219_v18  ;;  %11757 = vmatpush1.bf16.msra.mxu1 %v16222_v28  ;;  %v16310_v18 = vld [vmem:[%s21637_s1 + $0x2e40] ss:$16 sps:$4 sm:$0xff]   ;;  %v16313_v28 = vld [vmem:[%s21637_s1 + $0x2e48] ss:$16 sps:$4 sm:$0xff]  }
 0x590   :  { %10733 = vmatprep.subr.bf16.mxu0 %v16227_v14  ;;  %11758 = vmatprep.subr.bf16.mxu1 %v16230_v30  ;;  %v16318_v14 = vld [vmem:[%s21637_s1 + $0x2e64] ss:$16 sps:$4 sm:$0xff]   ;;  %v16321_v30 = vld [vmem:[%s21637_s1 + $0x2e6c] ss:$16 sps:$4 sm:$0xff]  }
 0x593   :  { %10734 = vmatpush1.bf16.msra.mxu0 %v16225_v19  ;;  %11759 = vmatpush1.bf16.msra.mxu1 %v16228_v32  ;;  %v16316_v19 = vld [vmem:[%s21637_s1 + $0x2e60] ss:$16 sps:$4 sm:$0xff]   ;;  %v16319_v32 = vld [vmem:[%s21637_s1 + $0x2e68] ss:$16 sps:$4 sm:$0xff]  }
 0x594   :  { %10735 = vmatprep.subr.bf16.mxu0 %v16233_v26  ;;  %11760 = vmatprep.subr.bf16.mxu1 %v16236_v23  ;;  %v16324_v26 = vld [vmem:[%s21637_s1 + $0x2e84] ss:$16 sps:$4 sm:$0xff]   ;;  %v16327_v23 = vld [vmem:[%s21637_s1 + $0x2e8c] ss:$16 sps:$4 sm:$0xff]  }
 0x597   :  { %10736 = vmatpush1.bf16.msra.mxu0 %v16231_v36  ;;  %11761 = vmatpush1.bf16.msra.mxu1 %v16234_v37  ;;  %v16322_v36 = vld [vmem:[%s21637_s1 + $0x2e80] ss:$16 sps:$4 sm:$0xff]   ;;  %v16325_v37 = vld [vmem:[%s21637_s1 + $0x2e88] ss:$16 sps:$4 sm:$0xff]  }
 0x598   :  { %10737 = vmatprep.subr.bf16.mxu0 %v16239_v21  ;;  %11762 = vmatprep.subr.bf16.mxu1 %v16242_v31  ;;  %v16330_v21 = vld [vmem:[%s21637_s1 + $0x2ea4] ss:$16 sps:$4 sm:$0xff]   ;;  %v16333_v31 = vld [vmem:[%s21637_s1 + $0x2eac] ss:$16 sps:$4 sm:$0xff]  }
 0x59b   :  { %10738 = vmatpush1.bf16.msra.mxu0 %v16237_v39  ;;  %11763 = vmatpush1.bf16.msra.mxu1 %v16240_v40  ;;  %v16328_v39 = vld [vmem:[%s21637_s1 + $0x2ea0] ss:$16 sps:$4 sm:$0xff]   ;;  %v16331_v40 = vld [vmem:[%s21637_s1 + $0x2ea8] ss:$16 sps:$4 sm:$0xff]  }
 0x59c   :  { %10739 = vmatprep.subr.bf16.mxu0 %v16245_v41  ;;  %11764 = vmatprep.subr.bf16.mxu1 %v16248_v25  ;;  %v16336_v41 = vld [vmem:[%s21637_s1 + $0x2ec4] ss:$16 sps:$4 sm:$0xff]   ;;  %v16339_v25 = vld [vmem:[%s21637_s1 + $0x2ecc] ss:$16 sps:$4 sm:$0xff]  }
 0x59f   :  { %10740 = vmatpush1.bf16.msra.mxu0 %v16243_v43  ;;  %11765 = vmatpush1.bf16.msra.mxu1 %v16246_v46  ;;  %v16334_v43 = vld [vmem:[%s21637_s1 + $0x2ec0] ss:$16 sps:$4 sm:$0xff]   ;;  %v16337_v46 = vld [vmem:[%s21637_s1 + $0x2ec8] ss:$16 sps:$4 sm:$0xff]  }
 0x5a0   :  { %10741 = vmatprep.subr.bf16.mxu0 %v16251_v29  ;;  %11766 = vmatprep.subr.bf16.mxu1 %v16254_v50  ;;  %v16342_v29 = vld [vmem:[%s21637_s1 + $0x2ee4] ss:$16 sps:$4 sm:$0xff]   ;;  %v16345_v50 = vld [vmem:[%s21637_s1 + $0x2eec] ss:$16 sps:$4 sm:$0xff]  }
 0x5a3   :  { %10742 = vmatpush1.bf16.msra.mxu0 %v16249_v33  ;;  %11767 = vmatpush1.bf16.msra.mxu1 %v16252_v51  ;;  %v16340_v33 = vld [vmem:[%s21637_s1 + $0x2ee0] ss:$16 sps:$4 sm:$0xff]   ;;  %v16343_v51 = vld [vmem:[%s21637_s1 + $0x2ee8] ss:$16 sps:$4 sm:$0xff]  }
 0x5a4   :  { %10743 = vmatprep.subr.bf16.mxu0 %v16257_v53  ;;  %11768 = vmatprep.subr.bf16.mxu1 %v16260_v38  ;;  %v16348_v53 = vld [vmem:[%s21637_s1 + $0x2f04] ss:$16 sps:$4 sm:$0xff]   ;;  %v16351_v38 = vld [vmem:[%s21637_s1 + $0x2f0c] ss:$16 sps:$4 sm:$0xff]  }
 0x5a7   :  { %10744 = vmatpush1.bf16.msra.mxu0 %v16255_v34  ;;  %11769 = vmatpush1.bf16.msra.mxu1 %v16258_v55  ;;  %v16346_v34 = vld [vmem:[%s21637_s1 + $0x2f00] ss:$16 sps:$4 sm:$0xff]   ;;  %v16349_v55 = vld [vmem:[%s21637_s1 + $0x2f08] ss:$16 sps:$4 sm:$0xff]  }
 0x5a8   :  { %10745 = vmatprep.subr.bf16.mxu0 %v16263_v56  ;;  %11770 = vmatprep.subr.bf16.mxu1 %v16266_v45  ;;  %v16354_v56 = vld [vmem:[%s21637_s1 + $0x2f24] ss:$16 sps:$4 sm:$0xff]   ;;  %v16357_v45 = vld [vmem:[%s21637_s1 + $0x2f2c] ss:$16 sps:$4 sm:$0xff]  }
 0x5ab   :  { %10746 = vmatpush1.bf16.msra.mxu0 %v16261_v58  ;;  %11771 = vmatpush1.bf16.msra.mxu1 %v16264_v61  ;;  %v16352_v58 = vld [vmem:[%s21637_s1 + $0x2f20] ss:$16 sps:$4 sm:$0xff]   ;;  %v16355_v61 = vld [vmem:[%s21637_s1 + $0x2f28] ss:$16 sps:$4 sm:$0xff]  }
 0x5ac   :  { %10747 = vmatprep.subr.bf16.mxu0 %v16269_v35  ;;  %11772 = vmatprep.subr.bf16.mxu1 %v16272_v62  ;;  %v16360_v35 = vld [vmem:[%s21637_s1 + $0x2f44] ss:$16 sps:$4 sm:$0xff]   ;;  %v16363_v62 = vld [vmem:[%s21637_s1 + $0x2f4c] ss:$16 sps:$4 sm:$0xff]  }
 0x5af   :  { %10748 = vmatpush1.bf16.msra.mxu0 %v16267_v44  ;;  %11773 = vmatpush1.bf16.msra.mxu1 %v16270_v0  ;;  %v16358_v44 = vld [vmem:[%s21637_s1 + $0x2f40] ss:$16 sps:$4 sm:$0xff]   ;;  %v16361_v0 = vld [vmem:[%s21637_s1 + $0x2f48] ss:$16 sps:$4 sm:$0xff]  }
 0x5b0   :  { %10749 = vmatprep.subr.bf16.mxu0 %v16275_v47  ;;  %11774 = vmatprep.subr.bf16.mxu1 %v16278_v1  ;;  %v16366_v47 = vld [vmem:[%s21637_s1 + $0x2f64] ss:$16 sps:$4 sm:$0xff]   ;;  %v16369_v1 = vld [vmem:[%s21637_s1 + $0x2f6c] ss:$16 sps:$4 sm:$0xff]  }
 0x5b3   :  { %10750 = vmatpush1.bf16.msra.mxu0 %v16273_v2  ;;  %11775 = vmatpush1.bf16.msra.mxu1 %v16276_v59  ;;  %v16364_v2 = vld [vmem:[%s21637_s1 + $0x2f60] ss:$16 sps:$4 sm:$0xff]   ;;  %v16367_v59 = vld [vmem:[%s21637_s1 + $0x2f68] ss:$16 sps:$4 sm:$0xff]  }
 0x5b4   :  { %10751 = vmatprep.subr.bf16.mxu0 %v16281_v57  ;;  %11776 = vmatprep.subr.bf16.mxu1 %v16284_v5  ;;  %v16372_v57 = vld [vmem:[%s21637_s1 + $0x2f84] ss:$16 sps:$4 sm:$0xff]   ;;  %v16375_v5 = vld [vmem:[%s21637_s1 + $0x2f8c] ss:$16 sps:$4 sm:$0xff]  }
 0x5b7   :  { %10752 = vmatpush1.bf16.msra.mxu0 %v16279_v60  ;;  %11777 = vmatpush1.bf16.msra.mxu1 %v16282_v54  ;;  %v16370_v60 = vld [vmem:[%s21637_s1 + $0x2f80] ss:$16 sps:$4 sm:$0xff]   ;;  %v16373_v54 = vld [vmem:[%s21637_s1 + $0x2f88] ss:$16 sps:$4 sm:$0xff]  }
 0x5b8   :  { %10753 = vmatprep.subr.bf16.mxu0 %v16287_v10  ;;  %11778 = vmatprep.subr.bf16.mxu1 %v16290_v48  ;;  %v16378_v10 = vld [vmem:[%s21637_s1 + $0x2fa4] ss:$16 sps:$4 sm:$0xff]   ;;  %v16381_v48 = vld [vmem:[%s21637_s1 + $0x2fac] ss:$16 sps:$4 sm:$0xff]  }
 0x5bb   :  { %10754 = vmatpush1.bf16.msra.mxu0 %v16285_v11  ;;  %11779 = vmatpush1.bf16.msra.mxu1 %v16288_v63  ;;  %v16376_v11 = vld [vmem:[%s21637_s1 + $0x2fa0] ss:$16 sps:$4 sm:$0xff]   ;;  %v16379_v63 = vld [vmem:[%s21637_s1 + $0x2fa8] ss:$16 sps:$4 sm:$0xff]  }
 0x5bc   :  { %10755 = vmatprep.subr.bf16.mxu0 %v16293_v12  ;;  %11780 = vmatprep.subr.bf16.mxu1 %v16296_v3  ;;  %v16384_v12 = vld [vmem:[%s21637_s1 + $0x2fc4] ss:$16 sps:$4 sm:$0xff]   ;;  %v16387_v3 = vld [vmem:[%s21637_s1 + $0x2fcc] ss:$16 sps:$4 sm:$0xff]  }
 0x5bf   :  { %10756 = vmatpush1.bf16.msra.mxu0 %v16291_v52  ;;  %11781 = vmatpush1.bf16.msra.mxu1 %v16294_v15  ;;  %v16382_v52 = vld [vmem:[%s21637_s1 + $0x2fc0] ss:$16 sps:$4 sm:$0xff]   ;;  %v16385_v15 = vld [vmem:[%s21637_s1 + $0x2fc8] ss:$16 sps:$4 sm:$0xff]  }
 0x5c0   :  { %10766 = vmatprep.subr.bf16.mxu0 %v16300_v7  ;;  %11791 = vmatprep.subr.bf16.mxu1 %v16303_v6  ;;  %v16390_v7 = vld [vmem:[%s21637_s1 + $0x2fe4] ss:$16 sps:$4 sm:$0xff]   ;;  %v16393_v6 = vld [vmem:[%s21637_s1 + $0x2fec] ss:$16 sps:$4 sm:$0xff]  }
 0x5c2   :  { %10758 = vmatmul.mubr.bf16.vlgmr.msra.gmra.mrb[0].mxu0 %v21224_v17  ;;  %11783 = vmatmul.mubr.bf16.vlgmr.msra.gmra.mrb[0].mxu1 %v21224_v17 }
 0x5c3   :  { %10767 = vmatpush1.bf16.msra.mxu0 %v16298_v8  ;;  %11792 = vmatpush1.bf16.msra.mxu1 %v16301_v20  ;;  %v16388_v8 = vld [vmem:[%s21637_s1 + $0x2fe0] ss:$16 sps:$4 sm:$0xff]   ;;  %v16391_v20 = vld [vmem:[%s21637_s1 + $0x2fe8] ss:$16 sps:$4 sm:$0xff]  }
 0x5c4   :  { %10768 = vmatprep.subr.bf16.mxu0 %v16306_v22  ;;  %11793 = vmatprep.subr.bf16.mxu1 %v16309_v9  ;;  %v16396_v22 = vld [vmem:[%s21637_s1 + $0x3004] ss:$16 sps:$4 sm:$0xff]   ;;  %v16399_v9 = vld [vmem:[%s21637_s1 + $0x300c] ss:$16 sps:$4 sm:$0xff]  }
 0x5c5   :  { %10798 = vmatprep.mubr.bf16.mxu0 %v1919_v4  ;;  %11823 = vmatprep.mubr.bf16.mxu1 %v1919_v4  ;;  %v1917_v4 = vcombine.high %v21224_v17, %v21224_v17  ;;  %v16405_v17 = vld [vmem:[%s21637_s1 + $0x302c] ss:$16 sps:$4 sm:$0xff]  }
 0x5c7   :  { %10769 = vmatpush1.bf16.msra.mxu0 %v16304_v24  ;;  %11794 = vmatpush1.bf16.msra.mxu1 %v16307_v13  ;;  %v16394_v24 = vld [vmem:[%s21637_s1 + $0x3000] ss:$16 sps:$4 sm:$0xff]   ;;  %v16397_v13 = vld [vmem:[%s21637_s1 + $0x3008] ss:$16 sps:$4 sm:$0xff]  }
 0x5c8   :  { %10770 = vmatprep.subr.bf16.mxu0 %v16312_v16  ;;  %11795 = vmatprep.subr.bf16.mxu1 %v16315_v27  ;;  %v16402_v16 = vld [vmem:[%s21637_s1 + $0x3024] ss:$16 sps:$4 sm:$0xff]   ;;  %v16400_v27 = vld [vmem:[%s21637_s1 + $0x3020] ss:$16 sps:$4 sm:$0xff]  }
 0x5cb   :  { %10771 = vmatpush1.bf16.msra.mxu0 %v16310_v18  ;;  %11796 = vmatpush1.bf16.msra.mxu1 %v16313_v28  ;;  %v16403_v18 = vld [vmem:[%s21637_s1 + $0x3028] ss:$16 sps:$4 sm:$0xff]   ;;  %v16408_v28 = vld [vmem:[%s21637_s1 + $0x3044] ss:$16 sps:$4 sm:$0xff]  }
 0x5cc   :  { %10772 = vmatprep.subr.bf16.mxu0 %v16318_v14  ;;  %11797 = vmatprep.subr.bf16.mxu1 %v16321_v30  ;;  %v16411_v14 = vld [vmem:[%s21637_s1 + $0x304c] ss:$16 sps:$4 sm:$0xff]   ;;  %v16505_v30 = vmov 0  }
 0x5cf   :  { %10773 = vmatpush1.bf16.msra.mxu0 %v16316_v19  ;;  %11798 = vmatpush1.bf16.msra.mxu1 %v16319_v32  ;;  %v16406_v19 = vld [vmem:[%s21637_s1 + $0x3040] ss:$16 sps:$4 sm:$0xff]   ;;  %v16409_v32 = vld [vmem:[%s21637_s1 + $0x3048] ss:$16 sps:$4 sm:$0xff]  }
 0x5d0   :  { %10774 = vmatprep.subr.bf16.mxu0 %v16324_v26  ;;  %11799 = vmatprep.subr.bf16.mxu1 %v16327_v23  ;;  %v16414_v26 = vld [vmem:[%s21637_s1 + $0x3064] ss:$16 sps:$4 sm:$0xff]   ;;  %v16417_v23 = vld [vmem:[%s21637_s1 + $0x306c] ss:$16 sps:$4 sm:$0xff]  }
 0x5d3   :  { %10775 = vmatpush1.bf16.msra.mxu0 %v16322_v36  ;;  %11800 = vmatpush1.bf16.msra.mxu1 %v16325_v37  ;;  %v16412_v36 = vld [vmem:[%s21637_s1 + $0x3060] ss:$16 sps:$4 sm:$0xff]   ;;  %v16415_v37 = vld [vmem:[%s21637_s1 + $0x3068] ss:$16 sps:$4 sm:$0xff]  }
 0x5d4   :  { %10776 = vmatprep.subr.bf16.mxu0 %v16330_v21  ;;  %11801 = vmatprep.subr.bf16.mxu1 %v16333_v31  ;;  %v16420_v21 = vld [vmem:[%s21637_s1 + $0x3084] ss:$16 sps:$4 sm:$0xff]   ;;  %v16423_v31 = vld [vmem:[%s21637_s1 + $0x308c] ss:$16 sps:$4 sm:$0xff]  }
 0x5d7   :  { %10777 = vmatpush1.bf16.msra.mxu0 %v16328_v39  ;;  %11802 = vmatpush1.bf16.msra.mxu1 %v16331_v40  ;;  %v16418_v39 = vld [vmem:[%s21637_s1 + $0x3080] ss:$16 sps:$4 sm:$0xff]   ;;  %v16421_v40 = vld [vmem:[%s21637_s1 + $0x3088] ss:$16 sps:$4 sm:$0xff]  }
 0x5d8   :  { %10778 = vmatprep.subr.bf16.mxu0 %v16336_v41  ;;  %11803 = vmatprep.subr.bf16.mxu1 %v16339_v25  ;;  %v16426_v41 = vld [vmem:[%s21637_s1 + $0x30a4] ss:$16 sps:$4 sm:$0xff]   ;;  %v16429_v25 = vld [vmem:[%s21637_s1 + $0x30ac] ss:$16 sps:$4 sm:$0xff]  }
 0x5db   :  { %10779 = vmatpush1.bf16.msra.mxu0 %v16334_v43  ;;  %11804 = vmatpush1.bf16.msra.mxu1 %v16337_v46  ;;  %v16424_v43 = vld [vmem:[%s21637_s1 + $0x30a0] ss:$16 sps:$4 sm:$0xff]   ;;  %v16427_v46 = vld [vmem:[%s21637_s1 + $0x30a8] ss:$16 sps:$4 sm:$0xff]  }
 0x5dc   :  { %10780 = vmatprep.subr.bf16.mxu0 %v16342_v29  ;;  %11805 = vmatprep.subr.bf16.mxu1 %v16345_v50  ;;  %v16432_v29 = vld [vmem:[%s21637_s1 + $0x30c4] ss:$16 sps:$4 sm:$0xff]   ;;  %v16435_v50 = vld [vmem:[%s21637_s1 + $0x30cc] ss:$16 sps:$4 sm:$0xff]  }
 0x5df   :  { %10781 = vmatpush1.bf16.msra.mxu0 %v16340_v33  ;;  %11806 = vmatpush1.bf16.msra.mxu1 %v16343_v51  ;;  %v16430_v33 = vld [vmem:[%s21637_s1 + $0x30c0] ss:$16 sps:$4 sm:$0xff]   ;;  %v16433_v51 = vld [vmem:[%s21637_s1 + $0x30c8] ss:$16 sps:$4 sm:$0xff]  }
 0x5e0   :  { %10782 = vmatprep.subr.bf16.mxu0 %v16348_v53  ;;  %11807 = vmatprep.subr.bf16.mxu1 %v16351_v38  ;;  %v16438_v53 = vld [vmem:[%s21637_s1 + $0x30e4] ss:$16 sps:$4 sm:$0xff]   ;;  %v16441_v38 = vld [vmem:[%s21637_s1 + $0x30ec] ss:$16 sps:$4 sm:$0xff]  }
 0x5e3   :  { %10783 = vmatpush1.bf16.msra.mxu0 %v16346_v34  ;;  %11808 = vmatpush1.bf16.msra.mxu1 %v16349_v55  ;;  %v16436_v34 = vld [vmem:[%s21637_s1 + $0x30e0] ss:$16 sps:$4 sm:$0xff]   ;;  %v16439_v55 = vld [vmem:[%s21637_s1 + $0x30e8] ss:$16 sps:$4 sm:$0xff]  }
 0x5e4   :  { %10784 = vmatprep.subr.bf16.mxu0 %v16354_v56  ;;  %11809 = vmatprep.subr.bf16.mxu1 %v16357_v45  ;;  %v12239_v56 = vld.sshfl [vmem:[%s21636_s0 + $0x30] sm:$0x1 pattern:$0x75316420]  ;;  %v16442_v45 = vld [vmem:[%s21639_s3 + $0x40] sm:$0xff]  }
 0x5e7   :  { %10785 = vmatpush1.bf16.msra.mxu0 %v16352_v58  ;;  %11810 = vmatpush1.bf16.msra.mxu1 %v16355_v61  ;;  %v16443_v58 = vld [vmem:[%s21639_s3 + $0xc0] sm:$0xff]   ;;  %v1933_v61 = vrot.slane %v12239_v56, %v16672_v49  ;;  %v16447_v49 = vld [vmem:[%s21639_s3 + $0xc8] sm:$0xff]  }
 0x5e8   :  { %10786 = vmatprep.subr.bf16.mxu0 %v16360_v35  ;;  %11811 = vmatprep.subr.bf16.mxu1 %v16363_v62  ;;  %v16444_v35 = vld [vmem:[%s21639_s3] sm:$0xff]  }
 0x5e9   :  { %v16445_v62 = vld [vmem:[%s21639_s3 + $0x80] sm:$0xff]  }
 0x5eb   :  { %10787 = vmatpush1.bf16.msra.mxu0 %v16358_v44  ;;  %11812 = vmatpush1.bf16.msra.mxu1 %v16361_v0  ;;  %v16446_v44 = vld [vmem:[%s21639_s3 + $0x48] sm:$0xff]  }
 0x5ec   :  { %10788 = vmatprep.subr.bf16.mxu0 %v16366_v47  ;;  %11813 = vmatprep.subr.bf16.mxu1 %v16369_v1  ;;  %v16448_v0 = vld [vmem:[%s21639_s3 + $0x8] sm:$0xff]   ;;  %v16450_v1 = vld [vmem:[%s21639_s3 + $0x50] sm:$0xff]  }
 0x5ed   :  { %v16449_v47 = vld [vmem:[%s21639_s3 + $0x88] sm:$0xff]  }
 0x5ef   :  { %10789 = vmatpush1.bf16.msra.mxu0 %v16364_v2  ;;  %11814 = vmatpush1.bf16.msra.mxu1 %v16367_v59  ;;  %v16451_v2 = vld [vmem:[%s21639_s3 + $0xd0] sm:$0xff]  }
 0x5f0   :  { %10790 = vmatprep.subr.bf16.mxu0 %v16372_v57  ;;  %11815 = vmatprep.subr.bf16.mxu1 %v16375_v5  ;;  %v16452_v59 = vld [vmem:[%s21639_s3 + $0x10] sm:$0xff]   ;;  %v16454_v5 = vld [vmem:[%s21639_s3 + $0x58] sm:$0xff]  }
 0x5f1   :  { %v16453_v57 = vld [vmem:[%s21639_s3 + $0x90] sm:$0xff]  }
 0x5f3   :  { %10791 = vmatpush1.bf16.msra.mxu0 %v16370_v60  ;;  %11816 = vmatpush1.bf16.msra.mxu1 %v16373_v54  ;;  %v16455_v60 = vld [vmem:[%s21639_s3 + $0xd8] sm:$0xff]  }
 0x5f4   :  { %10792 = vmatprep.subr.bf16.mxu0 %v16378_v10  ;;  %11817 = vmatprep.subr.bf16.mxu1 %v16381_v48  ;;  %v16456_v54 = vld [vmem:[%s21639_s3 + $0x18] sm:$0xff]   ;;  %v16458_v48 = vld [vmem:[%s21639_s3 + $0x60] sm:$0xff]  }
 0x5f5   :  { %v16457_v10 = vld [vmem:[%s21639_s3 + $0x98] sm:$0xff]  }
 0x5f7   :  { %10793 = vmatpush1.bf16.msra.mxu0 %v16376_v11  ;;  %11818 = vmatpush1.bf16.msra.mxu1 %v16379_v63  ;;  %v16459_v11 = vld [vmem:[%s21639_s3 + $0xe0] sm:$0xff]  }
 0x5f8   :  { %10794 = vmatprep.subr.bf16.mxu0 %v16384_v12  ;;  %11819 = vmatprep.subr.bf16.mxu1 %v16387_v3  ;;  %v16460_v63 = vld [vmem:[%s21639_s3 + $0x20] sm:$0xff]   ;;  %v16462_v3 = vld [vmem:[%s21639_s3 + $0x68] sm:$0xff]  }
 0x5f9   :  { %v16461_v12 = vld [vmem:[%s21639_s3 + $0xa0] sm:$0xff]  }
 0x5fb   :  { %10795 = vmatpush1.bf16.msra.mxu0 %v16382_v52  ;;  %11820 = vmatpush1.bf16.msra.mxu1 %v16385_v15  ;;  %v16463_v52 = vld [vmem:[%s21639_s3 + $0xe8] sm:$0xff]  }
 0x5fc   :  { %10796 = vmatprep.subr.bf16.mxu0 %v16390_v7  ;;  %11821 = vmatprep.subr.bf16.mxu1 %v16393_v6  ;;  %v16464_v15 = vld [vmem:[%s21639_s3 + $0x28] sm:$0xff]   ;;  %v16466_v6 = vld [vmem:[%s21639_s3 + $0x70] sm:$0xff]  }
 0x5fd   :  { %v16465_v7 = vld [vmem:[%s21639_s3 + $0xa8] sm:$0xff]  }
 0x5ff   :  { %10797 = vmatpush1.bf16.msra.mxu0 %v16388_v8  ;;  %11822 = vmatpush1.bf16.msra.mxu1 %v16391_v20  ;;  %v16467_v8 = vld [vmem:[%s21639_s3 + $0xf0] sm:$0xff]  }
 0x600   :  { %10807 = vmatprep.subr.bf16.mxu0 %v16396_v22  ;;  %11832 = vmatprep.subr.bf16.mxu1 %v16399_v9  ;;  %v16468_v20 = vld [vmem:[%s21639_s3 + $0x30] sm:$0xff]   ;;  %v16470_v9 = vld [vmem:[%s21639_s3 + $0x78] sm:$0xff]  }
 0x601   :  { %v16469_v22 = vld [vmem:[%s21639_s3 + $0xb0] sm:$0xff]  }
 0x602   :  { %10799 = vmatmul.mubr.bf16.vlgmr.msra.gmra.mrb[0].mxu0 %v1917_v4  ;;  %11824 = vmatmul.mubr.bf16.vlgmr.msra.gmra.mrb[0].mxu1 %v1917_v4  ;;  %v16471_v4 = vld [vmem:[%s21639_s3 + $0xf8] sm:$0xff]  }
 0x603   :  { %10808 = vmatpush1.bf16.msra.mxu0 %v16394_v24  ;;  %11833 = vmatpush1.bf16.msra.mxu1 %v16397_v13  ;;  %v16472_v24 = vld [vmem:[%s21639_s3 + $0x38] sm:$0xff]  }
 0x604   :  { %10809 = vmatprep.subr.bf16.mxu0 %v16402_v16  ;;  %11834 = vmatprep.subr.bf16.mxu1 %v16405_v17  ;;  %v16473_v13 = vld [vmem:[%s21639_s3 + $0xb8] sm:$0xff]   ;;  %v1601_v16 = vsub.s32 0, %v16654_v42  ;;  %v1609_v17 = vsub.s32 2, %v16654_v42 }
 0x605   :  { %10839 = vmatprep.mubr.bf16.mxu0 %v16505_v30  ;;  %11864 = vmatprep.mubr.bf16.mxu1 %v16505_v30 }
 0x607   :  { %10810 = vmatpush1.bf16.msra.mxu0 %v16400_v27  ;;  %11835 = vmatpush1.bf16.msra.mxu1 %v16403_v18  ;;  %v1597_v27 = vld [vmem:[%s21638_s2] sm:$0xf]  ;;  %v1605_v18 = vsub.s32 1, %v16654_v42 }
 0x608   :  { %10811 = vmatprep.subr.bf16.mxu0 %v16408_v28  ;;  %11836 = vmatprep.subr.bf16.mxu1 %v16411_v14  ;;  %v1613_v28 = vsub.s32 3, %v16654_v42  ;;  %v1602_v14 = vrot.slane %v1597_v27, %v1601_v16  ;;  %v1610_v30 = vrot.slane %v1597_v27, %v1609_v17 }
 0x60b   :  { %10812 = vmatpush1.bf16.msra.mxu0 %v16406_v19  ;;  %11837 = vmatpush1.bf16.msra.mxu1 %v16409_v32  ;;  %v1606_v19 = vrot.slane %v1597_v27, %v1605_v18  ;;  %v1614_v32 = vrot.slane %v1597_v27, %v1613_v28 }
 0x60c   :  { %10813 = vmatprep.subr.bf16.mxu0 %v16414_v26  ;;  %11838 = vmatprep.subr.bf16.mxu1 %v16417_v23 }
 0x60f   :  { %10814 = vmatpush1.bf16.msra.mxu0 %v16412_v36  ;;  %11839 = vmatpush1.bf16.msra.mxu1 %v16415_v37 }
 0x610   :  { %10815 = vmatprep.subr.bf16.mxu0 %v16420_v21  ;;  %11840 = vmatprep.subr.bf16.mxu1 %v16423_v31 }
 0x613   :  { %10816 = vmatpush1.bf16.msra.mxu0 %v16418_v39  ;;  %11841 = vmatpush1.bf16.msra.mxu1 %v16421_v40 }
 0x614   :  { %10817 = vmatprep.subr.bf16.mxu0 %v16426_v41  ;;  %11842 = vmatprep.subr.bf16.mxu1 %v16429_v25 }
 0x617   :  { %10818 = vmatpush1.bf16.msra.mxu0 %v16424_v43  ;;  %11843 = vmatpush1.bf16.msra.mxu1 %v16427_v46 }
 0x618   :  { %10819 = vmatprep.subr.bf16.mxu0 %v16432_v29  ;;  %11844 = vmatprep.subr.bf16.mxu1 %v16435_v50 }
 0x61b   :  { %10820 = vmatpush1.bf16.msra.mxu0 %v16430_v33  ;;  %11845 = vmatpush1.bf16.msra.mxu1 %v16433_v51 }
 0x61c   :  { %10821 = vmatprep.subr.bf16.mxu0 %v16438_v53  ;;  %11846 = vmatprep.subr.bf16.mxu1 %v16441_v38 }
 0x61f   :  { %10822 = vmatpush1.bf16.msra.mxu0 %v16436_v34  ;;  %11847 = vmatpush1.bf16.msra.mxu1 %v16439_v55 }
 0x620   :  { %13841 = vmatprep.subr.bf16.mxu0 %v16442_v45  ;;  %13863 = vmatprep.subr.bf16.mxu1 %v16443_v58  ;;  %v13808_v45 = vld [vmem:[%s21640_s4] ss:$0 sm:$0xff] }
 0x622   :  { %10840 = vmatmul.mubr.bf16.vlgmr.msra.gmra.mrb[0].mxu0 %v1933_v61  ;;  %11865 = vmatmul.mubr.bf16.vlgmr.msra.gmra.mrb[0].mxu1 %v1933_v61 }
 0x623   :  { %13842 = vmatpush3.bf16.msra.mxu0 %v16444_v35  ;;  %13864 = vmatpush3.bf16.msra.mxu1 %v16445_v62 }
 0x624   :  { %13843 = vmatprep.subr.bf16.mxu0 %v16446_v44  ;;  %13865 = vmatprep.subr.bf16.mxu1 %v16447_v49 }
 0x627   :  { %13844 = vmatpush3.bf16.msra.mxu0 %v16448_v0  ;;  %13866 = vmatpush3.bf16.msra.mxu1 %v16449_v47 }
 0x628   :  { %13845 = vmatprep.subr.bf16.mxu0 %v16450_v1  ;;  %13867 = vmatprep.subr.bf16.mxu1 %v16451_v2 }
 0x62b   :  { %13846 = vmatpush3.bf16.msra.mxu0 %v16452_v59  ;;  %13868 = vmatpush3.bf16.msra.mxu1 %v16453_v57 }
 0x62c   :  { %13847 = vmatprep.subr.bf16.mxu0 %v16454_v5  ;;  %13869 = vmatprep.subr.bf16.mxu1 %v16455_v60 }
 0x62f   :  { %13848 = vmatpush3.bf16.msra.mxu0 %v16456_v54  ;;  %13870 = vmatpush3.bf16.msra.mxu1 %v16457_v10 }
 0x630   :  { %13849 = vmatprep.subr.bf16.mxu0 %v16458_v48  ;;  %13871 = vmatprep.subr.bf16.mxu1 %v16459_v11 }
 0x633   :  { %13850 = vmatpush3.bf16.msra.mxu0 %v16460_v63  ;;  %13872 = vmatpush3.bf16.msra.mxu1 %v16461_v12 }
 0x634   :  { %13851 = vmatprep.subr.bf16.mxu0 %v16462_v3  ;;  %13873 = vmatprep.subr.bf16.mxu1 %v16463_v52 }
 0x637   :  { %13852 = vmatpush3.bf16.msra.mxu0 %v16464_v15  ;;  %13874 = vmatpush3.bf16.msra.mxu1 %v16465_v7 }
 0x638   :  { %13853 = vmatprep.subr.bf16.mxu0 %v16466_v6  ;;  %13875 = vmatprep.subr.bf16.mxu1 %v16467_v8 }
 0x63b   :  { %13854 = vmatpush3.bf16.msra.mxu0 %v16468_v20  ;;  %13876 = vmatpush3.bf16.msra.mxu1 %v16469_v22 }
 0x63c   :  { %13855 = vmatprep.subr.bf16.mxu0 %v16470_v9  ;;  %13877 = vmatprep.subr.bf16.mxu1 %v16471_v4 }
 0x63f   :  { %13856 = vmatpush3.bf16.msra.mxu0 %v16472_v24  ;;  %13878 = vmatpush3.bf16.msra.mxu1 %v16473_v13 }
 0x6f5   :  { %v10841_v26 = vpop.f32.mrb[0].mxu0  ;;  %v11866_v23 = vpop.f32.mrb[0].mxu1 }
 0x6f6   :  { %v13885_v36 = vadd.f32 %v10841_v26, %v1602_v14  ;;  %v13887_v37 = vadd.f32 %v11866_v23, %v1610_v30  ;;  %v10843_v21 = vpop.f32.mrb[1].mxu0  ;;  %v11868_v31 = vpop.f32.mrb[1].mxu1 }
 0x6f7   :  { %v13886_v39 = vadd.f32 %v10843_v21, %v1606_v19  ;;  %v13888_v40 = vadd.f32 %v11868_v31, %v1614_v32  ;;  %v10845_v41 = vpop.f32.mrb[2].mxu0  ;;  %v11870_v25 = vpop.f32.mrb[2].mxu1 }
 0x6f8   :  { %v11873_v43 = vmax.f32 %v13885_v36, 0.0  ;;  %v11875_v46 = vmax.f32 %v13887_v37, 0.0  ;;  %v10846_v29 = vpop.f32.mrb[3].mxu0  ;;  %v11871_v50 = vpop.f32.mrb[3].mxu1 }
 0x6f9   :  { %v11874_v33 = vmax.f32 %v13886_v39, 0.0  ;;  %v11876_v42 = vmax.f32 %v13888_v40, 0.0 }
 0x6fa   :  { %v11877_v38 = vpack.c.bf16 %v11873_v43, %v11873_v43  ;;  %v11879_v34 = vpack.c.bf16 %v11875_v46, %v11875_v46 }
 0x6fb   :  { %v11878_v51 = vpack.c.bf16 %v11874_v33, %v11874_v33  ;;  %v11880_v53 = vpack.c.bf16 %v11876_v42, %v11876_v42 }
 0x6fd   :  { %12176 = vmatprep.mubr.bf16.mxu0 %v11878_v51  ;;  %12216 = vmatprep.mubr.bf16.mxu1 %v11880_v53 }
 0x6fe   :  { %12177 = vmatmul.mubr.bf16.vlgmr.msra.gmra.mrb[4].mxu0 %v11877_v38  ;;  %12217 = vmatmul.mubr.bf16.vlgmr.msra.gmra.mrb[4].mxu1 %v11879_v34 }
 0x7d1   :  { %v13857_v55 = vpop.f32.mrb[4].mxu0  ;;  %v13879_v56 = vpop.f32.mrb[4].mxu1 }
 0x7d2   :  { %v13858_v58 = vpop.f32.mrb[5].mxu0  ;;  %v13880_v61 = vpop.f32.mrb[5].mxu1 }
 0x7d3   :  { %v13859_v35 = vadd.f32 %v13858_v58, %v13857_v55  ;;  %v13881_v62 = vadd.f32 %v13880_v61, %v13879_v56  ;;  %v13860_v44 = vpop.f32.mrb[6].mxu0  ;;  %v13882_v49 = vpop.f32.mrb[6].mxu1 }
 0x7d4   :  { %v13861_v0 = vpop.f32.mrb[7].mxu0  ;;  %v13883_v47 = vpop.f32.mrb[7].mxu1 }
 0x7d5   :  { %v12179_v1 = vadd.f32 %v13859_v35, %v13808_v45 }
 0x7d7   :  { %v12219_v2 = vadd.f32 %v13881_v62, %v12179_v1 }
 0x7d9   :  { %12224 = vst [vmem:[#allocation2] sm:$0x3] %v12219_v2 }
 0x7da   :  { %16491 = shalt.err (!%p16488_p4)
}
 0x7db   :  { %s16492_s13 = scalar_lea.hbm %s21641_s5, 32 }
 0x7dc   :  { %p16493_p5 = scmp.ne.s32.totalorder %s21641_s5, %s16492_s13  ;;  %p16496_p6 = scmp.lt.u32.totalorder %s16492_s13, %s21641_s5 }
 0x7de   :  { %p16498_p7 = pnand %p16496_p6, %p16493_p5 }
 0x7e0   :  { %16501 = shalt.err (!%p16498_p7)
}
 0x7e1   :  { %12234 = dma.vmem_to_hbm [thread:$0]  %s12232_s10, 32, %s21641_s5, [#allocation3]  }
 0x7e2   :  { %16502 = dma.done.wait [#allocation3], 32  }
 0x7e3   :  { %16503 = vsyncadd [#allocation3], 4294967264 }
 0x7e4   :  { %12238 = vsyncpa [#allocation3], 1 }

</bundles_post_ra>
